<compile_context>
chip_gen: v5e
topology: v5e:2x2
jax: 0.10.0
libtpu: 0.0.40
codegen_flags: <defaults>
</compile_context>

<pallas_src>
import functools
import math

import jax
import jax.numpy as jnp
from jax.experimental import pallas as pl
from jax.experimental.pallas import tpu as pltpu


# ----------------------------------------------------------------------------
# Helpers
# ----------------------------------------------------------------------------
def _pick_row_tile(ho, wo, target_rows=512):
    """Largest divisor th of ho with th*wo <= target_rows and (th*wo) % 8 == 0
    (or th == ho).  Falls back to the smallest legal divisor (not the whole image)
    when nothing fits, so row tiles stay pipelineable."""
    step = 8 // math.gcd(wo, 8)
    cands = [th for th in range(1, ho + 1)
             if ho % th == 0 and (th % step == 0 or th == ho)]
    fits = [th for th in cands if th * wo <= target_rows]
    return max(fits) if fits else min(cands)


def _vmem_limit_bytes():
    """Generation-aware VMEM budget: ~half the physical per-core VMEM, capped at 64 MiB."""
    try:
        cap = pltpu.get_tpu_info().vmem_capacity_bytes
    except Exception:            # conservative fallback (safe on v7x's 64 MiB VMEM)
        cap = 64 * 1024 * 1024
    return int(min(cap // 2, 64 * 1024 * 1024))


# ----------------------------------------------------------------------------
# Kernel 1: 3x3 conv (pad=1, stride 1/2) fused with
#           [pre-conv BN affine + zero padding into VMEM scratch],
#           post-conv BN (scale folded into bf16 weight, shift in epilogue),
#           optional PReLU, and optional SE global-pool channel sums.
#           Grid = (batch, output-row tile).
# ----------------------------------------------------------------------------
def _conv3x3_kernel(*refs, stride, th, wo, hh, ww, cin, cout,
                    apply_prelu, has_in_affine, emit_pool):
    it = iter(refs)
    x_ref = next(it)                      # (H, W, Cin)       unpadded activation
    w_ref = next(it)                      # (3, 3*Cin, Cout)  bf16, BN scale folded
    shift_ref = next(it)                  # (1, Cout)         post-conv BN shift (f32)
    alpha_ref = next(it) if apply_prelu else None      # (1, Cout) PReLU slope
    aff_ref = next(it) if has_in_affine else None      # (2, Cin)  pre-conv BN scale/shift
    out_ref = next(it)                    # (th*Wo, Cout)
    pool_ref = next(it) if emit_pool else None          # (1, Cout) per-image channel sums
    pad_ref = next(it)                    # VMEM scratch: padded (parity-split) image

    t = pl.program_id(1)

    # Build the zero-padded (and, for stride 2, parity-split) image once per image.
    @pl.when(t == 0)
    def _build_padded():
        xv = x_ref[...]
        if has_in_affine:                 # BN before the conv, applied pre-padding (exact)
            aff = aff_ref[...].astype(jnp.float32)
            xv = (xv.astype(jnp.float32) * aff[0:1].reshape(1, 1, cin)
                  + aff[1:2].reshape(1, 1, cin))
        xv = xv.astype(pad_ref.dtype)
        pad_ref[...] = jnp.zeros_like(pad_ref)
        if stride == 1:
            pad_ref[0, 1:hh + 1, 1:ww + 1, :] = xv
        else:                             # stride 2: split rows/cols by parity so the
            x4 = xv.reshape(hh // 2, 2, ww // 2, 2, cin)   # inner loop is contiguous
            for rr in range(2):
                for cc in range(2):
                    plane = ((rr + 1) % 2) * 2 + ((cc + 1) % 2)
                    r0 = (rr + 1) // 2
                    c0 = (cc + 1) // 2
                    pad_ref[plane, r0:r0 + hh // 2, c0:c0 + ww // 2, :] = \
                        x4[:, rr, :, cc, :]

    row0 = pl.multiple_of(t * th, th)
    acc = jnp.zeros((th * wo, cout), jnp.float32)
    for ky in range(3):
        if stride == 1:
            # one row-slab load per ky; kx shifts are static in-register slices
            slab = pad_ref[0, pl.ds(row0 + ky, th), :, :]          # (th, W+2, Cin)
            parts = [slab[:, kx:kx + wo, :] for kx in range(3)]
        else:
            rows = pl.ds(row0 + ky // 2, th)
            parts = [pad_ref[(ky % 2) * 2 + (kx % 2), rows, pl.ds(kx // 2, wo), :]
                     for kx in range(3)]
        # merge the 3 kx taps along K -> one bf16 MXU matmul with K = 3*Cin
        patch = jnp.concatenate(parts, axis=-1).reshape(th * wo, 3 * cin)
        acc = acc + jnp.dot(patch, w_ref[ky], preferred_element_type=jnp.float32)

    y = acc + shift_ref[...]
    if apply_prelu:
        a = alpha_ref[...]
        y = jnp.maximum(y, 0.0) + a * jnp.minimum(y, 0.0)
    out_ref[...] = y.astype(out_ref.dtype)

    if emit_pool:                         # SE global-average-pool partial sums
        @pl.when(t == 0)
        def _init_pool():
            pool_ref[...] = jnp.zeros_like(pool_ref)
        pool_ref[...] += jnp.sum(y, axis=0, keepdims=True)


def conv3x3_bn_act(x, w_oihw, out_scale, out_shift, *, in_scale=None, in_shift=None,
                   alpha=None, stride=1, out_dtype=jnp.float32, want_pool=False):
    """Fused [BN-in] -> conv3x3(pad=1, stride) -> BN-out -> [PReLU] (+ channel sums).

    x: (N, H, W, Cin) NHWC.  Returns the flat (N, Ho*Wo, Cout) output
    (plus (N, 1, Cout) per-image channel sums when want_pool=True).
    """
    N, H, W, Cin = x.shape
    Cout = w_oihw.shape[0]
    Ho = (H - 1) // stride + 1
    Wo = (W - 1) // stride + 1
    if stride == 1:
        nplane, Hs, Ws = 1, H + 2, W + 2
    else:
        # TODO(synk): stride > 2 or odd spatial dims would need a different parity split.
        assert stride == 2 and H % 2 == 0 and W % 2 == 0
        nplane, Hs, Ws = 4, H // 2 + 1, W // 2 + 1

    # Fold the post-conv BN scale into the weight; merge kx taps along K; cast to bf16.
    w3 = (jnp.transpose(w_oihw, (2, 3, 1, 0)).astype(jnp.float32)
          * out_scale.reshape(1, 1, 1, Cout).astype(jnp.float32))
    w3 = w3.reshape(3, 3 * Cin, Cout).astype(jnp.bfloat16)
    shift = out_shift.reshape(1, Cout).astype(jnp.float32)

    apply_prelu = alpha is not None
    has_in_affine = in_scale is not None
    th = _pick_row_tile(Ho, Wo)

    kernel = functools.partial(_conv3x3_kernel, stride=stride, th=th, wo=Wo, hh=H, ww=W,
                               cin=Cin, cout=Cout, apply_prelu=apply_prelu,
                               has_in_affine=has_in_affine, emit_pool=want_pool)

    in_specs = [
        # unpadded image: resident across the row-tile axis (fetched once per image)
        pl.BlockSpec((None, H, W, Cin), lambda n, t: (n, 0, 0, 0)),
        pl.BlockSpec((3, 3 * Cin, Cout), lambda n, t: (0, 0, 0)),
        pl.BlockSpec((1, Cout), lambda n, t: (0, 0)),
    ]
    inputs = [x, w3, shift]
    if apply_prelu:
        in_specs.append(pl.BlockSpec((1, Cout), lambda n, t: (0, 0)))
        inputs.append(alpha.reshape(1, Cout).astype(jnp.float32))
    if has_in_affine:
        in_specs.append(pl.BlockSpec((2, Cin), lambda n, t: (0, 0)))
        inputs.append(jnp.stack([in_scale, in_shift]).astype(jnp.float32))

    out_shape = [jax.ShapeDtypeStruct((N, Ho * Wo, Cout), out_dtype)]
    out_specs = [pl.BlockSpec((None, th * Wo, Cout), lambda n, t: (n, t, 0))]
    if want_pool:
        out_shape.append(jax.ShapeDtypeStruct((N, 1, Cout), jnp.float32))
        out_specs.append(pl.BlockSpec((None, 1, Cout), lambda n, t: (n, 0, 0)))

    bytes_io = int(x.size * x.dtype.itemsize + w3.size * 2
                   + N * Ho * Wo * Cout * jnp.dtype(out_dtype).itemsize)
    cost = pl.CostEstimate(flops=2 * N * Ho * Wo * 9 * Cin * Cout,
                           transcendentals=0, bytes_accessed=bytes_io)

    return pl.pallas_call(
        kernel,
        out_shape=tuple(out_shape) if want_pool else out_shape[0],
        grid=(N, Ho // th),
        in_specs=in_specs,
        out_specs=tuple(out_specs) if want_pool else out_specs[0],
        scratch_shapes=[pltpu.VMEM((nplane, Hs, Ws, Cin), jnp.bfloat16)],
        compiler_params=pltpu.CompilerParams(
            dimension_semantics=("parallel", "arbitrary"),
            vmem_limit_bytes=_vmem_limit_bytes()),
        cost_estimate=cost,
    )(*inputs)


# ----------------------------------------------------------------------------
# Kernel 2: SE channel scaling fused with the residual add (pure elementwise),
#           gridded over (batch, row tiles).
# ----------------------------------------------------------------------------
def _scale_add_kernel(res_ref, sc_ref, s_ref, out_ref):
    out_ref[...] = res_ref[...] * s_ref[...] + sc_ref[...]


def se_scale_add(res, sc, s):
    """out[n] = res[n] * s[n] + sc[n]; res/sc/out: (N, P, C), s: (N, 1, C)."""
    N, P, C = res.shape
    tp = _pick_row_tile(P, 1, target_rows=2048)
    cost = pl.CostEstimate(flops=2 * N * P * C, transcendentals=0,
                           bytes_accessed=int(3 * N * P * C * 4 + N * C * 4))
    return pl.pallas_call(
        _scale_add_kernel,
        out_shape=jax.ShapeDtypeStruct((N, P, C), jnp.float32),
        grid=(N, P // tp),
        in_specs=[pl.BlockSpec((None, tp, C), lambda n, t: (n, t, 0)),
                  pl.BlockSpec((None, tp, C), lambda n, t: (n, t, 0)),
                  pl.BlockSpec((None, 1, C), lambda n, t: (n, 0, 0))],
        out_specs=pl.BlockSpec((None, tp, C), lambda n, t: (n, t, 0)),
        compiler_params=pltpu.CompilerParams(
            dimension_semantics=("parallel", "parallel"),
            vmem_limit_bytes=_vmem_limit_bytes()),
        cost_estimate=cost,
    )(res.astype(jnp.float32), sc.astype(jnp.float32), s.astype(jnp.float32))


# ----------------------------------------------------------------------------
# Module forward (glue)
# ----------------------------------------------------------------------------
def bottleneck_irse_v2_forward(x_nchw, p, stride):
    x = jnp.transpose(x_nchw, (0, 2, 3, 1)).astype(jnp.float32)      # NCHW -> NHWC
    N, H, W, Cin = x.shape
    Cout = p['conv1_w'].shape[0]
    Ho = (H - 1) // stride + 1
    Wo = (W - 1) // stride + 1

    # residual branch: BN0 -> conv1(s=1) -> BN1 -> PReLU   (bf16 intermediate)
    h1 = conv3x3_bn_act(x, p['conv1_w'], p['bn1_scale'], p['bn1_shift'],
                        in_scale=p['bn0_scale'], in_shift=p['bn0_shift'],
                        alpha=p['prelu_alpha'], stride=1,
                        out_dtype=jnp.bfloat16)                      # (N, H*W, Cout)
    # conv2(s) -> BN2, plus fused SE global-pool channel sums
    h2, pool = conv3x3_bn_act(h1.reshape(N, H, W, Cout), p['conv2_w'],
                              p['bn2_scale'], p['bn2_shift'], stride=stride,
                              out_dtype=jnp.float32, want_pool=True)  # (N,Ho*Wo,C),(N,1,C)

    # SE excitation on the tiny (N, C) pooled vector (plain JAX; two 1x1 FCs).
    pooled = pool.reshape(N, Cout) * (1.0 / float(Ho * Wo))
    z = jnp.maximum(pooled @ p['se_w1'].T.astype(jnp.float32), 0.0)   # (N, Cr)
    s = jax.nn.sigmoid(z @ p['se_w2t'].astype(jnp.float32)).reshape(N, 1, Cout)

    # shortcut branch
    if Cin == Cout:
        if stride == 1:
            sc = x.reshape(N, H * W, Cout)
        else:
            # TODO(synk): AvgPool2d(3, stride, 1) shortcut kept in plain JAX
            # (count_include_pad=True semantics; not on the hot path).
            ssum = jax.lax.reduce_window(x, 0.0, jax.lax.add, (1, 3, 3, 1),
                                         (1, stride, stride, 1),
                                         [(0, 0), (1, 1), (1, 1), (0, 0)])
            sc = (ssum / 9.0).reshape(N, Ho * Wo, Cout)
    else:
        sc = conv3x3_bn_act(x, p['sc_w'], p['sc_bn_scale'], p['sc_bn_shift'],
                            stride=stride)                            # (N, Ho*Wo, Cout)

    out = se_scale_add(h2, sc, s)                                     # SE(res) + shortcut
    return jnp.transpose(out.reshape(N, Ho, Wo, Cout), (0, 3, 1, 2))  # NHWC -> NCHW


# ----------------------------------------------------------------------------
# Deterministic parameter init (shapes follow the PyTorch module __init__)
# ----------------------------------------------------------------------------
def make_params(key, cin, cout):
    eps = 1e-5
    keys = iter(jax.random.split(key, 32))

    def bn(c):
        gamma = 1.0 + 0.1 * jax.random.normal(next(keys), (c,), jnp.float32)
        beta = 0.1 * jax.random.normal(next(keys), (c,), jnp.float32)
        mean = 0.1 * jax.random.normal(next(keys), (c,), jnp.float32)
        var = jax.random.uniform(next(keys), (c,), jnp.float32, 0.5, 1.5)
        scale = gamma / jnp.sqrt(var + eps)
        return scale, beta - mean * scale

    def conv_w(co, ci):
        return jax.random.normal(next(keys), (co, ci, 3, 3), jnp.float32) / jnp.sqrt(9.0 * ci)

    p = {}
    p['bn0_scale'], p['bn0_shift'] = bn(cin)
    p['conv1_w'] = conv_w(cout, cin)
    p['bn1_scale'], p['bn1_shift'] = bn(cout)
    p['prelu_alpha'] = jnp.full((cout,), 0.25, jnp.float32)
    p['conv2_w'] = conv_w(cout, cout)
    p['bn2_scale'], p['bn2_shift'] = bn(cout)
    cr = cout // 16
    p['se_w1'] = jax.random.normal(next(keys), (cr, cout), jnp.float32) / jnp.sqrt(float(cout))
    p['se_w2t'] = jax.random.normal(next(keys), (cr, cout), jnp.float32) / jnp.sqrt(float(cr))
    if cin != cout:
        p['sc_w'] = conv_w(cout, cin)
        p['sc_bn_scale'], p['sc_bn_shift'] = bn(cout)
    return p


# ----------------------------------------------------------------------------
# Pure-JAX reference (correctness check)
# ----------------------------------------------------------------------------
def _ref_forward(x_nchw, p, stride):
    x = jnp.transpose(x_nchw, (0, 2, 3, 1)).astype(jnp.float32)

    def conv(v, w_oihw, s):
        w = jnp.transpose(w_oihw, (2, 3, 1, 0))
        return jax.lax.conv_general_dilated(
            v, w, (s, s), ((1, 1), (1, 1)),
            dimension_numbers=('NHWC', 'HWIO', 'NHWC'),
            precision=jax.lax.Precision.HIGHEST)

    h = x * p['bn0_scale'] + p['bn0_shift']
    h = conv(h, p['conv1_w'], 1)
    h = h * p['bn1_scale'] + p['bn1_shift']
    h = jnp.maximum(h, 0.0) + p['prelu_alpha'] * jnp.minimum(h, 0.0)
    h = conv(h, p['conv2_w'], stride)
    h = h * p['bn2_scale'] + p['bn2_shift']

    pooled = jnp.mean(h, axis=(1, 2))                          # (N, C)
    z = jnp.maximum(pooled @ p['se_w1'].T, 0.0)                # (N, Cr)
    s = jax.nn.sigmoid(z @ p['se_w2t'])                        # (N, C)
    res = h * s[:, None, None, :]

    Cin, Cout = x.shape[-1], h.shape[-1]
    if Cin == Cout and stride == 1:
        sc = x
    elif Cin == Cout:
        ssum = jax.lax.reduce_window(x, 0.0, jax.lax.add, (1, 3, 3, 1),
                                     (1, stride, stride, 1),
                                     [(0, 0), (1, 1), (1, 1), (0, 0)])
        sc = ssum / 9.0
    else:
        sc = conv(x, p['sc_w'], stride)
        sc = sc * p['sc_bn_scale'] + p['sc_bn_shift']

    return jnp.transpose(res + sc, (0, 3, 1, 2))


if __name__ == "__main__":
    IN_CH, OUT_CH, STRIDE = 16, 32, 1
    N, H, W = 2, 16, 16

    key = jax.random.PRNGKey(0)
    kp, kx = jax.random.split(key)
    params = make_params(kp, IN_CH, OUT_CH)
    x = jax.random.normal(kx, (N, IN_CH, H, W), jnp.float32)   # NCHW, like PyTorch

    fwd = jax.jit(functools.partial(bottleneck_irse_v2_forward, stride=STRIDE))
    out = jax.block_until_ready(fwd(x, params))

    ref = _ref_forward(x, params, STRIDE)
    assert out.shape == ref.shape, (out.shape, ref.shape)
    err = float(jnp.max(jnp.abs(out - ref)))
    scale = float(jnp.max(jnp.abs(ref)))
    # bf16 MXU operands with f32 accumulation (per perf review) -> bf16-level tolerance.
    assert err < 2e-2 * max(scale, 1.0), f"max abs error {err} (ref scale {scale})"
    print("KERNEL_OK")
</pallas_src>

<mosaic_0001>
module attributes {stable_mosaic.version = 11 : i64} {
  func.func @_conv3x3_kernel(%arg0: i32, %arg1: i32, %arg2: memref<1x16x16x16xf32, #tpu.memory_space<vmem>>, %arg3: memref<3x48x32xbf16, #tpu.memory_space<vmem>>, %arg4: memref<1x32xf32, #tpu.memory_space<vmem>>, %arg5: memref<1x256x32xf32, #tpu.memory_space<vmem>>, %arg6: memref<1x18x18x16xbf16, #tpu.memory_space<vmem>>) attributes {dimension_semantics = [#tpu.dimension_semantics<parallel>, #tpu.dimension_semantics<arbitrary>], iteration_bounds = array<i64: 2, 1>, scalar_prefetch = 0 : i64, scratch_operands = 1 : i64, tpu.core_type = #tpu.core_type<tc>, window_params = [{transform_indices = @transform_0, window_bounds = array<i64: 1, 16, 16, 16>}, {pipeline_mode = #tpu.pipeline_mode<synchronous>, transform_indices = @transform_1, window_bounds = array<i64: 3, 48, 32>}, {pipeline_mode = #tpu.pipeline_mode<synchronous>, transform_indices = @transform_2, window_bounds = array<i64: 1, 32>}, {transform_indices = @transform_3, window_bounds = array<i64: 1, 256, 32>}]} {
    %c0_i32 = arith.constant 0 : i32
    %0 = arith.cmpi eq, %arg1, %c0_i32 : i32
    %1 = arith.extui %0 : i1 to i32
    %c0_i32_0 = arith.constant 0 : i32
    %2 = arith.cmpi ne, %1, %c0_i32_0 : i32
    scf.if %2 {
      %c0_25 = arith.constant 0 : index
      %c0_26 = arith.constant 0 : index
      %c0_27 = arith.constant 0 : index
      %c0_28 = arith.constant 0 : index
      %51 = vector.load %arg2[%c0_25, %c0_26, %c0_27, %c0_28] : memref<1x16x16x16xf32, #tpu.memory_space<vmem>>, vector<1x16x16x16xf32>
      %52 = vector.shape_cast %51 : vector<1x16x16x16xf32> to vector<16x16x16xf32>
      %53 = arith.truncf %52 : vector<16x16x16xf32> to vector<16x16x16xbf16>
      %cst_29 = arith.constant 0.000000e+00 : bf16
      %54 = vector.broadcast %cst_29 : bf16 to vector<1x18x18x16xbf16>
      %c0_30 = arith.constant 0 : index
      %c0_31 = arith.constant 0 : index
      %c0_32 = arith.constant 0 : index
      %c0_33 = arith.constant 0 : index
      %55 = vector.load %arg6[%c0_30, %c0_31, %c0_32, %c0_33] : memref<1x18x18x16xbf16, #tpu.memory_space<vmem>>, vector<1x18x18x16xbf16>
      tpu.vector_store %arg6[%c0_30, %c0_31, %c0_32, %c0_33], %54 {strides = array<i32>} : memref<1x18x18x16xbf16, #tpu.memory_space<vmem>>, vector<1x18x18x16xbf16>,
      %c0_34 = arith.constant 0 : index
      %c1_35 = arith.constant 1 : index
      %c1_36 = arith.constant 1 : index
      %c0_37 = arith.constant 0 : index
      %56 = vector.load %arg6[%c0_34, %c1_35, %c1_36, %c0_37] : memref<1x18x18x16xbf16, #tpu.memory_space<vmem>>, vector<1x16x16x16xbf16>
      %57 = vector.shape_cast %56 : vector<1x16x16x16xbf16> to vector<16x16x16xbf16>
      %58 = vector.shape_cast %53 : vector<16x16x16xbf16> to vector<1x16x16x16xbf16>
      tpu.vector_store %arg6[%c0_34, %c1_35, %c1_36, %c0_37], %58 {strides = array<i32>} : memref<1x18x18x16xbf16, #tpu.memory_space<vmem>>, vector<1x16x16x16xbf16>,
    } else {
    }
    %c16_i32 = arith.constant 16 : i32
    %3 = arith.muli %arg1, %c16_i32 : i32
    %4 = tpu.assume_multiple %3, 16 : i32
    %cst = arith.constant 0.000000e+00 : f32
    %5 = vector.broadcast %cst : f32 to vector<256x32xf32>
    %c0_i32_1 = arith.constant 0 : i32
    %6 = arith.addi %4, %c0_i32_1 : i32
    %c0 = arith.constant 0 : index
    %7 = arith.index_cast %6 : i32 to index
    %c0_2 = arith.constant 0 : index
    %c0_3 = arith.constant 0 : index
    %8 = vector.load %arg6[%c0, %7, %c0_2, %c0_3] : memref<1x18x18x16xbf16, #tpu.memory_space<vmem>>, vector<1x16x18x16xbf16>
    %9 = vector.shape_cast %8 : vector<1x16x18x16xbf16> to vector<16x18x16xbf16>
    %10 = vector.extract_strided_slice %9 {offsets = [0, 0, 0], sizes = [16, 16, 16], strides = [1, 1, 1]} : vector<16x18x16xbf16> to vector<16x16x16xbf16>
    %11 = vector.extract_strided_slice %9 {offsets = [0, 1, 0], sizes = [16, 16, 16], strides = [1, 1, 1]} : vector<16x18x16xbf16> to vector<16x16x16xbf16>
    %12 = vector.extract_strided_slice %9 {offsets = [0, 2, 0], sizes = [16, 16, 16], strides = [1, 1, 1]} : vector<16x18x16xbf16> to vector<16x16x16xbf16>
    %13 = tpu.concatenate %10, %11, %12 in 2 : vector<16x16x16xbf16>, vector<16x16x16xbf16>, vector<16x16x16xbf16> -> vector<16x16x48xbf16>
    %14 = vector.shape_cast %13 : vector<16x16x48xbf16> to vector<256x48xbf16>
    %c0_4 = arith.constant 0 : index
    %c0_5 = arith.constant 0 : index
    %c0_6 = arith.constant 0 : index
    %15 = vector.load %arg3[%c0_4, %c0_5, %c0_6] : memref<3x48x32xbf16, #tpu.memory_space<vmem>>, vector<1x48x32xbf16>
    %16 = vector.shape_cast %15 : vector<1x48x32xbf16> to vector<48x32xbf16>
    %cst_7 = arith.constant dense<0.000000e+00> : vector<256x32xf32>
    %17 = tpu.matmul %14, %16, %cst_7 {dimension_numbers = #tpu.dot_dimension_numbers<[1], [0], [0], [1], [0, 0, 1, 1], [], []>} : vector<256x48xbf16>, vector<48x32xbf16>, vector<256x32xf32> -> vector<256x32xf32>
    %18 = arith.addf %5, %17 : vector<256x32xf32>
    %c1_i32 = arith.constant 1 : i32
    %19 = arith.addi %4, %c1_i32 : i32
    %c0_8 = arith.constant 0 : index
    %20 = arith.index_cast %19 : i32 to index
    %c0_9 = arith.constant 0 : index
    %c0_10 = arith.constant 0 : index
    %21 = vector.load %arg6[%c0_8, %20, %c0_9, %c0_10] : memref<1x18x18x16xbf16, #tpu.memory_space<vmem>>, vector<1x16x18x16xbf16>
    %22 = vector.shape_cast %21 : vector<1x16x18x16xbf16> to vector<16x18x16xbf16>
    %23 = vector.extract_strided_slice %22 {offsets = [0, 0, 0], sizes = [16, 16, 16], strides = [1, 1, 1]} : vector<16x18x16xbf16> to vector<16x16x16xbf16>
    %24 = vector.extract_strided_slice %22 {offsets = [0, 1, 0], sizes = [16, 16, 16], strides = [1, 1, 1]} : vector<16x18x16xbf16> to vector<16x16x16xbf16>
    %25 = vector.extract_strided_slice %22 {offsets = [0, 2, 0], sizes = [16, 16, 16], strides = [1, 1, 1]} : vector<16x18x16xbf16> to vector<16x16x16xbf16>
    %26 = tpu.concatenate %23, %24, %25 in 2 : vector<16x16x16xbf16>, vector<16x16x16xbf16>, vector<16x16x16xbf16> -> vector<16x16x48xbf16>
    %27 = vector.shape_cast %26 : vector<16x16x48xbf16> to vector<256x48xbf16>
    %c1 = arith.constant 1 : index
    %c0_11 = arith.constant 0 : index
    %c0_12 = arith.constant 0 : index
    %28 = vector.load %arg3[%c1, %c0_11, %c0_12] : memref<3x48x32xbf16, #tpu.memory_space<vmem>>, vector<1x48x32xbf16>
    %29 = vector.shape_cast %28 : vector<1x48x32xbf16> to vector<48x32xbf16>
    %cst_13 = arith.constant dense<0.000000e+00> : vector<256x32xf32>
    %30 = tpu.matmul %27, %29, %cst_13 {dimension_numbers = #tpu.dot_dimension_numbers<[1], [0], [0], [1], [0, 0, 1, 1], [], []>} : vector<256x48xbf16>, vector<48x32xbf16>, vector<256x32xf32> -> vector<256x32xf32>
    %31 = arith.addf %18, %30 : vector<256x32xf32>
    %c2_i32 = arith.constant 2 : i32
    %32 = arith.addi %4, %c2_i32 : i32
    %c0_14 = arith.constant 0 : index
    %33 = arith.index_cast %32 : i32 to index
    %c0_15 = arith.constant 0 : index
    %c0_16 = arith.constant 0 : index
    %34 = vector.load %arg6[%c0_14, %33, %c0_15, %c0_16] : memref<1x18x18x16xbf16, #tpu.memory_space<vmem>>, vector<1x16x18x16xbf16>
    %35 = vector.shape_cast %34 : vector<1x16x18x16xbf16> to vector<16x18x16xbf16>
    %36 = vector.extract_strided_slice %35 {offsets = [0, 0, 0], sizes = [16, 16, 16], strides = [1, 1, 1]} : vector<16x18x16xbf16> to vector<16x16x16xbf16>
    %37 = vector.extract_strided_slice %35 {offsets = [0, 1, 0], sizes = [16, 16, 16], strides = [1, 1, 1]} : vector<16x18x16xbf16> to vector<16x16x16xbf16>
    %38 = vector.extract_strided_slice %35 {offsets = [0, 2, 0], sizes = [16, 16, 16], strides = [1, 1, 1]} : vector<16x18x16xbf16> to vector<16x16x16xbf16>
    %39 = tpu.concatenate %36, %37, %38 in 2 : vector<16x16x16xbf16>, vector<16x16x16xbf16>, vector<16x16x16xbf16> -> vector<16x16x48xbf16>
    %40 = vector.shape_cast %39 : vector<16x16x48xbf16> to vector<256x48xbf16>
    %c2 = arith.constant 2 : index
    %c0_17 = arith.constant 0 : index
    %c0_18 = arith.constant 0 : index
    %41 = vector.load %arg3[%c2, %c0_17, %c0_18] : memref<3x48x32xbf16, #tpu.memory_space<vmem>>, vector<1x48x32xbf16>
    %42 = vector.shape_cast %41 : vector<1x48x32xbf16> to vector<48x32xbf16>
    %cst_19 = arith.constant dense<0.000000e+00> : vector<256x32xf32>
    %43 = tpu.matmul %40, %42, %cst_19 {dimension_numbers = #tpu.dot_dimension_numbers<[1], [0], [0], [1], [0, 0, 1, 1], [], []>} : vector<256x48xbf16>, vector<48x32xbf16>, vector<256x32xf32> -> vector<256x32xf32>
    %44 = arith.addf %31, %43 : vector<256x32xf32>
    %c0_20 = arith.constant 0 : index
    %c0_21 = arith.constant 0 : index
    %45 = vector.load %arg4[%c0_20, %c0_21] : memref<1x32xf32, #tpu.memory_space<vmem>>, vector<1x32xf32>
    %46 = vector.broadcast %45 : vector<1x32xf32> to vector<256x32xf32>
    %47 = arith.addf %44, %46 : vector<256x32xf32>
    %c0_22 = arith.constant 0 : index
    %c0_23 = arith.constant 0 : index
    %c0_24 = arith.constant 0 : index
    %48 = vector.load %arg5[%c0_22, %c0_23, %c0_24] : memref<1x256x32xf32, #tpu.memory_space<vmem>>, vector<1x256x32xf32>
    %49 = vector.shape_cast %48 : vector<1x256x32xf32> to vector<256x32xf32>
    %50 = vector.shape_cast %47 : vector<256x32xf32> to vector<1x256x32xf32>
    tpu.vector_store %arg5[%c0_22, %c0_23, %c0_24], %50 {strides = array<i32>} : memref<1x256x32xf32, #tpu.memory_space<vmem>>, vector<1x256x32xf32>,
    return
  }
  func.func @transform_0(%arg0: i32, %arg1: i32) -> (i32, i32, i32, i32) {
    %c0_i32 = arith.constant 0 : i32
    %c0_i32_0 = arith.constant 0 : i32
    %c0_i32_1 = arith.constant 0 : i32
    %c0_i32_2 = arith.constant 0 : i32
    return %arg0, %c0_i32, %c0_i32_0, %c0_i32_1 : i32, i32, i32, i32
  }
  func.func @transform_1(%arg0: i32, %arg1: i32) -> (i32, i32, i32) {
    %c0_i32 = arith.constant 0 : i32
    %c0_i32_0 = arith.constant 0 : i32
    %c0_i32_1 = arith.constant 0 : i32
    %c0_i32_2 = arith.constant 0 : i32
    return %c0_i32, %c0_i32_0, %c0_i32_1 : i32, i32, i32
  }
  func.func @transform_2(%arg0: i32, %arg1: i32) -> (i32, i32) {
    %c0_i32 = arith.constant 0 : i32
    %c0_i32_0 = arith.constant 0 : i32
    %c0_i32_1 = arith.constant 0 : i32
    return %c0_i32, %c0_i32_0 : i32, i32
  }
  func.func @transform_3(%arg0: i32, %arg1: i32) -> (i32, i32, i32) {
    %c0_i32 = arith.constant 0 : i32
    %c0_i32_0 = arith.constant 0 : i32
    return %arg0, %arg1, %c0_i32 : i32, i32, i32
  }
}

module attributes {stable_mosaic.version = 11 : i64} {
  func.func @_conv3x3_kernel(%arg0: i32, %arg1: i32, %arg2: memref<1x16x16x16xf32, #tpu.memory_space<vmem>>, %arg3: memref<3x48x32xbf16, #tpu.memory_space<vmem>>, %arg4: memref<1x32xf32, #tpu.memory_space<vmem>>, %arg5: memref<1x32xf32, #tpu.memory_space<vmem>>, %arg6: memref<2x16xf32, #tpu.memory_space<vmem>>, %arg7: memref<1x256x32xbf16, #tpu.memory_space<vmem>>, %arg8: memref<1x18x18x16xbf16, #tpu.memory_space<vmem>>) attributes {dimension_semantics = [#tpu.dimension_semantics<parallel>, #tpu.dimension_semantics<arbitrary>], iteration_bounds = array<i64: 2, 1>, scalar_prefetch = 0 : i64, scratch_operands = 1 : i64, tpu.core_type = #tpu.core_type<tc>, window_params = [{transform_indices = @transform_0, window_bounds = array<i64: 1, 16, 16, 16>}, {pipeline_mode = #tpu.pipeline_mode<synchronous>, transform_indices = @transform_1, window_bounds = array<i64: 3, 48, 32>}, {pipeline_mode = #tpu.pipeline_mode<synchronous>, transform_indices = @transform_2, window_bounds = array<i64: 1, 32>}, {pipeline_mode = #tpu.pipeline_mode<synchronous>, transform_indices = @transform_3, window_bounds = array<i64: 1, 32>}, {pipeline_mode = #tpu.pipeline_mode<synchronous>, transform_indices = @transform_4, window_bounds = array<i64: 2, 16>}, {transform_indices = @transform_5, window_bounds = array<i64: 1, 256, 32>}]} {
    %c0_i32 = arith.constant 0 : i32
    %0 = arith.cmpi eq, %arg1, %c0_i32 : i32
    %1 = arith.extui %0 : i1 to i32
    %c0_i32_0 = arith.constant 0 : i32
    %2 = arith.cmpi ne, %1, %c0_i32_0 : i32
    scf.if %2 {
      %c0_29 = arith.constant 0 : index
      %c0_30 = arith.constant 0 : index
      %c0_31 = arith.constant 0 : index
      %c0_32 = arith.constant 0 : index
      %60 = vector.load %arg2[%c0_29, %c0_30, %c0_31, %c0_32] : memref<1x16x16x16xf32, #tpu.memory_space<vmem>>, vector<1x16x16x16xf32>
      %61 = vector.shape_cast %60 : vector<1x16x16x16xf32> to vector<16x16x16xf32>
      %c0_33 = arith.constant 0 : index
      %c0_34 = arith.constant 0 : index
      %62 = vector.load %arg6[%c0_33, %c0_34] : memref<2x16xf32, #tpu.memory_space<vmem>>, vector<2x16xf32>
      %63 = vector.extract_strided_slice %62 {offsets = [0, 0], sizes = [1, 16], strides = [1, 1]} : vector<2x16xf32> to vector<1x16xf32>
      %64 = vector.shape_cast %63 : vector<1x16xf32> to vector<1x1x16xf32>
      %65 = vector.broadcast %64 : vector<1x1x16xf32> to vector<16x16x16xf32>
      %66 = arith.mulf %61, %65 : vector<16x16x16xf32>
      %67 = vector.extract_strided_slice %62 {offsets = [1, 0], sizes = [1, 16], strides = [1, 1]} : vector<2x16xf32> to vector<1x16xf32>
      %68 = vector.shape_cast %67 : vector<1x16xf32> to vector<1x1x16xf32>
      %69 = vector.broadcast %68 : vector<1x1x16xf32> to vector<16x16x16xf32>
      %70 = arith.addf %66, %69 : vector<16x16x16xf32>
      %71 = arith.truncf %70 : vector<16x16x16xf32> to vector<16x16x16xbf16>
      %cst_35 = arith.constant 0.000000e+00 : bf16
      %72 = vector.broadcast %cst_35 : bf16 to vector<1x18x18x16xbf16>
      %c0_36 = arith.constant 0 : index
      %c0_37 = arith.constant 0 : index
      %c0_38 = arith.constant 0 : index
      %c0_39 = arith.constant 0 : index
      %73 = vector.load %arg8[%c0_36, %c0_37, %c0_38, %c0_39] : memref<1x18x18x16xbf16, #tpu.memory_space<vmem>>, vector<1x18x18x16xbf16>
      tpu.vector_store %arg8[%c0_36, %c0_37, %c0_38, %c0_39], %72 {strides = array<i32>} : memref<1x18x18x16xbf16, #tpu.memory_space<vmem>>, vector<1x18x18x16xbf16>,
      %c0_40 = arith.constant 0 : index
      %c1_41 = arith.constant 1 : index
      %c1_42 = arith.constant 1 : index
      %c0_43 = arith.constant 0 : index
      %74 = vector.load %arg8[%c0_40, %c1_41, %c1_42, %c0_43] : memref<1x18x18x16xbf16, #tpu.memory_space<vmem>>, vector<1x16x16x16xbf16>
      %75 = vector.shape_cast %74 : vector<1x16x16x16xbf16> to vector<16x16x16xbf16>
      %76 = vector.shape_cast %71 : vector<16x16x16xbf16> to vector<1x16x16x16xbf16>
      tpu.vector_store %arg8[%c0_40, %c1_41, %c1_42, %c0_43], %76 {strides = array<i32>} : memref<1x18x18x16xbf16, #tpu.memory_space<vmem>>, vector<1x16x16x16xbf16>,
    } else {
    }
    %c16_i32 = arith.constant 16 : i32
    %3 = arith.muli %arg1, %c16_i32 : i32
    %4 = tpu.assume_multiple %3, 16 : i32
    %cst = arith.constant 0.000000e+00 : f32
    %5 = vector.broadcast %cst : f32 to vector<256x32xf32>
    %c0_i32_1 = arith.constant 0 : i32
    %6 = arith.addi %4, %c0_i32_1 : i32
    %c0 = arith.constant 0 : index
    %7 = arith.index_cast %6 : i32 to index
    %c0_2 = arith.constant 0 : index
    %c0_3 = arith.constant 0 : index
    %8 = vector.load %arg8[%c0, %7, %c0_2, %c0_3] : memref<1x18x18x16xbf16, #tpu.memory_space<vmem>>, vector<1x16x18x16xbf16>
    %9 = vector.shape_cast %8 : vector<1x16x18x16xbf16> to vector<16x18x16xbf16>
    %10 = vector.extract_strided_slice %9 {offsets = [0, 0, 0], sizes = [16, 16, 16], strides = [1, 1, 1]} : vector<16x18x16xbf16> to vector<16x16x16xbf16>
    %11 = vector.extract_strided_slice %9 {offsets = [0, 1, 0], sizes = [16, 16, 16], strides = [1, 1, 1]} : vector<16x18x16xbf16> to vector<16x16x16xbf16>
    %12 = vector.extract_strided_slice %9 {offsets = [0, 2, 0], sizes = [16, 16, 16], strides = [1, 1, 1]} : vector<16x18x16xbf16> to vector<16x16x16xbf16>
    %13 = tpu.concatenate %10, %11, %12 in 2 : vector<16x16x16xbf16>, vector<16x16x16xbf16>, vector<16x16x16xbf16> -> vector<16x16x48xbf16>
    %14 = vector.shape_cast %13 : vector<16x16x48xbf16> to vector<256x48xbf16>
    %c0_4 = arith.constant 0 : index
    %c0_5 = arith.constant 0 : index
    %c0_6 = arith.constant 0 : index
    %15 = vector.load %arg3[%c0_4, %c0_5, %c0_6] : memref<3x48x32xbf16, #tpu.memory_space<vmem>>, vector<1x48x32xbf16>
    %16 = vector.shape_cast %15 : vector<1x48x32xbf16> to vector<48x32xbf16>
    %cst_7 = arith.constant dense<0.000000e+00> : vector<256x32xf32>
    %17 = tpu.matmul %14, %16, %cst_7 {dimension_numbers = #tpu.dot_dimension_numbers<[1], [0], [0], [1], [0, 0, 1, 1], [], []>} : vector<256x48xbf16>, vector<48x32xbf16>, vector<256x32xf32> -> vector<256x32xf32>
    %18 = arith.addf %5, %17 : vector<256x32xf32>
    %c1_i32 = arith.constant 1 : i32
    %19 = arith.addi %4, %c1_i32 : i32
    %c0_8 = arith.constant 0 : index
    %20 = arith.index_cast %19 : i32 to index
    %c0_9 = arith.constant 0 : index
    %c0_10 = arith.constant 0 : index
    %21 = vector.load %arg8[%c0_8, %20, %c0_9, %c0_10] : memref<1x18x18x16xbf16, #tpu.memory_space<vmem>>, vector<1x16x18x16xbf16>
    %22 = vector.shape_cast %21 : vector<1x16x18x16xbf16> to vector<16x18x16xbf16>
    %23 = vector.extract_strided_slice %22 {offsets = [0, 0, 0], sizes = [16, 16, 16], strides = [1, 1, 1]} : vector<16x18x16xbf16> to vector<16x16x16xbf16>
    %24 = vector.extract_strided_slice %22 {offsets = [0, 1, 0], sizes = [16, 16, 16], strides = [1, 1, 1]} : vector<16x18x16xbf16> to vector<16x16x16xbf16>
    %25 = vector.extract_strided_slice %22 {offsets = [0, 2, 0], sizes = [16, 16, 16], strides = [1, 1, 1]} : vector<16x18x16xbf16> to vector<16x16x16xbf16>
    %26 = tpu.concatenate %23, %24, %25 in 2 : vector<16x16x16xbf16>, vector<16x16x16xbf16>, vector<16x16x16xbf16> -> vector<16x16x48xbf16>
    %27 = vector.shape_cast %26 : vector<16x16x48xbf16> to vector<256x48xbf16>
    %c1 = arith.constant 1 : index
    %c0_11 = arith.constant 0 : index
    %c0_12 = arith.constant 0 : index
    %28 = vector.load %arg3[%c1, %c0_11, %c0_12] : memref<3x48x32xbf16, #tpu.memory_space<vmem>>, vector<1x48x32xbf16>
    %29 = vector.shape_cast %28 : vector<1x48x32xbf16> to vector<48x32xbf16>
    %cst_13 = arith.constant dense<0.000000e+00> : vector<256x32xf32>
    %30 = tpu.matmul %27, %29, %cst_13 {dimension_numbers = #tpu.dot_dimension_numbers<[1], [0], [0], [1], [0, 0, 1, 1], [], []>} : vector<256x48xbf16>, vector<48x32xbf16>, vector<256x32xf32> -> vector<256x32xf32>
    %31 = arith.addf %18, %30 : vector<256x32xf32>
    %c2_i32 = arith.constant 2 : i32
    %32 = arith.addi %4, %c2_i32 : i32
    %c0_14 = arith.constant 0 : index
    %33 = arith.index_cast %32 : i32 to index
    %c0_15 = arith.constant 0 : index
    %c0_16 = arith.constant 0 : index
    %34 = vector.load %arg8[%c0_14, %33, %c0_15, %c0_16] : memref<1x18x18x16xbf16, #tpu.memory_space<vmem>>, vector<1x16x18x16xbf16>
    %35 = vector.shape_cast %34 : vector<1x16x18x16xbf16> to vector<16x18x16xbf16>
    %36 = vector.extract_strided_slice %35 {offsets = [0, 0, 0], sizes = [16, 16, 16], strides = [1, 1, 1]} : vector<16x18x16xbf16> to vector<16x16x16xbf16>
    %37 = vector.extract_strided_slice %35 {offsets = [0, 1, 0], sizes = [16, 16, 16], strides = [1, 1, 1]} : vector<16x18x16xbf16> to vector<16x16x16xbf16>
    %38 = vector.extract_strided_slice %35 {offsets = [0, 2, 0], sizes = [16, 16, 16], strides = [1, 1, 1]} : vector<16x18x16xbf16> to vector<16x16x16xbf16>
    %39 = tpu.concatenate %36, %37, %38 in 2 : vector<16x16x16xbf16>, vector<16x16x16xbf16>, vector<16x16x16xbf16> -> vector<16x16x48xbf16>
    %40 = vector.shape_cast %39 : vector<16x16x48xbf16> to vector<256x48xbf16>
    %c2 = arith.constant 2 : index
    %c0_17 = arith.constant 0 : index
    %c0_18 = arith.constant 0 : index
    %41 = vector.load %arg3[%c2, %c0_17, %c0_18] : memref<3x48x32xbf16, #tpu.memory_space<vmem>>, vector<1x48x32xbf16>
    %42 = vector.shape_cast %41 : vector<1x48x32xbf16> to vector<48x32xbf16>
    %cst_19 = arith.constant dense<0.000000e+00> : vector<256x32xf32>
    %43 = tpu.matmul %40, %42, %cst_19 {dimension_numbers = #tpu.dot_dimension_numbers<[1], [0], [0], [1], [0, 0, 1, 1], [], []>} : vector<256x48xbf16>, vector<48x32xbf16>, vector<256x32xf32> -> vector<256x32xf32>
    %44 = arith.addf %31, %43 : vector<256x32xf32>
    %c0_20 = arith.constant 0 : index
    %c0_21 = arith.constant 0 : index
    %45 = vector.load %arg4[%c0_20, %c0_21] : memref<1x32xf32, #tpu.memory_space<vmem>>, vector<1x32xf32>
    %46 = vector.broadcast %45 : vector<1x32xf32> to vector<256x32xf32>
    %47 = arith.addf %44, %46 : vector<256x32xf32>
    %c0_22 = arith.constant 0 : index
    %c0_23 = arith.constant 0 : index
    %48 = vector.load %arg5[%c0_22, %c0_23] : memref<1x32xf32, #tpu.memory_space<vmem>>, vector<1x32xf32>
    %cst_24 = arith.constant 0.000000e+00 : f32
    %49 = vector.broadcast %cst_24 : f32 to vector<256x32xf32>
    %50 = arith.maximumf %47, %49 : vector<256x32xf32>
    %cst_25 = arith.constant 0.000000e+00 : f32
    %51 = vector.broadcast %cst_25 : f32 to vector<256x32xf32>
    %52 = arith.minimumf %47, %51 : vector<256x32xf32>
    %53 = vector.broadcast %48 : vector<1x32xf32> to vector<256x32xf32>
    %54 = arith.mulf %53, %52 : vector<256x32xf32>
    %55 = arith.addf %50, %54 : vector<256x32xf32>
    %56 = arith.truncf %55 : vector<256x32xf32> to vector<256x32xbf16>
    %c0_26 = arith.constant 0 : index
    %c0_27 = arith.constant 0 : index
    %c0_28 = arith.constant 0 : index
    %57 = vector.load %arg7[%c0_26, %c0_27, %c0_28] : memref<1x256x32xbf16, #tpu.memory_space<vmem>>, vector<1x256x32xbf16>
    %58 = vector.shape_cast %57 : vector<1x256x32xbf16> to vector<256x32xbf16>
    %59 = vector.shape_cast %56 : vector<256x32xbf16> to vector<1x256x32xbf16>
    tpu.vector_store %arg7[%c0_26, %c0_27, %c0_28], %59 {strides = array<i32>} : memref<1x256x32xbf16, #tpu.memory_space<vmem>>, vector<1x256x32xbf16>,
    return
  }
  func.func @transform_0(%arg0: i32, %arg1: i32) -> (i32, i32, i32, i32) {
    %c0_i32 = arith.constant 0 : i32
    %c0_i32_0 = arith.constant 0 : i32
    %c0_i32_1 = arith.constant 0 : i32
    %c0_i32_2 = arith.constant 0 : i32
    return %arg0, %c0_i32, %c0_i32_0, %c0_i32_1 : i32, i32, i32, i32
  }
  func.func @transform_1(%arg0: i32, %arg1: i32) -> (i32, i32, i32) {
    %c0_i32 = arith.constant 0 : i32
    %c0_i32_0 = arith.constant 0 : i32
    %c0_i32_1 = arith.constant 0 : i32
    %c0_i32_2 = arith.constant 0 : i32
    return %c0_i32, %c0_i32_0, %c0_i32_1 : i32, i32, i32
  }
  func.func @transform_2(%arg0: i32, %arg1: i32) -> (i32, i32) {
    %c0_i32 = arith.constant 0 : i32
    %c0_i32_0 = arith.constant 0 : i32
    %c0_i32_1 = arith.constant 0 : i32
    return %c0_i32, %c0_i32_0 : i32, i32
  }
  func.func @transform_3(%arg0: i32, %arg1: i32) -> (i32, i32) {
    %c0_i32 = arith.constant 0 : i32
    %c0_i32_0 = arith.constant 0 : i32
    %c0_i32_1 = arith.constant 0 : i32
    return %c0_i32, %c0_i32_0 : i32, i32
  }
  func.func @transform_4(%arg0: i32, %arg1: i32) -> (i32, i32) {
    %c0_i32 = arith.constant 0 : i32
    %c0_i32_0 = arith.constant 0 : i32
    %c0_i32_1 = arith.constant 0 : i32
    return %c0_i32, %c0_i32_0 : i32, i32
  }
  func.func @transform_5(%arg0: i32, %arg1: i32) -> (i32, i32, i32) {
    %c0_i32 = arith.constant 0 : i32
    %c0_i32_0 = arith.constant 0 : i32
    return %arg0, %arg1, %c0_i32 : i32, i32, i32
  }
}

module attributes {stable_mosaic.version = 11 : i64} {
  func.func @_conv3x3_kernel(%arg0: i32, %arg1: i32, %arg2: memref<1x16x16x32xbf16, #tpu.memory_space<vmem>>, %arg3: memref<3x96x32xbf16, #tpu.memory_space<vmem>>, %arg4: memref<1x32xf32, #tpu.memory_space<vmem>>, %arg5: memref<1x256x32xf32, #tpu.memory_space<vmem>>, %arg6: memref<1x1x32xf32, #tpu.memory_space<vmem>>, %arg7: memref<1x18x18x32xbf16, #tpu.memory_space<vmem>>) attributes {dimension_semantics = [#tpu.dimension_semantics<parallel>, #tpu.dimension_semantics<arbitrary>], iteration_bounds = array<i64: 2, 1>, scalar_prefetch = 0 : i64, scratch_operands = 1 : i64, tpu.core_type = #tpu.core_type<tc>, window_params = [{transform_indices = @transform_0, window_bounds = array<i64: 1, 16, 16, 32>}, {pipeline_mode = #tpu.pipeline_mode<synchronous>, transform_indices = @transform_1, window_bounds = array<i64: 3, 96, 32>}, {pipeline_mode = #tpu.pipeline_mode<synchronous>, transform_indices = @transform_2, window_bounds = array<i64: 1, 32>}, {transform_indices = @transform_3, window_bounds = array<i64: 1, 256, 32>}, {transform_indices = @transform_4, window_bounds = array<i64: 1, 1, 32>}]} {
    %c0_i32 = arith.constant 0 : i32
    %0 = arith.cmpi eq, %arg1, %c0_i32 : i32
    %1 = arith.extui %0 : i1 to i32
    %c0_i32_0 = arith.constant 0 : i32
    %2 = arith.cmpi ne, %1, %c0_i32_0 : i32
    scf.if %2 {
      %c0_34 = arith.constant 0 : index
      %c0_35 = arith.constant 0 : index
      %c0_36 = arith.constant 0 : index
      %c0_37 = arith.constant 0 : index
      %62 = vector.load %arg2[%c0_34, %c0_35, %c0_36, %c0_37] : memref<1x16x16x32xbf16, #tpu.memory_space<vmem>>, vector<1x16x16x32xbf16>
      %63 = vector.shape_cast %62 : vector<1x16x16x32xbf16> to vector<16x16x32xbf16>
      %cst_38 = arith.constant 0.000000e+00 : bf16
      %64 = vector.broadcast %cst_38 : bf16 to vector<1x18x18x32xbf16>
      %c0_39 = arith.constant 0 : index
      %c0_40 = arith.constant 0 : index
      %c0_41 = arith.constant 0 : index
      %c0_42 = arith.constant 0 : index
      %65 = vector.load %arg7[%c0_39, %c0_40, %c0_41, %c0_42] : memref<1x18x18x32xbf16, #tpu.memory_space<vmem>>, vector<1x18x18x32xbf16>
      tpu.vector_store %arg7[%c0_39, %c0_40, %c0_41, %c0_42], %64 {strides = array<i32>} : memref<1x18x18x32xbf16, #tpu.memory_space<vmem>>, vector<1x18x18x32xbf16>,
      %c0_43 = arith.constant 0 : index
      %c1_44 = arith.constant 1 : index
      %c1_45 = arith.constant 1 : index
      %c0_46 = arith.constant 0 : index
      %66 = vector.load %arg7[%c0_43, %c1_44, %c1_45, %c0_46] : memref<1x18x18x32xbf16, #tpu.memory_space<vmem>>, vector<1x16x16x32xbf16>
      %67 = vector.shape_cast %66 : vector<1x16x16x32xbf16> to vector<16x16x32xbf16>
      %68 = vector.shape_cast %63 : vector<16x16x32xbf16> to vector<1x16x16x32xbf16>
      tpu.vector_store %arg7[%c0_43, %c1_44, %c1_45, %c0_46], %68 {strides = array<i32>} : memref<1x18x18x32xbf16, #tpu.memory_space<vmem>>, vector<1x16x16x32xbf16>,
    } else {
    }
    %c16_i32 = arith.constant 16 : i32
    %3 = arith.muli %arg1, %c16_i32 : i32
    %4 = tpu.assume_multiple %3, 16 : i32
    %cst = arith.constant 0.000000e+00 : f32
    %5 = vector.broadcast %cst : f32 to vector<256x32xf32>
    %c0_i32_1 = arith.constant 0 : i32
    %6 = arith.addi %4, %c0_i32_1 : i32
    %c0 = arith.constant 0 : index
    %7 = arith.index_cast %6 : i32 to index
    %c0_2 = arith.constant 0 : index
    %c0_3 = arith.constant 0 : index
    %8 = vector.load %arg7[%c0, %7, %c0_2, %c0_3] : memref<1x18x18x32xbf16, #tpu.memory_space<vmem>>, vector<1x16x18x32xbf16>
    %9 = vector.shape_cast %8 : vector<1x16x18x32xbf16> to vector<16x18x32xbf16>
    %10 = vector.extract_strided_slice %9 {offsets = [0, 0, 0], sizes = [16, 16, 32], strides = [1, 1, 1]} : vector<16x18x32xbf16> to vector<16x16x32xbf16>
    %11 = vector.extract_strided_slice %9 {offsets = [0, 1, 0], sizes = [16, 16, 32], strides = [1, 1, 1]} : vector<16x18x32xbf16> to vector<16x16x32xbf16>
    %12 = vector.extract_strided_slice %9 {offsets = [0, 2, 0], sizes = [16, 16, 32], strides = [1, 1, 1]} : vector<16x18x32xbf16> to vector<16x16x32xbf16>
    %13 = tpu.concatenate %10, %11, %12 in 2 : vector<16x16x32xbf16>, vector<16x16x32xbf16>, vector<16x16x32xbf16> -> vector<16x16x96xbf16>
    %14 = vector.shape_cast %13 : vector<16x16x96xbf16> to vector<256x96xbf16>
    %c0_4 = arith.constant 0 : index
    %c0_5 = arith.constant 0 : index
    %c0_6 = arith.constant 0 : index
    %15 = vector.load %arg3[%c0_4, %c0_5, %c0_6] : memref<3x96x32xbf16, #tpu.memory_space<vmem>>, vector<1x96x32xbf16>
    %16 = vector.shape_cast %15 : vector<1x96x32xbf16> to vector<96x32xbf16>
    %cst_7 = arith.constant dense<0.000000e+00> : vector<256x32xf32>
    %17 = tpu.matmul %14, %16, %cst_7 {dimension_numbers = #tpu.dot_dimension_numbers<[1], [0], [0], [1], [0, 0, 1, 1], [], []>} : vector<256x96xbf16>, vector<96x32xbf16>, vector<256x32xf32> -> vector<256x32xf32>
    %18 = arith.addf %5, %17 : vector<256x32xf32>
    %c1_i32 = arith.constant 1 : i32
    %19 = arith.addi %4, %c1_i32 : i32
    %c0_8 = arith.constant 0 : index
    %20 = arith.index_cast %19 : i32 to index
    %c0_9 = arith.constant 0 : index
    %c0_10 = arith.constant 0 : index
    %21 = vector.load %arg7[%c0_8, %20, %c0_9, %c0_10] : memref<1x18x18x32xbf16, #tpu.memory_space<vmem>>, vector<1x16x18x32xbf16>
    %22 = vector.shape_cast %21 : vector<1x16x18x32xbf16> to vector<16x18x32xbf16>
    %23 = vector.extract_strided_slice %22 {offsets = [0, 0, 0], sizes = [16, 16, 32], strides = [1, 1, 1]} : vector<16x18x32xbf16> to vector<16x16x32xbf16>
    %24 = vector.extract_strided_slice %22 {offsets = [0, 1, 0], sizes = [16, 16, 32], strides = [1, 1, 1]} : vector<16x18x32xbf16> to vector<16x16x32xbf16>
    %25 = vector.extract_strided_slice %22 {offsets = [0, 2, 0], sizes = [16, 16, 32], strides = [1, 1, 1]} : vector<16x18x32xbf16> to vector<16x16x32xbf16>
    %26 = tpu.concatenate %23, %24, %25 in 2 : vector<16x16x32xbf16>, vector<16x16x32xbf16>, vector<16x16x32xbf16> -> vector<16x16x96xbf16>
    %27 = vector.shape_cast %26 : vector<16x16x96xbf16> to vector<256x96xbf16>
    %c1 = arith.constant 1 : index
    %c0_11 = arith.constant 0 : index
    %c0_12 = arith.constant 0 : index
    %28 = vector.load %arg3[%c1, %c0_11, %c0_12] : memref<3x96x32xbf16, #tpu.memory_space<vmem>>, vector<1x96x32xbf16>
    %29 = vector.shape_cast %28 : vector<1x96x32xbf16> to vector<96x32xbf16>
    %cst_13 = arith.constant dense<0.000000e+00> : vector<256x32xf32>
    %30 = tpu.matmul %27, %29, %cst_13 {dimension_numbers = #tpu.dot_dimension_numbers<[1], [0], [0], [1], [0, 0, 1, 1], [], []>} : vector<256x96xbf16>, vector<96x32xbf16>, vector<256x32xf32> -> vector<256x32xf32>
    %31 = arith.addf %18, %30 : vector<256x32xf32>
    %c2_i32 = arith.constant 2 : i32
    %32 = arith.addi %4, %c2_i32 : i32
    %c0_14 = arith.constant 0 : index
    %33 = arith.index_cast %32 : i32 to index
    %c0_15 = arith.constant 0 : index
    %c0_16 = arith.constant 0 : index
    %34 = vector.load %arg7[%c0_14, %33, %c0_15, %c0_16] : memref<1x18x18x32xbf16, #tpu.memory_space<vmem>>, vector<1x16x18x32xbf16>
    %35 = vector.shape_cast %34 : vector<1x16x18x32xbf16> to vector<16x18x32xbf16>
    %36 = vector.extract_strided_slice %35 {offsets = [0, 0, 0], sizes = [16, 16, 32], strides = [1, 1, 1]} : vector<16x18x32xbf16> to vector<16x16x32xbf16>
    %37 = vector.extract_strided_slice %35 {offsets = [0, 1, 0], sizes = [16, 16, 32], strides = [1, 1, 1]} : vector<16x18x32xbf16> to vector<16x16x32xbf16>
    %38 = vector.extract_strided_slice %35 {offsets = [0, 2, 0], sizes = [16, 16, 32], strides = [1, 1, 1]} : vector<16x18x32xbf16> to vector<16x16x32xbf16>
    %39 = tpu.concatenate %36, %37, %38 in 2 : vector<16x16x32xbf16>, vector<16x16x32xbf16>, vector<16x16x32xbf16> -> vector<16x16x96xbf16>
    %40 = vector.shape_cast %39 : vector<16x16x96xbf16> to vector<256x96xbf16>
    %c2 = arith.constant 2 : index
    %c0_17 = arith.constant 0 : index
    %c0_18 = arith.constant 0 : index
    %41 = vector.load %arg3[%c2, %c0_17, %c0_18] : memref<3x96x32xbf16, #tpu.memory_space<vmem>>, vector<1x96x32xbf16>
    %42 = vector.shape_cast %41 : vector<1x96x32xbf16> to vector<96x32xbf16>
    %cst_19 = arith.constant dense<0.000000e+00> : vector<256x32xf32>
    %43 = tpu.matmul %40, %42, %cst_19 {dimension_numbers = #tpu.dot_dimension_numbers<[1], [0], [0], [1], [0, 0, 1, 1], [], []>} : vector<256x96xbf16>, vector<96x32xbf16>, vector<256x32xf32> -> vector<256x32xf32>
    %44 = arith.addf %31, %43 : vector<256x32xf32>
    %c0_20 = arith.constant 0 : index
    %c0_21 = arith.constant 0 : index
    %45 = vector.load %arg4[%c0_20, %c0_21] : memref<1x32xf32, #tpu.memory_space<vmem>>, vector<1x32xf32>
    %46 = vector.broadcast %45 : vector<1x32xf32> to vector<256x32xf32>
    %47 = arith.addf %44, %46 : vector<256x32xf32>
    %c0_22 = arith.constant 0 : index
    %c0_23 = arith.constant 0 : index
    %c0_24 = arith.constant 0 : index
    %48 = vector.load %arg5[%c0_22, %c0_23, %c0_24] : memref<1x256x32xf32, #tpu.memory_space<vmem>>, vector<1x256x32xf32>
    %49 = vector.shape_cast %48 : vector<1x256x32xf32> to vector<256x32xf32>
    %50 = vector.shape_cast %47 : vector<256x32xf32> to vector<1x256x32xf32>
    tpu.vector_store %arg5[%c0_22, %c0_23, %c0_24], %50 {strides = array<i32>} : memref<1x256x32xf32, #tpu.memory_space<vmem>>, vector<1x256x32xf32>,
    %c0_i32_25 = arith.constant 0 : i32
    %51 = arith.cmpi eq, %arg1, %c0_i32_25 : i32
    %52 = arith.extui %51 : i1 to i32
    %c0_i32_26 = arith.constant 0 : i32
    %53 = arith.cmpi ne, %52, %c0_i32_26 : i32
    scf.if %53 {
      %cst_34 = arith.constant 0.000000e+00 : f32
      %62 = vector.broadcast %cst_34 : f32 to vector<1x32xf32>
      %c0_35 = arith.constant 0 : index
      %c0_36 = arith.constant 0 : index
      %c0_37 = arith.constant 0 : index
      %63 = vector.load %arg6[%c0_35, %c0_36, %c0_37] : memref<1x1x32xf32, #tpu.memory_space<vmem>>, vector<1x1x32xf32>
      %64 = vector.shape_cast %63 : vector<1x1x32xf32> to vector<1x32xf32>
      %65 = vector.shape_cast %62 : vector<1x32xf32> to vector<1x1x32xf32>
      tpu.vector_store %arg6[%c0_35, %c0_36, %c0_37], %65 {strides = array<i32>} : memref<1x1x32xf32, #tpu.memory_space<vmem>>, vector<1x1x32xf32>,
    } else {
    }
    %c0_27 = arith.constant 0 : index
    %c0_28 = arith.constant 0 : index
    %c0_29 = arith.constant 0 : index
    %54 = vector.load %arg6[%c0_27, %c0_28, %c0_29] : memref<1x1x32xf32, #tpu.memory_space<vmem>>, vector<1x1x32xf32>
    %55 = vector.shape_cast %54 : vector<1x1x32xf32> to vector<1x32xf32>
    %cst_30 = arith.constant dense<0.000000e+00> : vector<32xf32>
    %56 = vector.multi_reduction <add>, %47, %cst_30 [0] : vector<256x32xf32> to vector<32xf32>
    %57 = vector.shape_cast %56 : vector<32xf32> to vector<1x32xf32>
    %58 = arith.addf %55, %57 : vector<1x32xf32>
    %c0_31 = arith.constant 0 : index
    %c0_32 = arith.constant 0 : index
    %c0_33 = arith.constant 0 : index
    %59 = vector.load %arg6[%c0_31, %c0_32, %c0_33] : memref<1x1x32xf32, #tpu.memory_space<vmem>>, vector<1x1x32xf32>
    %60 = vector.shape_cast %59 : vector<1x1x32xf32> to vector<1x32xf32>
    %61 = vector.shape_cast %58 : vector<1x32xf32> to vector<1x1x32xf32>
    tpu.vector_store %arg6[%c0_31, %c0_32, %c0_33], %61 {strides = array<i32>} : memref<1x1x32xf32, #tpu.memory_space<vmem>>, vector<1x1x32xf32>,
    return
  }
  func.func @transform_0(%arg0: i32, %arg1: i32) -> (i32, i32, i32, i32) {
    %c0_i32 = arith.constant 0 : i32
    %c0_i32_0 = arith.constant 0 : i32
    %c0_i32_1 = arith.constant 0 : i32
    %c0_i32_2 = arith.constant 0 : i32
    return %arg0, %c0_i32, %c0_i32_0, %c0_i32_1 : i32, i32, i32, i32
  }
  func.func @transform_1(%arg0: i32, %arg1: i32) -> (i32, i32, i32) {
    %c0_i32 = arith.constant 0 : i32
    %c0_i32_0 = arith.constant 0 : i32
    %c0_i32_1 = arith.constant 0 : i32
    %c0_i32_2 = arith.constant 0 : i32
    return %c0_i32, %c0_i32_0, %c0_i32_1 : i32, i32, i32
  }
  func.func @transform_2(%arg0: i32, %arg1: i32) -> (i32, i32) {
    %c0_i32 = arith.constant 0 : i32
    %c0_i32_0 = arith.constant 0 : i32
    %c0_i32_1 = arith.constant 0 : i32
    return %c0_i32, %c0_i32_0 : i32, i32
  }
  func.func @transform_3(%arg0: i32, %arg1: i32) -> (i32, i32, i32) {
    %c0_i32 = arith.constant 0 : i32
    %c0_i32_0 = arith.constant 0 : i32
    return %arg0, %arg1, %c0_i32 : i32, i32, i32
  }
  func.func @transform_4(%arg0: i32, %arg1: i32) -> (i32, i32, i32) {
    %c0_i32 = arith.constant 0 : i32
    %c0_i32_0 = arith.constant 0 : i32
    %c0_i32_1 = arith.constant 0 : i32
    return %arg0, %c0_i32, %c0_i32_0 : i32, i32, i32
  }
}

module attributes {stable_mosaic.version = 11 : i64} {
  func.func @_scale_add_kernel(%arg0: i32, %arg1: i32, %arg2: memref<1x256x32xf32, #tpu.memory_space<vmem>>, %arg3: memref<1x256x32xf32, #tpu.memory_space<vmem>>, %arg4: memref<1x1x32xf32, #tpu.memory_space<vmem>>, %arg5: memref<1x256x32xf32, #tpu.memory_space<vmem>>) attributes {dimension_semantics = [#tpu.dimension_semantics<parallel>, #tpu.dimension_semantics<parallel>], iteration_bounds = array<i64: 2, 1>, scalar_prefetch = 0 : i64, scratch_operands = 0 : i64, tpu.core_type = #tpu.core_type<tc>, window_params = [{transform_indices = @transform_0, window_bounds = array<i64: 1, 256, 32>}, {transform_indices = @transform_1, window_bounds = array<i64: 1, 256, 32>}, {transform_indices = @transform_2, window_bounds = array<i64: 1, 1, 32>}, {transform_indices = @transform_3, window_bounds = array<i64: 1, 256, 32>}]} {
    %c0 = arith.constant 0 : index
    %c0_0 = arith.constant 0 : index
    %c0_1 = arith.constant 0 : index
    %0 = vector.load %arg2[%c0, %c0_0, %c0_1] : memref<1x256x32xf32, #tpu.memory_space<vmem>>, vector<1x256x32xf32>
    %1 = vector.shape_cast %0 : vector<1x256x32xf32> to vector<256x32xf32>
    %c0_2 = arith.constant 0 : index
    %c0_3 = arith.constant 0 : index
    %c0_4 = arith.constant 0 : index
    %2 = vector.load %arg4[%c0_2, %c0_3, %c0_4] : memref<1x1x32xf32, #tpu.memory_space<vmem>>, vector<1x1x32xf32>
    %3 = vector.shape_cast %2 : vector<1x1x32xf32> to vector<1x32xf32>
    %4 = vector.broadcast %3 : vector<1x32xf32> to vector<256x32xf32>
    %5 = arith.mulf %1, %4 : vector<256x32xf32>
    %c0_5 = arith.constant 0 : index
    %c0_6 = arith.constant 0 : index
    %c0_7 = arith.constant 0 : index
    %6 = vector.load %arg3[%c0_5, %c0_6, %c0_7] : memref<1x256x32xf32, #tpu.memory_space<vmem>>, vector<1x256x32xf32>
    %7 = vector.shape_cast %6 : vector<1x256x32xf32> to vector<256x32xf32>
    %8 = arith.addf %5, %7 : vector<256x32xf32>
    %c0_8 = arith.constant 0 : index
    %c0_9 = arith.constant 0 : index
    %c0_10 = arith.constant 0 : index
    %9 = vector.load %arg5[%c0_8, %c0_9, %c0_10] : memref<1x256x32xf32, #tpu.memory_space<vmem>>, vector<1x256x32xf32>
    %10 = vector.shape_cast %9 : vector<1x256x32xf32> to vector<256x32xf32>
    %11 = vector.shape_cast %8 : vector<256x32xf32> to vector<1x256x32xf32>
    tpu.vector_store %arg5[%c0_8, %c0_9, %c0_10], %11 {strides = array<i32>} : memref<1x256x32xf32, #tpu.memory_space<vmem>>, vector<1x256x32xf32>,
    return
  }
  func.func @transform_0(%arg0: i32, %arg1: i32) -> (i32, i32, i32) {
    %c0_i32 = arith.constant 0 : i32
    %c0_i32_0 = arith.constant 0 : i32
    return %arg0, %arg1, %c0_i32 : i32, i32, i32
  }
  func.func @transform_1(%arg0: i32, %arg1: i32) -> (i32, i32, i32) {
    %c0_i32 = arith.constant 0 : i32
    %c0_i32_0 = arith.constant 0 : i32
    return %arg0, %arg1, %c0_i32 : i32, i32, i32
  }
  func.func @transform_2(%arg0: i32, %arg1: i32) -> (i32, i32, i32) {
    %c0_i32 = arith.constant 0 : i32
    %c0_i32_0 = arith.constant 0 : i32
    %c0_i32_1 = arith.constant 0 : i32
    return %arg0, %c0_i32, %c0_i32_0 : i32, i32, i32
  }
  func.func @transform_3(%arg0: i32, %arg1: i32) -> (i32, i32, i32) {
    %c0_i32 = arith.constant 0 : i32
    %c0_i32_0 = arith.constant 0 : i32
    return %arg0, %arg1, %c0_i32 : i32, i32, i32
  }
}

</mosaic_0001>

<bundles_post_ra>
// kernel: bottleneck_irse_v2_forward.7
= control target key start
LH: loop header
LB: loop body
LE: loop exit
PB: predicated region body
PF: predicated region fallthrough
CT: control target
= control target key end

     0   :  { %8 = vsyncpa [#allocation3], 0  ;;  %s996_s0 = inlined_call_operand.vmem [shape: f32[2,256,32], index: 0, kind: input, shape index: {}]   ;;  %s997_s1 = inlined_call_operand.vmem [shape: f32[2,256,32], index: 1, kind: input, shape index: {}]   ;;  %s998_s2 = inlined_call_operand.vmem [shape: f32[2,1,32], index: 2, kind: input, shape index: {}]   ;;  %s999_s3 = inlined_call_operand.hbm [shape: f32[2,256,32], index: 3, kind: output, shape index: {}]  }
   0x1   :  { %10 = vsyncpa [#allocation3 + $0x1], 0  ;;  %s717_s12 = smov 0   ;;  %s719_s13 = smov 0  }
   0x2   :  { %s721_s14 = smov 0   ;;  %s723_s15 = smov 0  }
   0x3   :  { %s725_s16 = smov 0   ;;  %s727_s17 = smov 0  }
   0x4 LB: > { %s539_s18 = sadd.s32 4294967295, %s693_s17   ;;  %s540_s19 = sadd.s32 4294967294, %s693_s17   ;;  %s693_s17 = sphi %s727_s17, %s16_s17   ;;  %s689_s16 = sphi %s725_s16, %s1006_s16   ;;  %s685_s15 = sphi %s723_s15, %s1005_s15   ;;  %s681_s14 = sphi %s721_s14, %s1004_s14   ;;  %s677_s13 = sphi %s719_s13, %s1003_s13   ;;  %s673_s12 = sphi %s717_s12, %s1002_s12  }
   0x5   : > { %s28_s20 = sadd.s32 1, %s689_s16  ;;  %s119_s21 = sadd.s32 1, %s681_s14 }
   0x6   : > { %p30_p0 = scmp.ge.s32.totalorder %s28_s20, 2  ;;  %p129_p1 = scmp.ne.s32.totalorder %s681_s14, %s677_s13 }
   0x7   : > { %p130_p2 = scmp.eq.s32.totalorder %s539_s18, 1  ;;  %p135_p3 = scmp.ne.s32.totalorder %s677_s13, %s673_s12 }
   0x8   : > { %s1008_s20 = smov (%p30_p0, %s28_s20), 0  ;;  %p136_p5 = scmp.eq.s32.totalorder %s540_s19, 1 }
   0x9   : > { %p757_p4 = por %p130_p2, %p129_p1  ;;  %s114_s23 = ssub.s32 %s689_s16, %s1008_s20 }
   0xa   : > { %p543_p6 = scmp.ge.s32.totalorder %s693_s17, 1  ;;  %p117_p7 = scmp.eq.s32.totalorder %s114_s23, 0 }
   0xb   : > { %p764_p8 = por %p136_p5, %p135_p3  ;;  %p186_p9 = scmp.lt.s32.totalorder %s693_s17, 3 }
   0xc   : > { %s770_s25 = scalar_select %p117_p7, %s681_s14, %s119_s21  }
   0xd   : > { %p187_p10 = pnand %p543_p6, %p186_p9 }
   0xe   : > { %p227_p11 = scmp.lt.s32.totalorder (!%p187_p10), %s685_s15, 1  ;;  %s223_s26 = sand.u32 (!%p187_p10), 1, %s677_s13  }
   0xf   : > { %190 = sbr.rel (%p187_p10) target bundleno = 64 (0x40), region = 32  ;;  %s777_s28 = sshll.u32 (!%p187_p10), %s223_s26, 8 }
  0x10   : > { %s816_s18 = scalar_lea.vmem (!%p187_p10), [#allocation2], %s777_s28  ;;  %s556_s19 = sshll.u32 (!%p187_p10), %s685_s15, 8 }
  0x11   : > { %s429_s23 = scalar_lea.hbm (!%p187_p10), %s999_s3, %s556_s19  ;;  %s635_s7 = scalar_lea.hbm (!%p187_p10), %s999_s3, 512 }
  0x12   : > { %s432_s28 = sshll.u32 (!%p187_p10), %s429_s23, 4  ;;  %s433_s28 = int_to_ptr.hbm [resolvable:$true] %s432_s28 }
  0x13   : > { %s629_s30 = sshra.s32 (!%p187_p10), %s433_s28, 4  ;;  %s630_s30 = int_to_ptr.hbm [resolvable:$true] %s629_s30 }
  0x14   : > { %s228_s27 = scalar_select %p227_p11, %s685_s15, 1  ;;  %vm382_vm0 = vcmask 261120  }
  0x15   : > { %s631_s4 = scalar_lea.hbm %s630_s30, 256  ;;  %p636_p1 = scmp.lt.s32.totalorder %s630_s30, %s999_s3 }
  0x16   : > { %s554_s29 = sshll.u32 %s228_s27, 8  ;;  %s248_s5 = scalar_lea.vmem %s998_s2, %s228_s27 }
  0x17   : > { %s785_s8 = scalar_lea.vmem %s996_s0, %s554_s29  ;;  %s790_s11 = scalar_lea.vmem %s997_s1, %s554_s29  ;;  %v792_v0 = vld [vmem:[%s248_s5] ss:$0 sm:$0xff] }
  0x18   : > { %v250_v1 = vld [vmem:[%s785_s8] sm:$0xff]  ;;  %v251_v3 = vld [vmem:[%s785_s8 + $0x8] sm:$0xff]  ;;  %v252_v7 = vld [vmem:[%s785_s8 + $0x10] sm:$0xff]  ;;  %s430_s27 = sshll.u32 %s816_s18, 4  ;;  %s416_s29 = scalar_lea.sflag [#allocation3], %s223_s26  ;;  %s431_s27 = int_to_ptr.vmem [resolvable:$true] %s430_s27 }
  0x19   : > { %v318_v2 = vld [vmem:[%s790_s11] sm:$0xff]  ;;  %v286_v4 = vmul.f32 %v792_v0, %v250_v1  ;;  %v287_v5 = vmul.f32 %v792_v0, %v251_v3  ;;  %v319_v6 = vld [vmem:[%s790_s11 + $0x8] sm:$0xff]  ;;  %v320_v8 = vld [vmem:[%s790_s11 + $0x10] sm:$0xff]  ;;  %v288_v9 = vmul.f32 %v792_v0, %v252_v7  ;;  %p632_p12 = scmp.ne.s32.totalorder %s630_s30, %s631_s4  ;;  %p637_p2 = scmp.lt.s32.totalorder %s635_s7, %s631_s4 }
  0x1a   : > { %v253_v10 = vld [vmem:[%s785_s8 + $0x18] sm:$0xff]  ;;  %v254_v12 = vld [vmem:[%s785_s8 + $0x20] sm:$0xff]  ;;  %v255_v18 = vld [vmem:[%s785_s8 + $0x28] sm:$0xff] }
  0x1b   : > { %v321_v11 = vld [vmem:[%s790_s11 + $0x18] sm:$0xff]  ;;  %v350_v13 = vadd.f32 %v318_v2, %v286_v4  ;;  %v351_v14 = vadd.f32 %v319_v6, %v287_v5  ;;  %v289_v15 = vmul.f32 %v792_v0, %v253_v10  ;;  %v290_v16 = vmul.f32 %v792_v0, %v254_v12  ;;  %v322_v17 = vld [vmem:[%s790_s11 + $0x20] sm:$0xff]  ;;  %v323_v19 = vld [vmem:[%s790_s11 + $0x28] sm:$0xff]  ;;  %p633_p13 = pnand %p632_p12, %p757_p4  ;;  %p638_p3 = por %p637_p2, %p636_p1 }
  0x1c   : > { %v352_v20 = vadd.f32 %v320_v8, %v288_v9  ;;  %v291_v21 = vmul.f32 %v792_v0, %v255_v18  ;;  %v256_v22 = vld [vmem:[%s785_s8 + $0x30] sm:$0xff]  ;;  %v257_v24 = vld [vmem:[%s785_s8 + $0x38] sm:$0xff]  ;;  %v258_v30 = vld [vmem:[%s785_s8 + $0x40] sm:$0xff] }
  0x1d   : > { %v324_v23 = vld [vmem:[%s790_s11 + $0x30] sm:$0xff]  ;;  %383 = vst.msk [vmem:[%s816_s18] sm:$0xff] %vm382_vm0, %v350_v13  ;;  %v353_v25 = vadd.f32 %v321_v11, %v289_v15  ;;  %v354_v26 = vadd.f32 %v322_v17, %v290_v16  ;;  %v292_v27 = vmul.f32 %v792_v0, %v256_v22  ;;  %v293_v28 = vmul.f32 %v792_v0, %v257_v24  ;;  %v325_v29 = vld [vmem:[%s790_s11 + $0x38] sm:$0xff]  ;;  %v326_v33 = vld [vmem:[%s790_s11 + $0x40] sm:$0xff]  ;;  %p634_p0 = pneg %p633_p13 }
  0x1e   : > { %384 = vst.msk [vmem:[%s816_s18 + $0x8] sm:$0xff] %vm382_vm0, %v351_v14  ;;  %v355_v31 = vadd.f32 %v323_v19, %v291_v21  ;;  %v294_v32 = vmul.f32 %v792_v0, %v258_v30  ;;  %v259_v34 = vld [vmem:[%s785_s8 + $0x48] sm:$0xff]  ;;  %v260_v35 = vld [vmem:[%s785_s8 + $0x50] sm:$0xff]  ;;  %v261_v40 = vld [vmem:[%s785_s8 + $0x58] sm:$0xff] }
  0x1f   : > { %385 = vst.msk [vmem:[%s816_s18 + $0x10] sm:$0xff] %vm382_vm0, %v352_v20  ;;  %v356_v36 = vadd.f32 %v324_v23, %v292_v27  ;;  %v295_v37 = vmul.f32 %v792_v0, %v259_v34  ;;  %v327_v38 = vld [vmem:[%s790_s11 + $0x48] sm:$0xff]  ;;  %v296_v39 = vmul.f32 %v792_v0, %v260_v35  ;;  %v357_v41 = vadd.f32 %v325_v29, %v293_v28  ;;  %v328_v42 = vld [vmem:[%s790_s11 + $0x50] sm:$0xff]  ;;  %v262_v44 = vld [vmem:[%s785_s8 + $0x60] sm:$0xff]  ;;  %p639_p5 = pnand %p638_p3, %p634_p0 }
  0x20   : > { %386 = vst.msk [vmem:[%s816_s18 + $0x18] sm:$0xff] %vm382_vm0, %v353_v25  ;;  %v297_v43 = vmul.f32 %v792_v0, %v261_v40  ;;  %v263_v45 = vld [vmem:[%s785_s8 + $0x68] sm:$0xff]  ;;  %v358_v46 = vadd.f32 %v326_v33, %v294_v32  ;;  %v329_v47 = vld [vmem:[%s790_s11 + $0x58] sm:$0xff]  ;;  %v298_v48 = vmul.f32 %v792_v0, %v262_v44  ;;  %v264_v49 = vld [vmem:[%s785_s8 + $0x70] sm:$0xff] }
  0x21   : > { %387 = vst.msk [vmem:[%s816_s18 + $0x20] sm:$0xff] %vm382_vm0, %v354_v26  ;;  %v359_v50 = vadd.f32 %v327_v38, %v295_v37  ;;  %v330_v51 = vld [vmem:[%s790_s11 + $0x60] sm:$0xff]  ;;  %v299_v52 = vmul.f32 %v792_v0, %v263_v45  ;;  %v265_v53 = vld [vmem:[%s785_s8 + $0x78] sm:$0xff]  ;;  %v360_v55 = vadd.f32 %v328_v42, %v296_v39  ;;  %v331_v56 = vld [vmem:[%s790_s11 + $0x68] sm:$0xff]  ;;  %v300_v57 = vmul.f32 %v792_v0, %v264_v49 }
  0x22   : > { %388 = vst.msk [vmem:[%s816_s18 + $0x28] sm:$0xff] %vm382_vm0, %v355_v31  ;;  %v266_v54 = vld [vmem:[%s785_s8 + $0x80] sm:$0xff]  ;;  %v267_v58 = vld [vmem:[%s785_s8 + $0x88] sm:$0xff]  ;;  %v361_v59 = vadd.f32 %v329_v47, %v297_v43  ;;  %v332_v60 = vld [vmem:[%s790_s11 + $0x70] sm:$0xff]  ;;  %v301_v61 = vmul.f32 %v792_v0, %v265_v53  ;;  %v362_v63 = vadd.f32 %v330_v51, %v298_v48 }
  0x23   : > { %389 = vst.msk [vmem:[%s816_s18 + $0x30] sm:$0xff] %vm382_vm0, %v356_v36  ;;  %v268_v62 = vld [vmem:[%s785_s8 + $0x90] sm:$0xff]  ;;  %v333_v1 = vld [vmem:[%s790_s11 + $0x78] sm:$0xff]  ;;  %v302_v2 = vmul.f32 %v792_v0, %v266_v54  ;;  %v363_v4 = vadd.f32 %v331_v56, %v299_v52  ;;  %v334_v5 = vld [vmem:[%s790_s11 + $0x80] sm:$0xff]  ;;  %v303_v6 = vmul.f32 %v792_v0, %v267_v58  ;;  %v364_v8 = vadd.f32 %v332_v60, %v300_v57 }
  0x24   : > { %390 = vst.msk [vmem:[%s816_s18 + $0x38] sm:$0xff] %vm382_vm0, %v357_v41  ;;  %v269_v3 = vld [vmem:[%s785_s8 + $0x98] sm:$0xff]  ;;  %v270_v7 = vld [vmem:[%s785_s8 + $0xa0] sm:$0xff]  ;;  %v335_v9 = vld [vmem:[%s790_s11 + $0x88] sm:$0xff]  ;;  %v304_v10 = vmul.f32 %v792_v0, %v268_v62  ;;  %v365_v12 = vadd.f32 %v333_v1, %v301_v61 }
  0x25   : > { %391 = vst.msk [vmem:[%s816_s18 + $0x40] sm:$0xff] %vm382_vm0, %v358_v46  ;;  %v271_v11 = vld [vmem:[%s785_s8 + $0xa8] sm:$0xff]  ;;  %v336_v13 = vld [vmem:[%s790_s11 + $0x90] sm:$0xff]  ;;  %v305_v14 = vmul.f32 %v792_v0, %v269_v3  ;;  %v366_v16 = vadd.f32 %v334_v5, %v302_v2  ;;  %v337_v17 = vld [vmem:[%s790_s11 + $0x98] sm:$0xff]  ;;  %v306_v18 = vmul.f32 %v792_v0, %v270_v7  ;;  %v367_v20 = vadd.f32 %v335_v9, %v303_v6 }
  0x26   : > { %392 = vst.msk [vmem:[%s816_s18 + $0x48] sm:$0xff] %vm382_vm0, %v359_v50  ;;  %v272_v15 = vld [vmem:[%s785_s8 + $0xb0] sm:$0xff]  ;;  %v273_v19 = vld [vmem:[%s785_s8 + $0xb8] sm:$0xff]  ;;  %v338_v21 = vld [vmem:[%s790_s11 + $0xa0] sm:$0xff]  ;;  %v307_v22 = vmul.f32 %v792_v0, %v271_v11  ;;  %v368_v24 = vadd.f32 %v336_v13, %v304_v10 }
  0x27   : > { %393 = vst.msk [vmem:[%s816_s18 + $0x50] sm:$0xff] %vm382_vm0, %v360_v55  ;;  %v274_v23 = vld [vmem:[%s785_s8 + $0xc0] sm:$0xff]  ;;  %v339_v25 = vld [vmem:[%s790_s11 + $0xa8] sm:$0xff]  ;;  %v308_v26 = vmul.f32 %v792_v0, %v272_v15  ;;  %v369_v28 = vadd.f32 %v337_v17, %v305_v14  ;;  %v340_v29 = vld [vmem:[%s790_s11 + $0xb0] sm:$0xff]  ;;  %v309_v30 = vmul.f32 %v792_v0, %v273_v19  ;;  %v370_v32 = vadd.f32 %v338_v21, %v306_v18 }
  0x28   : > { %394 = vst.msk [vmem:[%s816_s18 + $0x58] sm:$0xff] %vm382_vm0, %v361_v59  ;;  %v275_v27 = vld [vmem:[%s785_s8 + $0xc8] sm:$0xff]  ;;  %v276_v31 = vld [vmem:[%s785_s8 + $0xd0] sm:$0xff]  ;;  %v341_v33 = vld [vmem:[%s790_s11 + $0xb8] sm:$0xff]  ;;  %v310_v34 = vmul.f32 %v792_v0, %v274_v23  ;;  %v371_v36 = vadd.f32 %v339_v25, %v307_v22 }
  0x29   : > { %395 = vst.msk [vmem:[%s816_s18 + $0x60] sm:$0xff] %vm382_vm0, %v362_v63  ;;  %v277_v35 = vld [vmem:[%s785_s8 + $0xd8] sm:$0xff]  ;;  %v342_v37 = vld [vmem:[%s790_s11 + $0xc0] sm:$0xff]  ;;  %v311_v38 = vmul.f32 %v792_v0, %v275_v27  ;;  %v372_v40 = vadd.f32 %v340_v29, %v308_v26  ;;  %v343_v41 = vld [vmem:[%s790_s11 + $0xc8] sm:$0xff]  ;;  %v312_v42 = vmul.f32 %v792_v0, %v276_v31  ;;  %v373_v44 = vadd.f32 %v341_v33, %v309_v30 }
  0x2a   : > { %396 = vst.msk [vmem:[%s816_s18 + $0x68] sm:$0xff] %vm382_vm0, %v363_v4  ;;  %v278_v39 = vld [vmem:[%s785_s8 + $0xe0] sm:$0xff]  ;;  %v279_v43 = vld [vmem:[%s785_s8 + $0xe8] sm:$0xff]  ;;  %v344_v45 = vld [vmem:[%s790_s11 + $0xd0] sm:$0xff]  ;;  %v313_v46 = vmul.f32 %v792_v0, %v277_v35  ;;  %v374_v48 = vadd.f32 %v342_v37, %v310_v34 }
  0x2b   : > { %397 = vst.msk [vmem:[%s816_s18 + $0x70] sm:$0xff] %vm382_vm0, %v364_v8  ;;  %v280_v47 = vld [vmem:[%s785_s8 + $0xf0] sm:$0xff]  ;;  %v345_v49 = vld [vmem:[%s790_s11 + $0xd8] sm:$0xff]  ;;  %v314_v50 = vmul.f32 %v792_v0, %v278_v39  ;;  %v375_v52 = vadd.f32 %v343_v41, %v311_v38  ;;  %v346_v53 = vld [vmem:[%s790_s11 + $0xe0] sm:$0xff]  ;;  %v315_v54 = vmul.f32 %v792_v0, %v279_v43  ;;  %v376_v55 = vadd.f32 %v344_v45, %v312_v42 }
  0x2c   : > { %398 = vst.msk [vmem:[%s816_s18 + $0x78] sm:$0xff] %vm382_vm0, %v365_v12  ;;  %v281_v51 = vld [vmem:[%s785_s8 + $0xf8] sm:$0xff]  ;;  %v347_v56 = vld [vmem:[%s790_s11 + $0xe8] sm:$0xff]  ;;  %v316_v57 = vmul.f32 %v792_v0, %v280_v47  ;;  %v377_v58 = vadd.f32 %v345_v49, %v313_v46  ;;  %v348_v59 = vld [vmem:[%s790_s11 + $0xf0] sm:$0xff] }
  0x2d   : > { %399 = vst.msk [vmem:[%s816_s18 + $0x80] sm:$0xff] %vm382_vm0, %v366_v16  ;;  %v317_v60 = vmul.f32 %v792_v0, %v281_v51  ;;  %v378_v61 = vadd.f32 %v346_v53, %v314_v50  ;;  %v349_v62 = vld [vmem:[%s790_s11 + $0xf8] sm:$0xff]  ;;  %v379_v63 = vadd.f32 %v347_v56, %v315_v54 }
  0x2e   : > { %400 = vst.msk [vmem:[%s816_s18 + $0x88] sm:$0xff] %vm382_vm0, %v367_v20  ;;  %v380_v1 = vadd.f32 %v348_v59, %v316_v57 }
  0x2f   : > { %401 = vst.msk [vmem:[%s816_s18 + $0x90] sm:$0xff] %vm382_vm0, %v368_v24  ;;  %v381_v2 = vadd.f32 %v349_v62, %v317_v60 }
  0x30   : > { %402 = vst.msk [vmem:[%s816_s18 + $0x98] sm:$0xff] %vm382_vm0, %v369_v28 }
  0x31   : > { %403 = vst.msk [vmem:[%s816_s18 + $0xa0] sm:$0xff] %vm382_vm0, %v370_v32 }
  0x32   : > { %404 = vst.msk [vmem:[%s816_s18 + $0xa8] sm:$0xff] %vm382_vm0, %v371_v36 }
  0x33   : > { %405 = vst.msk [vmem:[%s816_s18 + $0xb0] sm:$0xff] %vm382_vm0, %v372_v40 }
  0x34   : > { %406 = vst.msk [vmem:[%s816_s18 + $0xb8] sm:$0xff] %vm382_vm0, %v373_v44 }
  0x35   : > { %407 = vst.msk [vmem:[%s816_s18 + $0xc0] sm:$0xff] %vm382_vm0, %v374_v48 }
  0x36   : > { %408 = vst.msk [vmem:[%s816_s18 + $0xc8] sm:$0xff] %vm382_vm0, %v375_v52 }
  0x37   : > { %409 = vst.msk [vmem:[%s816_s18 + $0xd0] sm:$0xff] %vm382_vm0, %v376_v55 }
  0x38   : > { %410 = vst.msk [vmem:[%s816_s18 + $0xd8] sm:$0xff] %vm382_vm0, %v377_v58 }
  0x39   : > { %411 = vst.msk [vmem:[%s816_s18 + $0xe0] sm:$0xff] %vm382_vm0, %v378_v61 }
  0x3a   : > { %412 = vst.msk [vmem:[%s816_s18 + $0xe8] sm:$0xff] %vm382_vm0, %v379_v63 }
  0x3b   : > { %413 = vst.msk [vmem:[%s816_s18 + $0xf0] sm:$0xff] %vm382_vm0, %v380_v1 }
  0x3c   : > { %414 = vst.msk [vmem:[%s816_s18 + $0xf8] sm:$0xff] %vm382_vm0, %v381_v2 }
  0x3d   : > { %642 = shalt.err (!%p639_p5)
}
  0x3e   : > { %s695_s26 = smov 128   ;;  %s696_s10 = smov 8  }
  0x3f   : > { %557 = dma.vmem_to_hbm [thread:$0]  (%p757_p4), %s431_s27, 4096, %s433_s28, %s416_s29, %s695_s26, %s695_s26, %s696_s10  }
  0x40 PF: > { %p563_p6 = scmp.ge.s32.totalorder %s693_s17, 2  ;;  %s447_s11 = sand.u32 1, %s673_s12  }
  0x41   : > { %s448_s18 = scalar_lea.sflag [#allocation3], %s447_s11 }
  0x42   : > { %p560_p7 = pnand %p563_p6, %p764_p8 }
  0x44   : > { %p561_p9 = pneg %p560_p7 }
  0x46   : > { %668 = dma.done.wait (%p561_p9), %s448_s18, 4096  }
  0x47   : > { %670 = vsyncadd (%p561_p9), %s448_s18, 4294963200  ;;  %s16_s17 = sadd.s32 1, %s693_s17   ;;  %s1002_s12 = smov %s677_s13 }
  0x48   : > { %p13_p10 = scmp.ge.s32.totalorder %s16_s17, 4   ;;  %s1003_s13 = smov %s681_s14 }
  0x49   : > { %s1004_s14 = smov %s770_s25  ;;  %s1005_s15 = smov %s689_s16 }
  0x4a   : > { %s1006_s16 = smov %s1008_s20  ;;  %15 = sbr.rel (!%p13_p10) target bundleno = 4 (0x4), region = 73 }
  0x4f   :  { %454 = vsyncpa [#allocation3], 1 }
  0x50   :  { %456 = vsyncpa [#allocation3 + $0x1], 1 }

// kernel: bottleneck_irse_v2_forward.6
= control target key start
LH: loop header
LB: loop body
LE: loop exit
PB: predicated region body
PF: predicated region fallthrough
CT: control target
= control target key end

     0   :  { %s3604_s12 = smov 0   ;;  %s3606_s13 = smov 0   ;;  %s4931_s0 = inlined_call_operand.vmem [shape: f32[2,16,16,16], index: 0, kind: input, shape index: {}]   ;;  %s4932_s1 = inlined_call_operand.vmem [shape: bf16[3,48,32], index: 1, kind: input, shape index: {}]   ;;  %s4933_s2 = inlined_call_operand.vmem [shape: f32[1,32], index: 2, kind: input, shape index: {}]   ;;  %s4934_s3 = inlined_call_operand.vmem [shape: f32[2,256,32], index: 3, kind: output, shape index: {}]  }
   0x1   :  { %s3608_s14 = smov 0  }
   0x2 LB: > { %s25_s15 = sadd.s32 1, %s3575_s13  ;;  %p3041_p0 = scmp.ge.s32.totalorder %s3579_s14, 1  ;;  %s3579_s14 = sphi %s3608_s14, %s13_s14   ;;  %s3575_s13 = sphi %s3606_s13, %s4942_s13   ;;  %s3571_s12 = sphi %s3604_s12, %s4941_s12  }
   0x3   : > { %p27_p1 = scmp.ge.s32.totalorder %s25_s15, 2  ;;  %p151_p2 = scmp.lt.s32.totalorder %s3579_s14, 3 }
   0x5   : > { %s4944_s15 = smov (%p27_p1, %s25_s15), 0  ;;  %p152_p3 = pnand %p3041_p0, %p151_p2 }
   0x6   : > { %p179_p4 = scmp.lt.s32.totalorder (!%p152_p3), %s3571_s12, 1  ;;  %s3582_s16 = smov (!%p152_p3), 32  }
   0x7   : > { %155 = sbr.rel (%p152_p3) target bundleno = 589 (0x24d), region = 32  ;;  %s3583_s21 = smov (!%p152_p3), 16  }
   0xc   : > { %vm263_vm0 = vcmask 125952   ;;  %vm266_vm1 = vcmask 122880   ;;  %v3581_v0 = vmov 0   ;;  %vm1165_vm2 = vcmask 1046528   ;;  %s4946_s12 = smov (!%p179_p4, %s3571_s12), 1 }
   0xd   : > { %264 = vst.msk [vmem:[#allocation2] sm:$0xf] %vm263_vm0, %v3581_v0  ;;  %s3432_s17 = sshll.u32 %s4946_s12, 8  ;;  %vm319_vm3 = vsmask.f32 256  ;;  %vm1246_vm10 = vcmask 130048  }
   0xe   : > { %265 = vst.msk [vmem:[#allocation2 + $0x4] sm:$0xf] %vm263_vm0, %v3581_v0  ;;  %s3694_s20 = scalar_lea.vmem %s4931_s0, %s3432_s17  ;;  %vm320_vm4 = vsmask.f32 4368  ;;  %vm644_vm6 = vsmask.f32 7938  ;;  %vm3817_vm8 = vmand %vm266_vm1, %vm319_vm3  ;;  %s4699_s22 = scalar_lea.vmem %s4934_s3, %s3432_s17 }
   0xf   : > { %267 = vst.msk [vmem:[#allocation2 + $0x8] sm:$0x1] %vm266_vm1, %v3581_v0  ;;  %v224_v8 = vld [vmem:[%s3694_s20 + $0xc8] sm:$0xff]  ;;  %v223_v9 = vld [vmem:[%s3694_s20 + $0xc0] sm:$0xff]  ;;  %v201_v11 = vld [vmem:[%s3694_s20 + $0x10] sm:$0xff]  ;;  %vm1279_vm11 = vcmask 261120  }
  0x10   : > { %268 = vst.msk [vmem:[#allocation2 + $0xc] sm:$0xf] %vm263_vm0, %v3581_v0  ;;  %v256_v10 = vpack.c.bf16 %v224_v8, %v224_v8  ;;  %v202_v12 = vld [vmem:[%s3694_s20 + $0x18] sm:$0xff]  ;;  %v255_v13 = vpack.c.bf16 %v223_v9, %v223_v9  ;;  %v3718_v14 = vpack.c.bf16 %v201_v11, %v201_v11  ;;  %v199_v18 = vld [vmem:[%s3694_s20] sm:$0xff]  ;;  %v200_v19 = vld [vmem:[%s3694_s20 + $0x8] sm:$0xff]  ;;  %vm1891_vm12 = vcmask 392192  }
  0x11   : > { %269 = vst.msk [vmem:[#allocation2 + $0x10] sm:$0xf] %vm263_vm0, %v3581_v0  ;;  %v3720_v15 = vpack.c.bf16 %v202_v12, %v202_v12  ;;  %v203_v20 = vld [vmem:[%s3694_s20 + $0x20] sm:$0xff]  ;;  %v204_v23 = vld [vmem:[%s3694_s20 + $0x28] sm:$0xff]  ;;  %v3738_v24 = vpack.c.bf16 %v199_v18, %v199_v18  ;;  %v3740_v25 = vpack.c.bf16 %v200_v19, %v200_v19  ;;  %v225_v37 = vld [vmem:[%s3694_s20 + $0xd0] sm:$0xff] }
  0x12   : > { %270 = vst.msk [vmem:[#allocation2 + $0x14] sm:$0x1] %vm266_vm1, %v3581_v0  ;;  %v535_v16 = vshrl.u32 %v256_v10, 16  ;;  %v527_v17 = vshrl.u32 %v255_v13, 16  ;;  %v340_v21 = vshrl.u32 %v3718_v14, 16  ;;  %v3742_v26 = vpack.c.bf16 %v203_v20, %v203_v20  ;;  %vm3772_vm5 = vmor %vm319_vm3, %vm320_vm4  ;;  %v226_v49 = vld [vmem:[%s3694_s20 + $0xd8] sm:$0xff] }
  0x13   : > { %271 = vst.msk [vmem:[#allocation2 + $0x18] sm:$0xf] %vm263_vm0, %v3581_v0  ;;  %v348_v22 = vshrl.u32 %v3720_v15, 16  ;;  %v538_v29 = vshll.u32 %v256_v10, 16  ;;  %v530_v30 = vshll.u32 %v255_v13, 16  ;;  %v3750_v31 = vpack.c.bf16 %v204_v23, %v204_v23  ;;  %vm3801_vm7 = vmand %vm263_vm0, %vm644_vm6 }
  0x14   : > { %272 = vst.msk [vmem:[#allocation2 + $0x1c] sm:$0xf] %vm263_vm0, %v3581_v0  ;;  %v529_v27 = vrot.slane %v527_v17, 7  ;;  %v3746_v28 = vrot.slane %v535_v16, 7  ;;  %v3754_v32 = vrot.slane %v340_v21, 7  ;;  %v323_v34 = vshrl.u32 %v3738_v24, 16 }
  0x15   : > { %v3640_v1 = vld [vmem:[#allocation2] sm:$0xff]  ;;  %273 = vst.msk [vmem:[#allocation2 + $0x20] sm:$0x1] %vm266_vm1, %v3581_v0  ;;  %v3756_v33 = vrot.slane %v348_v22, 7  ;;  %v331_v35 = vshrl.u32 %v3740_v25, 16  ;;  %v357_v36 = vshrl.u32 %v3742_v26, 16  ;;  %v3784_v50 = vpack.c.bf16 %v225_v37, %v225_v37 }
  0x16   : > { %v766_v2 = vld [vmem:[#allocation2 + $0x8] sm:$0x1]  ;;  %274 = vst.msk [vmem:[#allocation2 + $0x24] sm:$0xf] %vm263_vm0, %v3581_v0  ;;  %v1166_v5 = vrot.slane %v3640_v1, 1  ;;  %v533_v38 = vrot.slane %v529_v27, 4  ;;  %v540_v39 = vor.u32 %v538_v29, %v3746_v28  ;;  %v532_v43 = vor.u32 %v530_v30, %v529_v27 }
  0x17   : > { %v908_v3 = vunpack.c.l.b16 %v766_v2  ;;  %275 = vst.msk [vmem:[#allocation2 + $0x28] sm:$0xf] %vm263_vm0, %v3581_v0  ;;  %v542_v40 = vrot.slane %v3746_v28, 4  ;;  %v343_v41 = vshll.u32 %v3718_v14, 16  ;;  %v351_v44 = vshll.u32 %v3720_v15, 16  ;;  %v228_v16 = vld [vmem:[%s3694_s20 + $0xe8] sm:$0xff] }
  0x18   : > { %276 = vst.msk [vmem:[#allocation2 + $0x2c] sm:$0x1] %vm266_vm1, %v3581_v0  ;;  %v365_v45 = vshrl.u32 %v3750_v31, 16  ;;  %v346_v46 = vrot.slane %v3754_v32, 4  ;;  %v355_v47 = vrot.slane %v3756_v33, 4  ;;  %v944_v48 = vshll.u32 %v3640_v1, 16 }
  0x19   : > { %v3650_v4 = vpack.c.b16 %v908_v3, %v908_v3  ;;  %277 = vst.msk [vmem:[#allocation2 + $0x30] sm:$0xf] %vm263_vm0, %v3581_v0  ;;  %v3788_v52 = vrot.slane %v323_v34, 7  ;;  %v326_v53 = vshll.u32 %v3738_v24, 16  ;;  %v3791_v54 = vrot.slane %v331_v35, 7  ;;  %v227_v21 = vld [vmem:[%s3694_s20 + $0xe0] sm:$0xff] }
  0x1a   : > { %278 = vst.msk [vmem:[#allocation2 + $0x34] sm:$0xf] %vm263_vm0, %v3581_v0  ;;  %v655_v51 = vld [vmem:[#allocation2 + $0x18] sm:$0xf]  ;;  %v3793_v55 = vrot.slane %v357_v36, 7  ;;  %v541_v56 = vsel %vm3772_vm5, %v533_v38, %v540_v39  ;;  %v345_v59 = vor.u32 %v343_v41, %v3754_v32  ;;  %v942_v60 = vshrl.u32 %v3640_v1, 16 }
  0x1b   : > { %v1167_v6 = vrot.slane %v3650_v4, 1  ;;  %279 = vst.msk [vmem:[#allocation2 + $0x38] sm:$0x1] %vm266_vm1, %v3581_v0  ;;  %v946_v61 = vrot.slane %v944_v48, 1  ;;  %v949_v62 = vshll.u32 %v3650_v4, 16  ;;  %v360_v63 = vshll.u32 %v3742_v26, 16 }
  0x1c   : > { %280 = vst.msk [vmem:[#allocation2 + $0x3c] sm:$0xf] %vm263_vm0, %v3581_v0  ;;  %v3811_v2 = vrot.slane %v365_v45, 7  ;;  %v258_v3 = vpack.c.bf16 %v226_v49, %v226_v49  ;;  %v334_v4 = vshll.u32 %v3740_v25, 16  ;;  %v544_v8 = vshrl.u32 %v3784_v50, 16 }
  0x1d   : > { %v1168_v7 = vsel %vm1165_vm2, %v1166_v5, %v1167_v6  ;;  %281 = vst.msk [vmem:[#allocation2 + $0x40] sm:$0xf] %vm263_vm0, %v3581_v0  ;;  %v353_v6 = vor.u32 %v351_v44, %v3756_v33  ;;  %v951_v10 = vrot.slane %v949_v62, 1  ;;  %v338_v11 = vrot.slane %v3791_v54, 4  ;;  %v659_v18 = vld [vmem:[#allocation2 + $0x20] sm:$0x1] }
  0x1e   : > { %1214 = vrot.lane.b32.xlu0 %v1168_v7, %s3582_s16  ;;  %282 = vst.msk [vmem:[#allocation2 + $0x44] sm:$0x1] %vm266_vm1, %v3581_v0  ;;  %v947_v7 = vor.u32 %v946_v61, %v942_v60  ;;  %v368_v12 = vshll.u32 %v3750_v31, 16  ;;  %vm940_vm9 = vsmask.f32 7424  ;;  %v656_v13 = vsel %vm3801_vm7, %v345_v59, %v655_v51 }
  0x1f   : > { %283 = vst.msk [vmem:[#allocation2 + $0x48] sm:$0xf] %vm263_vm0, %v3581_v0  ;;  %v328_v14 = vor.u32 %v326_v53, %v3788_v52  ;;  %v329_v15 = vrot.slane %v3788_v52, 4  ;;  %v552_v20 = vshrl.u32 %v258_v3, 16  ;;  %v260_v22 = vpack.c.bf16 %v228_v16, %v228_v16  ;;  %v646_v24 = vld [vmem:[#allocation2 + $0xc] sm:$0xf] }
  0x20   : > { %284 = vst.msk [vmem:[#allocation2 + $0x4c] sm:$0xf] %vm263_vm0, %v3581_v0  ;;  %v952_v19 = vsel %vm940_vm9, %v947_v7, %v951_v10  ;;  %v336_v23 = vor.u32 %v334_v4, %v3791_v54  ;;  %v546_v25 = vrot.slane %v544_v8, 7  ;;  %v547_v26 = vshll.u32 %v3784_v50, 16  ;;  %v652_v28 = vld [vmem:[#allocation2 + $0x14] sm:$0x1] }
  0x21   : > { %285 = vst.msk [vmem:[#allocation2 + $0x50] sm:$0x1] %vm266_vm1, %v3581_v0  ;;  %1133 = vrot.lane.b32.xlu2 %v952_v19, %s3583_s21  ;;  %v354_v27 = vsel %vm3772_vm5, %v346_v46, %v353_v6  ;;  %v555_v29 = vshll.u32 %v258_v3, 16  ;;  %v660_v30 = vsel %vm3817_vm8, %v355_v47, %v659_v18  ;;  %v362_v31 = vor.u32 %v360_v63, %v3793_v55  ;;  %v662_v37 = vld [vmem:[#allocation2 + $0x24] sm:$0xf] }
  0x22   : > { %286 = vst.msk [vmem:[#allocation2 + $0x54] sm:$0xf] %vm263_vm0, %v3581_v0  ;;  %v569_v33 = vshrl.u32 %v260_v22, 16  ;;  %v647_v34 = vsel %vm3801_vm7, %v328_v14, %v646_v24  ;;  %v363_v35 = vrot.slane %v3793_v55, 4  ;;  %v370_v36 = vor.u32 %v368_v12, %v3811_v2 }
  0x23   : > { %287 = vst.msk [vmem:[#allocation2 + $0x58] sm:$0xf] %vm263_vm0, %v3581_v0  ;;  %v554_v38 = vrot.slane %v552_v20, 7  ;;  %v337_v39 = vsel %vm3772_vm5, %v329_v15, %v336_v23  ;;  %v372_v41 = vrot.slane %v3811_v2, 4  ;;  %v549_v44 = vor.u32 %v547_v26, %v546_v25 }
  0x24   : > { %288 = vst.msk [vmem:[#allocation2 + $0x5c] sm:$0x1] %vm266_vm1, %v3581_v0  ;;  %v550_v45 = vrot.slane %v546_v25, 4  ;;  %v663_v49 = vsel %vm3801_vm7, %v362_v31, %v662_v37  ;;  %v571_v51 = vrot.slane %v569_v33, 7  ;;  %v572_v52 = vshll.u32 %v260_v22, 16 }
  0x25   : > { %289 = vst.msk [vmem:[#allocation2 + $0x60] sm:$0xf] %vm263_vm0, %v3581_v0  ;;  %v557_v46 = vor.u32 %v555_v29, %v554_v38  ;;  %v371_v53 = vsel %vm3772_vm5, %v363_v35, %v370_v36  ;;  %v559_v54 = vrot.slane %v554_v38, 4 }
  0x26   : > { %290 = vst.msk [vmem:[#allocation2 + $0x64] sm:$0xf] %vm263_vm0, %v3581_v0  ;;  %v574_v6 = vor.u32 %v572_v52, %v571_v51 }
  0x27   : > { %291 = vst.msk [vmem:[#allocation2 + $0x68] sm:$0x1] %vm266_vm1, %v3581_v0  ;;  %v558_v60 = vsel %vm3772_vm5, %v550_v45, %v557_v46 }
  0x28   : > { %292 = vst.msk [vmem:[#allocation2 + $0x6c] sm:$0xf] %vm263_vm0, %v3581_v0 }
  0x29   : > { %293 = vst.msk [vmem:[#allocation2 + $0x70] sm:$0xf] %vm263_vm0, %v3581_v0 }
  0x2a   : > { %294 = vst.msk [vmem:[#allocation2 + $0x74] sm:$0x1] %vm266_vm1, %v3581_v0 }
  0x2b   : > { %295 = vst.msk [vmem:[#allocation2 + $0x78] sm:$0xf] %vm263_vm0, %v3581_v0 }
  0x2c   : > { %296 = vst.msk [vmem:[#allocation2 + $0x7c] sm:$0xf] %vm263_vm0, %v3581_v0 }
  0x2d   : > { %297 = vst.msk [vmem:[#allocation2 + $0x80] sm:$0x1] %vm266_vm1, %v3581_v0 }
  0x2e   : > { %298 = vst.msk [vmem:[#allocation2 + $0x84] sm:$0xf] %vm263_vm0, %v3581_v0 }
  0x2f   : > { %299 = vst.msk [vmem:[#allocation2 + $0x88] sm:$0xf] %vm263_vm0, %v3581_v0 }
  0x30   : > { %300 = vst.msk [vmem:[#allocation2 + $0x8c] sm:$0x1] %vm266_vm1, %v3581_v0 }
  0x31   : > { %301 = vst.msk [vmem:[#allocation2 + $0x90] sm:$0xf] %vm263_vm0, %v3581_v0 }
  0x32   : > { %302 = vst.msk [vmem:[#allocation2 + $0x94] sm:$0xf] %vm263_vm0, %v3581_v0 }
  0x33   : > { %303 = vst.msk [vmem:[#allocation2 + $0x98] sm:$0x1] %vm266_vm1, %v3581_v0 }
  0x34   : > { %304 = vst.msk [vmem:[#allocation2 + $0x9c] sm:$0xf] %vm263_vm0, %v3581_v0 }
  0x35   : > { %305 = vst.msk [vmem:[#allocation2 + $0xa0] sm:$0xf] %vm263_vm0, %v3581_v0 }
  0x36   : > { %306 = vst.msk [vmem:[#allocation2 + $0xa4] sm:$0x1] %vm266_vm1, %v3581_v0 }
  0x37   : > { %307 = vst.msk [vmem:[#allocation2 + $0xa8] sm:$0xf] %vm263_vm0, %v3581_v0 }
  0x38   : > { %308 = vst.msk [vmem:[#allocation2 + $0xac] sm:$0xf] %vm263_vm0, %v3581_v0 }
  0x39   : > { %309 = vst.msk [vmem:[#allocation2 + $0xb0] sm:$0x1] %vm266_vm1, %v3581_v0 }
  0x3a   : > { %310 = vst.msk [vmem:[#allocation2 + $0xb4] sm:$0xf] %vm263_vm0, %v3581_v0 }
  0x3b   : > { %311 = vst.msk [vmem:[#allocation2 + $0xb8] sm:$0xf] %vm263_vm0, %v3581_v0  ;;  %v732_v58 = vld [vmem:[#allocation2 + $0x9c] sm:$0xf] }
  0x3c   : > { %312 = vst.msk [vmem:[#allocation2 + $0xbc] sm:$0x1] %vm266_vm1, %v3581_v0  ;;  %v733_v9 = vsel %vm3801_vm7, %v532_v43, %v732_v58  ;;  %v666_v43 = vld [vmem:[#allocation2 + $0x2c] sm:$0x1] }
  0x3d   : > { %313 = vst.msk [vmem:[#allocation2 + $0xc0] sm:$0xf] %vm263_vm0, %v3581_v0  ;;  %v736_v1 = vld [vmem:[#allocation2 + $0xa4] sm:$0x1] }
  0x3e   : > { %314 = vst.msk [vmem:[#allocation2 + $0xc4] sm:$0xf] %vm263_vm0, %v3581_v0  ;;  %v737_v17 = vsel %vm3817_vm8, %v542_v40, %v736_v1  ;;  %v653_v40 = vsel %vm3817_vm8, %v338_v11, %v652_v28  ;;  %v739_v50 = vld [vmem:[#allocation2 + $0xa8] sm:$0xf] }
  0x3f   : > { %315 = vst.msk [vmem:[#allocation2 + $0xc8] sm:$0x1] %vm266_vm1, %v3581_v0  ;;  %v740_v61 = vsel %vm3801_vm7, %v549_v44, %v739_v50 }
  0x40   : > { %316 = vst.msk [vmem:[#allocation2 + $0xcc] sm:$0xf] %vm263_vm0, %v3581_v0  ;;  %v743_v58 = vld [vmem:[#allocation2 + $0xb0] sm:$0x1] }
  0x41   : > { %317 = vst.msk [vmem:[#allocation2 + $0xd0] sm:$0xf] %vm263_vm0, %v3581_v0  ;;  %v746_v7 = vld [vmem:[#allocation2 + $0xb4] sm:$0xf]  ;;  %v744_v8 = vsel %vm3817_vm8, %v559_v54, %v743_v58 }
  0x42   : > { %318 = vst.msk [vmem:[#allocation2 + $0xd4] sm:$0x1] %vm266_vm1, %v3581_v0  ;;  %v259_v0 = vpack.c.bf16 %v227_v21, %v227_v21 }
  0x43   : > { %734 = vst [vmem:[#allocation2 + $0x9c] sm:$0xf] %v733_v9  ;;  %v576_v9 = vrot.slane %v571_v51, 4  ;;  %v750_v10 = vld [vmem:[#allocation2 + $0xbc] sm:$0x1] }
  0x44   : > { %735 = vst.msk [vmem:[#allocation2 + $0xa0] sm:$0xf] %vm263_vm0, %v541_v56  ;;  %v561_v32 = vshrl.u32 %v259_v0, 16  ;;  %v564_v48 = vshll.u32 %v259_v0, 16  ;;  %v667_v56 = vsel %vm3817_vm8, %v372_v41, %v666_v43 }
  0x45   : > { %738 = vst [vmem:[#allocation2 + $0xa4] sm:$0x1] %v737_v17  ;;  %v751_v25 = vsel %vm3817_vm8, %v576_v9, %v750_v10  ;;  %v205_v9 = vld [vmem:[%s3694_s20 + $0x30] sm:$0xff] }
  0x46   : > { %657 = vst [vmem:[#allocation2 + $0x18] sm:$0xf] %v656_v13  ;;  %v563_v47 = vrot.slane %v561_v32, 7 }
  0x47   : > { %658 = vst.msk [vmem:[#allocation2 + $0x1c] sm:$0xf] %vm263_vm0, %v354_v27 }
  0x48   : > { %661 = vst [vmem:[#allocation2 + $0x20] sm:$0x1] %v660_v30  ;;  %v566_v62 = vor.u32 %v564_v48, %v563_v47  ;;  %v567_v63 = vrot.slane %v563_v47, 4 }
  0x49   : > { %648 = vst [vmem:[#allocation2 + $0xc] sm:$0xf] %v647_v34 }
  0x4a   : > { %649 = vst.msk [vmem:[#allocation2 + $0x10] sm:$0xf] %vm263_vm0, %v337_v39  ;;  %v747_v17 = vsel %vm3801_vm7, %v566_v62, %v746_v7  ;;  %v575_v21 = vsel %vm3772_vm5, %v567_v63, %v574_v6 }
  0x4b   : > { %v3465_v55 = vld [vmem:[#allocation2 + $0x9c] sm:$0xff]  ;;  %654 = vst [vmem:[#allocation2 + $0x14] sm:$0x1] %v653_v40 }
  0x4c   : > { %v3148_v59 = vld [vmem:[#allocation2 + $0xa4] sm:$0x1]  ;;  %664 = vst [vmem:[#allocation2 + $0x24] sm:$0xf] %v663_v49  ;;  %v1643_v3 = vshrl.u32 %v3465_v55, 16  ;;  %v1645_v1 = vshll.u32 %v3465_v55, 16 }
  0x4d   : > { %v1478_v2 = vunpack.c.l.b16 %v3148_v59  ;;  %665 = vst.msk [vmem:[#allocation2 + $0x28] sm:$0xf] %vm263_vm0, %v371_v53  ;;  %v1758_v12 = vrot.slane %v3465_v55, 1 }
  0x4e   : > { %v3472_v4 = vld [vmem:[#allocation2 + $0x18] sm:$0xff]  ;;  %668 = vst [vmem:[#allocation2 + $0x2c] sm:$0x1] %v667_v56  ;;  %v1647_v13 = vrot.slane %v1645_v1, 1 }
  0x4f   : > { %v1494_v11 = vpack.c.b16 %v1478_v2, %v1478_v2  ;;  %v3286_v14 = vld [vmem:[#allocation2 + $0x20] sm:$0x1]  ;;  %741 = vst [vmem:[#allocation2 + $0xa8] sm:$0xf] %v740_v61  ;;  %v2335_v16 = vshll.u32 %v3472_v4, 16  ;;  %v2333_v27 = vshrl.u32 %v3472_v4, 16 }
  0x50   : > { %v2300_v15 = vunpack.c.l.b16 %v3286_v14  ;;  %742 = vst.msk [vmem:[#allocation2 + $0xac] sm:$0xf] %vm263_vm0, %v558_v60  ;;  %v1648_v19 = vor.u32 %v1647_v13, %v1643_v3  ;;  %v2556_v34 = vrot.slane %v3472_v4, 1  ;;  %v3115_v48 = vld [vmem:[#allocation2 + $0x20] sm:$0x1]  ;;  %v3892_v53 = vld [vmem:[#allocation2 + $0x18] sm:$0xff] }
  0x51   : > { %v1759_v18 = vrot.slane %v1494_v11, 1  ;;  %v1650_v20 = vshll.u32 %v1494_v11, 16  ;;  %745 = vst [vmem:[#allocation2 + $0xb0] sm:$0x1] %v744_v8  ;;  %v2337_v28 = vrot.slane %v2335_v16, 1  ;;  %v3885_v31 = vld [vmem:[#allocation2 + $0xc] sm:$0xff]  ;;  %v1467_v60 = vunpack.c.l.b16 %v3115_v48 }
  0x52   : > { %v2316_v22 = vpack.c.b16 %v2300_v15, %v2300_v15  ;;  %v3112_v23 = vld [vmem:[#allocation2 + $0x14] sm:$0x1]  ;;  %748 = vst [vmem:[#allocation2 + $0xb4] sm:$0xf] %v747_v17  ;;  %v956_v47 = vshll.u32 %v3885_v31, 16  ;;  %v3453_v50 = vld [vmem:[#allocation2 + $0xc] sm:$0xff] }
  0x53   : > { %v769_v24 = vld [vmem:[#allocation2 + $0x14] sm:$0x1]  ;;  %v1760_v26 = vsel %vm1165_vm2, %v1758_v12, %v1759_v18  ;;  %v1652_v0 = vrot.slane %v1650_v20, 1  ;;  %749 = vst.msk [vmem:[#allocation2 + $0xb8] sm:$0xf] %vm263_vm0, %v575_v21  ;;  %v1466_v36 = vunpack.c.l.b16 %v3112_v23  ;;  %v2338_v39 = vor.u32 %v2337_v28, %v2333_v27  ;;  %v206_v61 = vld [vmem:[%s3694_s20 + $0x38] sm:$0xff] }
  0x54   : > { %1794 = vrot.lane.b32.xlu1 %v1760_v26, %s3582_s16  ;;  %v2340_v29 = vshll.u32 %v2316_v22, 16  ;;  %v3473_v30 = vld [vmem:[#allocation2 + $0x24] sm:$0xff]  ;;  %v909_v32 = vunpack.c.l.b16 %v769_v24  ;;  %v2557_v35 = vrot.slane %v2316_v22, 1  ;;  %752 = vst [vmem:[#allocation2 + $0xbc] sm:$0x1] %v751_v25  ;;  %v954_v63 = vshrl.u32 %v3885_v31, 16 }
  0x55   : > { %v1653_v33 = vsel %vm940_vm9, %v1648_v19, %v1652_v0  ;;  %v3289_v37 = vld [vmem:[#allocation2 + $0x2c] sm:$0x1]  ;;  %v2347_v41 = vshll.u32 %v3473_v30, 16  ;;  %v2559_v44 = vrot.slane %v3473_v30, 1  ;;  %v1482_v51 = vpack.c.b16 %v1466_v36, %v1466_v36 }
  0x56   : > { %1714 = vrot.lane.b32.xlu0 %v1653_v33, %s3583_s21  ;;  %v2301_v38 = vunpack.c.l.b16 %v3289_v37  ;;  %v2342_v40 = vrot.slane %v2340_v29, 1  ;;  %v925_v46 = vpack.c.b16 %v909_v32, %v909_v32  ;;  %v2558_v49 = vsel %vm1165_vm2, %v2556_v34, %v2557_v35  ;;  %v3534_v57 = vld [vmem:[#allocation2 + $0xc] sm:$0xff] }
  0x57   : > { %v2345_v54 = vshrl.u32 %v3473_v30, 16  ;;  %v2349_v58 = vrot.slane %v2347_v41, 1  ;;  %v958_v2 = vrot.slane %v956_v47, 1  ;;  %v1722_v1 = vrot.slane %v3453_v50, 1  ;;  %v3900_v7 = vld [vmem:[#allocation2 + $0xa8] sm:$0xff] }
  0x58   : > { %v2317_v43 = vpack.c.b16 %v2301_v38, %v2301_v38  ;;  %v3151_v45 = vld [vmem:[#allocation2 + $0xb0] sm:$0x1]  ;;  %v2343_v56 = vsel %vm940_vm9, %v2338_v39, %v2342_v40  ;;  %v961_v3 = vshll.u32 %v925_v46, 16  ;;  %v1723_v6 = vrot.slane %v1482_v51, 1 }
  0x59   : > { %v1479_v52 = vunpack.c.l.b16 %v3151_v45  ;;  %v1513_v8 = vshll.u32 %v3892_v53, 16  ;;  %v1169_v10 = vrot.slane %v3885_v31, 1  ;;  %v1170_v11 = vrot.slane %v925_v46, 1 }
  0x5a   : > { %v2560_v55 = vrot.slane %v2317_v43, 1  ;;  %v2352_v59 = vshll.u32 %v2317_v43, 16  ;;  %v238_v12 = vpack.c.bf16 %v206_v61, %v206_v61  ;;  %v2350_v13 = vor.u32 %v2349_v58, %v2345_v54  ;;  %v3917_v34 = vld [vmem:[#allocation2 + $0xb4] sm:$0xff] }
  0x5b   : > { %v3902_v4 = vpack.c.b16 %v1479_v52, %v1479_v52  ;;  %v1483_v15 = vpack.c.b16 %v1467_v60, %v1467_v60  ;;  %v1501_v16 = vshll.u32 %v3453_v50, 16  ;;  %v959_v17 = vor.u32 %v958_v2, %v954_v63  ;;  %v3154_v25 = vld [vmem:[#allocation2 + $0xbc] sm:$0x1]  ;;  %v207_v63 = vld [vmem:[%s3694_s20 + $0x40] sm:$0xff] }
  0x5c   : > { %2604 = vrot.lane.b32.xlu1 %v2558_v49, %s3582_s16  ;;  %v2561_v62 = vsel %vm1165_vm2, %v2559_v44, %v2560_v55  ;;  %v2354_v14 = vrot.slane %v2352_v59, 1  ;;  %v963_v18 = vrot.slane %v961_v3, 1  ;;  %v1511_v19 = vshrl.u32 %v3892_v53, 16  ;;  %v673_v55 = vld [vmem:[#allocation2 + $0x38] sm:$0x1] }
  0x5d   : > { %2606 = vrot.lane.b32.xlu2 %v2561_v62, %s3582_s16  ;;  %v237_v20 = vpack.c.bf16 %v205_v9, %v205_v9  ;;  %v1724_v21 = vsel %vm1165_vm2, %v1722_v1, %v1723_v6  ;;  %v1761_v22 = vrot.slane %v3900_v7, 1  ;;  %v1762_v23 = vrot.slane %v3902_v4, 1  ;;  %v230_v62 = vld [vmem:[%s3694_s20 + $0xf8] sm:$0xff] }
  0x5e   : > { %2524 = vrot.lane.b32.xlu0 %v2343_v56, %s3583_s21  ;;  %v1515_v24 = vrot.slane %v1513_v8, 1  ;;  %v1171_v26 = vsel %vm1165_vm2, %v1169_v10, %v1170_v11  ;;  %v1499_v0 = vshrl.u32 %v3453_v50, 16  ;;  %v1503_v27 = vrot.slane %v1501_v16, 1  ;;  %v669_v50 = vld [vmem:[#allocation2 + $0x30] sm:$0xf]  ;;  %v208_v8 = vld [vmem:[%s3694_s20 + $0x48] sm:$0xff] }
  0x5f   : > { %v1506_v28 = vshll.u32 %v1482_v51, 16  ;;  %v2355_v29 = vsel %vm940_vm9, %v2350_v13, %v2354_v14  ;;  %v1518_v30 = vshll.u32 %v1483_v15, 16  ;;  %v382_v31 = vshrl.u32 %v238_v12, 16  ;;  %v229_v56 = vld [vmem:[%s3694_s20 + $0xf0] sm:$0xff]  ;;  %v3118_v11 = vld [vmem:[#allocation2 + $0x2c] sm:$0x1] }
  0x60   : > { %v964_v32 = vsel %vm940_vm9, %v959_v17, %v963_v18  ;;  %v1725_v33 = vrot.slane %v3892_v53, 1  ;;  %v1480_v35 = vunpack.c.l.b16 %v3154_v25  ;;  %v374_v36 = vshrl.u32 %v237_v20, 16  ;;  %v757_v25 = vld [vmem:[#allocation2 + $0xc8] sm:$0x1] }
  0x61   : > { %v1763_v37 = vsel %vm1165_vm2, %v1761_v22, %v1762_v23  ;;  %v1516_v38 = vor.u32 %v1515_v24, %v1511_v19  ;;  %v1726_v39 = vrot.slane %v1483_v15, 1  ;;  %v377_v40 = vshll.u32 %v237_v20, 16 }
  0x62   : > { %v1504_v41 = vor.u32 %v1503_v27, %v1499_v0  ;;  %v1508_v43 = vrot.slane %v1506_v28, 1  ;;  %v1657_v44 = vshll.u32 %v3900_v7, 16  ;;  %v376_v45 = vrot.slane %v374_v36, 7  ;;  %v772_v36 = vld [vmem:[#allocation2 + $0x20] sm:$0x1] }
  0x63   : > { %v1520_v46 = vrot.slane %v1518_v30, 1  ;;  %v1667_v47 = vshrl.u32 %v3917_v34, 16  ;;  %v384_v48 = vrot.slane %v382_v31, 7  ;;  %v385_v49 = vshll.u32 %v238_v12, 16  ;;  %v753_v31 = vld [vmem:[#allocation2 + $0xc0] sm:$0xf] }
  0x64   : > { %1770 = vrot.lane.b32.xlu1 %v1724_v21, %s3582_s16  ;;  %v3924_v51 = vpack.c.b16 %v1480_v35, %v1480_v35  ;;  %v1669_v52 = vshll.u32 %v3917_v34, 16  ;;  %v379_v53 = vor.u32 %v377_v40, %v376_v45  ;;  %v380_v54 = vrot.slane %v376_v45, 4  ;;  %v3949_v35 = vld [vmem:[#allocation2 + $0x24] sm:$0xff] }
  0x65   : > { %1216 = vrot.lane.b32.xlu2 %v1171_v26, %s3582_s16  ;;  %v3929_v58 = vsel %vm1165_vm2, %v1725_v33, %v1726_v39  ;;  %v1662_v59 = vshll.u32 %v3902_v4, 16  ;;  %v387_v60 = vor.u32 %v385_v49, %v384_v48  ;;  %v389_v61 = vrot.slane %v384_v48, 4 }
  0x66   : > { %2526 = vrot.lane.b32.xlu0 %v2355_v29, %s3583_s21  ;;  %v1509_v2 = vsel %vm940_vm9, %v1504_v41, %v1508_v43  ;;  %v1655_v3 = vshrl.u32 %v3900_v7, 16  ;;  %v1659_v1 = vrot.slane %v1657_v44, 1  ;;  %v670_v6 = vsel %vm3801_vm7, %v379_v53, %v669_v50  ;;  %v676_v50 = vld [vmem:[#allocation2 + $0x3c] sm:$0xf] }
  0x67   : > { %v1521_v9 = vsel %vm940_vm9, %v1516_v38, %v1520_v46  ;;  %v388_v10 = vsel %vm3772_vm5, %v380_v54, %v387_v60  ;;  %671 = vst [vmem:[#allocation2 + $0x30] sm:$0xf] %v670_v6  ;;  %v674_v4 = vsel %vm3817_vm8, %v389_v61, %v673_v55  ;;  %v261_v12 = vpack.c.bf16 %v229_v56, %v229_v56  ;;  %v3959_v54 = vld [vmem:[#allocation2 + $0x18] sm:$0xff] }
  0x68   : > { %v1671_v13 = vrot.slane %v1669_v52, 1  ;;  %v1674_v7 = vshll.u32 %v3924_v51, 16  ;;  %672 = vst.msk [vmem:[#allocation2 + $0x34] sm:$0xf] %vm263_vm0, %v388_v10  ;;  %v262_v14 = vpack.c.bf16 %v230_v62, %v230_v62  ;;  %v239_v15 = vpack.c.bf16 %v207_v63, %v207_v63  ;;  %v680_v52 = vld [vmem:[#allocation2 + $0x44] sm:$0x1] }
  0x69   : > { %v1664_v16 = vrot.slane %v1662_v59, 1  ;;  %675 = vst [vmem:[#allocation2 + $0x38] sm:$0x1] %v674_v4  ;;  %v578_v17 = vshrl.u32 %v261_v12, 16  ;;  %v581_v18 = vshll.u32 %v261_v12, 16  ;;  %v240_v19 = vpack.c.bf16 %v208_v8, %v208_v8 }
  0x6a   : > { %v1660_v20 = vor.u32 %v1659_v1, %v1655_v3  ;;  %v1468_v21 = vunpack.c.l.b16 %v3118_v11  ;;  %v586_v22 = vshrl.u32 %v262_v14, 16  ;;  %v589_v23 = vshll.u32 %v262_v14, 16  ;;  %v209_v3 = vld [vmem:[%s3694_s20 + $0x50] sm:$0xff] }
  0x6b   : > { %v580_v24 = vrot.slane %v578_v17, 7  ;;  %v391_v26 = vshrl.u32 %v239_v15, 16  ;;  %v394_v0 = vshll.u32 %v239_v15, 16  ;;  %v399_v27 = vshrl.u32 %v240_v19, 16 }
  0x6c   : > { %1796 = vrot.lane.b32.xlu1 %v1763_v37, %s3582_s16  ;;  %v1672_v28 = vor.u32 %v1671_v13, %v1667_v47  ;;  %v1676_v29 = vrot.slane %v1674_v7, 1  ;;  %v588_v30 = vrot.slane %v586_v22, 7  ;;  %v402_v33 = vshll.u32 %v240_v19, 16 }
  0x6d   : > { %1690 = vrot.lane.b32.xlu2 %v1509_v2, %s3583_s21  ;;  %v583_v37 = vor.u32 %v581_v18, %v580_v24  ;;  %v584_v38 = vrot.slane %v580_v24, 4  ;;  %v401_v39 = vrot.slane %v399_v27, 7  ;;  %v1665_v40 = vsel %vm940_vm9, %v1660_v20, %v1664_v16 }
  0x6e   : > { %1135 = vrot.lane.b32.xlu0 %v964_v32, %s3583_s21  ;;  %v393_v32 = vrot.slane %v391_v26, 7  ;;  %v3952_v41 = vpack.c.b16 %v1468_v21, %v1468_v21  ;;  %v591_v43 = vor.u32 %v589_v23, %v588_v30  ;;  %v593_v44 = vrot.slane %v588_v30, 4 }
  0x6f   : > { %v3954_v45 = vld [vmem:[#allocation2 + $0x30] sm:$0xff]  ;;  %v754_v46 = vsel %vm3801_vm7, %v583_v37, %v753_v31  ;;  %v404_v49 = vor.u32 %v402_v33, %v401_v39  ;;  %v910_v55 = vunpack.c.l.b16 %v772_v36  ;;  %v406_v60 = vrot.slane %v401_v39, 4 }
  0x70   : > { %v396_v47 = vor.u32 %v394_v0, %v393_v32  ;;  %v397_v48 = vrot.slane %v393_v32, 4  ;;  %v3292_v53 = vld [vmem:[#allocation2 + $0x38] sm:$0x1]  ;;  %v592_v56 = vsel %vm3772_vm5, %v584_v38, %v591_v43  ;;  %755 = vst [vmem:[#allocation2 + $0xc0] sm:$0xf] %v754_v46  ;;  %v758_v59 = vsel %vm3817_vm8, %v593_v44, %v757_v25 }
  0x71   : > { %v2302_v61 = vunpack.c.l.b16 %v3292_v53  ;;  %v1525_v62 = vshll.u32 %v3949_v35, 16  ;;  %756 = vst.msk [vmem:[#allocation2 + $0xc4] sm:$0xf] %vm263_vm0, %v592_v56  ;;  %v2357_v63 = vshrl.u32 %v3954_v45, 16  ;;  %v2359_v2 = vshll.u32 %v3954_v45, 16  ;;  %v210_v25 = vld [vmem:[%s3694_s20 + $0x58] sm:$0xff] }
  0x72   : > { %759 = vst [vmem:[#allocation2 + $0xc8] sm:$0x1] %v758_v59  ;;  %v405_v1 = vsel %vm3772_vm5, %v397_v48, %v404_v49  ;;  %v677_v6 = vsel %vm3801_vm7, %v396_v47, %v676_v50  ;;  %v681_v8 = vsel %vm3817_vm8, %v406_v60, %v680_v52  ;;  %v1764_v10 = vrot.slane %v3917_v34, 1  ;;  %v775_v48 = vld [vmem:[#allocation2 + $0x2c] sm:$0x1] }
  0x73   : > { %v1765_v4 = vrot.slane %v3924_v51, 1  ;;  %v2318_v11 = vpack.c.b16 %v2302_v61, %v2302_v61  ;;  %v2361_v12 = vrot.slane %v2359_v2, 1  ;;  %678 = vst [vmem:[#allocation2 + $0x3c] sm:$0xf] %v677_v6  ;;  %v1530_v13 = vshll.u32 %v3952_v41, 16  ;;  %v221_v61 = vld [vmem:[%s3694_s20 + $0xb0] sm:$0xff] }
  0x74   : > { %1692 = vrot.lane.b32.xlu1 %v1521_v9, %s3583_s21  ;;  %v968_v9 = vshll.u32 %v3959_v54, 16  ;;  %v926_v7 = vpack.c.b16 %v910_v55, %v910_v55  ;;  %679 = vst.msk [vmem:[#allocation2 + $0x40] sm:$0xf] %vm263_vm0, %v405_v1  ;;  %v241_v14 = vpack.c.bf16 %v209_v3, %v209_v3  ;;  %v1523_v15 = vshrl.u32 %v3949_v35, 16  ;;  %v683_v49 = vld [vmem:[#allocation2 + $0x48] sm:$0xf] }
  0x75   : > { %1716 = vrot.lane.b32.xlu2 %v1665_v40, %s3583_s21  ;;  %v1527_v16 = vrot.slane %v1525_v62, 1  ;;  %v2362_v17 = vor.u32 %v2361_v12, %v2357_v63  ;;  %v2364_v18 = vshll.u32 %v2318_v11, 16  ;;  %682 = vst [vmem:[#allocation2 + $0x44] sm:$0x1] %v681_v8  ;;  %v966_v34 = vshrl.u32 %v3959_v54, 16  ;;  %v222_v62 = vld [vmem:[%s3694_s20 + $0xb8] sm:$0xff] }
  0x76   : > { %1772 = vrot.lane.b32.xlu0 %v3929_v58, %s3582_s16  ;;  %v1677_v58 = vsel %vm940_vm9, %v1672_v28, %v1676_v29  ;;  %v970_v51 = vrot.slane %v968_v9, 1  ;;  %v973_v19 = vshll.u32 %v926_v7, 16  ;;  %v408_v20 = vshrl.u32 %v241_v14, 16 }
  0x77   : > { %v1766_v21 = vsel %vm1165_vm2, %v1764_v10, %v1765_v4  ;;  %v2366_v22 = vrot.slane %v2364_v18, 1  ;;  %v1532_v23 = vrot.slane %v1530_v13, 1  ;;  %v2562_v26 = vrot.slane %v3954_v45, 1  ;;  %v3121_v18 = vld [vmem:[#allocation2 + $0x38] sm:$0x1] }
  0x78   : > { %v3989_v24 = vld [vmem:[#allocation2 + $0xc0] sm:$0xff]  ;;  %v2563_v0 = vrot.slane %v2318_v11, 1  ;;  %v1528_v27 = vor.u32 %v1527_v16, %v1523_v15  ;;  %v971_v31 = vor.u32 %v970_v51, %v966_v34  ;;  %v975_v33 = vrot.slane %v973_v19, 1 }
  0x79   : > { %v3157_v28 = vld [vmem:[#allocation2 + $0xc8] sm:$0x1]  ;;  %v2367_v29 = vsel %vm940_vm9, %v2362_v17, %v2366_v22  ;;  %v410_v36 = vrot.slane %v408_v20, 7  ;;  %v1681_v37 = vshll.u32 %v3989_v24, 16  ;;  %v242_v38 = vpack.c.bf16 %v210_v25, %v210_v25 }
  0x7a   : > { %v1481_v30 = vunpack.c.l.b16 %v3157_v28  ;;  %v411_v32 = vshll.u32 %v241_v14, 16  ;;  %v1172_v39 = vrot.slane %v3959_v54, 1  ;;  %v1173_v40 = vrot.slane %v926_v7, 1  ;;  %v4020_v11 = vld [vmem:[#allocation2 + $0x24] sm:$0xff] }
  0x7b   : > { %v4000_v44 = vld [vmem:[#allocation2 + $0x3c] sm:$0xff]  ;;  %v2564_v46 = vsel %vm1165_vm2, %v2562_v26, %v2563_v0  ;;  %v1533_v50 = vsel %vm940_vm9, %v1528_v27, %v1532_v23  ;;  %v1679_v52 = vshrl.u32 %v3989_v24, 16  ;;  %v976_v53 = vsel %vm940_vm9, %v971_v31, %v975_v33  ;;  %v729_v31 = vld [vmem:[#allocation2 + $0x98] sm:$0x1]  ;;  %v4035_v33 = vld [vmem:[#allocation2 + $0x30] sm:$0xff] }
  0x7c   : > { %1718 = vrot.lane.b32.xlu1 %v1677_v58, %s3583_s21  ;;  %v3998_v43 = vpack.c.b16 %v1481_v30, %v1481_v30  ;;  %v3295_v45 = vld [vmem:[#allocation2 + $0x44] sm:$0x1]  ;;  %v413_v54 = vor.u32 %v411_v32, %v410_v36  ;;  %v1683_v55 = vrot.slane %v1681_v37, 1  ;;  %v416_v59 = vshrl.u32 %v242_v38, 16  ;;  %v687_v58 = vld [vmem:[#allocation2 + $0x50] sm:$0x1] }
  0x7d   : > { %2528 = vrot.lane.b32.xlu2 %v2367_v29, %s3583_s21  ;;  %v2303_v47 = vunpack.c.l.b16 %v3295_v45  ;;  %v419_v60 = vshll.u32 %v242_v38, 16  ;;  %v1174_v63 = vsel %vm1165_vm2, %v1172_v39, %v1173_v40  ;;  %v2371_v2 = vshll.u32 %v4000_v44, 16  ;;  %v725_v30 = vld [vmem:[#allocation2 + $0x90] sm:$0xf] }
  0x7e   : > { %1798 = vrot.lane.b32.xlu0 %v1766_v21, %s3582_s16  ;;  %v1686_v56 = vshll.u32 %v3998_v43, 16  ;;  %v911_v3 = vunpack.c.l.b16 %v775_v48  ;;  %v684_v1 = vsel %vm3801_vm7, %v413_v54, %v683_v49  ;;  %v1728_v8 = vrot.slane %v3949_v35, 1  ;;  %v4049_v49 = vld [vmem:[%s4932_s1 + $0x10] sm:$0xff] }
  0x7f   : > { %v4014_v6 = vpack.c.b16 %v2303_v47, %v2303_v47  ;;  %v414_v9 = vrot.slane %v410_v36, 4  ;;  %v418_v10 = vrot.slane %v416_v59, 7  ;;  %685 = vst [vmem:[#allocation2 + $0x48] sm:$0xf] %v684_v1  ;;  %v2369_v4 = vshrl.u32 %v4000_v44, 16  ;;  %2068 = vmatpush.bf16.msra.mxu1 %v4049_v49 }
  0x80   : > { %v1729_v12 = vrot.slane %v3952_v41, 1  ;;  %v253_v13 = vpack.c.bf16 %v221_v61, %v221_v61  ;;  %v254_v7 = vpack.c.bf16 %v222_v62, %v222_v62  ;;  %v1684_v14 = vor.u32 %v1683_v55, %v1679_v52 }
  0x81   : > { %v1688_v15 = vrot.slane %v1686_v56, 1  ;;  %v421_v16 = vor.u32 %v419_v60, %v418_v10  ;;  %v423_v35 = vrot.slane %v418_v10, 4  ;;  %v2373_v17 = vrot.slane %v2371_v2, 1 }
  0x82   : > { %v510_v34 = vshrl.u32 %v253_v13, 16  ;;  %v513_v51 = vshll.u32 %v253_v13, 16  ;;  %v518_v19 = vshrl.u32 %v254_v7, 16  ;;  %v2376_v20 = vshll.u32 %v4014_v6, 16 }
  0x83   : > { %v422_v21 = vsel %vm3772_vm5, %v414_v9, %v421_v16  ;;  %v688_v41 = vsel %vm3817_vm8, %v423_v35, %v687_v58  ;;  %v521_v22 = vshll.u32 %v254_v7, 16  ;;  %v980_v23 = vshll.u32 %v4020_v11, 16  ;;  %v4072_v7 = vld [vmem:[#allocation2 + $0x30] sm:$0xff] }
  0x84   : > { %2608 = vrot.lane.b32.xlu1 %v2564_v46, %s3582_s16  ;;  %686 = vst.msk [vmem:[#allocation2 + $0x4c] sm:$0xf] %vm263_vm0, %v422_v21  ;;  %v512_v25 = vrot.slane %v510_v34, 7  ;;  %v520_v26 = vrot.slane %v518_v19, 7  ;;  %v1689_v0 = vsel %vm940_vm9, %v1684_v14, %v1688_v15  ;;  %v4031_v27 = vpack.c.b16 %v911_v3, %v911_v3  ;;  %v212_v14 = vld [vmem:[%s3694_s20 + $0x68] sm:$0xff]  ;;  %v4093_v21 = vld [vmem:[%s4932_s1] sm:$0xff] }
  0x85   : > { %1137 = vrot.lane.b32.xlu2 %v976_v53, %s3583_s21  ;;  %v1730_v28 = vsel %vm1165_vm2, %v1728_v8, %v1729_v12  ;;  %v1469_v29 = vunpack.c.l.b16 %v3121_v18  ;;  %689 = vst [vmem:[#allocation2 + $0x50] sm:$0x1] %v688_v41  ;;  %v2374_v39 = vor.u32 %v2373_v17, %v2369_v4  ;;  %v2378_v40 = vrot.slane %v2376_v20, 1  ;;  %v778_v15 = vld [vmem:[#allocation2 + $0x38] sm:$0x1]  ;;  %v4081_v17 = vld [vmem:[%s4932_s1 + $0x8] sm:$0xff] }
  0x86   : > { %1694 = vrot.lane.b32.xlu0 %v1533_v50, %s3583_s21  ;;  %v515_v36 = vor.u32 %v513_v51, %v512_v25  ;;  %v516_v37 = vrot.slane %v512_v25, 4  ;;  %v523_v38 = vor.u32 %v521_v22, %v520_v26  ;;  %v525_v32 = vrot.slane %v520_v26, 4  ;;  %2069 = vmatpush.bf16.msra.mxu1 %v4081_v17 }
  0x87   : > { %v1537_v48 = vshll.u32 %v4035_v33, 16  ;;  %v2565_v50 = vrot.slane %v4000_v44, 1  ;;  %v2566_v52 = vrot.slane %v4014_v6, 1  ;;  %v1767_v53 = vrot.slane %v3989_v24, 1  ;;  %v211_v44 = vld [vmem:[%s3694_s20 + $0x60] sm:$0xff] }
  0x88   : > { %v524_v45 = vsel %vm3772_vm5, %v516_v37, %v523_v38  ;;  %v726_v46 = vsel %vm3801_vm7, %v515_v36, %v725_v30  ;;  %v730_v47 = vsel %vm3817_vm8, %v525_v32, %v729_v31  ;;  %v1768_v54 = vrot.slane %v3998_v43, 1  ;;  %v3124_v30 = vld [vmem:[#allocation2 + $0x44] sm:$0x1] }
  0x89   : > { %727 = vst [vmem:[#allocation2 + $0x90] sm:$0xf] %v726_v46  ;;  %v978_v55 = vshrl.u32 %v4020_v11, 16  ;;  %v982_v56 = vrot.slane %v980_v23, 1  ;;  %v985_v59 = vshll.u32 %v4031_v27, 16  ;;  %v1485_v60 = vpack.c.b16 %v1469_v29, %v1469_v29 }
  0x8a   : > { %728 = vst.msk [vmem:[#allocation2 + $0x94] sm:$0xf] %vm263_vm0, %v524_v45  ;;  %v2379_v61 = vsel %vm940_vm9, %v2374_v39, %v2378_v40  ;;  %v1535_v43 = vshrl.u32 %v4035_v33, 16  ;;  %v2567_v3 = vsel %vm1165_vm2, %v2565_v50, %v2566_v52  ;;  %v1175_v1 = vrot.slane %v4020_v11, 1  ;;  %2070 = vmatpush.bf16.msra.mxu1 %v4093_v21  ;;  %v1134_v50 = vpop.permute.xlu2 %1133 }
  0x8b   : > { %731 = vst [vmem:[#allocation2 + $0x98] sm:$0x1] %v730_v47  ;;  %v4061_v62 = vld [vmem:[#allocation2 + $0x48] sm:$0xff]  ;;  %v1542_v2 = vshll.u32 %v1485_v60, 16  ;;  %v1769_v8 = vsel %vm1165_vm2, %v1767_v53, %v1768_v54  ;;  %v983_v9 = vor.u32 %v982_v56, %v978_v55  ;;  %v987_v10 = vrot.slane %v985_v59, 1  ;;  %v3528_v53 = vld [vmem:[#allocation2] sm:$0xff] }
  0x8c   : > { %1218 = vrot.lane.b32.xlu1 %v1174_v63, %s3582_s16  ;;  %v3298_v24 = vld [vmem:[#allocation2 + $0x50] sm:$0x1]  ;;  %v1539_v63 = vrot.slane %v1537_v48, 1  ;;  %v1176_v4 = vrot.slane %v4031_v27, 1  ;;  %v4069_v12 = vpack.c.bf16 %v211_v44, %v211_v44  ;;  %v1731_v58 = vrot.slane %v4035_v33, 1  ;;  %v3471_v55 = vld [vmem:[%s4932_s1 + $0x28] sm:$0xff] }
  0x8d   : > { %1774 = vrot.lane.b32.xlu2 %v1730_v28, %s3582_s16  ;;  %v2304_v6 = vunpack.c.l.b16 %v3298_v24  ;;  %v1732_v13 = vrot.slane %v1485_v60, 1  ;;  %v2383_v11 = vshll.u32 %v4061_v62, 16  ;;  %v1544_v35 = vrot.slane %v1542_v2, 1  ;;  %v213_v59 = vld [vmem:[%s3694_s20 + $0x70] sm:$0xff]  ;;  %3491 = vmatpush.bf16.msra.mxu3 %v3471_v55 }
  0x8e   : > { %1720 = vrot.lane.b32.xlu0 %v1689_v0, %s3583_s21  ;;  %v1540_v16 = vor.u32 %v1539_v63, %v1535_v43  ;;  %v988_v34 = vsel %vm940_vm9, %v983_v9, %v987_v10  ;;  %v1177_v51 = vsel %vm1165_vm2, %v1175_v1, %v1176_v4  ;;  %v244_v41 = vpack.c.bf16 %v212_v14, %v212_v14  ;;  %v690_v63 = vld [vmem:[#allocation2 + $0x54] sm:$0xf] }
  0x8f   : > { %v4083_v18 = vpack.c.b16 %v2304_v6, %v2304_v6  ;;  %v425_v22 = vshrl.u32 %v4069_v12, 16  ;;  %v1733_v23 = vsel %vm1165_vm2, %v1731_v58, %v1732_v13  ;;  %v912_v26 = vunpack.c.l.b16 %v778_v15  ;;  %1929 = vmatpush.bf16.msra.mxu0 %v3471_v55  ;;  %v214_v58 = vld [vmem:[%s3694_s20 + $0x78] sm:$0xff] }
  0x90   : > { %v992_v0 = vshll.u32 %v4072_v7, 16  ;;  %v2381_v27 = vshrl.u32 %v4061_v62, 16  ;;  %v2385_v28 = vrot.slane %v2383_v11, 1  ;;  %v1545_v29 = vsel %vm940_vm9, %v1540_v16, %v1544_v35  ;;  %v1215_v32 = vpop.permute.xlu0 %1214 }
  0x91   : > { %v4087_v19 = vld [vmem:[#allocation2 + $0x90] sm:$0xff]  ;;  %v2388_v33 = vshll.u32 %v4083_v18, 16  ;;  %v427_v39 = vrot.slane %v425_v22, 7  ;;  %v428_v40 = vshll.u32 %v4069_v12, 16  ;;  %v433_v45 = vshrl.u32 %v244_v41, 16 }
  0x92   : > { %v802_v20 = vld [vmem:[#allocation2 + $0x98] sm:$0x1]  ;;  %v1088_v31 = vshll.u32 %v4087_v19, 16  ;;  %v1086_v37 = vshrl.u32 %v4087_v19, 16  ;;  %v4108_v46 = vpack.c.b16 %v912_v26, %v912_v26  ;;  %v1470_v47 = vunpack.c.l.b16 %v3124_v30  ;;  %v694_v12 = vld [vmem:[#allocation2 + $0x5c] sm:$0x1] }
  0x93   : > { %v920_v25 = vunpack.c.l.b16 %v802_v20  ;;  %v2386_v52 = vor.u32 %v2385_v28, %v2381_v27  ;;  %v1248_v54 = vsel %vm1246_vm10, %v3528_v53, %v1134_v50  ;;  %v436_v56 = vshll.u32 %v244_v41, 16  ;;  %v805_v28 = vld [vmem:[#allocation2 + $0xa4] sm:$0x1]  ;;  %v3469_v30 = vld [vmem:[%s4932_s1 + $0x18] sm:$0xff] }
  0x94   : > { %2530 = vrot.lane.b32.xlu1 %v2379_v61, %s3583_s21  ;;  %v1090_v38 = vrot.slane %v1088_v31, 1  ;;  %v2390_v60 = vrot.slane %v2388_v33, 1  ;;  %v4118_v61 = vld [vmem:[#allocation2 + $0x3c] sm:$0xff]  ;;  %v1281_v43 = vsel %vm1279_vm11, %v1248_v54, %v1215_v32  ;;  %v990_v2 = vshrl.u32 %v4072_v7, 16 }
  0x95   : > { %1800 = vrot.lane.b32.xlu2 %v1769_v8, %s3582_s16  ;;  %v4102_v36 = vpack.c.b16 %v920_v25, %v920_v25  ;;  %3268 = vmatmul.msk.bf16.vlgmr.msra.gmra.mxu1 %vm1891_vm12, %v1281_v43  ;;  %v430_v1 = vor.u32 %v428_v40, %v427_v39  ;;  %v431_v6 = vrot.slane %v427_v39, 4  ;;  %v435_v8 = vrot.slane %v433_v45, 7  ;;  %v697_v32 = vld [vmem:[#allocation2 + $0x60] sm:$0xf] }
  0x96   : > { %2610 = vrot.lane.b32.xlu0 %v2567_v3, %s3582_s16  ;;  %v1091_v44 = vor.u32 %v1090_v38, %v1086_v37  ;;  %v3470_v3 = vld [vmem:[%s4932_s1 + $0x20] sm:$0xff]  ;;  %v994_v9 = vrot.slane %v992_v0, 1  ;;  %v997_v10 = vshll.u32 %v4108_v46, 16  ;;  %v1547_v4 = vshrl.u32 %v4118_v61, 16 }
  0x97   : > { %v1093_v48 = vshll.u32 %v4102_v36, 16  ;;  %v245_v13 = vpack.c.bf16 %v213_v59, %v213_v59  ;;  %v4129_v14 = vpack.c.b16 %v1470_v47, %v1470_v47  ;;  %v438_v11 = vor.u32 %v436_v56, %v435_v8  ;;  %3492 = vmatpush.bf16.msra.mxu3 %v3470_v3  ;;  %1930 = vmatpush.bf16.msra.mxu0 %v3470_v3  ;;  %v4157_v39 = vld [vmem:[#allocation2 + $0x9c] sm:$0xff] }
  0x98   : > { %v440_v15 = vrot.slane %v435_v8, 4  ;;  %v691_v16 = vsel %vm3801_vm7, %v430_v1, %v690_v63  ;;  %v2391_v35 = vsel %vm940_vm9, %v2386_v52, %v2390_v60  ;;  %v246_v25 = vpack.c.bf16 %v214_v58, %v214_v58  ;;  %v701_v63 = vld [vmem:[#allocation2 + $0x68] sm:$0x1] }
  0x99   : > { %v1095_v24 = vrot.slane %v1093_v48, 1  ;;  %692 = vst [vmem:[#allocation2 + $0x54] sm:$0xf] %v691_v16  ;;  %v442_v20 = vshrl.u32 %v245_v13, 16  ;;  %v439_v41 = vsel %vm3772_vm5, %v431_v6, %v438_v11  ;;  %v445_v26 = vshll.u32 %v245_v13, 16 }
  0x9a   : > { %v695_v22 = vsel %vm3817_vm8, %v440_v15, %v694_v12  ;;  %v1202_v0 = vrot.slane %v4087_v19, 1  ;;  %v1203_v27 = vrot.slane %v4102_v36, 1  ;;  %693 = vst.msk [vmem:[#allocation2 + $0x58] sm:$0xf] %vm263_vm0, %v439_v41  ;;  %v4152_v19 = vld [vmem:[%s4932_s1 + $0x40] sm:$0xff]  ;;  %v1554_v36 = vshll.u32 %v4129_v14, 16 }
  0x9b   : > { %696 = vst [vmem:[#allocation2 + $0x5c] sm:$0x1] %v695_v22  ;;  %v444_v31 = vrot.slane %v442_v20, 7  ;;  %v2568_v37 = vrot.slane %v4061_v62, 1  ;;  %v2569_v38 = vrot.slane %v4083_v18, 1  ;;  %v921_v40 = vunpack.c.l.b16 %v805_v28  ;;  %3493 = vmatpush.bf16.msra.mxu3 %v3469_v30  ;;  %2762 = vmatpush.bf16.msra.mxu2 %v4152_v19  ;;  %v4166_v62 = vld [vmem:[%s4932_s1 + $0x38] sm:$0xff] }
  0x9c   : > { %1139 = vrot.lane.b32.xlu1 %v988_v34, %s3583_s21  ;;  %v1549_v34 = vshll.u32 %v4118_v61, 16  ;;  %v450_v47 = vshrl.u32 %v246_v25, 16  ;;  %v1204_v48 = vsel %vm1165_vm2, %v1202_v0, %v1203_v27  ;;  %1931 = vmatpush.bf16.msra.mxu0 %v3469_v30  ;;  %v453_v52 = vshll.u32 %v246_v25, 16  ;;  %v3127_v13 = vld [vmem:[#allocation2 + $0x50] sm:$0x1] }
  0x9d   : > { %1696 = vrot.lane.b32.xlu2 %v1545_v29, %s3583_s21  ;;  %v999_v29 = vrot.slane %v997_v10, 1  ;;  %v447_v45 = vor.u32 %v445_v26, %v444_v31  ;;  %v1556_v55 = vrot.slane %v1554_v36, 1  ;;  %v2570_v56 = vsel %vm1165_vm2, %v2568_v37, %v2569_v38  ;;  %v781_v27 = vld [vmem:[#allocation2 + $0x44] sm:$0x1]  ;;  %v704_v37 = vld [vmem:[#allocation2 + $0x6c] sm:$0xf] }
  0x9e   : > { %1220 = vrot.lane.b32.xlu0 %v1177_v51, %s3582_s16  ;;  %v1096_v51 = vsel %vm940_vm9, %v1091_v44, %v1095_v24  ;;  %v1551_v33 = vrot.slane %v1549_v34, 1  ;;  %v452_v18 = vrot.slane %v450_v47, 7  ;;  %v448_v59 = vrot.slane %v444_v31, 4 }
  0x9f   : > { %3494 = vmatpush.bf16.msrb.mxu3 %v4049_v49  ;;  %v698_v53 = vsel %vm3801_vm7, %v447_v45, %v697_v32  ;;  %v216_v49 = vld [vmem:[%s3694_s20 + $0x88] sm:$0xff]  ;;  %v4173_v60 = vpack.c.b16 %v921_v40, %v921_v40  ;;  %v1100_v44 = vshll.u32 %v4157_v39, 16  ;;  %2763 = vmatpush.bf16.msra.mxu2 %v4166_v62  ;;  %v1734_v3 = vrot.slane %v4118_v61, 1  ;;  %v4190_v61 = vld [vmem:[%s4932_s1 + $0x30] sm:$0xff]  ;;  %v4215_v40 = vld [vmem:[#allocation2 + $0x3c] sm:$0xff] }
  0xa0   : > { %v1552_v54 = vor.u32 %v1551_v33, %v1547_v4  ;;  %699 = vst [vmem:[#allocation2 + $0x60] sm:$0xf] %v698_v53  ;;  %v455_v24 = vor.u32 %v453_v52, %v452_v18  ;;  %v457_v43 = vrot.slane %v452_v18, 4  ;;  %v1735_v10 = vrot.slane %v4129_v14, 1 }
  0xa1   : > { %v4179_v1 = vld [vmem:[#allocation2 + $0x54] sm:$0xff]  ;;  %v1178_v12 = vrot.slane %v4072_v7, 1  ;;  %v1179_v58 = vrot.slane %v4108_v46, 1  ;;  %v1098_v7 = vshrl.u32 %v4157_v39, 16  ;;  %v1102_v46 = vrot.slane %v1100_v44, 1 }
  0xa2   : > { %v3301_v6 = vld [vmem:[#allocation2 + $0x5c] sm:$0x1]  ;;  %v2395_v11 = vshll.u32 %v4179_v1, 16  ;;  %v702_v14 = vsel %vm3817_vm8, %v457_v43, %v701_v63  ;;  %v1557_v16 = vsel %vm940_vm9, %v1552_v54, %v1556_v55  ;;  %v1736_v25 = vsel %vm1165_vm2, %v1734_v3, %v1735_v10 }
  0xa3   : > { %3495 = vmatpush.bf16.msrb.mxu3 %v4081_v17  ;;  %v2305_v4 = vunpack.c.l.b16 %v3301_v6  ;;  %v456_v17 = vsel %vm3772_vm5, %v448_v59, %v455_v24  ;;  %2764 = vmatpush.bf16.msra.mxu2 %v4190_v61  ;;  %703 = vst [vmem:[#allocation2 + $0x68] sm:$0x1] %v702_v14  ;;  %v1471_v26 = vunpack.c.l.b16 %v3127_v13  ;;  %v1180_v0 = vsel %vm1165_vm2, %v1178_v12, %v1179_v58 }
  0xa4   : > { %1776 = vrot.lane.b32.xlu1 %v1733_v23, %s3582_s16  ;;  %v995_v23 = vor.u32 %v994_v9, %v990_v2  ;;  %v215_v2 = vld [vmem:[%s3694_s20 + $0x80] sm:$0xff]  ;;  %v248_v9 = vpack.c.bf16 %v216_v49, %v216_v49  ;;  %700 = vst.msk [vmem:[#allocation2 + $0x64] sm:$0xf] %vm263_vm0, %v456_v17  ;;  %v2393_v28 = vshrl.u32 %v4179_v1, 16  ;;  %v1103_v31 = vor.u32 %v1102_v46, %v1098_v7 }
  0xa5   : > { %1157 = vrot.lane.b32.xlu2 %v1096_v51, %s3583_s21  ;;  %v247_v8 = vpack.c.bf16 %v215_v2, %v215_v2  ;;  %v4202_v34 = vpack.c.b16 %v2305_v4, %v2305_v4  ;;  %v4204_v51 = vld [vmem:[#allocation2 + $0x48] sm:$0xff]  ;;  %v1205_v33 = vrot.slane %v4157_v39, 1  ;;  %v1206_v36 = vrot.slane %v4173_v60, 1 }
  0xa6   : > { %2532 = vrot.lane.b32.xlu0 %v2391_v35, %s3583_s21  ;;  %v1000_v50 = vsel %vm940_vm9, %v995_v23, %v999_v29  ;;  %v1105_v35 = vshll.u32 %v4173_v60, 16  ;;  %v467_v22 = vshrl.u32 %v248_v9, 16  ;;  %v2397_v23 = vrot.slane %v2395_v11, 1 }
  0xa7   : > { %v459_v15 = vshrl.u32 %v247_v8, 16  ;;  %v462_v41 = vshll.u32 %v247_v8, 16  ;;  %3496 = vmatpush.bf16.msrb.mxu3 %v4093_v21  ;;  %v2400_v29 = vshll.u32 %v4202_v34, 16  ;;  %v470_v21 = vshll.u32 %v248_v9, 16  ;;  %v4234_v9 = vld [vmem:[#allocation2 + $0xa8] sm:$0xff] }
  0xa8   : > { %v1107_v38 = vrot.slane %v1105_v35, 1  ;;  %v1561_v32 = vshll.u32 %v4204_v51, 16  ;;  %v913_v45 = vunpack.c.l.b16 %v781_v27  ;;  %v469_v47 = vrot.slane %v467_v22, 7 }
  0xa9   : > { %v461_v20 = vrot.slane %v459_v15, 7  ;;  %v2398_v53 = vor.u32 %v2397_v23, %v2393_v28  ;;  %v2402_v54 = vrot.slane %v2400_v29, 1  ;;  %v1004_v55 = vshll.u32 %v4215_v40, 16  ;;  %v217_v23 = vld [vmem:[%s3694_s20 + $0x90] sm:$0xff] }
  0xaa   : > { %v1207_v59 = vsel %vm1165_vm2, %v1205_v33, %v1206_v36  ;;  %v472_v49 = vor.u32 %v470_v21, %v469_v47  ;;  %v474_v60 = vrot.slane %v469_v47, 4  ;;  %v1108_v44 = vsel %vm940_vm9, %v1103_v31, %v1107_v38  ;;  %v3304_v17 = vld [vmem:[#allocation2 + $0x68] sm:$0x1]  ;;  %v218_v36 = vld [vmem:[%s3694_s20 + $0x98] sm:$0xff] }
  0xab   : > { %v464_v30 = vor.u32 %v462_v41, %v461_v20  ;;  %v465_v18 = vrot.slane %v461_v20, 4  ;;  %v1559_v24 = vshrl.u32 %v4204_v51, 16  ;;  %v1563_v43 = vrot.slane %v1561_v32, 1  ;;  %v4249_v41 = vld [vmem:[#allocation2 + $0x60] sm:$0xff] }
  0xac   : > { %1238 = vrot.lane.b32.xlu1 %v1204_v48, %s3582_s16  ;;  %v4218_v48 = vpack.c.b16 %v1471_v26, %v1471_v26  ;;  %v929_v63 = vpack.c.b16 %v913_v45, %v913_v45  ;;  %v2403_v10 = vsel %vm940_vm9, %v2398_v53, %v2402_v54  ;;  %v1002_v4 = vshrl.u32 %v4215_v40, 16 }
  0xad   : > { %2612 = vrot.lane.b32.xlu2 %v2570_v56, %s3582_s16  ;;  %v705_v39 = vsel %vm3801_vm7, %v464_v30, %v704_v37  ;;  %v708_v56 = vld [vmem:[#allocation2 + $0x74] sm:$0x1]  ;;  %v473_v6 = vsel %vm3772_vm5, %v465_v18, %v472_v49  ;;  %v1006_v12 = vrot.slane %v1004_v55, 1  ;;  %v2571_v13 = vrot.slane %v4179_v1, 1 }
  0xae   : > { %1141 = vrot.lane.b32.xlu0 %v1000_v50, %s3583_s21  ;;  %v808_v50 = vld [vmem:[#allocation2 + $0xb0] sm:$0x1]  ;;  %706 = vst [vmem:[#allocation2 + $0x6c] sm:$0xf] %v705_v39  ;;  %v1566_v2 = vshll.u32 %v4218_v48, 16  ;;  %v709_v8 = vsel %vm3817_vm8, %v474_v60, %v708_v56  ;;  %v1009_v58 = vshll.u32 %v929_v63, 16  ;;  %v1564_v14 = vor.u32 %v1563_v43, %v1559_v24 }
  0xaf   : > { %v922_v3 = vunpack.c.l.b16 %v808_v50  ;;  %707 = vst.msk [vmem:[#allocation2 + $0x70] sm:$0xf] %vm263_vm0, %v473_v6  ;;  %v2572_v11 = vrot.slane %v4202_v34, 1  ;;  %v1112_v35 = vshll.u32 %v4234_v9, 16  ;;  %v1007_v20 = vor.u32 %v1006_v12, %v1002_v4  ;;  %v3529_v24 = vld [vmem:[#allocation2 + $0x9c] sm:$0xff] }
  0xb0   : > { %710 = vst [vmem:[#allocation2 + $0x74] sm:$0x1] %v709_v8  ;;  %v1568_v15 = vrot.slane %v1566_v2, 1  ;;  %v1011_v1 = vrot.slane %v1009_v58, 1  ;;  %v2306_v34 = vunpack.c.l.b16 %v3304_v17  ;;  %v1181_v27 = vrot.slane %v4215_v40, 1  ;;  %v4288_v58 = vld [vmem:[#allocation2 + $0x54] sm:$0xff] }
  0xb1   : > { %v4246_v46 = vpack.c.b16 %v922_v3, %v922_v3  ;;  %v2573_v22 = vsel %vm1165_vm2, %v2571_v13, %v2572_v11  ;;  %v1182_v28 = vrot.slane %v929_v63, 1  ;;  %v1110_v29 = vshrl.u32 %v4234_v9, 16  ;;  %v3130_v3 = vld [vmem:[#allocation2 + $0x5c] sm:$0x1] }
  0xb2   : > { %v1114_v30 = vrot.slane %v1112_v35, 1  ;;  %v1012_v33 = vsel %vm940_vm9, %v1007_v20, %v1011_v1  ;;  %v4262_v21 = vpack.c.b16 %v2306_v34, %v2306_v34  ;;  %v2407_v37 = vshll.u32 %v4249_v41, 16 }
  0xb3   : > { %v1117_v31 = vshll.u32 %v4246_v46, 16  ;;  %v249_v40 = vpack.c.bf16 %v217_v23, %v217_v23  ;;  %v1183_v47 = vsel %vm1165_vm2, %v1181_v27, %v1182_v28  ;;  %v4271_v50 = vpack.c.bf16 %v218_v36, %v218_v36  ;;  %v3530_v36 = vld [vmem:[#allocation2 + $0x18] sm:$0xff] }
  0xb4   : > { %1698 = vrot.lane.b32.xlu1 %v1557_v16, %s3583_s21  ;;  %v784_v16 = vld [vmem:[#allocation2 + $0x50] sm:$0x1]  ;;  %v1115_v18 = vor.u32 %v1114_v30, %v1110_v29  ;;  %v1737_v54 = vrot.slane %v4204_v51, 1  ;;  %v1738_v55 = vrot.slane %v4218_v48, 1  ;;  %v2409_v49 = vrot.slane %v2407_v37, 1 }
  0xb5   : > { %1222 = vrot.lane.b32.xlu2 %v1180_v0, %s3582_s16  ;;  %v914_v26 = vunpack.c.l.b16 %v784_v16  ;;  %v1569_v0 = vsel %vm940_vm9, %v1564_v14, %v1568_v15  ;;  %v1119_v39 = vrot.slane %v1117_v31, 1  ;;  %v2412_v60 = vshll.u32 %v4262_v21, 16 }
  0xb6   : > { %1778 = vrot.lane.b32.xlu0 %v1736_v25, %s3582_s16  ;;  %v4252_v25 = vld [vmem:[#allocation2 + $0x48] sm:$0xff]  ;;  %v476_v6 = vshrl.u32 %v249_v40, 16  ;;  %v484_v48 = vshrl.u32 %v4271_v50, 16  ;;  %v1472_v13 = vunpack.c.l.b16 %v3130_v3  ;;  %v2574_v11 = vrot.slane %v4249_v41, 1  ;;  %v787_v3 = vld [vmem:[#allocation2 + $0x5c] sm:$0x1] }
  0xb7   : > { %v4223_v52 = vpop.permute.xlu2 %2606  ;;  %v4265_v38 = vpack.c.b16 %v914_v26, %v914_v26  ;;  %v1016_v32 = vshll.u32 %v4252_v25, 16  ;;  %v1120_v8 = vsel %vm940_vm9, %v1115_v18, %v1119_v39  ;;  %v2414_v12 = vrot.slane %v2412_v60, 1  ;;  %v3307_v15 = vld [vmem:[#allocation2 + $0x74] sm:$0x1]  ;;  %v4305_v29 = vld [vmem:[#allocation2 + $0x6c] sm:$0xff] }
  0xb8   : > { %v478_v16 = vrot.slane %v476_v6, 7  ;;  %v1184_v20 = vrot.slane %v4252_v25, 1  ;;  %v1573_v1 = vshll.u32 %v4288_v58, 16  ;;  %v479_v34 = vshll.u32 %v249_v40, 16  ;;  %v811_v40 = vld [vmem:[#allocation2 + $0xbc] sm:$0x1] }
  0xb9   : > { %v1018_v63 = vrot.slane %v1016_v32, 1  ;;  %v1021_v2 = vshll.u32 %v4265_v38, 16  ;;  %v2575_v26 = vrot.slane %v4262_v21, 1  ;;  %v2307_v30 = vunpack.c.l.b16 %v3307_v15 }
  0xba   : > { %v481_v31 = vor.u32 %v479_v34, %v478_v16  ;;  %v482_v21 = vrot.slane %v478_v16, 4  ;;  %v915_v16 = vunpack.c.l.b16 %v787_v3 }
  0xbb   : > { %v1023_v14 = vrot.slane %v1021_v2, 1  ;;  %v923_v2 = vunpack.c.l.b16 %v811_v40  ;;  %v3133_v40 = vld [vmem:[#allocation2 + $0x68] sm:$0x1] }
  0xbc   : > { %1159 = vrot.lane.b32.xlu1 %v1108_v44, %s3583_s21  ;;  %v1014_v44 = vshrl.u32 %v4252_v25, 16  ;;  %v4303_v25 = vpack.c.b16 %v1472_v13, %v1472_v13  ;;  %v1473_v42 = vunpack.c.l.b16 %v3133_v40 }
  0xbd   : > { %2534 = vrot.lane.b32.xlu2 %v2403_v10, %s3583_s21  ;;  %v1739_v10 = vsel %vm1165_vm2, %v1737_v54, %v1738_v55  ;;  %v220_v55 = vld [vmem:[%s3694_s20 + $0xa8] sm:$0xff]  ;;  %v4345_v34 = vpack.c.b16 %v923_v2, %v923_v2 }
  0xbe   : > { %1240 = vrot.lane.b32.xlu0 %v1207_v59, %s3582_s16  ;;  %v2405_v59 = vshrl.u32 %v4249_v41, 16  ;;  %v1019_v17 = vor.u32 %v1018_v63, %v1014_v44  ;;  %v1208_v41 = vrot.slane %v4234_v9, 1  ;;  %v1578_v18 = vshll.u32 %v4303_v25, 16  ;;  %v4329_v63 = vld [vmem:[#allocation2 + $0xb4] sm:$0xff] }
  0xbf   : > { %v4244_v7 = vpop.permute.xlu2 %1216  ;;  %v1124_v13 = vshll.u32 %v4329_v63, 16 }
  0xc0   : > { %v2410_v4 = vor.u32 %v2409_v49, %v2405_v59  ;;  %v1024_v39 = vsel %vm940_vm9, %v1019_v17, %v1023_v14  ;;  %v2419_v49 = vshll.u32 %v4305_v29, 16 }
  0xc2   : > { %v2415_v28 = vsel %vm940_vm9, %v2410_v4, %v2414_v12  ;;  %v2421_v14 = vrot.slane %v2419_v49, 1  ;;  %v4371_v49 = vld [vmem:[#allocation2 + $0x60] sm:$0xff] }
  0xc3   : > { %v1743_v40 = vrot.slane %v4371_v49, 1 }
  0xc4   : > { %2614 = vrot.lane.b32.xlu1 %v2573_v22, %s3582_s16  ;;  %v486_v22 = vrot.slane %v484_v48, 7 }
  0xc5   : > { %1143 = vrot.lane.b32.xlu2 %v1012_v33, %s3583_s21  ;;  %v715_v33 = vld [vmem:[#allocation2 + $0x80] sm:$0x1] }
  0xc6   : > { %v1795_v45 = vpop.permute.xlu1 %1794  ;;  %1700 = vrot.lane.b32.xlu0 %v1569_v0, %s3583_s21  ;;  %v1209_v0 = vrot.slane %v4246_v46, 1  ;;  %v487_v46 = vshll.u32 %v4271_v50, 16  ;;  %v491_v37 = vrot.slane %v486_v22, 4 }
  0xc7   : > { %v4273_v53 = vpop.permute.xlu2 %1690 }
  0xc8   : > { %v1715_v56 = vpop.permute.xlu0 %1714  ;;  %v1210_v54 = vsel %vm1165_vm2, %v1208_v41, %v1209_v0  ;;  %v489_v50 = vor.u32 %v487_v46, %v486_v22  ;;  %v716_v44 = vsel %vm3817_vm8, %v491_v37, %v715_v33  ;;  %v4347_v22 = vld [vmem:[#allocation2 + $0x54] sm:$0xff]  ;;  %v1122_v41 = vshrl.u32 %v4329_v63, 16 }
  0xc9   : > { %v1827_v43 = vsel %vm1246_vm10, %v3529_v24, %v1715_v56  ;;  %v3531_v56 = vld [vmem:[#allocation2 + $0xc] sm:$0xff]  ;;  %v219_v24 = vld [vmem:[%s3694_s20 + $0xa0] sm:$0xff]  ;;  %717 = vst [vmem:[#allocation2 + $0x80] sm:$0x1] %v716_v44  ;;  %v1741_v37 = vrot.slane %v4303_v25, 1 }
  0xca   : > { %v1859_v51 = vsel %vm1279_vm11, %v1827_v43, %v1795_v45  ;;  %v1571_v45 = vshrl.u32 %v4288_v58, 16  ;;  %v1803_v59 = vsel %vm1246_vm10, %v3531_v56, %v4273_v53  ;;  %v4327_v43 = vpack.c.b16 %v2307_v30, %v2307_v30  ;;  %v3533_v25 = vld [vmem:[#allocation2 + $0x24] sm:$0xff] }
  0xcb   : > { %3252 = vmatmul.msk.bf16.vlgmr.msra.gmra.mxu3 %vm1891_vm12, %v1859_v51  ;;  %v490_v6 = vsel %vm3772_vm5, %v482_v21, %v489_v50  ;;  %v251_v53 = vpack.c.bf16 %v219_v24, %v219_v24  ;;  %v1129_v30 = vshll.u32 %v4345_v34, 16  ;;  %v1740_v21 = vrot.slane %v4288_v58, 1 }
  0xcc   : > { %1224 = vrot.lane.b32.xlu1 %v1183_v47, %s3582_s16  ;;  %3497 = vmatpush.bf16.msra.mxu3 %v4152_v19  ;;  %v1185_v19 = vrot.slane %v4265_v38, 1  ;;  %v711_v38 = vld [vmem:[#allocation2 + $0x78] sm:$0xf]  ;;  %v1575_v47 = vrot.slane %v1573_v1, 1  ;;  %714 = vst.msk [vmem:[#allocation2 + $0x7c] sm:$0xf] %vm263_vm0, %v490_v6 }
  0xcd   : > { %1780 = vrot.lane.b32.xlu2 %v1739_v10, %s3582_s16  ;;  %v712_v60 = vsel %vm3801_vm7, %v481_v31, %v711_v38  ;;  %v252_v10 = vpack.c.bf16 %v220_v55, %v220_v55  ;;  %v2424_v1 = vshll.u32 %v4327_v43, 16  ;;  %v4357_v38 = vpack.c.b16 %v915_v16, %v915_v16 }
  0xce   : > { %v2605_v35 = vpop.permute.xlu1 %2604  ;;  %1161 = vrot.lane.b32.xlu0 %v1120_v8, %s3583_s21  ;;  %713 = vst [vmem:[#allocation2 + $0x78] sm:$0xf] %v712_v60  ;;  %v1576_v48 = vor.u32 %v1575_v47, %v1571_v45  ;;  %v1580_v8 = vrot.slane %v1578_v18, 1  ;;  %v1186_v12 = vsel %vm1165_vm2, %v1184_v20, %v1185_v19  ;;  %v718_v45 = vld [vmem:[#allocation2 + $0x84] sm:$0xf]  ;;  %v1131_v55 = vrot.slane %v1129_v30, 1 }
  0xcf   : > { %v4301_v23 = vpop.permute.xlu2 %1716  ;;  %v1742_v44 = vsel %vm1165_vm2, %v1740_v21, %v1741_v37  ;;  %v1026_v24 = vshrl.u32 %v4347_v22, 16 }
  0xd0   : > { %v2525_v27 = vpop.permute.xlu0 %2524  ;;  %3498 = vmatpush.bf16.msra.mxu3 %v4166_v62  ;;  %v2576_v62 = vsel %vm1165_vm2, %v2574_v11, %v2575_v26  ;;  %v493_v11 = vshrl.u32 %v251_v53, 16  ;;  %v496_v26 = vshll.u32 %v251_v53, 16  ;;  %v1581_v19 = vsel %vm940_vm9, %v1576_v48, %v1580_v8 }
  0xd1   : > { %v2637_v9 = vsel %vm1246_vm10, %v3530_v36, %v2525_v27  ;;  %v504_v27 = vshll.u32 %v252_v10, 16  ;;  %v3532_v36 = vld [vmem:[#allocation2 + $0xa8] sm:$0xff]  ;;  %v1033_v48 = vshll.u32 %v4357_v38, 16 }
  0xd2   : > { %v2669_v32 = vsel %vm1279_vm11, %v2637_v9, %v2605_v35  ;;  %v501_v35 = vshrl.u32 %v252_v10, 16  ;;  %v495_v20 = vrot.slane %v493_v11, 7  ;;  %v1829_v9 = vsel %vm1246_vm10, %v3532_v36, %v4301_v23  ;;  %v722_v10 = vld [vmem:[#allocation2 + $0x8c] sm:$0x1] }
  0xd3   : > { %3414 = vmatmul.msk.bf16.vlgmr.msra.gmra.mxu2 %vm1891_vm12, %v2669_v32  ;;  %v1028_v32 = vshll.u32 %v4347_v22, 16 }
  0xd4   : > { %2536 = vrot.lane.b32.xlu1 %v2415_v28, %s3583_s21  ;;  %3499 = vmatpush.bf16.msra.mxu3 %v4190_v61  ;;  %v2417_v61 = vshrl.u32 %v4305_v29, 16  ;;  %v503_v0 = vrot.slane %v501_v35, 7  ;;  %v1126_v28 = vrot.slane %v1124_v13, 1  ;;  %v498_v31 = vor.u32 %v496_v26, %v495_v20 }
  0xd5   : > { %1242 = vrot.lane.b32.xlu2 %v1210_v54, %s3582_s16  ;;  %v499_v33 = vrot.slane %v495_v20, 4  ;;  %v1030_v6 = vrot.slane %v1028_v32, 1  ;;  %v1035_v35 = vrot.slane %v1033_v48, 1  ;;  %v2578_v20 = vrot.slane %v4327_v43, 1  ;;  %v3537_v48 = vld [vmem:[#allocation2 + $0x30] sm:$0xff] }
  0xd6   : > { %v1771_v51 = vpop.permute.xlu1 %1770  ;;  %2616 = vrot.lane.b32.xlu0 %v2576_v62, %s3582_s16  ;;  %v506_v46 = vor.u32 %v504_v27, %v503_v0  ;;  %v2422_v18 = vor.u32 %v2421_v14, %v2417_v61  ;;  %v2426_v62 = vrot.slane %v2424_v1, 1  ;;  %v719_v58 = vsel %vm3801_vm7, %v498_v31, %v718_v45  ;;  %v3535_v14 = vld [vmem:[#allocation2 + $0x18] sm:$0xff]  ;;  %v3322_v31 = vld [vmem:[#allocation2 + $0xb0] sm:$0x1] }
  0xd7   : > { %v1835_v4 = vsel %vm1279_vm11, %v1803_v59, %v1771_v51  ;;  %v4342_v15 = vpop.permute.xlu2 %2528  ;;  %v1127_v50 = vor.u32 %v1126_v28, %v1122_v41  ;;  %720 = vst [vmem:[#allocation2 + $0x84] sm:$0xf] %v719_v58  ;;  %v508_v53 = vrot.slane %v503_v0, 4  ;;  %v1031_v11 = vor.u32 %v1030_v6, %v1026_v24  ;;  %v4405_v28 = vld [vmem:[#allocation2 + $0x78] sm:$0xff] }
  0xd8   : > { %v2527_v17 = vpop.permute.xlu0 %2526  ;;  %3240 = vmatmul.msk.bf16.vlgmr.msra.gmra.mxu0 %vm1891_vm12, %v1835_v4  ;;  %v507_v23 = vsel %vm3772_vm5, %v499_v33, %v506_v46  ;;  %v2427_v51 = vsel %vm940_vm9, %v2422_v18, %v2426_v62  ;;  %v4387_v4 = vpack.c.b16 %v1473_v42, %v1473_v42  ;;  %v2577_v1 = vrot.slane %v4305_v29, 1 }
  0xd9   : > { %721 = vst.msk [vmem:[#allocation2 + $0x88] sm:$0xf] %vm263_vm0, %v507_v23  ;;  %v1132_v8 = vsel %vm940_vm9, %v1127_v50, %v1131_v55  ;;  %v723_v61 = vsel %vm3817_vm8, %v508_v53, %v722_v10  ;;  %v1583_v26 = vshrl.u32 %v4371_v49, 16  ;;  %v1036_v29 = vsel %vm940_vm9, %v1031_v11, %v1035_v35  ;;  %v3136_v23 = vld [vmem:[#allocation2 + $0x74] sm:$0x1] }
  0xda   : > { %724 = vst [vmem:[#allocation2 + $0x8c] sm:$0x1] %v723_v61  ;;  %v1590_v41 = vshll.u32 %v4387_v4, 16  ;;  %v2579_v43 = vsel %vm1165_vm2, %v2577_v1, %v2578_v20  ;;  %v2312_v21 = vunpack.c.l.b16 %v3322_v31  ;;  %v2431_v37 = vshll.u32 %v4405_v28, 16 }
  0xdb   : > { %v1744_v62 = vrot.slane %v4387_v4, 1  ;;  %v1187_v58 = vrot.slane %v4347_v22, 1  ;;  %v2429_v42 = vshrl.u32 %v4405_v28, 16  ;;  %v1474_v24 = vunpack.c.l.b16 %v3136_v23 }
  0xdc   : > { %1145 = vrot.lane.b32.xlu1 %v1024_v39, %s3583_s21  ;;  %v2639_v39 = vsel %vm1246_vm10, %v3533_v25, %v2527_v17  ;;  %v3310_v17 = vld [vmem:[#allocation2 + $0x80] sm:$0x1]  ;;  %v1592_v36 = vrot.slane %v1590_v41, 1  ;;  %v1188_v25 = vrot.slane %v4357_v38, 1  ;;  %v4425_v55 = vpack.c.b16 %v2312_v21, %v2312_v21 }
  0xdd   : > { %1702 = vrot.lane.b32.xlu2 %v1581_v19, %s3583_s21  ;;  %v2671_v3 = vsel %vm1279_vm11, %v2639_v39, %v4223_v52  ;;  %v1211_v52 = vrot.slane %v4329_v63, 1  ;;  %v2308_v30 = vunpack.c.l.b16 %v3310_v17  ;;  %v1745_v53 = vsel %vm1165_vm2, %v1743_v40, %v1744_v62 }
  0xde   : > { %v1797_v47 = vpop.permute.xlu1 %1796  ;;  %1226 = vrot.lane.b32.xlu0 %v1186_v12, %s3582_s16  ;;  %v1212_v12 = vrot.slane %v4345_v34, 1  ;;  %v2484_v6 = vshll.u32 %v4425_v55, 16  ;;  %v2580_v10 = vrot.slane %v4405_v28, 1  ;;  %v4444_v61 = vpack.c.b16 %v1474_v24, %v1474_v24 }
  0xdf   : > { %v1861_v54 = vsel %vm1279_vm11, %v1829_v9, %v1797_v47  ;;  %v4369_v59 = vpop.permute.xlu2 %1137  ;;  %v4411_v9 = vld [vmem:[#allocation2 + $0xa8] sm:$0xff]  ;;  %v2324_v46 = vpack.c.b16 %v2308_v30, %v2308_v30  ;;  %v3536_v47 = vld [vmem:[#allocation2 + $0xb4] sm:$0xff] }
  0xe0   : > { %3253 = vmatmul.msk.bf16.gmra.mxu3 %vm1891_vm12, %v1861_v54  ;;  %v1136_v56 = vpop.permute.xlu0 %1135  ;;  %v1213_v27 = vsel %vm1165_vm2, %v1211_v52, %v1212_v12  ;;  %v2479_v45 = vshll.u32 %v4411_v9, 16  ;;  %v2477_v38 = vshrl.u32 %v4411_v9, 16  ;;  %v4441_v12 = vld [vmem:[#allocation2 + $0x60] sm:$0xff]  ;;  %v2592_v40 = vrot.slane %v4411_v9, 1 }
  0xe1   : > { %v1250_v60 = vsel %vm1246_vm10, %v3534_v57, %v1136_v56  ;;  %v2433_v57 = vrot.slane %v2431_v37, 1  ;;  %v2581_v17 = vrot.slane %v2324_v46, 1  ;;  %v1040_v35 = vshll.u32 %v4441_v12, 16 }
  0xe2   : > { %v1283_v2 = vsel %vm1279_vm11, %v1250_v60, %v4244_v7  ;;  %v1585_v7 = vshll.u32 %v4371_v49, 16  ;;  %v2436_v60 = vshll.u32 %v2324_v46, 16  ;;  %v1038_v46 = vshrl.u32 %v4441_v12, 16 }
  0xe3   : > { %3269 = vmatmul.msk.bf16.gmra.mxu1 %vm1891_vm12, %v1283_v2  ;;  %3415 = vmatmul.msk.bf16.gmra.mxu2 %vm1891_vm12, %v2671_v3  ;;  %v790_v2 = vld [vmem:[#allocation2 + $0x68] sm:$0x1]  ;;  %v2481_v3 = vrot.slane %v2479_v45, 1  ;;  %v2434_v4 = vor.u32 %v2433_v57, %v2429_v42  ;;  %v1042_v37 = vrot.slane %v1040_v35, 1  ;;  %v3539_v45 = vld [vmem:[#allocation2 + $0x18] sm:$0xff]  ;;  %v3540_v57 = vld [vmem:[#allocation2 + $0xc0] sm:$0xff] }
  0xe4   : > { %1782 = vrot.lane.b32.xlu1 %v1742_v44, %s3582_s16  ;;  %v1587_v19 = vrot.slane %v1585_v7, 1  ;;  %v4429_v44 = vld [vmem:[#allocation2 + $0x6c] sm:$0xff]  ;;  %v2438_v7 = vrot.slane %v2436_v60, 1  ;;  %v1747_v35 = vrot.slane %v4444_v61, 1 }
  0xe5   : > { %1163 = vrot.lane.b32.xlu2 %v1132_v8, %s3583_s21  ;;  %v2641_v8 = vsel %vm1246_vm10, %v3537_v48, %v4342_v15  ;;  %v1597_v52 = vshll.u32 %v4429_v44, 16  ;;  %v2482_v15 = vor.u32 %v2481_v3, %v2477_v38  ;;  %v1595_v20 = vshrl.u32 %v4429_v44, 16 }
  0xe6   : > { %v1693_v13 = vpop.permute.xlu1 %1692  ;;  %2538 = vrot.lane.b32.xlu0 %v2427_v51, %s3583_s21  ;;  %v1588_v33 = vor.u32 %v1587_v19, %v1583_v26  ;;  %v1189_v51 = vsel %vm1165_vm2, %v1187_v58, %v1188_v25  ;;  %v3313_v26 = vld [vmem:[#allocation2 + $0x8c] sm:$0x1]  ;;  %v3538_v19 = vld [vmem:[#allocation2 + $0x24] sm:$0xff]  ;;  %v3325_v25 = vld [vmem:[#allocation2 + $0xbc] sm:$0x1] }
  0xe7   : > { %v1805_v16 = vsel %vm1246_vm10, %v3535_v14, %v1693_v13  ;;  %v4401_v0 = vpop.permute.xlu2 %1774  ;;  %v916_v13 = vunpack.c.l.b16 %v790_v2  ;;  %v2486_v14 = vrot.slane %v2484_v6, 1  ;;  %v2309_v21 = vunpack.c.l.b16 %v3313_v26  ;;  %v4480_v2 = vld [vmem:[#allocation2 + $0xb4] sm:$0xff] }
  0xe8   : > { %v1773_v34 = vpop.permute.xlu0 %1772  ;;  %v1593_v54 = vsel %vm940_vm9, %v1588_v33, %v1592_v36  ;;  %v4459_v33 = vld [vmem:[#allocation2 + $0x84] sm:$0xff]  ;;  %v2313_v38 = vunpack.c.l.b16 %v3325_v25 }
  0xe9   : > { %v1837_v5 = vsel %vm1279_vm11, %v1805_v16, %v1773_v34  ;;  %v932_v30 = vpack.c.b16 %v916_v13, %v916_v13  ;;  %v2487_v36 = vsel %vm940_vm9, %v2482_v15, %v2486_v14  ;;  %v2443_v58 = vshll.u32 %v4459_v33, 16 }
  0xea   : > { %3241 = vmatmul.msk.bf16.gmra.mxu0 %vm1891_vm12, %v1837_v5  ;;  %v2439_v5 = vsel %vm940_vm9, %v2434_v4, %v2438_v7  ;;  %v2441_v6 = vshrl.u32 %v4459_v33, 16  ;;  %v2329_v7 = vpack.c.b16 %v2313_v38, %v2313_v38 }
  0xeb   : > { %v1191_v4 = vrot.slane %v932_v30, 1 }
  0xec   : > { %1244 = vrot.lane.b32.xlu1 %v1213_v27, %s3582_s16  ;;  %v1599_v27 = vrot.slane %v1597_v52, 1  ;;  %v2491_v52 = vshll.u32 %v4480_v2, 16 }
  0xed   : > { %2618 = vrot.lane.b32.xlu2 %v2579_v43, %s3582_s16  ;;  %v1602_v43 = vshll.u32 %v4444_v61, 16 }
  0xee   : > { %v1719_v32 = vpop.permute.xlu1 %1718  ;;  %1147 = vrot.lane.b32.xlu0 %v1036_v29, %s3583_s21  ;;  %v2582_v29 = vsel %vm1165_vm2, %v2580_v10, %v2581_v17  ;;  %v1600_v62 = vor.u32 %v1599_v27, %v1595_v20  ;;  %v1190_v10 = vrot.slane %v4441_v12, 1  ;;  %v3541_v17 = vld [vmem:[#allocation2 + $0x3c] sm:$0xff]  ;;  %v2489_v27 = vshrl.u32 %v4480_v2, 16 }
  0xef   : > { %v1831_v18 = vsel %vm1246_vm10, %v3536_v47, %v1719_v32  ;;  %v4423_v50 = vpop.permute.xlu2 %1800  ;;  %v1045_v32 = vshll.u32 %v932_v30, 16  ;;  %v1252_v47 = vsel %vm1246_vm10, %v3539_v45, %v4369_v59  ;;  %v1604_v23 = vrot.slane %v1602_v43, 1 }
  0xf0   : > { %v1799_v39 = vpop.permute.xlu0 %1798  ;;  %v1192_v20 = vsel %vm1165_vm2, %v1190_v10, %v1191_v4  ;;  %v2493_v30 = vrot.slane %v2491_v52, 1  ;;  %v2595_v45 = vrot.slane %v4480_v2, 1 }
  0xf1   : > { %v1863_v56 = vsel %vm1279_vm11, %v1831_v18, %v1799_v39 }
  0xf2   : > { %3254 = vmatmul.msk.bf16.gmra.mxu3 %vm1891_vm12, %v1863_v56  ;;  %v1043_v56 = vor.u32 %v1042_v37, %v1038_v46  ;;  %v2494_v46 = vor.u32 %v2493_v30, %v2489_v27 }
  0xf4   : > { %1704 = vrot.lane.b32.xlu1 %v1593_v54, %s3583_s21  ;;  %v4473_v54 = vpack.c.b16 %v2309_v21, %v2309_v21 }
  0xf5   : > { %1228 = vrot.lane.b32.xlu2 %v1189_v51, %s3582_s16  ;;  %v1605_v51 = vsel %vm940_vm9, %v1600_v62, %v1604_v23  ;;  %v3328_v23 = vld [vmem:[#allocation2 + $0xc8] sm:$0x1] }
  0xf6   : > { %v2609_v11 = vpop.permute.xlu1 %2608  ;;  %1784 = vrot.lane.b32.xlu0 %v1745_v53, %s3582_s16  ;;  %v2445_v53 = vrot.slane %v2443_v58, 1  ;;  %v2448_v48 = vshll.u32 %v4473_v54, 16  ;;  %v2583_v58 = vrot.slane %v4459_v33, 1  ;;  %v2584_v25 = vrot.slane %v4473_v54, 1  ;;  %v4527_v54 = vld [vmem:[#allocation2 + $0xc0] sm:$0xff] }
  0xf7   : > { %v2673_v16 = vsel %vm1279_vm11, %v2641_v8, %v2609_v11  ;;  %v4451_v34 = vpop.permute.xlu2 %1696 }
  0xf8   : > { %3416 = vmatmul.msk.bf16.gmra.mxu2 %vm1891_vm12, %v2673_v16  ;;  %v1695_v1 = vpop.permute.xlu0 %1694  ;;  %v2446_v11 = vor.u32 %v2445_v53, %v2441_v6  ;;  %v2450_v14 = vrot.slane %v2448_v48, 1  ;;  %v1746_v16 = vrot.slane %v4429_v44, 1  ;;  %v2314_v53 = vunpack.c.l.b16 %v3328_v23 }
  0xf9   : > { %v1807_v41 = vsel %vm1246_vm10, %v3538_v19, %v1695_v1  ;;  %v4500_v19 = vld [vmem:[#allocation2 + $0x6c] sm:$0xff]  ;;  %v2585_v48 = vsel %vm1165_vm2, %v2583_v58, %v2584_v25 }
  0xfa   : > { %v1839_v31 = vsel %vm1279_vm11, %v1807_v41, %v4401_v0  ;;  %v2593_v0 = vrot.slane %v4425_v55, 1  ;;  %v1047_v55 = vrot.slane %v1045_v32, 1  ;;  %v2451_v43 = vsel %vm940_vm9, %v2446_v11, %v2450_v14  ;;  %v4509_v32 = vld [vmem:[#allocation2 + $0x78] sm:$0xff]  ;;  %v4534_v11 = vld [vmem:[#allocation2 + $0x90] sm:$0xff] }
  0xfb   : > { %3242 = vmatmul.msk.bf16.gmra.mxu0 %vm1891_vm12, %v1839_v31  ;;  %v2496_v31 = vshll.u32 %v2329_v7, 16  ;;  %v1748_v61 = vsel %vm1165_vm2, %v1746_v16, %v1747_v35  ;;  %v1052_v21 = vshll.u32 %v4500_v19, 16  ;;  %v4539_v35 = vpack.c.b16 %v2314_v53, %v2314_v53 }
  0xfc   : > { %2540 = vrot.lane.b32.xlu1 %v2439_v5, %s3583_s21  ;;  %v2594_v24 = vsel %vm1165_vm2, %v2592_v40, %v2593_v0  ;;  %v1048_v8 = vsel %vm940_vm9, %v1043_v56, %v1047_v55  ;;  %v1050_v55 = vshrl.u32 %v4500_v19, 16  ;;  %v2455_v30 = vshll.u32 %v4534_v11, 16 }
  0xfd   : > { %2548 = vrot.lane.b32.xlu2 %v2487_v36, %s3583_s21  ;;  %v2498_v37 = vrot.slane %v2496_v31, 1  ;;  %v1749_v25 = vrot.slane %v4509_v32, 1 }
  0xfe   : > { %v1219_v18 = vpop.permute.xlu1 %1218  ;;  %2620 = vrot.lane.b32.xlu0 %v2582_v29, %s3582_s16  ;;  %v3139_v29 = vld [vmem:[#allocation2 + $0x80] sm:$0x1]  ;;  %v2457_v23 = vrot.slane %v2455_v30, 1  ;;  %v3319_v30 = vld [vmem:[#allocation2 + $0xa4] sm:$0x1] }
  0xff   : > { %v1285_v39 = vsel %vm1279_vm11, %v1252_v47, %v1219_v18  ;;  %v4476_v59 = vpop.permute.xlu2 %1157  ;;  %v1475_v40 = vunpack.c.l.b16 %v3139_v29  ;;  %v2596_v47 = vrot.slane %v2329_v7, 1  ;;  %v3542_v18 = vld [vmem:[#allocation2 + $0x24] sm:$0xff]  ;;  %v2499_v38 = vsel %vm940_vm9, %v2494_v46, %v2498_v37 }
 0x100   : > { %3270 = vmatmul.msk.bf16.gmra.mxu1 %vm1891_vm12, %v1285_v39  ;;  %v1721_v42 = vpop.permute.xlu0 %1720  ;;  %v1609_v39 = vshll.u32 %v4509_v32, 16 }
 0x101   : > { %v1833_v60 = vsel %vm1246_vm10, %v3540_v57, %v1721_v42  ;;  %v1054_v42 = vrot.slane %v1052_v21, 1  ;;  %v2597_v6 = vsel %vm1165_vm2, %v2595_v45, %v2596_v47  ;;  %v2501_v21 = vshrl.u32 %v4527_v54, 16  ;;  %v4555_v45 = vld [vmem:[#allocation2 + $0x78] sm:$0xff] }
 0x102   : > { %v1865_v3 = vsel %vm1279_vm11, %v1833_v60, %v4423_v50  ;;  %v793_v50 = vld [vmem:[#allocation2 + $0x74] sm:$0x1]  ;;  %v1611_v10 = vrot.slane %v1609_v39, 1 }
 0x103   : > { %3255 = vmatmul.msk.bf16.gmra.mxu3 %vm1891_vm12, %v1865_v3  ;;  %v917_v41 = vunpack.c.l.b16 %v793_v50  ;;  %v4523_v3 = vpack.c.b16 %v1475_v40, %v1475_v40  ;;  %v1055_v7 = vor.u32 %v1054_v42, %v1050_v55  ;;  %v1193_v50 = vrot.slane %v4500_v19, 1  ;;  %v3545_v39 = vld [vmem:[#allocation2 + $0x90] sm:$0xff] }
 0x104   : > { %2628 = vrot.lane.b32.xlu1 %v2594_v24, %s3582_s16 }
 0x105   : > { %1149 = vrot.lane.b32.xlu2 %v1048_v8, %s3583_s21  ;;  %v933_v36 = vpack.c.b16 %v917_v41, %v917_v41  ;;  %v1607_v8 = vshrl.u32 %v4509_v32, 16  ;;  %v1614_v4 = vshll.u32 %v4523_v3, 16  ;;  %v796_v41 = vld [vmem:[#allocation2 + $0x80] sm:$0x1] }
 0x106   : > { %v2531_v13 = vpop.permute.xlu1 %2530  ;;  %1706 = vrot.lane.b32.xlu0 %v1605_v51, %s3583_s21  ;;  %v3316_v51 = vld [vmem:[#allocation2 + $0x98] sm:$0x1]  ;;  %v918_v47 = vunpack.c.l.b16 %v796_v41 }
 0x107   : > { %v2643_v15 = vsel %vm1246_vm10, %v3541_v17, %v2531_v13  ;;  %v4498_v26 = vpop.permute.xlu2 %2612  ;;  %v1057_v57 = vshll.u32 %v933_v36, 16  ;;  %v1194_v13 = vrot.slane %v933_v36, 1  ;;  %v2310_v17 = vunpack.c.l.b16 %v3316_v51 }
 0x108   : > { %v2611_v1 = vpop.permute.xlu0 %2610  ;;  %v1616_v27 = vrot.slane %v1614_v4, 1  ;;  %v4569_v53 = vpack.c.b16 %v918_v47, %v918_v47 }
 0x109   : > { %v2675_v5 = vsel %vm1279_vm11, %v2643_v15, %v2611_v1  ;;  %v1059_v52 = vrot.slane %v1057_v57, 1  ;;  %v3543_v15 = vld [vmem:[#allocation2 + $0x30] sm:$0xff]  ;;  %v2503_v1 = vshll.u32 %v4527_v54, 16  ;;  %v1195_v36 = vsel %vm1165_vm2, %v1193_v50, %v1194_v13 }
 0x10a   : > { %3417 = vmatmul.msk.bf16.gmra.mxu2 %vm1891_vm12, %v2675_v5  ;;  %v1809_v14 = vsel %vm1246_vm10, %v3543_v15, %v4451_v34  ;;  %v1612_v5 = vor.u32 %v1611_v10, %v1607_v8  ;;  %v2326_v46 = vpack.c.b16 %v2310_v17, %v2310_v17  ;;  %v3546_v8 = vld [vmem:[#allocation2 + $0x30] sm:$0xff]  ;;  %v1062_v13 = vshrl.u32 %v4555_v45, 16 }
 0x10b   : > { %v1060_v34 = vsel %vm940_vm9, %v1055_v7, %v1059_v52  ;;  %v2505_v40 = vrot.slane %v2503_v1, 1  ;;  %v4576_v7 = vld [vmem:[#allocation2 + $0x84] sm:$0xff]  ;;  %v2586_v1 = vrot.slane %v4534_v11, 1 }
 0x10c   : > { %1230 = vrot.lane.b32.xlu1 %v1192_v20, %s3582_s16  ;;  %v2460_v58 = vshll.u32 %v2326_v46, 16 }
 0x10d   : > { %1786 = vrot.lane.b32.xlu2 %v1748_v61, %s3582_s16  ;;  %v2506_v42 = vor.u32 %v2505_v40, %v2501_v21 }
 0x10e   : > { %v1140_v0 = vpop.permute.xlu1 %1139  ;;  %2542 = vrot.lane.b32.xlu0 %v2451_v43, %s3583_s21  ;;  %v3544_v43 = vld [vmem:[#allocation2 + $0x48] sm:$0xff] }
 0x10f   : > { %v1254_v62 = vsel %vm1246_vm10, %v3542_v18, %v1140_v0  ;;  %v4519_v60 = vpop.permute.xlu2 %1222  ;;  %v2508_v0 = vshll.u32 %v4539_v35, 16  ;;  %v1617_v18 = vsel %vm940_vm9, %v1612_v5, %v1616_v27  ;;  %v1621_v5 = vshll.u32 %v4576_v7, 16 }
 0x110   : > { %v1221_v56 = vpop.permute.xlu0 %1220 }
 0x111   : > { %v1287_v24 = vsel %vm1279_vm11, %v1254_v62, %v1221_v56  ;;  %v2453_v62 = vshrl.u32 %v4534_v11, 16  ;;  %v1272_v56 = vsel %vm1246_vm10, %v3545_v39, %v4476_v59  ;;  %v2510_v57 = vrot.slane %v2508_v0, 1  ;;  %v4597_v0 = vld [vmem:[#allocation2 + $0x9c] sm:$0xff] }
 0x112   : > { %3271 = vmatmul.msk.bf16.gmra.mxu1 %vm1891_vm12, %v1287_v24  ;;  %v1064_v24 = vshll.u32 %v4555_v45, 16 }
 0x113   : > { %v2458_v51 = vor.u32 %v2457_v23, %v2453_v62  ;;  %v2511_v15 = vsel %vm940_vm9, %v2506_v42, %v2510_v57  ;;  %v2311_v23 = vunpack.c.l.b16 %v3319_v30  ;;  %v4605_v42 = vld [vmem:[#allocation2 + $0xcc] sm:$0xff] }
 0x114   : > { %2550 = vrot.lane.b32.xlu1 %v2499_v38, %s3583_s21  ;;  %v3142_v38 = vld [vmem:[#allocation2 + $0x8c] sm:$0x1]  ;;  %v1066_v17 = vrot.slane %v1064_v24, 1 }
 0x115   : > { %2622 = vrot.lane.b32.xlu2 %v2585_v48, %s3582_s16  ;;  %v1476_v52 = vunpack.c.l.b16 %v3142_v38  ;;  %v1752_v38 = vrot.slane %v4576_v7, 1 }
 0x116   : > { %v1777_v16 = vpop.permute.xlu1 %1776  ;;  %2630 = vrot.lane.b32.xlu0 %v2597_v6, %s3582_s16  ;;  %v1067_v27 = vor.u32 %v1066_v17, %v1062_v13 }
 0x117   : > { %v1841_v20 = vsel %vm1279_vm11, %v1809_v14, %v1777_v16  ;;  %v4547_v29 = vpop.permute.xlu2 %2534  ;;  %v1069_v14 = vshll.u32 %v4569_v53, 16  ;;  %v1492_v41 = vpack.c.b16 %v1476_v52, %v1476_v52 }
 0x118   : > { %3243 = vmatmul.msk.bf16.gmra.mxu0 %vm1891_vm12, %v1841_v20  ;;  %v2533_v31 = vpop.permute.xlu0 %2532  ;;  %v2587_v20 = vrot.slane %v2326_v46, 1 }
 0x119   : > { %v2645_v61 = vsel %vm1246_vm10, %v3544_v43, %v2533_v31  ;;  %v3547_v31 = vld [vmem:[#allocation2 + $0x3c] sm:$0xff]  ;;  %v1071_v43 = vrot.slane %v1069_v14, 1  ;;  %v1626_v62 = vshll.u32 %v1492_v41, 16 }
 0x11a   : > { %v2677_v37 = vsel %vm1279_vm11, %v2645_v61, %v4498_v26  ;;  %v1750_v26 = vrot.slane %v4523_v3, 1  ;;  %v2462_v3 = vrot.slane %v2460_v58, 1  ;;  %v2598_v61 = vrot.slane %v4527_v54, 1  ;;  %v3331_v58 = vld [vmem:[#allocation2 + $0xd4] sm:$0x1] }
 0x11b   : > { %3418 = vmatmul.msk.bf16.gmra.mxu2 %vm1891_vm12, %v2677_v37  ;;  %v2588_v46 = vsel %vm1165_vm2, %v2586_v1, %v2587_v20  ;;  %v1619_v37 = vshrl.u32 %v4576_v7, 16  ;;  %v2315_v57 = vunpack.c.l.b16 %v3331_v58 }
 0x11c   : > { %1151 = vrot.lane.b32.xlu1 %v1060_v34, %s3583_s21  ;;  %v1751_v4 = vsel %vm1165_vm2, %v1749_v25, %v1750_v26  ;;  %v2463_v16 = vsel %vm940_vm9, %v2458_v51, %v2462_v3  ;;  %v1072_v25 = vsel %vm940_vm9, %v1067_v27, %v1071_v43  ;;  %v2467_v26 = vshll.u32 %v4597_v0, 16  ;;  %v3548_v51 = vld [vmem:[#allocation2 + $0x9c] sm:$0xff] }
 0x11d   : > { %1708 = vrot.lane.b32.xlu2 %v1617_v18, %s3583_s21  ;;  %v1623_v18 = vrot.slane %v1621_v5, 1  ;;  %v4619_v1 = vpack.c.b16 %v2315_v57, %v2315_v57  ;;  %v799_v5 = vld [vmem:[#allocation2 + $0x8c] sm:$0x1]  ;;  %v2513_v27 = vshrl.u32 %v4605_v42, 16 }
 0x11e   : > { %v1239_v55 = vpop.permute.xlu1 %1238  ;;  %1232 = vrot.lane.b32.xlu0 %v1195_v36, %s3582_s16  ;;  %v2599_v36 = vrot.slane %v4539_v35, 1  ;;  %v2469_v13 = vrot.slane %v2467_v26, 1 }
 0x11f   : > { %v1305_v6 = vsel %vm1279_vm11, %v1272_v56, %v1239_v55  ;;  %v4572_v59 = vpop.permute.xlu2 %1143  ;;  %v1624_v39 = vor.u32 %v1623_v18, %v1619_v37  ;;  %v1628_v56 = vrot.slane %v1626_v62, 1  ;;  %v2327_v55 = vpack.c.b16 %v2311_v23, %v2311_v23  ;;  %v3549_v37 = vld [vmem:[#allocation2 + $0x54] sm:$0xff] }
 0x120   : > { %3280 = vmatmul.msk.bf16.vlgmr.msrb.gmra.mxu3 %vm1891_vm12, %v1305_v6  ;;  %v1142_v48 = vpop.permute.xlu0 %1141  ;;  %v2600_v35 = vsel %vm1165_vm2, %v2598_v61, %v2599_v36  ;;  %v1753_v6 = vrot.slane %v1492_v41, 1  ;;  %v2589_v61 = vrot.slane %v4597_v0, 1 }
 0x121   : > { %v1256_v10 = vsel %vm1246_vm10, %v3546_v8, %v1142_v48  ;;  %v3145_v48 = vld [vmem:[#allocation2 + $0x98] sm:$0x1]  ;;  %v1196_v8 = vrot.slane %v4555_v45, 1  ;;  %v1629_v14 = vsel %vm940_vm9, %v1624_v39, %v1628_v56  ;;  %v2590_v36 = vrot.slane %v2327_v55, 1 }
 0x122   : > { %v1289_v50 = vsel %vm1279_vm11, %v1256_v10, %v4519_v60  ;;  %v1197_v10 = vrot.slane %v4569_v53, 1  ;;  %v1754_v20 = vsel %vm1165_vm2, %v1752_v38, %v1753_v6  ;;  %v4623_v53 = vld [vmem:[#allocation2 + $0x90] sm:$0xff]  ;;  %v1477_v41 = vunpack.c.l.b16 %v3145_v48 }
 0x123   : > { %3272 = vmatmul.msk.bf16.gmra.mxu1 %vm1891_vm12, %v1289_v50  ;;  %v2465_v50 = vshrl.u32 %v4597_v0, 16  ;;  %v1633_v23 = vshll.u32 %v4623_v53, 16 }
 0x124   : > { %1788 = vrot.lane.b32.xlu1 %v1751_v4, %s3582_s16  ;;  %v2515_v4 = vshll.u32 %v4605_v42, 16  ;;  %v4635_v62 = vpack.c.b16 %v1477_v41, %v1477_v41 }
 0x125   : > { %2544 = vrot.lane.b32.xlu2 %v2463_v16, %s3583_s21  ;;  %v2472_v16 = vshll.u32 %v2327_v55, 16 }
 0x126   : > { %v1699_v60 = vpop.permute.xlu1 %1698  ;;  %2552 = vrot.lane.b32.xlu0 %v2511_v15, %s3583_s21  ;;  %v2517_v30 = vrot.slane %v2515_v4, 1  ;;  %v1638_v48 = vshll.u32 %v4635_v62, 16 }
 0x127   : > { %v1811_v34 = vsel %vm1246_vm10, %v3547_v31, %v1699_v60  ;;  %v4595_v40 = vpop.permute.xlu2 %1780  ;;  %v1198_v60 = vsel %vm1165_vm2, %v1196_v8, %v1197_v10  ;;  %v2520_v31 = vshll.u32 %v4619_v1, 16  ;;  %v2474_v43 = vrot.slane %v2472_v16, 1 }
 0x128   : > { %v1779_v21 = vpop.permute.xlu0 %1778  ;;  %v1640_v41 = vrot.slane %v1638_v48, 1 }
 0x129   : > { %v1843_v47 = vsel %vm1279_vm11, %v1811_v34, %v1779_v21  ;;  %v2470_v34 = vor.u32 %v2469_v13, %v2465_v50  ;;  %v4630_v21 = vld [vmem:[#allocation2 + $0x84] sm:$0xff]  ;;  %v2601_v50 = vrot.slane %v4605_v42, 1  ;;  %v2602_v13 = vrot.slane %v4619_v1, 1 }
 0x12a   : > { %3244 = vmatmul.msk.bf16.gmra.mxu0 %vm1891_vm12, %v1843_v47  ;;  %v2647_v47 = vsel %vm1246_vm10, %v3549_v37, %v4547_v29  ;;  %v1076_v26 = vshll.u32 %v4630_v21, 16  ;;  %v3550_v29 = vld [vmem:[#allocation2 + $0x48] sm:$0xff]  ;;  %v1074_v10 = vshrl.u32 %v4630_v21, 16 }
 0x12b   : > { %v2475_v57 = vsel %vm940_vm9, %v2470_v34, %v2474_v43  ;;  %v3552_v1 = vld [vmem:[#allocation2 + $0xa8] sm:$0xff] }
 0x12c   : > { %2624 = vrot.lane.b32.xlu1 %v2588_v46, %s3582_s16  ;;  %v919_v46 = vunpack.c.l.b16 %v799_v5  ;;  %v1078_v4 = vrot.slane %v1076_v26, 1 }
 0x12d   : > { %2632 = vrot.lane.b32.xlu2 %v2600_v35, %s3582_s16  ;;  %v2522_v35 = vrot.slane %v2520_v31, 1 }
 0x12e   : > { %v1160_v24 = vpop.permute.xlu1 %1159  ;;  %1153 = vrot.lane.b32.xlu0 %v1072_v25, %s3583_s21  ;;  %v2518_v25 = vor.u32 %v2517_v30, %v2513_v27  ;;  %v935_v38 = vpack.c.b16 %v919_v46, %v919_v46  ;;  %v1079_v5 = vor.u32 %v1078_v4, %v1074_v10  ;;  %v3555_v10 = vld [vmem:[#allocation2 + $0x54] sm:$0xff] }
 0x12f   : > { %v1274_v3 = vsel %vm1246_vm10, %v3548_v51, %v1160_v24  ;;  %v4615_v17 = vpop.permute.xlu2 %1242  ;;  %v2591_v24 = vsel %vm1165_vm2, %v2589_v61, %v2590_v36  ;;  %v1631_v51 = vshrl.u32 %v4623_v53, 16  ;;  %v1199_v36 = vrot.slane %v4630_v21, 1 }
 0x130   : > { %v1241_v52 = vpop.permute.xlu0 %1240  ;;  %v2523_v8 = vsel %vm940_vm9, %v2518_v25, %v2522_v35  ;;  %v1200_v46 = vrot.slane %v935_v38, 1 }
 0x131   : > { %v1307_v15 = vsel %vm1279_vm11, %v1274_v3, %v1241_v52  ;;  %v1635_v3 = vrot.slane %v1633_v23, 1  ;;  %v1081_v52 = vshll.u32 %v935_v38, 16  ;;  %v1756_v23 = vrot.slane %v4635_v62, 1 }
 0x132   : > { %3281 = vmatmul.msk.bf16.gmra.mxu3 %vm1891_vm12, %v1307_v15  ;;  %v1201_v26 = vsel %vm1165_vm2, %v1199_v36, %v1200_v46 }
 0x133   : > { %v1636_v16 = vor.u32 %v1635_v3, %v1631_v51 }
 0x134   : > { %1710 = vrot.lane.b32.xlu1 %v1629_v14, %s3583_s21 }
 0x135   : > { %1234 = vrot.lane.b32.xlu2 %v1198_v60, %s3582_s16  ;;  %v1083_v60 = vrot.slane %v1081_v52, 1  ;;  %v1641_v43 = vsel %vm940_vm9, %v1636_v16, %v1640_v41 }
 0x136   : > { %v2615_v18 = vpop.permute.xlu1 %2614  ;;  %1790 = vrot.lane.b32.xlu0 %v1754_v20, %s3582_s16 }
 0x137   : > { %v2679_v58 = vsel %vm1279_vm11, %v2647_v47, %v2615_v18  ;;  %v4642_v56 = vpop.permute.xlu2 %1702  ;;  %v1084_v61 = vsel %vm940_vm9, %v1079_v5, %v1083_v60  ;;  %v3553_v47 = vld [vmem:[#allocation2 + $0x60] sm:$0xff] }
 0x138   : > { %3419 = vmatmul.msk.bf16.gmra.mxu2 %vm1891_vm12, %v2679_v58  ;;  %v1701_v39 = vpop.permute.xlu0 %1700  ;;  %v1815_v4 = vsel %vm1246_vm10, %v3555_v10, %v4642_v56 }
 0x139   : > { %v1813_v55 = vsel %vm1246_vm10, %v3550_v29, %v1701_v39 }
 0x13a   : > { %v1845_v6 = vsel %vm1279_vm11, %v1813_v55, %v4595_v40  ;;  %v3551_v40 = vld [vmem:[#allocation2 + $0x3c] sm:$0xff]  ;;  %v3554_v55 = vld [vmem:[#allocation2 + $0x48] sm:$0xff] }
 0x13b   : > { %3245 = vmatmul.msk.bf16.gmra.mxu0 %vm1891_vm12, %v1845_v6  ;;  %v1258_v15 = vsel %vm1246_vm10, %v3551_v40, %v4572_v59  ;;  %v2603_v59 = vsel %vm1165_vm2, %v2601_v50, %v2602_v13  ;;  %v2072_v6 = vpop.f32.mrf.mxu1 }
 0x13c   : > { %2546 = vrot.lane.b32.xlu1 %v2475_v57, %s3583_s21 }
 0x13d   : > { %2554 = vrot.lane.b32.xlu2 %v2523_v8, %s3583_s21  ;;  %v4689_v8 = vld [vmem:[%s4933_s2] ss:$0 sm:$0xff] }
 0x13e   : > { %v1225_v14 = vpop.permute.xlu1 %1224  ;;  %2626 = vrot.lane.b32.xlu0 %v2591_v24, %s3582_s16 }
 0x13f   : > { %v1291_v20 = vsel %vm1279_vm11, %v1258_v15, %v1225_v14  ;;  %v1164_v30 = vpop.permute.xlu2 %1163  ;;  %v3556_v14 = vld [vmem:[#allocation2 + $0x6c] sm:$0xff] }
 0x140   : > { %3273 = vmatmul.msk.bf16.gmra.mxu1 %vm1891_vm12, %v1291_v20  ;;  %v1162_v27 = vpop.permute.xlu0 %1161 }
 0x141   : > { %v1276_v31 = vsel %vm1246_vm10, %v3552_v1, %v1162_v27  ;;  %v1278_v1 = vsel %vm1246_vm10, %v4329_v63, %v1164_v30 }
 0x142   : > { %v1309_v34 = vsel %vm1279_vm11, %v1276_v31, %v4615_v17  ;;  %v1755_v17 = vrot.slane %v4623_v53, 1 }
 0x143   : > { %3282 = vmatmul.msk.bf16.gmra.mxu3 %vm1891_vm12, %v1309_v34  ;;  %v2074_v41 = vpop.f32.mrf.mxu1 }
 0x144   : > { %2634 = vrot.lane.b32.xlu1 %v2603_v59, %s3582_s16  ;;  %v1757_v39 = vsel %vm1165_vm2, %v1755_v17, %v1756_v23 }
 0x145   : > { %1155 = vrot.lane.b32.xlu2 %v1084_v61, %s3583_s21 }
 0x146   : > { %v2537_v37 = vpop.permute.xlu1 %2536  ;;  %1712 = vrot.lane.b32.xlu0 %v1641_v43, %s3583_s21 }
 0x147   : > { %v2649_v18 = vsel %vm1246_vm10, %v3553_v47, %v2537_v37  ;;  %v2619_v25 = vpop.permute.xlu2 %2618 }
 0x148   : > { %v2617_v58 = vpop.permute.xlu0 %2616 }
 0x149   : > { %v2681_v35 = vsel %vm1279_vm11, %v2649_v18, %v2617_v58 }
 0x14a   : > { %3420 = vmatmul.msk.bf16.gmra.mxu2 %vm1891_vm12, %v2681_v35 }
 0x14c   : > { %1236 = vrot.lane.b32.xlu1 %v1201_v26, %s3582_s16 }
 0x14d   : > { %1792 = vrot.lane.b32.xlu2 %v1757_v39, %s3582_s16 }
 0x14e   : > { %v1146_v29 = vpop.permute.xlu1 %1145  ;;  %v4719_v17 = vpop.f32.mrf.mxu3 }
 0x14f   : > { %v1260_v57 = vsel %vm1246_vm10, %v3554_v55, %v1146_v29  ;;  %v1229_v62 = vpop.permute.xlu2 %1228 }
 0x150   : > { %v1227_v24 = vpop.permute.xlu0 %1226 }
 0x151   : > { %v1293_v38 = vsel %vm1279_vm11, %v1260_v57, %v1227_v24 }
 0x152   : > { %3274 = vmatmul.msk.bf16.gmra.mxu1 %vm1891_vm12, %v1293_v38 }
 0x155   : > { %v1933_v51 = vpop.f32.mrf.mxu0 }
 0x156   : > { %v2073_v3 = vadd.f32 %v2072_v6, %v1933_v51  ;;  %v2766_v48 = vpop.f32.mrf.mxu2  ;;  %v1783_v52 = vpop.permute.xlu1 %1782 }
 0x157   : > { %v1847_v13 = vsel %vm1279_vm11, %v1815_v4, %v1783_v52  ;;  %v2549_v15 = vpop.permute.xlu2 %2548 }
 0x158   : > { %v2846_v50 = vadd.f32 %v2766_v48, %v2073_v3  ;;  %v2539_v40 = vpop.permute.xlu0 %2538  ;;  %3246 = vmatmul.msk.bf16.gmra.mxu0 %vm1891_vm12, %v1847_v13  ;;  %v4731_v3 = vpop.f32.mrf.mxu3  ;;  %v2661_v4 = vsel %vm1246_vm10, %v4411_v9, %v2549_v15 }
 0x159   : > { %v2651_v16 = vsel %vm1246_vm10, %v3556_v14, %v2539_v40 }
 0x15a   : > { %v2882_v56 = vadd.f32 %v4689_v8, %v2846_v50  ;;  %v2683_v20 = vsel %vm1279_vm11, %v2651_v16, %v2619_v25 }
 0x15b   : > { %3421 = vmatmul.msk.bf16.gmra.mxu2 %vm1891_vm12, %v2683_v20 }
 0x15c   : > { %2914 = vst.msk [vmem:[%s4699_s22] sm:$0xff] %vm1279_vm11, %v2882_v56 }
 0x15d   : > { %v1935_v5 = vpop.f32.mrf.mxu0 }
 0x15e   : > { %v2075_v60 = vadd.f32 %v2074_v41, %v1935_v5  ;;  %v2768_v27 = vpop.f32.mrf.mxu2  ;;  %v1245_v31 = vpop.permute.xlu1 %1244 }
 0x15f   : > { %v1311_v34 = vsel %vm1279_vm11, %v1278_v1, %v1245_v31  ;;  %v1150_v36 = vpop.permute.xlu2 %1149 }
 0x160   : > { %v2847_v59 = vadd.f32 %v2768_v27, %v2075_v60  ;;  %v1148_v43 = vpop.permute.xlu0 %1147  ;;  %3283 = vmatmul.msk.bf16.gmra.mxu3 %vm1891_vm12, %v1311_v34  ;;  %v2077_v63 = vpop.f32.mrf.mxu1  ;;  %v1264_v41 = vsel %vm1246_vm10, %v4441_v12, %v1150_v36 }
 0x161   : > { %v1262_v61 = vsel %vm1246_vm10, %v4347_v22, %v1148_v43 }
 0x162   : > { %v2883_v46 = vadd.f32 %v4689_v8, %v2847_v59  ;;  %v1295_v37 = vsel %vm1279_vm11, %v1262_v61, %v1229_v62 }
 0x163   : > { %3275 = vmatmul.msk.bf16.gmra.mxu1 %vm1891_vm12, %v1295_v37  ;;  %v4743_v40 = vpop.f32.mrf.mxu3 }
 0x164   : > { %2915 = vst.msk [vmem:[%s4699_s22 + $0x8] sm:$0xff] %vm1279_vm11, %v2883_v46 }
 0x166   : > { %v2771_v30 = vpop.f32.mrf.mxu2  ;;  %v1705_v47 = vpop.permute.xlu1 %1704 }
 0x167   : > { %v1938_v18 = vpop.f32.mrf.mxu0  ;;  %v1817_v23 = vsel %vm1246_vm10, %v4371_v49, %v1705_v47  ;;  %v1787_v35 = vpop.permute.xlu2 %1786 }
 0x168   : > { %v2078_v22 = vadd.f32 %v2077_v63, %v1938_v18  ;;  %v1785_v58 = vpop.permute.xlu0 %1784  ;;  %v2079_v29 = vpop.f32.mrf.mxu1 }
 0x169   : > { %v1849_v25 = vsel %vm1279_vm11, %v1817_v23, %v1785_v58 }
 0x16a   : > { %v2848_v26 = vadd.f32 %v2771_v30, %v2078_v22  ;;  %3247 = vmatmul.msk.bf16.gmra.mxu0 %vm1891_vm12, %v1849_v25 }
 0x16b   : > { %v4756_v34 = vpop.f32.mrf.mxu3 }
 0x16c   : > { %v2884_v39 = vadd.f32 %v4689_v8, %v2848_v26 }
 0x16e   : > { %2916 = vst.msk [vmem:[%s4699_s22 + $0x10] sm:$0xff] %vm1279_vm11, %v2884_v39  ;;  %v2541_v55 = vpop.permute.xlu1 %2540  ;;  %v2773_v38 = vpop.f32.mrf.mxu2 }
 0x16f   : > { %v1940_v57 = vpop.f32.mrf.mxu0  ;;  %v2653_v24 = vsel %vm1246_vm10, %v4405_v28, %v2541_v55  ;;  %v2623_v51 = vpop.permute.xlu2 %2622 }
 0x170   : > { %v2080_v49 = vadd.f32 %v2079_v29, %v1940_v57  ;;  %v2621_v62 = vpop.permute.xlu0 %2620 }
 0x171   : > { %v2685_v6 = vsel %vm1279_vm11, %v2653_v24, %v2621_v62 }
 0x172   : > { %v2849_v48 = vadd.f32 %v2773_v38, %v2080_v49  ;;  %3422 = vmatmul.msk.bf16.gmra.mxu2 %vm1891_vm12, %v2685_v6 }
 0x174   : > { %v2885_v10 = vadd.f32 %v4689_v8, %v2849_v48 }
 0x175   : > { %v4765_v23 = vpop.f32.mrf.mxu3 }
 0x176   : > { %2917 = vst.msk [vmem:[%s4699_s22 + $0x18] sm:$0xff] %vm1279_vm11, %v2885_v10  ;;  %v2629_v52 = vpop.permute.xlu1 %2628 }
 0x177   : > { %v2693_v28 = vsel %vm1279_vm11, %v2661_v4, %v2629_v52  ;;  %v1709_v56 = vpop.permute.xlu2 %1708 }
 0x178   : > { %v1707_v50 = vpop.permute.xlu0 %1706  ;;  %3426 = vmatmul.msk.bf16.vlgmr.msra.gmra.mxu3 %vm1891_vm12, %v2693_v28  ;;  %v1943_v14 = vpop.f32.mrf.mxu0  ;;  %v1821_v24 = vsel %vm1246_vm10, %v4509_v32, %v1709_v56 }
 0x179   : > { %v1819_v13 = vsel %vm1246_vm10, %v4429_v44, %v1707_v50 }
 0x17a   : > { %v1851_v16 = vsel %vm1279_vm11, %v1819_v13, %v1787_v35 }
 0x17b   : > { %3248 = vmatmul.msk.bf16.gmra.mxu0 %vm1891_vm12, %v1851_v16  ;;  %v2776_v20 = vpop.f32.mrf.mxu2 }
 0x17d   : > { %v2082_v9 = vpop.f32.mrf.mxu1  ;;  %v4773_v55 = vpop.f32.mrf.mxu3 }
 0x17e   : > { %v2083_v15 = vadd.f32 %v2082_v9, %v1943_v14  ;;  %v1231_v5 = vpop.permute.xlu1 %1230 }
 0x17f   : > { %v1297_v27 = vsel %vm1279_vm11, %v1264_v41, %v1231_v5  ;;  %v2545_v61 = vpop.permute.xlu2 %2544 }
 0x180   : > { %v2850_v60 = vadd.f32 %v2776_v20, %v2083_v15  ;;  %v2543_v44 = vpop.permute.xlu0 %2542  ;;  %3276 = vmatmul.msk.bf16.gmra.mxu1 %vm1891_vm12, %v1297_v27  ;;  %v1945_v12 = vpop.f32.mrf.mxu0  ;;  %v2657_v50 = vsel %vm1246_vm10, %v4534_v11, %v2545_v61 }
 0x181   : > { %v2655_v1 = vsel %vm1246_vm10, %v4459_v33, %v2543_v44 }
 0x182   : > { %v2886_v31 = vadd.f32 %v4689_v8, %v2850_v60  ;;  %v2687_v59 = vsel %vm1279_vm11, %v2655_v1, %v2623_v51 }
 0x183   : > { %3423 = vmatmul.msk.bf16.gmra.mxu2 %vm1891_vm12, %v2687_v59  ;;  %v2778_v46 = vpop.f32.mrf.mxu2 }
 0x184   : > { %2918 = vst.msk [vmem:[%s4699_s22 + $0x20] sm:$0xff] %vm1279_vm11, %v2886_v31 }
 0x185   : > { %v2084_v43 = vpop.f32.mrf.mxu1 }
 0x186   : > { %v2085_v36 = vadd.f32 %v2084_v43, %v1945_v12  ;;  %v2551_v37 = vpop.permute.xlu1 %2550  ;;  %v4788_v14 = vpop.f32.mrf.mxu3 }
 0x187   : > { %v2663_v33 = vsel %vm1246_vm10, %v4480_v2, %v2551_v37  ;;  %v2633_v58 = vpop.permute.xlu2 %2632 }
 0x188   : > { %v2851_v63 = vadd.f32 %v2778_v46, %v2085_v36  ;;  %v2631_v30 = vpop.permute.xlu0 %2630 }
 0x189   : > { %v2695_v47 = vsel %vm1279_vm11, %v2663_v33, %v2631_v30 }
 0x18a   : > { %v2887_v18 = vadd.f32 %v4689_v8, %v2851_v63  ;;  %3427 = vmatmul.msk.bf16.gmra.mxu3 %vm1891_vm12, %v2695_v47 }
 0x18c   : > { %2919 = vst.msk [vmem:[%s4699_s22 + $0x28] sm:$0xff] %vm1279_vm11, %v2887_v18 }
 0x18d   : > { %v2781_v39 = vpop.f32.mrf.mxu2 }
 0x18e   : > { %v1152_v22 = vpop.permute.xlu1 %1151  ;;  %v4802_v59 = vpop.f32.mrf.mxu3 }
 0x18f   : > { %v1266_v25 = vsel %vm1246_vm10, %v4500_v19, %v1152_v22  ;;  %v2087_v35 = vpop.f32.mrf.mxu1  ;;  %v1235_v51 = vpop.permute.xlu2 %1234 }
 0x190   : > { %v1233_v26 = vpop.permute.xlu0 %1232 }
 0x191   : > { %v1299_v2 = vsel %vm1279_vm11, %v1266_v25, %v1233_v26 }
 0x192   : > { %3277 = vmatmul.msk.bf16.gmra.mxu1 %vm1891_vm12, %v1299_v2 }
 0x195   : > { %v1948_v29 = vpop.f32.mrf.mxu0  ;;  %v2783_v32 = vpop.f32.mrf.mxu2 }
 0x196   : > { %v2088_v57 = vadd.f32 %v2087_v35, %v1948_v29  ;;  %v1789_v49 = vpop.permute.xlu1 %1788 }
 0x197   : > { %v1853_v38 = vsel %vm1279_vm11, %v1821_v24, %v1789_v49  ;;  %v2089_v10 = vpop.f32.mrf.mxu1  ;;  %v2555_v11 = vpop.permute.xlu2 %2554 }
 0x198   : > { %v2852_v62 = vadd.f32 %v2781_v39, %v2088_v57  ;;  %v2553_v19 = vpop.permute.xlu0 %2552  ;;  %3249 = vmatmul.msk.bf16.gmra.mxu0 %vm1891_vm12, %v1853_v38  ;;  %v2667_v25 = vsel %vm1246_vm10, %v4605_v42, %v2555_v11 }
 0x199   : > { %v2665_v6 = vsel %vm1246_vm10, %v4527_v54, %v2553_v19 }
 0x19a   : > { %v2888_v48 = vadd.f32 %v4689_v8, %v2852_v62  ;;  %v2697_v4 = vsel %vm1279_vm11, %v2665_v6, %v2633_v58 }
 0x19b   : > { %3428 = vmatmul.msk.bf16.gmra.mxu3 %vm1891_vm12, %v2697_v4 }
 0x19c   : > { %2920 = vst.msk [vmem:[%s4699_s22 + $0x30] sm:$0xff] %vm1279_vm11, %v2888_v48 }
 0x19d   : > { %v1950_v52 = vpop.f32.mrf.mxu0 }
 0x19e   : > { %v2090_v28 = vadd.f32 %v2089_v10, %v1950_v52  ;;  %v2625_v13 = vpop.permute.xlu1 %2624  ;;  %v2786_v5 = vpop.f32.mrf.mxu2 }
 0x19f   : > { %v2689_v16 = vsel %vm1279_vm11, %v2657_v50, %v2625_v13  ;;  %v1156_v61 = vpop.permute.xlu2 %1155 }
 0x1a0   : > { %v2853_v54 = vadd.f32 %v2783_v32, %v2090_v28  ;;  %v1154_v56 = vpop.permute.xlu0 %1153  ;;  %3424 = vmatmul.msk.bf16.gmra.mxu2 %vm1891_vm12, %v2689_v16  ;;  %v2092_v41 = vpop.f32.mrf.mxu1  ;;  %v1270_v38 = vsel %vm1246_vm10, %v4630_v21, %v1156_v61 }
 0x1a1   : > { %v1268_v20 = vsel %vm1246_vm10, %v4555_v45, %v1154_v56 }
 0x1a2   : > { %v2889_v9 = vadd.f32 %v4689_v8, %v2853_v54  ;;  %v1301_v15 = vsel %vm1279_vm11, %v1268_v20, %v1235_v51 }
 0x1a3   : > { %3278 = vmatmul.msk.bf16.gmra.mxu1 %vm1891_vm12, %v1301_v15  ;;  %v4811_v18 = vpop.f32.mrf.mxu3 }
 0x1a4   : > { %2921 = vst.msk [vmem:[%s4699_s22 + $0x38] sm:$0xff] %vm1279_vm11, %v2889_v9 }
 0x1a6   : > { %v1711_v60 = vpop.permute.xlu1 %1710  ;;  %v2788_v30 = vpop.f32.mrf.mxu2 }
 0x1a7   : > { %v1953_v27 = vpop.f32.mrf.mxu0  ;;  %v1823_v44 = vsel %vm1246_vm10, %v4576_v7, %v1711_v60  ;;  %v1793_v26 = vpop.permute.xlu2 %1792 }
 0x1a8   : > { %v2093_v1 = vadd.f32 %v2092_v41, %v1953_v27  ;;  %v1791_v31 = vpop.permute.xlu0 %1790  ;;  %v2094_v36 = vpop.f32.mrf.mxu1 }
 0x1a9   : > { %v1855_v45 = vsel %vm1279_vm11, %v1823_v44, %v1791_v31 }
 0x1aa   : > { %v2854_v12 = vadd.f32 %v2786_v5, %v2093_v1  ;;  %3250 = vmatmul.msk.bf16.gmra.mxu0 %vm1891_vm12, %v1855_v45 }
 0x1ab   : > { %v2134_v24 = vpop.f32.mrf.mxu3 }
 0x1ac   : > { %v2890_v43 = vadd.f32 %v4689_v8, %v2854_v12 }
 0x1ae   : > { %2922 = vst.msk [vmem:[%s4699_s22 + $0x40] sm:$0xff] %vm1279_vm11, %v2890_v43  ;;  %v2547_v46 = vpop.permute.xlu1 %2546 }
 0x1af   : > { %v1955_v37 = vpop.f32.mrf.mxu0  ;;  %v2659_v7 = vsel %vm1246_vm10, %v4597_v0, %v2547_v46 }
 0x1b0   : > { %v2095_v63 = vadd.f32 %v2094_v36, %v1955_v37  ;;  %v2627_v33 = vpop.permute.xlu0 %2626 }
 0x1b1   : > { %v2691_v47 = vsel %vm1279_vm11, %v2659_v7, %v2627_v33 }
 0x1b2   : > { %v2855_v22 = vadd.f32 %v2788_v30, %v2095_v63  ;;  %3425 = vmatmul.msk.bf16.gmra.mxu2 %vm1891_vm12, %v2691_v47 }
 0x1b4   : > { %v2891_v58 = vadd.f32 %v4689_v8, %v2855_v22 }
 0x1b5   : > { %v4830_v48 = vpop.f32.mrf.mxu3 }
 0x1b6   : > { %2923 = vst.msk [vmem:[%s4699_s22 + $0x48] sm:$0xff] %vm1279_vm11, %v2891_v58  ;;  %v2635_v35 = vpop.permute.xlu1 %2634  ;;  %v2133_v58 = vadd.f32 %v4811_v18, %v4719_v17 }
 0x1b7   : > { %v2699_v0 = vsel %vm1279_vm11, %v2667_v25, %v2635_v35 }
 0x1b8   : > { %v1713_v2 = vpop.permute.xlu0 %1712  ;;  %3429 = vmatmul.msk.bf16.gmra.mxu3 %vm1891_vm12, %v2699_v0  ;;  %v1958_v57 = vpop.f32.mrf.mxu0 }
 0x1b9   : > { %v1825_v39 = vsel %vm1246_vm10, %v4623_v53, %v1713_v2 }
 0x1ba   : > { %v1857_v29 = vsel %vm1279_vm11, %v1825_v39, %v1793_v26 }
 0x1bb   : > { %3251 = vmatmul.msk.bf16.gmra.mxu0 %vm1891_vm12, %v1857_v29  ;;  %v2791_v49 = vpop.f32.mrf.mxu2 }
 0x1bd   : > { %v2097_v62 = vpop.f32.mrf.mxu1  ;;  %v4837_v50 = vpop.f32.mrf.mxu3 }
 0x1be   : > { %v2098_v42 = vadd.f32 %v2097_v62, %v1958_v57  ;;  %v1237_v19 = vpop.permute.xlu1 %1236 }
 0x1bf   : > { %v1303_v51 = vsel %vm1279_vm11, %v1270_v38, %v1237_v19 }
 0x1c0   : > { %v2856_v6 = vadd.f32 %v2791_v49, %v2098_v42  ;;  %3279 = vmatmul.msk.bf16.gmra.mxu1 %vm1891_vm12, %v1303_v51  ;;  %v1960_v10 = vpop.f32.mrf.mxu0  ;;  %v2135_v49 = vadd.f32 %v2134_v24, %v4731_v3  ;;  %v2138_v3 = vadd.f32 %v4830_v48, %v4743_v40 }
 0x1c2   : > { %v2892_v53 = vadd.f32 %v4689_v8, %v2856_v6 }
 0x1c3   : > { %v2793_v52 = vpop.f32.mrf.mxu2 }
 0x1c4   : > { %2924 = vst.msk [vmem:[%s4699_s22 + $0x50] sm:$0xff] %vm1279_vm11, %v2892_v53 }
 0x1c5   : > { %v2099_v4 = vpop.f32.mrf.mxu1 }
 0x1c6   : > { %v2100_v32 = vadd.f32 %v2099_v4, %v1960_v10  ;;  %v4839_v20 = vpop.f32.mrf.mxu3 }
 0x1c8   : > { %v2857_v28 = vadd.f32 %v2793_v52, %v2100_v32 }
 0x1ca   : > { %v2893_v21 = vadd.f32 %v4689_v8, %v2857_v28  ;;  %v2140_v28 = vadd.f32 %v4837_v50, %v4756_v34 }
 0x1cc   : > { %2925 = vst.msk [vmem:[%s4699_s22 + $0x58] sm:$0xff] %vm1279_vm11, %v2893_v21 }
 0x1cd   : > { %v2796_v54 = vpop.f32.mrf.mxu2 }
 0x1ce   : > { %v4844_v44 = vpop.f32.mrf.mxu3 }
 0x1cf   : > { %v2102_v13 = vpop.f32.mrf.mxu1 }
 0x1d5   : > { %v1963_v16 = vpop.f32.mrf.mxu0  ;;  %v2798_v41 = vpop.f32.mrf.mxu2 }
 0x1d6   : > { %v2103_v56 = vadd.f32 %v2102_v13, %v1963_v16 }
 0x1d7   : > { %v2104_v11 = vpop.f32.mrf.mxu1 }
 0x1d8   : > { %v2858_v9 = vadd.f32 %v2796_v54, %v2103_v56 }
 0x1da   : > { %v2894_v15 = vadd.f32 %v4689_v8, %v2858_v9 }
 0x1dc   : > { %2926 = vst.msk [vmem:[%s4699_s22 + $0x60] sm:$0xff] %vm1279_vm11, %v2894_v15 }
 0x1dd   : > { %v1965_v5 = vpop.f32.mrf.mxu0 }
 0x1de   : > { %v2105_v60 = vadd.f32 %v2104_v11, %v1965_v5  ;;  %v2801_v45 = vpop.f32.mrf.mxu2  ;;  %v2143_v11 = vadd.f32 %v4839_v20, %v4765_v23 }
 0x1e0   : > { %v2859_v27 = vadd.f32 %v2798_v41, %v2105_v60  ;;  %v2107_v31 = vpop.f32.mrf.mxu1 }
 0x1e2   : > { %v2895_v1 = vadd.f32 %v4689_v8, %v2859_v27 }
 0x1e3   : > { %v4849_v61 = vpop.f32.mrf.mxu3 }
 0x1e4   : > { %2927 = vst.msk [vmem:[%s4699_s22 + $0x68] sm:$0xff] %vm1279_vm11, %v2895_v1 }
 0x1e6   : > { %v2803_v33 = vpop.f32.mrf.mxu2 }
 0x1e7   : > { %v1968_v12 = vpop.f32.mrf.mxu0 }
 0x1e8   : > { %v2108_v43 = vadd.f32 %v2107_v31, %v1968_v12  ;;  %v2109_v37 = vpop.f32.mrf.mxu1 }
 0x1ea   : > { %v2860_v36 = vadd.f32 %v2801_v45, %v2108_v43  ;;  %v2145_v45 = vadd.f32 %v4844_v44, %v4773_v55 }
 0x1eb   : > { %v4854_v47 = vpop.f32.mrf.mxu3 }
 0x1ec   : > { %v2896_v46 = vadd.f32 %v4689_v8, %v2860_v36 }
 0x1ee   : > { %2928 = vst.msk [vmem:[%s4699_s22 + $0x70] sm:$0xff] %vm1279_vm11, %v2896_v46 }
 0x1ef   : > { %v1970_v7 = vpop.f32.mrf.mxu0 }
 0x1f0   : > { %v2110_v63 = vadd.f32 %v2109_v37, %v1970_v7 }
 0x1f2   : > { %v2861_v30 = vadd.f32 %v2803_v33, %v2110_v63 }
 0x1f4   : > { %v2897_v22 = vadd.f32 %v4689_v8, %v2861_v30 }
 0x1f5   : > { %v2806_v0 = vpop.f32.mrf.mxu2 }
 0x1f6   : > { %2929 = vst.msk [vmem:[%s4699_s22 + $0x78] sm:$0xff] %vm1279_vm11, %v2897_v22 }
 0x1f8   : > { %v1973_v25 = vpop.f32.mrf.mxu0 }
 0x1fb   : > { %v2826_v35 = vpop.f32.mrf.mxu3 }
 0x1fc   : > { %v2870_v26 = vadd.f32 %v2826_v35, %v2133_v58 }
 0x1fd   : > { %v2112_v2 = vpop.f32.mrf.mxu1  ;;  %v2808_v51 = vpop.f32.mrf.mxu2 }
 0x1fe   : > { %v2906_v39 = vadd.f32 %v4689_v8, %v2870_v26  ;;  %v2113_v29 = vadd.f32 %v2112_v2, %v1973_v25  ;;  %v2148_v25 = vadd.f32 %v4849_v61, %v4788_v14 }
 0x200   : > { %2938 = vst.msk [vmem:[%s4699_s22 + $0xc0] sm:$0xff] %vm1279_vm11, %v2906_v39  ;;  %v2862_v57 = vadd.f32 %v2806_v0, %v2113_v29  ;;  %v1975_v18 = vpop.f32.mrf.mxu0 }
 0x202   : > { %v2898_v62 = vadd.f32 %v4689_v8, %v2862_v57 }
 0x203   : > { %v2828_v42 = vpop.f32.mrf.mxu3 }
 0x204   : > { %2930 = vst.msk [vmem:[%s4699_s22 + $0x80] sm:$0xff] %vm1279_vm11, %v2898_v62  ;;  %v2871_v17 = vadd.f32 %v2828_v42, %v2135_v49  ;;  %v2150_v62 = vadd.f32 %v4854_v47, %v4802_v59 }
 0x205   : > { %v2114_v38 = vpop.f32.mrf.mxu1 }
 0x206   : > { %v2907_v19 = vadd.f32 %v4689_v8, %v2871_v17  ;;  %v2115_v6 = vadd.f32 %v2114_v38, %v1975_v18  ;;  %v2811_v21 = vpop.f32.mrf.mxu2 }
 0x208   : > { %2939 = vst.msk [vmem:[%s4699_s22 + $0xc8] sm:$0xff] %vm1279_vm11, %v2907_v19  ;;  %v2863_v53 = vadd.f32 %v2808_v51, %v2115_v6 }
 0x20a   : > { %v2899_v10 = vadd.f32 %v4689_v8, %v2863_v53 }
 0x20c   : > { %2931 = vst.msk [vmem:[%s4699_s22 + $0x88] sm:$0xff] %vm1279_vm11, %v2899_v10 }
 0x20d   : > { %v2831_v24 = vpop.f32.mrf.mxu3 }
 0x20e   : > { %v2872_v4 = vadd.f32 %v2831_v24, %v2138_v3  ;;  %v2813_v41 = vpop.f32.mrf.mxu2 }
 0x20f   : > { %v2117_v52 = vpop.f32.mrf.mxu1 }
 0x210   : > { %v2908_v32 = vadd.f32 %v4689_v8, %v2872_v4 }
 0x212   : > { %2940 = vst.msk [vmem:[%s4699_s22 + $0xd0] sm:$0xff] %vm1279_vm11, %v2908_v32 }
 0x215   : > { %v2833_v13 = vpop.f32.mrf.mxu3  ;;  %v1978_v54 = vpop.f32.mrf.mxu0 }
 0x216   : > { %v2873_v16 = vadd.f32 %v2833_v13, %v2140_v28  ;;  %v2118_v56 = vadd.f32 %v2117_v52, %v1978_v54 }
 0x217   : > { %v2119_v15 = vpop.f32.mrf.mxu1 }
 0x218   : > { %v2909_v40 = vadd.f32 %v4689_v8, %v2873_v16  ;;  %v2864_v48 = vadd.f32 %v2811_v21, %v2118_v56 }
 0x21a   : > { %2941 = vst.msk [vmem:[%s4699_s22 + $0xd8] sm:$0xff] %vm1279_vm11, %v2909_v40  ;;  %v2900_v9 = vadd.f32 %v4689_v8, %v2864_v48 }
 0x21c   : > { %2932 = vst.msk [vmem:[%s4699_s22 + $0x90] sm:$0xff] %vm1279_vm11, %v2900_v9 }
 0x21d   : > { %v1980_v34 = vpop.f32.mrf.mxu0 }
 0x21e   : > { %v2836_v50 = vpop.f32.mrf.mxu3  ;;  %v2120_v5 = vadd.f32 %v2119_v15, %v1980_v34 }
 0x21f   : > { %v2874_v60 = vadd.f32 %v2836_v50, %v2143_v11 }
 0x220   : > { %v2865_v27 = vadd.f32 %v2813_v41, %v2120_v5  ;;  %v2122_v23 = vpop.f32.mrf.mxu1 }
 0x221   : > { %v2910_v1 = vadd.f32 %v4689_v8, %v2874_v60 }
 0x222   : > { %v2901_v31 = vadd.f32 %v4689_v8, %v2865_v27 }
 0x223   : > { %2942 = vst.msk [vmem:[%s4699_s22 + $0xe0] sm:$0xff] %vm1279_vm11, %v2910_v1  ;;  %v2816_v12 = vpop.f32.mrf.mxu2 }
 0x224   : > { %2933 = vst.msk [vmem:[%s4699_s22 + $0x98] sm:$0xff] %vm1279_vm11, %v2901_v31 }
 0x226   : > { %v2838_v20 = vpop.f32.mrf.mxu3 }
 0x227   : > { %v2875_v43 = vadd.f32 %v2838_v20, %v2145_v45  ;;  %v1983_v36 = vpop.f32.mrf.mxu0 }
 0x228   : > { %v2123_v46 = vadd.f32 %v2122_v23, %v1983_v36  ;;  %v2124_v55 = vpop.f32.mrf.mxu1 }
 0x229   : > { %v2911_v37 = vadd.f32 %v4689_v8, %v2875_v43 }
 0x22a   : > { %v2866_v7 = vadd.f32 %v2816_v12, %v2123_v46 }
 0x22b   : > { %2943 = vst.msk [vmem:[%s4699_s22 + $0xe8] sm:$0xff] %vm1279_vm11, %v2911_v37  ;;  %v2818_v30 = vpop.f32.mrf.mxu2 }
 0x22c   : > { %v2902_v63 = vadd.f32 %v4689_v8, %v2866_v7 }
 0x22e   : > { %2934 = vst.msk [vmem:[%s4699_s22 + $0xa0] sm:$0xff] %vm1279_vm11, %v2902_v63 }
 0x22f   : > { %v1985_v44 = vpop.f32.mrf.mxu0 }
 0x230   : > { %v2125_v33 = vadd.f32 %v2124_v55, %v1985_v44 }
 0x232   : > { %v2867_v22 = vadd.f32 %v2818_v30, %v2125_v33 }
 0x234   : > { %v2903_v58 = vadd.f32 %v4689_v8, %v2867_v22 }
 0x235   : > { %v2821_v2 = vpop.f32.mrf.mxu2 }
 0x236   : > { %2935 = vst.msk [vmem:[%s4699_s22 + $0xa8] sm:$0xff] %vm1279_vm11, %v2903_v58 }
 0x238   : > { %v1988_v35 = vpop.f32.mrf.mxu0 }
 0x23b   : > { %v2841_v26 = vpop.f32.mrf.mxu3 }
 0x23c   : > { %v2876_v0 = vadd.f32 %v2841_v26, %v2148_v25 }
 0x23d   : > { %v2127_v39 = vpop.f32.mrf.mxu1  ;;  %v2823_v6 = vpop.f32.mrf.mxu2 }
 0x23e   : > { %v2912_v29 = vadd.f32 %v4689_v8, %v2876_v0  ;;  %v2128_v57 = vadd.f32 %v2127_v39, %v1988_v35 }
 0x240   : > { %2944 = vst.msk [vmem:[%s4699_s22 + $0xf0] sm:$0xff] %vm1279_vm11, %v2912_v29  ;;  %v2868_v49 = vadd.f32 %v2821_v2, %v2128_v57  ;;  %v1990_v61 = vpop.f32.mrf.mxu0 }
 0x242   : > { %v2904_v42 = vadd.f32 %v4689_v8, %v2868_v49 }
 0x243   : > { %v2843_v17 = vpop.f32.mrf.mxu3 }
 0x244   : > { %2936 = vst.msk [vmem:[%s4699_s22 + $0xb0] sm:$0xff] %vm1279_vm11, %v2904_v42  ;;  %v2877_v14 = vadd.f32 %v2843_v17, %v2150_v62 }
 0x245   : > { %v2129_v18 = vpop.f32.mrf.mxu1 }
 0x246   : > { %v2913_v38 = vadd.f32 %v4689_v8, %v2877_v14  ;;  %v2130_v19 = vadd.f32 %v2129_v18, %v1990_v61 }
 0x248   : > { %2945 = vst.msk [vmem:[%s4699_s22 + $0xf8] sm:$0xff] %vm1279_vm11, %v2913_v38  ;;  %v2869_v51 = vadd.f32 %v2823_v6, %v2130_v19 }
 0x24a   : > { %v2905_v53 = vadd.f32 %v4689_v8, %v2869_v51 }
 0x24c   : > { %2937 = vst.msk [vmem:[%s4699_s22 + $0xb8] sm:$0xff] %vm1279_vm11, %v2905_v53 }
 0x24d PF: > { %s13_s14 = sadd.s32 1, %s3579_s14   ;;  %s4941_s12 = smov %s3575_s13 }
 0x24e   : > { %p10_p5 = scmp.ge.s32.totalorder %s13_s14, 4   ;;  %s4942_s13 = smov %s4944_s15 }
 0x250   :  { %12 = sbr.rel (!%p10_p5) target bundleno = 2 (0x2), region = 72 }

// kernel: bottleneck_irse_v2_forward.4
= control target key start
LH: loop header
LB: loop body
LE: loop exit
PB: predicated region body
PF: predicated region fallthrough
CT: control target
= control target key end

     0   :  { %s3901_s18 = smov 0   ;;  %s3903_s19 = smov 0   ;;  %s5355_s0 = inlined_call_operand.vmem [shape: f32[2,16,16,16], index: 0, kind: input, shape index: {}]   ;;  %s5356_s1 = inlined_call_operand.vmem [shape: bf16[3,48,32], index: 1, kind: input, shape index: {}]   ;;  %s5357_s2 = inlined_call_operand.vmem [shape: f32[1,32], index: 2, kind: input, shape index: {}]   ;;  %s5358_s3 = inlined_call_operand.vmem [shape: f32[1,32], index: 3, kind: input, shape index: {}]   ;;  %s5359_s4 = inlined_call_operand.vmem [shape: f32[2,16], index: 4, kind: input, shape index: {}]   ;;  %s5360_s5 = inlined_call_operand.vmem [shape: bf16[2,256,32], index: 5, kind: output, shape index: {}]  }
   0x1   :  { %s3905_s20 = smov 0  }
   0x2 LB: > { %s27_s21 = sadd.s32 1, %s3862_s19  ;;  %p3327_p0 = scmp.ge.s32.totalorder %s3866_s20, 1  ;;  %s3866_s20 = sphi %s3905_s20, %s15_s20   ;;  %s3862_s19 = sphi %s3903_s19, %s5368_s19   ;;  %s3858_s18 = sphi %s3901_s18, %s5367_s18  }
   0x3   : > { %p29_p1 = scmp.ge.s32.totalorder %s27_s21, 2  ;;  %p201_p2 = scmp.lt.s32.totalorder %s3866_s20, 3 }
   0x5   : > { %s5370_s21 = smov (%p29_p1, %s27_s21), 0  ;;  %p202_p3 = pnand %p3327_p0, %p201_p2 }
   0x6   : > { %p233_p4 = scmp.lt.s32.totalorder (!%p202_p3), %s3858_s18, 1  ;;  %s3869_s28 = smov (!%p202_p3), 32  }
   0x7   : > { %205 = sbr.rel (%p202_p3) target bundleno = 597 (0x255), region = 40  ;;  %s3870_s29 = smov (!%p202_p3), 16  }
   0xc   : > { %vm384_vm0 = vcmask 125952   ;;  %vm387_vm1 = vcmask 122880   ;;  %v3868_v0 = vmov 0   ;;  %s5372_s18 = smov (!%p233_p4, %s3858_s18), 1  ;;  %vm1286_vm2 = vcmask 1046528  }
   0xd   : > { %385 = vst.msk [vmem:[#allocation2] sm:$0xf] %vm384_vm0, %v3868_v0  ;;  %s3718_s22 = sshll.u32 %s5372_s18, 8  ;;  %v285_v7 = vld [vmem:[%s5359_s4] sm:$0x3]  ;;  %vm1367_vm10 = vcmask 130048  }
   0xe   : > { %386 = vst.msk [vmem:[#allocation2 + $0x4] sm:$0xf] %vm384_vm0, %v3868_v0  ;;  %s3966_s27 = scalar_lea.vmem %s5355_s0, %s3718_s22  ;;  %v3974_v9 = vperm.slane %v285_v7, 0  ;;  %v3987_v13 = vperm.slane %v285_v7, 1  ;;  %vm440_vm3 = vsmask.f32 256 }
   0xf   : > { %388 = vst.msk [vmem:[#allocation2 + $0x8] sm:$0x1] %vm387_vm1, %v3868_v0  ;;  %v277_v10 = vld [vmem:[%s3966_s27 + $0xc0] sm:$0xff]  ;;  %v278_v11 = vld [vmem:[%s3966_s27 + $0xc8] sm:$0xff]  ;;  %v256_v15 = vld [vmem:[%s3966_s27 + $0x18] sm:$0xff]  ;;  %vm1400_vm11 = vcmask 261120  }
  0x10   : > { %389 = vst.msk [vmem:[#allocation2 + $0xc] sm:$0xf] %vm384_vm0, %v3868_v0  ;;  %v311_v12 = vmul.f32 %v3974_v9, %v277_v10  ;;  %v312_v14 = vmul.f32 %v3974_v9, %v278_v11  ;;  %v255_v16 = vld [vmem:[%s3966_s27 + $0x10] sm:$0xff]  ;;  %v290_v18 = vmul.f32 %v3974_v9, %v256_v15  ;;  %v254_v21 = vld [vmem:[%s3966_s27 + $0x8] sm:$0xff]  ;;  %v253_v26 = vld [vmem:[%s3966_s27] sm:$0xff]  ;;  %vm2012_vm12 = vcmask 392192  }
  0x11   : > { %390 = vst.msk [vmem:[#allocation2 + $0x10] sm:$0xf] %vm384_vm0, %v3868_v0  ;;  %v289_v20 = vmul.f32 %v3974_v9, %v255_v16  ;;  %v288_v22 = vmul.f32 %v3974_v9, %v254_v21  ;;  %v258_v23 = vld [vmem:[%s3966_s27 + $0x28] sm:$0xff]  ;;  %v257_v29 = vld [vmem:[%s3966_s27 + $0x20] sm:$0xff]  ;;  %v287_v31 = vmul.f32 %v3974_v9, %v253_v26  ;;  %v279_v44 = vld [vmem:[%s3966_s27 + $0xd0] sm:$0xff]  ;;  %s3719_s6 = sshll.u32 %s5372_s18, 7 }
  0x12   : > { %391 = vst.msk [vmem:[#allocation2 + $0x14] sm:$0x1] %vm387_vm1, %v3868_v0  ;;  %v344_v17 = vadd.f32 %v3987_v13, %v311_v12  ;;  %v345_v19 = vadd.f32 %v3987_v13, %v312_v14  ;;  %v323_v25 = vadd.f32 %v3987_v13, %v290_v18  ;;  %v292_v30 = vmul.f32 %v3974_v9, %v258_v23  ;;  %v280_v45 = vld [vmem:[%s3966_s27 + $0xd8] sm:$0xff]  ;;  %vm4138_vm8 = vmand %vm387_vm1, %vm440_vm3  ;;  %s5096_s9 = scalar_lea.vmem %s5360_s5, %s3719_s6 }
  0x13   : > { %392 = vst.msk [vmem:[#allocation2 + $0x18] sm:$0xf] %vm384_vm0, %v3868_v0  ;;  %v322_v28 = vadd.f32 %v3987_v13, %v289_v20  ;;  %v321_v32 = vadd.f32 %v3987_v13, %v288_v22  ;;  %v291_v35 = vmul.f32 %v3974_v9, %v257_v29  ;;  %v320_v39 = vadd.f32 %v3987_v13, %v287_v31 }
  0x14   : > { %393 = vst.msk [vmem:[#allocation2 + $0x1c] sm:$0xf] %vm384_vm0, %v3868_v0  ;;  %v376_v24 = vpack.c.bf16 %v344_v17, %v344_v17  ;;  %v377_v27 = vpack.c.bf16 %v345_v19, %v345_v19  ;;  %v4030_v34 = vpack.c.bf16 %v323_v25, %v323_v25  ;;  %v325_v38 = vadd.f32 %v3987_v13, %v292_v30 }
  0x15   : > { %v3935_v1 = vld [vmem:[#allocation2] sm:$0xff]  ;;  %394 = vst.msk [vmem:[#allocation2 + $0x20] sm:$0x1] %vm387_vm1, %v3868_v0  ;;  %v4035_v37 = vpack.c.bf16 %v322_v28, %v322_v28  ;;  %v4041_v40 = vpack.c.bf16 %v321_v32, %v321_v32  ;;  %v324_v43 = vadd.f32 %v3987_v13, %v291_v35  ;;  %v4062_v51 = vpack.c.bf16 %v320_v39, %v320_v39 }
  0x16   : > { %v887_v2 = vld [vmem:[#allocation2 + $0x8] sm:$0x1]  ;;  %395 = vst.msk [vmem:[#allocation2 + $0x24] sm:$0xf] %vm384_vm0, %v3868_v0  ;;  %v1287_v5 = vrot.slane %v3935_v1, 1  ;;  %v648_v33 = vshrl.u32 %v376_v24, 16  ;;  %v4058_v49 = vpack.c.bf16 %v325_v38, %v325_v38  ;;  %v313_v53 = vmul.f32 %v3974_v9, %v279_v44 }
  0x17   : > { %v1029_v3 = vunpack.c.l.b16 %v887_v2  ;;  %396 = vst.msk [vmem:[#allocation2 + $0x28] sm:$0xf] %vm384_vm0, %v3868_v0  ;;  %v656_v36 = vshrl.u32 %v377_v27, 16  ;;  %v469_v42 = vshrl.u32 %v4030_v34, 16  ;;  %v651_v46 = vshll.u32 %v376_v24, 16 }
  0x18   : > { %397 = vst.msk [vmem:[#allocation2 + $0x2c] sm:$0x1] %vm387_vm1, %v3868_v0  ;;  %v4047_v41 = vrot.slane %v648_v33, 7  ;;  %v461_v48 = vshrl.u32 %v4035_v37, 16  ;;  %v659_v50 = vshll.u32 %v377_v27, 16  ;;  %v452_v52 = vshrl.u32 %v4041_v40, 16 }
  0x19   : > { %v3947_v4 = vpack.c.b16 %v1029_v3, %v1029_v3  ;;  %398 = vst.msk [vmem:[#allocation2 + $0x30] sm:$0xf] %vm384_vm0, %v3868_v0  ;;  %v4055_v47 = vrot.slane %v656_v36, 7  ;;  %v314_v54 = vmul.f32 %v3974_v9, %v280_v45  ;;  %v4071_v55 = vrot.slane %v469_v42, 7  ;;  %v281_v36 = vld [vmem:[%s3966_s27 + $0xe0] sm:$0xff] }
  0x1a   : > { %399 = vst.msk [vmem:[#allocation2 + $0x34] sm:$0xf] %vm384_vm0, %v3868_v0  ;;  %v4073_v56 = vpack.c.bf16 %v324_v43, %v324_v43  ;;  %v346_v57 = vadd.f32 %v3987_v13, %v313_v53  ;;  %vm441_vm4 = vsmask.f32 4368  ;;  %v4079_v58 = vor.u32 %v651_v46, %v4047_v41  ;;  %v776_v38 = vld [vmem:[#allocation2 + $0x18] sm:$0xf] }
  0x1b   : > { %v1288_v6 = vrot.slane %v3947_v4, 1  ;;  %400 = vst.msk [vmem:[#allocation2 + $0x38] sm:$0x1] %vm387_vm1, %v3868_v0  ;;  %v4081_v59 = vrot.slane %v461_v48, 7  ;;  %v486_v60 = vshrl.u32 %v4058_v49, 16  ;;  %v654_v61 = vrot.slane %v4047_v41, 4  ;;  %vm4114_vm6 = vmor %vm440_vm3, %vm441_vm4 }
  0x1c   : > { %401 = vst.msk [vmem:[#allocation2 + $0x3c] sm:$0xf] %vm384_vm0, %v3868_v0  ;;  %v661_v62 = vor.u32 %v659_v50, %v4055_v47  ;;  %v444_v63 = vshrl.u32 %v4062_v51, 16  ;;  %v4089_v2 = vrot.slane %v452_v52, 7  ;;  %v663_v3 = vrot.slane %v4055_v47, 4 }
  0x1d   : > { %v1289_v8 = vsel %vm1286_vm2, %v1287_v5, %v1288_v6  ;;  %402 = vst.msk [vmem:[#allocation2 + $0x40] sm:$0xf] %vm384_vm0, %v3868_v0  ;;  %vm765_vm5 = vsmask.f32 7938  ;;  %v464_v5 = vshll.u32 %v4035_v37, 16  ;;  %v347_v6 = vadd.f32 %v3987_v13, %v314_v54 }
  0x1e   : > { %1335 = vrot.lane.b32.xlu0 %v1289_v8, %s3869_s28  ;;  %403 = vst.msk [vmem:[#allocation2 + $0x44] sm:$0x1] %vm387_vm1, %v3868_v0  ;;  %v472_v7 = vshll.u32 %v4030_v34, 16  ;;  %v476_v8 = vrot.slane %v4071_v55, 4  ;;  %v478_v10 = vshrl.u32 %v4073_v56, 16  ;;  %v4101_v11 = vpack.c.bf16 %v346_v57, %v346_v57  ;;  %vm4127_vm7 = vmand %vm384_vm0, %vm765_vm5 }
  0x1f   : > { %404 = vst.msk [vmem:[#allocation2 + $0x48] sm:$0xf] %vm384_vm0, %v3868_v0  ;;  %v467_v12 = vrot.slane %v4081_v59, 4  ;;  %v1065_v14 = vshll.u32 %v3935_v1, 16  ;;  %v481_v15 = vshll.u32 %v4073_v56, 16  ;;  %v4108_v16 = vrot.slane %v486_v60, 7 }
  0x20   : > { %405 = vst.msk [vmem:[#allocation2 + $0x4c] sm:$0xf] %vm384_vm0, %v3868_v0  ;;  %v4118_v18 = vrot.slane %v444_v63, 7  ;;  %v447_v19 = vshll.u32 %v4062_v51, 16  ;;  %v459_v20 = vrot.slane %v4089_v2, 4  ;;  %v489_v21 = vshll.u32 %v4058_v49, 16 }
  0x21   : > { %406 = vst.msk [vmem:[#allocation2 + $0x50] sm:$0x1] %vm387_vm1, %v3868_v0  ;;  %v1063_v24 = vshrl.u32 %v3935_v1, 16  ;;  %v1067_v25 = vrot.slane %v1065_v14, 1  ;;  %v4132_v26 = vpack.c.bf16 %v347_v6, %v347_v6  ;;  %v1070_v28 = vshll.u32 %v3947_v4, 16  ;;  %v282_v4 = vld [vmem:[%s3966_s27 + $0xe8] sm:$0xff] }
  0x22   : > { %407 = vst.msk [vmem:[#allocation2 + $0x54] sm:$0xf] %vm384_vm0, %v3868_v0  ;;  %v455_v29 = vshll.u32 %v4041_v40, 16  ;;  %v4144_v30 = vrot.slane %v478_v10, 7  ;;  %v665_v1 = vshrl.u32 %v4101_v11, 16  ;;  %v662_v31 = vsel %vm4114_vm6, %v654_v61, %v661_v62 }
  0x23   : > { %408 = vst.msk [vmem:[#allocation2 + $0x58] sm:$0xf] %vm384_vm0, %v3868_v0  ;;  %v466_v33 = vor.u32 %v464_v5, %v4081_v59  ;;  %v474_v34 = vor.u32 %v472_v7, %v4071_v55  ;;  %v1068_v35 = vor.u32 %v1067_v25, %v1063_v24  ;;  %v1072_v39 = vrot.slane %v1070_v28, 1  ;;  %v780_v46 = vld [vmem:[#allocation2 + $0x20] sm:$0x1] }
  0x24   : > { %409 = vst.msk [vmem:[#allocation2 + $0x5c] sm:$0x1] %vm387_vm1, %v3868_v0  ;;  %v315_v40 = vmul.f32 %v3974_v9, %v281_v36  ;;  %v316_v41 = vmul.f32 %v3974_v9, %v282_v4  ;;  %vm1061_vm9 = vsmask.f32 7424  ;;  %v449_v42 = vor.u32 %v447_v19, %v4118_v18  ;;  %v773_v56 = vld [vmem:[#allocation2 + $0x14] sm:$0x1] }
  0x25   : > { %410 = vst.msk [vmem:[#allocation2 + $0x60] sm:$0xf] %vm384_vm0, %v3868_v0  ;;  %v450_v43 = vrot.slane %v4118_v18, 4  ;;  %v673_v44 = vshrl.u32 %v4132_v26, 16  ;;  %v1073_v47 = vsel %vm1061_vm9, %v1068_v35, %v1072_v39  ;;  %v777_v50 = vsel %vm4127_vm7, %v466_v33, %v776_v38 }
  0x26   : > { %411 = vst.msk [vmem:[#allocation2 + $0x64] sm:$0xf] %vm384_vm0, %v3868_v0  ;;  %v348_v48 = vadd.f32 %v3987_v13, %v315_v40  ;;  %v349_v49 = vadd.f32 %v3987_v13, %v316_v41  ;;  %1254 = vrot.lane.b32.xlu2 %v1073_v47, %s3870_s29  ;;  %v457_v51 = vor.u32 %v455_v29, %v4089_v2  ;;  %v667_v52 = vrot.slane %v665_v1, 7 }
  0x27   : > { %412 = vst.msk [vmem:[#allocation2 + $0x68] sm:$0x1] %vm387_vm1, %v3868_v0  ;;  %v668_v53 = vshll.u32 %v4101_v11, 16  ;;  %v475_v54 = vsel %vm4114_vm6, %v467_v12, %v474_v34  ;;  %v676_v57 = vshll.u32 %v4132_v26, 16  ;;  %v781_v60 = vsel %vm4138_vm8, %v476_v8, %v780_v46  ;;  %v787_v12 = vld [vmem:[#allocation2 + $0x2c] sm:$0x1] }
  0x28   : > { %413 = vst.msk [vmem:[#allocation2 + $0x6c] sm:$0xf] %vm384_vm0, %v3868_v0  ;;  %v381_v59 = vpack.c.bf16 %v349_v49, %v349_v49  ;;  %v483_v61 = vor.u32 %v481_v15, %v4144_v30  ;;  %v484_v62 = vrot.slane %v4144_v30, 4  ;;  %v491_v63 = vor.u32 %v489_v21, %v4108_v16 }
  0x29   : > { %414 = vst.msk [vmem:[#allocation2 + $0x70] sm:$0xf] %vm384_vm0, %v3868_v0  ;;  %v675_v6 = vrot.slane %v673_v44, 7  ;;  %v458_v55 = vsel %vm4114_vm6, %v450_v43, %v457_v51  ;;  %v774_v8 = vsel %vm4138_vm8, %v459_v20, %v773_v56  ;;  %v493_v11 = vrot.slane %v4108_v16, 4 }
  0x2a   : > { %415 = vst.msk [vmem:[#allocation2 + $0x74] sm:$0x1] %vm387_vm1, %v3868_v0  ;;  %v690_v10 = vshrl.u32 %v381_v59, 16  ;;  %v670_v14 = vor.u32 %v668_v53, %v667_v52  ;;  %v671_v15 = vrot.slane %v667_v52, 4  ;;  %v693_v26 = vshll.u32 %v381_v59, 16  ;;  %v260_v52 = vld [vmem:[%s3966_s27 + $0x38] sm:$0xff] }
  0x2b   : > { %416 = vst.msk [vmem:[#allocation2 + $0x78] sm:$0xf] %vm384_vm0, %v3868_v0  ;;  %v678_v18 = vor.u32 %v676_v57, %v675_v6  ;;  %v492_v2 = vsel %vm4114_vm6, %v484_v62, %v491_v63  ;;  %v680_v16 = vrot.slane %v675_v6, 4  ;;  %v788_v28 = vsel %vm4138_vm8, %v493_v11, %v787_v12  ;;  %v259_v62 = vld [vmem:[%s3966_s27 + $0x30] sm:$0xff] }
  0x2c   : > { %417 = vst.msk [vmem:[#allocation2 + $0x7c] sm:$0xf] %vm384_vm0, %v3868_v0  ;;  %v692_v25 = vrot.slane %v690_v10, 7  ;;  %vm3199_vm13 = vcmask 257024  }
  0x2d   : > { %418 = vst.msk [vmem:[#allocation2 + $0x80] sm:$0x1] %vm387_vm1, %v3868_v0  ;;  %v679_v1 = vsel %vm4114_vm6, %v671_v15, %v678_v18  ;;  %v293_v18 = vmul.f32 %v3974_v9, %v259_v62 }
  0x2e   : > { %419 = vst.msk [vmem:[#allocation2 + $0x84] sm:$0xf] %vm384_vm0, %v3868_v0  ;;  %v695_v4 = vor.u32 %v693_v26, %v692_v25  ;;  %v697_v40 = vrot.slane %v692_v25, 4 }
  0x2f   : > { %420 = vst.msk [vmem:[#allocation2 + $0x88] sm:$0xf] %vm384_vm0, %v3868_v0 }
  0x30   : > { %421 = vst.msk [vmem:[#allocation2 + $0x8c] sm:$0x1] %vm387_vm1, %v3868_v0 }
  0x31   : > { %422 = vst.msk [vmem:[#allocation2 + $0x90] sm:$0xf] %vm384_vm0, %v3868_v0 }
  0x32   : > { %423 = vst.msk [vmem:[#allocation2 + $0x94] sm:$0xf] %vm384_vm0, %v3868_v0 }
  0x33   : > { %424 = vst.msk [vmem:[#allocation2 + $0x98] sm:$0x1] %vm387_vm1, %v3868_v0 }
  0x34   : > { %425 = vst.msk [vmem:[#allocation2 + $0x9c] sm:$0xf] %vm384_vm0, %v3868_v0 }
  0x35   : > { %426 = vst.msk [vmem:[#allocation2 + $0xa0] sm:$0xf] %vm384_vm0, %v3868_v0 }
  0x36   : > { %427 = vst.msk [vmem:[#allocation2 + $0xa4] sm:$0x1] %vm387_vm1, %v3868_v0 }
  0x37   : > { %428 = vst.msk [vmem:[#allocation2 + $0xa8] sm:$0xf] %vm384_vm0, %v3868_v0 }
  0x38   : > { %429 = vst.msk [vmem:[#allocation2 + $0xac] sm:$0xf] %vm384_vm0, %v3868_v0 }
  0x39   : > { %430 = vst.msk [vmem:[#allocation2 + $0xb0] sm:$0x1] %vm387_vm1, %v3868_v0 }
  0x3a   : > { %431 = vst.msk [vmem:[#allocation2 + $0xb4] sm:$0xf] %vm384_vm0, %v3868_v0 }
  0x3b   : > { %432 = vst.msk [vmem:[#allocation2 + $0xb8] sm:$0xf] %vm384_vm0, %v3868_v0  ;;  %v853_v23 = vld [vmem:[#allocation2 + $0x9c] sm:$0xf] }
  0x3c   : > { %433 = vst.msk [vmem:[#allocation2 + $0xbc] sm:$0x1] %vm387_vm1, %v3868_v0  ;;  %v854_v37 = vsel %vm4127_vm7, %v4079_v58, %v853_v23  ;;  %v380_v58 = vpack.c.bf16 %v348_v48, %v348_v48 }
  0x3d   : > { %434 = vst.msk [vmem:[#allocation2 + $0xc0] sm:$0xf] %vm384_vm0, %v3868_v0  ;;  %v857_v32 = vld [vmem:[#allocation2 + $0xa4] sm:$0x1] }
  0x3e   : > { %435 = vst.msk [vmem:[#allocation2 + $0xc4] sm:$0xf] %vm384_vm0, %v3868_v0  ;;  %v858_v45 = vsel %vm4138_vm8, %v663_v3, %v857_v32  ;;  %v783_v3 = vld [vmem:[#allocation2 + $0x24] sm:$0xf]  ;;  %v682_v7 = vshrl.u32 %v380_v58, 16  ;;  %v685_v21 = vshll.u32 %v380_v58, 16 }
  0x3f   : > { %436 = vst.msk [vmem:[#allocation2 + $0xc8] sm:$0x1] %vm387_vm1, %v3868_v0  ;;  %v784_v23 = vsel %vm4127_vm7, %v483_v61, %v783_v3  ;;  %v860_v24 = vld [vmem:[#allocation2 + $0xa8] sm:$0xf] }
  0x40   : > { %437 = vst.msk [vmem:[#allocation2 + $0xcc] sm:$0xf] %vm384_vm0, %v3868_v0  ;;  %v684_v19 = vrot.slane %v682_v7, 7  ;;  %v864_v29 = vld [vmem:[#allocation2 + $0xb0] sm:$0x1]  ;;  %v294_v7 = vmul.f32 %v3974_v9, %v260_v52 }
  0x41   : > { %438 = vst.msk [vmem:[#allocation2 + $0xd0] sm:$0xf] %vm384_vm0, %v3868_v0  ;;  %v865_v39 = vsel %vm4138_vm8, %v680_v16, %v864_v29 }
  0x42   : > { %439 = vst.msk [vmem:[#allocation2 + $0xd4] sm:$0x1] %vm387_vm1, %v3868_v0  ;;  %v767_v0 = vld [vmem:[#allocation2 + $0xc] sm:$0xf]  ;;  %v687_v32 = vor.u32 %v685_v21, %v684_v19  ;;  %v688_v33 = vrot.slane %v684_v19, 4 }
  0x43   : > { %855 = vst [vmem:[#allocation2 + $0x9c] sm:$0xf] %v854_v37  ;;  %v768_v5 = vsel %vm4127_vm7, %v449_v42, %v767_v0  ;;  %v867_v37 = vld [vmem:[#allocation2 + $0xb4] sm:$0xf]  ;;  %v871_v41 = vld [vmem:[#allocation2 + $0xbc] sm:$0x1] }
  0x44   : > { %856 = vst.msk [vmem:[#allocation2 + $0xa0] sm:$0xf] %vm384_vm0, %v662_v31  ;;  %v861_v31 = vsel %vm4127_vm7, %v670_v14, %v860_v24  ;;  %v868_v48 = vsel %vm4127_vm7, %v687_v32, %v867_v37  ;;  %v696_v0 = vsel %vm4114_vm6, %v688_v33, %v695_v4  ;;  %v872_v57 = vsel %vm4138_vm8, %v697_v40, %v871_v41 }
  0x45   : > { %859 = vst [vmem:[#allocation2 + $0xa4] sm:$0x1] %v858_v45 }
  0x46   : > { %778 = vst [vmem:[#allocation2 + $0x18] sm:$0xf] %v777_v50 }
  0x47   : > { %779 = vst.msk [vmem:[#allocation2 + $0x1c] sm:$0xf] %vm384_vm0, %v475_v54 }
  0x48   : > { %782 = vst [vmem:[#allocation2 + $0x20] sm:$0x1] %v781_v60 }
  0x49   : > { %769 = vst [vmem:[#allocation2 + $0xc] sm:$0xf] %v768_v5 }
  0x4a   : > { %770 = vst.msk [vmem:[#allocation2 + $0x10] sm:$0xf] %vm384_vm0, %v458_v55 }
  0x4b   : > { %v3751_v20 = vld [vmem:[#allocation2 + $0x9c] sm:$0xff]  ;;  %775 = vst [vmem:[#allocation2 + $0x14] sm:$0x1] %v774_v8 }
  0x4c   : > { %v3434_v30 = vld [vmem:[#allocation2 + $0xa4] sm:$0x1]  ;;  %785 = vst [vmem:[#allocation2 + $0x24] sm:$0xf] %v784_v23  ;;  %v1764_v35 = vshrl.u32 %v3751_v20, 16  ;;  %v1766_v36 = vshll.u32 %v3751_v20, 16 }
  0x4d   : > { %v1599_v34 = vunpack.c.l.b16 %v3434_v30  ;;  %786 = vst.msk [vmem:[#allocation2 + $0x28] sm:$0xf] %vm384_vm0, %v492_v2  ;;  %v1879_v43 = vrot.slane %v3751_v20, 1 }
  0x4e   : > { %v3758_v38 = vld [vmem:[#allocation2 + $0x18] sm:$0xff]  ;;  %789 = vst [vmem:[#allocation2 + $0x2c] sm:$0x1] %v788_v28  ;;  %v1768_v44 = vrot.slane %v1766_v36, 1 }
  0x4f   : > { %v1615_v42 = vpack.c.b16 %v1599_v34, %v1599_v34  ;;  %v3572_v45 = vld [vmem:[#allocation2 + $0x20] sm:$0x1]  ;;  %862 = vst [vmem:[#allocation2 + $0xa8] sm:$0xf] %v861_v31  ;;  %v2456_v47 = vshll.u32 %v3758_v38, 16  ;;  %v2454_v60 = vshrl.u32 %v3758_v38, 16 }
  0x50   : > { %v2421_v46 = vunpack.c.l.b16 %v3572_v45  ;;  %863 = vst.msk [vmem:[#allocation2 + $0xac] sm:$0xf] %vm384_vm0, %v679_v1  ;;  %v1769_v50 = vor.u32 %v1768_v44, %v1764_v35  ;;  %v2677_v55 = vrot.slane %v3758_v38, 1  ;;  %v3401_v30 = vld [vmem:[#allocation2 + $0x20] sm:$0x1]  ;;  %v327_v1 = vadd.f32 %v3987_v13, %v294_v7  ;;  %v4241_v34 = vld [vmem:[#allocation2 + $0x18] sm:$0xff] }
  0x51   : > { %v1880_v49 = vrot.slane %v1615_v42, 1  ;;  %v1771_v51 = vshll.u32 %v1615_v42, 16  ;;  %866 = vst [vmem:[#allocation2 + $0xb0] sm:$0x1] %v865_v39  ;;  %v2458_v61 = vrot.slane %v2456_v47, 1  ;;  %v4225_v5 = vld [vmem:[#allocation2 + $0xc] sm:$0xff]  ;;  %v326_v35 = vadd.f32 %v3987_v13, %v293_v18 }
  0x52   : > { %v2437_v53 = vpack.c.b16 %v2421_v46, %v2421_v46  ;;  %v3398_v54 = vld [vmem:[#allocation2 + $0x14] sm:$0x1]  ;;  %869 = vst [vmem:[#allocation2 + $0xb4] sm:$0xf] %v868_v48  ;;  %v4231_v14 = vld [vmem:[#allocation2 + $0xc] sm:$0xff]  ;;  %v1077_v16 = vshll.u32 %v4225_v5, 16  ;;  %v1588_v42 = vunpack.c.l.b16 %v3401_v30 }
  0x53   : > { %v890_v56 = vld [vmem:[#allocation2 + $0x14] sm:$0x1]  ;;  %v1881_v58 = vsel %vm1286_vm2, %v1879_v43, %v1880_v49  ;;  %v1773_v59 = vrot.slane %v1771_v51, 1  ;;  %870 = vst.msk [vmem:[#allocation2 + $0xb8] sm:$0xf] %vm384_vm0, %v696_v0  ;;  %v1587_v11 = vunpack.c.l.b16 %v3398_v54  ;;  %v2459_v19 = vor.u32 %v2458_v61, %v2454_v60 }
  0x54   : > { %1915 = vrot.lane.b32.xlu1 %v1881_v58, %s3869_s28  ;;  %v2461_v63 = vshll.u32 %v2437_v53, 16  ;;  %v3759_v3 = vld [vmem:[#allocation2 + $0x24] sm:$0xff]  ;;  %v1030_v6 = vunpack.c.l.b16 %v890_v56  ;;  %v2678_v8 = vrot.slane %v2437_v53, 1  ;;  %873 = vst [vmem:[#allocation2 + $0xbc] sm:$0x1] %v872_v57  ;;  %v1843_v31 = vrot.slane %v4231_v14, 1 }
  0x55   : > { %v1774_v10 = vsel %vm1061_vm9, %v1769_v50, %v1773_v59  ;;  %v3575_v12 = vld [vmem:[#allocation2 + $0x2c] sm:$0x1]  ;;  %v2468_v23 = vshll.u32 %v3759_v3, 16  ;;  %v2680_v25 = vrot.slane %v3759_v3, 1  ;;  %v4236_v28 = vpack.c.b16 %v1587_v11, %v1587_v11  ;;  %v283_v61 = vld [vmem:[%s3966_s27 + $0xf0] sm:$0xff] }
  0x56   : > { %1835 = vrot.lane.b32.xlu0 %v1774_v10, %s3870_s29  ;;  %v2422_v15 = vunpack.c.l.b16 %v3575_v12  ;;  %v2463_v21 = vrot.slane %v2461_v63, 1  ;;  %v1046_v2 = vpack.c.b16 %v1030_v6, %v1030_v6  ;;  %v2679_v20 = vsel %vm1286_vm2, %v2677_v55, %v2678_v8 }
  0x57   : > { %v1075_v33 = vshrl.u32 %v4225_v5, 16  ;;  %v2466_v4 = vshrl.u32 %v3759_v3, 16  ;;  %v2470_v37 = vrot.slane %v2468_v23, 1  ;;  %v1079_v40 = vrot.slane %v1077_v16, 1  ;;  %v4249_v44 = vld [vmem:[#allocation2 + $0xa8] sm:$0xff] }
  0x58   : > { %v2438_v24 = vpack.c.b16 %v2422_v15, %v2422_v15  ;;  %v3437_v26 = vld [vmem:[#allocation2 + $0xb0] sm:$0x1]  ;;  %v2464_v36 = vsel %vm1061_vm9, %v2459_v19, %v2463_v21  ;;  %v1082_v41 = vshll.u32 %v1046_v2, 16  ;;  %v1844_v43 = vrot.slane %v4236_v28, 1 }
  0x59   : > { %v1600_v29 = vunpack.c.l.b16 %v3437_v26  ;;  %v1290_v46 = vrot.slane %v4225_v5, 1  ;;  %v1291_v47 = vrot.slane %v1046_v2, 1  ;;  %v1634_v49 = vshll.u32 %v4241_v34, 16 }
  0x5a   : > { %v2681_v32 = vrot.slane %v2438_v24, 1  ;;  %v2473_v38 = vshll.u32 %v2438_v24, 16  ;;  %v358_v50 = vpack.c.bf16 %v326_v35, %v326_v35  ;;  %v359_v51 = vpack.c.bf16 %v327_v1, %v327_v1  ;;  %v4258_v56 = vld [vmem:[#allocation2 + $0xb4] sm:$0xff] }
  0x5b   : > { %v4251_v45 = vpack.c.b16 %v1600_v29, %v1600_v29  ;;  %v3440_v48 = vld [vmem:[#allocation2 + $0xbc] sm:$0x1]  ;;  %v2471_v0 = vor.u32 %v2470_v37, %v2466_v4  ;;  %v1632_v53 = vshrl.u32 %v4241_v34, 16  ;;  %v1622_v54 = vshll.u32 %v4231_v14, 16 }
  0x5c   : > { %2725 = vrot.lane.b32.xlu1 %v2679_v20, %s3869_s28  ;;  %v2682_v39 = vsel %vm1286_vm2, %v2680_v25, %v2681_v32  ;;  %v2475_v52 = vrot.slane %v2473_v38, 1  ;;  %v1080_v57 = vor.u32 %v1079_v40, %v1075_v33  ;;  %v1084_v58 = vrot.slane %v1082_v41, 1  ;;  %v284_v29 = vld [vmem:[%s3966_s27 + $0xf8] sm:$0xff]  ;;  %v790_v33 = vld [vmem:[#allocation2 + $0x30] sm:$0xf]  ;;  %v261_v41 = vld [vmem:[%s3966_s27 + $0x40] sm:$0xff] }
  0x5d   : > { %2727 = vrot.lane.b32.xlu2 %v2682_v39, %s3869_s28  ;;  %v4260_v59 = vpack.c.b16 %v1588_v42, %v1588_v42  ;;  %v1601_v60 = vunpack.c.l.b16 %v3440_v48  ;;  %v1845_v62 = vsel %vm1286_vm2, %v1843_v31, %v1844_v43  ;;  %v1882_v63 = vrot.slane %v4249_v44, 1 }
  0x5e   : > { %2645 = vrot.lane.b32.xlu0 %v2464_v36, %s3870_s29  ;;  %v1883_v3 = vrot.slane %v4251_v45, 1  ;;  %v1292_v5 = vsel %vm1286_vm2, %v1290_v46, %v1291_v47  ;;  %v1636_v6 = vrot.slane %v1634_v49, 1  ;;  %v1620_v7 = vshrl.u32 %v4231_v14, 16  ;;  %v794_v47 = vld [vmem:[#allocation2 + $0x38] sm:$0x1] }
  0x5f   : > { %v1624_v10 = vrot.slane %v1622_v54, 1  ;;  %v1627_v55 = vshll.u32 %v4236_v28, 16  ;;  %v2476_v8 = vsel %vm1061_vm9, %v2471_v0, %v2475_v52  ;;  %v1846_v11 = vrot.slane %v4241_v34, 1 }
  0x60   : > { %v1790_v12 = vshll.u32 %v4258_v56, 16  ;;  %v317_v15 = vmul.f32 %v3974_v9, %v283_v61  ;;  %v1085_v18 = vsel %vm1061_vm9, %v1080_v57, %v1084_v58  ;;  %v1639_v19 = vshll.u32 %v4260_v59, 16  ;;  %v4302_v61 = vld [vmem:[#allocation2 + $0x24] sm:$0xff] }
  0x61   : > { %v1617_v21 = vpack.c.b16 %v1601_v60, %v1601_v60  ;;  %v495_v14 = vshrl.u32 %v358_v50, 16  ;;  %v1884_v23 = vsel %vm1286_vm2, %v1882_v63, %v1883_v3  ;;  %v1847_v24 = vrot.slane %v4260_v59, 1 }
  0x62   : > { %v1778_v25 = vshll.u32 %v4249_v44, 16  ;;  %v498_v26 = vshll.u32 %v358_v50, 16  ;;  %v1637_v2 = vor.u32 %v1636_v6, %v1632_v53  ;;  %v1625_v16 = vor.u32 %v1624_v10, %v1620_v7  ;;  %v3404_v53 = vld [vmem:[#allocation2 + $0x2c] sm:$0x1] }
  0x63   : > { %v1629_v20 = vrot.slane %v1627_v55, 1  ;;  %v497_v28 = vrot.slane %v495_v14, 7  ;;  %v1788_v30 = vshrl.u32 %v4258_v56, 16  ;;  %v1792_v1 = vrot.slane %v1790_v12, 1 }
  0x64   : > { %1891 = vrot.lane.b32.xlu1 %v1845_v62, %s3869_s28  ;;  %v503_v31 = vshrl.u32 %v359_v51, 16  ;;  %v506_v32 = vshll.u32 %v359_v51, 16  ;;  %v1641_v34 = vrot.slane %v1639_v19, 1  ;;  %v1795_v35 = vshll.u32 %v1617_v21, 16 }
  0x65   : > { %1337 = vrot.lane.b32.xlu2 %v1292_v5, %s3869_s28  ;;  %v1885_v36 = vrot.slane %v4258_v56, 1  ;;  %v500_v4 = vor.u32 %v498_v26, %v497_v28  ;;  %v1776_v37 = vshrl.u32 %v4249_v44, 16  ;;  %v1780_v38 = vrot.slane %v1778_v25, 1  ;;  %v262_v44 = vld [vmem:[%s3966_s27 + $0x48] sm:$0xff]  ;;  %v893_v25 = vld [vmem:[#allocation2 + $0x20] sm:$0x1] }
  0x66   : > { %2647 = vrot.lane.b32.xlu0 %v2476_v8, %s3870_s29  ;;  %v501_v39 = vrot.slane %v497_v28, 4  ;;  %v505_v40 = vrot.slane %v503_v31, 7  ;;  %v1630_v42 = vsel %vm1061_vm9, %v1625_v16, %v1629_v20  ;;  %v1783_v43 = vshll.u32 %v4251_v45, 16  ;;  %v874_v20 = vld [vmem:[#allocation2 + $0xc0] sm:$0xf] }
  0x67   : > { %v791_v46 = vsel %vm4127_vm7, %v500_v4, %v790_v33  ;;  %v318_v48 = vmul.f32 %v3974_v9, %v284_v29  ;;  %v1793_v49 = vor.u32 %v1792_v1, %v1788_v30  ;;  %v1886_v50 = vrot.slane %v1617_v21, 1  ;;  %v878_v28 = vld [vmem:[#allocation2 + $0xc8] sm:$0x1]  ;;  %v4325_v4 = vld [vmem:[#allocation2 + $0x18] sm:$0xff] }
  0x68   : > { %v508_v51 = vor.u32 %v506_v32, %v505_v40  ;;  %v510_v0 = vrot.slane %v505_v40, 4  ;;  %792 = vst [vmem:[#allocation2 + $0x30] sm:$0xf] %v791_v46  ;;  %v1797_v52 = vrot.slane %v1795_v35, 1  ;;  %v350_v54 = vadd.f32 %v3987_v13, %v317_v15 }
  0x69   : > { %v351_v45 = vadd.f32 %v3987_v13, %v318_v48  ;;  %v295_v56 = vmul.f32 %v3974_v9, %v261_v41  ;;  %v1848_v57 = vsel %vm1286_vm2, %v1846_v11, %v1847_v24  ;;  %v1781_v58 = vor.u32 %v1780_v38, %v1776_v37  ;;  %v263_v48 = vld [vmem:[%s3966_s27 + $0x50] sm:$0xff] }
  0x6a   : > { %v509_v59 = vsel %vm4114_vm6, %v501_v39, %v508_v51  ;;  %v795_v60 = vsel %vm4138_vm8, %v510_v0, %v794_v47  ;;  %v1785_v62 = vrot.slane %v1783_v43, 1  ;;  %v382_v63 = vpack.c.bf16 %v350_v54, %v350_v54  ;;  %v797_v47 = vld [vmem:[#allocation2 + $0x3c] sm:$0xf] }
  0x6b   : > { %793 = vst.msk [vmem:[#allocation2 + $0x34] sm:$0xf] %vm384_vm0, %v509_v59  ;;  %v383_v3 = vpack.c.bf16 %v351_v45, %v351_v45  ;;  %v296_v5 = vmul.f32 %v3974_v9, %v262_v44  ;;  %v1642_v6 = vsel %vm1061_vm9, %v1637_v2, %v1641_v34  ;;  %v4309_v7 = vsel %vm1286_vm2, %v1885_v36, %v1886_v50  ;;  %v264_v59 = vld [vmem:[%s3966_s27 + $0x58] sm:$0xff] }
  0x6c   : > { %1917 = vrot.lane.b32.xlu1 %v1884_v23, %s3869_s28  ;;  %796 = vst [vmem:[#allocation2 + $0x38] sm:$0x1] %v795_v60  ;;  %v1589_v10 = vunpack.c.l.b16 %v3404_v53  ;;  %v328_v55 = vadd.f32 %v3987_v13, %v295_v56  ;;  %v4313_v8 = vsel %vm1061_vm9, %v1793_v49, %v1797_v52  ;;  %v699_v11 = vshrl.u32 %v382_v63, 16 }
  0x6d   : > { %1811 = vrot.lane.b32.xlu2 %v1630_v42, %s3870_s29  ;;  %v702_v12 = vshll.u32 %v382_v63, 16  ;;  %v707_v15 = vshrl.u32 %v383_v3, 16  ;;  %v710_v19 = vshll.u32 %v383_v3, 16  ;;  %v329_v21 = vadd.f32 %v3987_v13, %v296_v5 }
  0x6e   : > { %1256 = vrot.lane.b32.xlu0 %v1085_v18, %s3870_s29  ;;  %v1646_v18 = vshll.u32 %v4302_v61, 16  ;;  %v360_v14 = vpack.c.bf16 %v328_v55, %v328_v55  ;;  %v1786_v23 = vsel %vm1061_vm9, %v1781_v58, %v1785_v62  ;;  %v1644_v24 = vshrl.u32 %v4302_v61, 16  ;;  %v801_v58 = vld [vmem:[#allocation2 + $0x44] sm:$0x1] }
  0x6f   : > { %v701_v26 = vrot.slane %v699_v11, 7  ;;  %v709_v2 = vrot.slane %v707_v15, 7  ;;  %v4319_v16 = vpack.c.b16 %v1589_v10, %v1589_v10  ;;  %v361_v29 = vpack.c.bf16 %v329_v21, %v329_v21 }
  0x70   : > { %v512_v30 = vshrl.u32 %v360_v14, 16  ;;  %v515_v1 = vshll.u32 %v360_v14, 16  ;;  %v1648_v36 = vrot.slane %v1646_v18, 1  ;;  %v1031_v37 = vunpack.c.l.b16 %v893_v25 }
  0x71   : > { %v704_v31 = vor.u32 %v702_v12, %v701_v26  ;;  %v705_v32 = vrot.slane %v701_v26, 4  ;;  %v712_v33 = vor.u32 %v710_v19, %v709_v2  ;;  %v714_v34 = vrot.slane %v709_v2, 4 }
  0x72   : > { %v4323_v35 = vld [vmem:[#allocation2 + $0x30] sm:$0xff]  ;;  %v514_v38 = vrot.slane %v512_v30, 7  ;;  %v520_v39 = vshrl.u32 %v361_v29, 16  ;;  %v523_v46 = vshll.u32 %v361_v29, 16  ;;  %v1089_v0 = vshll.u32 %v4325_v4, 16 }
  0x73   : > { %v3578_v40 = vld [vmem:[#allocation2 + $0x38] sm:$0x1]  ;;  %v713_v41 = vsel %vm4114_vm6, %v705_v32, %v712_v33  ;;  %v875_v42 = vsel %vm4127_vm7, %v704_v31, %v874_v20  ;;  %v879_v43 = vsel %vm4138_vm8, %v714_v34, %v878_v28  ;;  %v2478_v50 = vshrl.u32 %v4323_v35, 16  ;;  %v275_v33 = vld [vmem:[%s3966_s27 + $0xb0] sm:$0xff] }
  0x74   : > { %1813 = vrot.lane.b32.xlu1 %v1642_v6, %s3870_s29  ;;  %v2423_v49 = vunpack.c.l.b16 %v3578_v40  ;;  %876 = vst [vmem:[#allocation2 + $0xc0] sm:$0xf] %v875_v42  ;;  %v2480_v51 = vshll.u32 %v4323_v35, 16  ;;  %v1651_v44 = vshll.u32 %v4319_v16, 16  ;;  %v517_v52 = vor.u32 %v515_v1, %v514_v38  ;;  %v276_v34 = vld [vmem:[%s3966_s27 + $0xb8] sm:$0xff] }
  0x75   : > { %1837 = vrot.lane.b32.xlu2 %v1786_v23, %s3870_s29  ;;  %877 = vst.msk [vmem:[#allocation2 + $0xc4] sm:$0xf] %vm384_vm0, %v713_v41  ;;  %v518_v53 = vrot.slane %v514_v38, 4  ;;  %v522_v54 = vrot.slane %v520_v39, 7  ;;  %v1047_v56 = vpack.c.b16 %v1031_v37, %v1031_v37  ;;  %v297_v60 = vmul.f32 %v3974_v9, %v263_v48 }
  0x76   : > { %1893 = vrot.lane.b32.xlu0 %v1848_v57, %s3869_s28  ;;  %v2439_v45 = vpack.c.b16 %v2423_v49, %v2423_v49  ;;  %880 = vst [vmem:[#allocation2 + $0xc8] sm:$0x1] %v879_v43  ;;  %v2482_v57 = vrot.slane %v2480_v51, 1  ;;  %v798_v3 = vsel %vm4127_vm7, %v517_v52, %v797_v47  ;;  %v1087_v5 = vshrl.u32 %v4325_v4, 16 }
  0x77   : > { %v525_v62 = vor.u32 %v523_v46, %v522_v54  ;;  %v527_v63 = vrot.slane %v522_v54, 4  ;;  %799 = vst [vmem:[#allocation2 + $0x3c] sm:$0xf] %v798_v3  ;;  %v1091_v55 = vrot.slane %v1089_v0, 1  ;;  %v1094_v11 = vshll.u32 %v1047_v56, 16  ;;  %v4387_v3 = vld [vmem:[#allocation2 + $0x24] sm:$0xff] }
  0x78   : > { %v2483_v6 = vor.u32 %v2482_v57, %v2478_v50  ;;  %v2485_v10 = vshll.u32 %v2439_v45, 16  ;;  %v298_v18 = vmul.f32 %v3974_v9, %v264_v59  ;;  %v2683_v19 = vrot.slane %v4323_v35, 1 }
  0x79   : > { %v526_v12 = vsel %vm4114_vm6, %v518_v53, %v525_v62  ;;  %v802_v15 = vsel %vm4138_vm8, %v527_v63, %v801_v58  ;;  %v2684_v21 = vrot.slane %v2439_v45, 1  ;;  %v1653_v23 = vrot.slane %v1651_v44, 1 }
  0x7a   : > { %v2487_v14 = vrot.slane %v2485_v10, 1  ;;  %800 = vst.msk [vmem:[#allocation2 + $0x40] sm:$0xf] %vm384_vm0, %v526_v12  ;;  %v1293_v25 = vrot.slane %v4325_v4, 1  ;;  %v1294_v26 = vrot.slane %v1047_v56, 1  ;;  %v1092_v28 = vor.u32 %v1091_v55, %v1087_v5 }
  0x7b   : > { %803 = vst [vmem:[#allocation2 + $0x44] sm:$0x1] %v802_v15  ;;  %v1096_v29 = vrot.slane %v1094_v11, 1  ;;  %v330_v30 = vadd.f32 %v3987_v13, %v297_v60  ;;  %v896_v4 = vld [vmem:[#allocation2 + $0x2c] sm:$0x1]  ;;  %v309_v48 = vmul.f32 %v3974_v9, %v275_v33  ;;  %v310_v49 = vmul.f32 %v3974_v9, %v276_v34 }
  0x7c   : > { %1839 = vrot.lane.b32.xlu1 %v4313_v8, %s3870_s29  ;;  %v1649_v8 = vor.u32 %v1648_v36, %v1644_v24  ;;  %v4359_v2 = vld [vmem:[#allocation2 + $0xc0] sm:$0xff]  ;;  %v2488_v20 = vsel %vm1061_vm9, %v2483_v6, %v2487_v14  ;;  %v2685_v24 = vsel %vm1286_vm2, %v2683_v19, %v2684_v21  ;;  %v1295_v36 = vsel %vm1286_vm2, %v1293_v25, %v1294_v26  ;;  %v804_v5 = vld [vmem:[#allocation2 + $0x48] sm:$0xf]  ;;  %v808_v12 = vld [vmem:[#allocation2 + $0x50] sm:$0x1] }
  0x7d   : > { %v3443_v1 = vld [vmem:[#allocation2 + $0xc8] sm:$0x1]  ;;  %2649 = vrot.lane.b32.xlu2 %v2488_v20, %s3870_s29  ;;  %v1802_v32 = vshll.u32 %v4359_v2, 16  ;;  %v362_v37 = vpack.c.bf16 %v330_v30, %v330_v30  ;;  %v1800_v40 = vshrl.u32 %v4359_v2, 16  ;;  %v1097_v42 = vsel %vm1061_vm9, %v1092_v28, %v1096_v29  ;;  %v3407_v28 = vld [vmem:[#allocation2 + $0x38] sm:$0x1] }
  0x7e   : > { %1919 = vrot.lane.b32.xlu0 %v4309_v7, %s3869_s28  ;;  %v331_v7 = vadd.f32 %v3987_v13, %v298_v18  ;;  %v1602_v31 = vunpack.c.l.b16 %v3443_v1  ;;  %v1654_v35 = vsel %vm1061_vm9, %v1649_v8, %v1653_v23  ;;  %v1032_v0 = vunpack.c.l.b16 %v896_v4 }
  0x7f   : > { %v1804_v41 = vrot.slane %v1802_v32, 1  ;;  %v529_v46 = vshrl.u32 %v362_v37, 16  ;;  %v532_v44 = vshll.u32 %v362_v37, 16  ;;  %v1849_v45 = vrot.slane %v4302_v61, 1  ;;  %v4413_v37 = vld [vmem:[#allocation2 + $0x30] sm:$0xff] }
  0x80   : > { %v363_v38 = vpack.c.bf16 %v331_v7, %v331_v7  ;;  %v4371_v39 = vpack.c.b16 %v1602_v31, %v1602_v31  ;;  %v1850_v56 = vrot.slane %v4319_v16, 1  ;;  %v342_v6 = vadd.f32 %v3987_v13, %v309_v48  ;;  %v846_v48 = vld [vmem:[#allocation2 + $0x90] sm:$0xf] }
  0x81   : > { %v4376_v43 = vld [vmem:[#allocation2 + $0x3c] sm:$0xff]  ;;  %v1805_v57 = vor.u32 %v1804_v41, %v1800_v40  ;;  %v531_v59 = vrot.slane %v529_v46, 7  ;;  %v343_v10 = vadd.f32 %v3987_v13, %v310_v49  ;;  %v4391_v18 = vpack.c.b16 %v1032_v0, %v1032_v0 }
  0x82   : > { %v537_v47 = vshrl.u32 %v363_v38, 16  ;;  %v1807_v50 = vshll.u32 %v4371_v39, 16  ;;  %v3581_v51 = vld [vmem:[#allocation2 + $0x44] sm:$0x1]  ;;  %v540_v52 = vshll.u32 %v363_v38, 16  ;;  %v2492_v54 = vshll.u32 %v4376_v43, 16 }
  0x83   : > { %v2424_v53 = vunpack.c.l.b16 %v3581_v51  ;;  %v2490_v63 = vshrl.u32 %v4376_v43, 16  ;;  %v534_v61 = vor.u32 %v532_v44, %v531_v59  ;;  %v535_v11 = vrot.slane %v531_v59, 4  ;;  %v850_v51 = vld [vmem:[#allocation2 + $0x98] sm:$0x1] }
  0x84   : > { %2729 = vrot.lane.b32.xlu1 %v2685_v24, %s3869_s28  ;;  %v1809_v58 = vrot.slane %v1807_v50, 1  ;;  %v539_v60 = vrot.slane %v537_v47, 7  ;;  %v2494_v55 = vrot.slane %v2492_v54, 1  ;;  %v1099_v19 = vshrl.u32 %v4387_v3, 16 }
  0x85   : > { %v2440_v62 = vpack.c.b16 %v2424_v53, %v2424_v53  ;;  %1258 = vrot.lane.b32.xlu2 %v1097_v42, %s3870_s29  ;;  %v805_v23 = vsel %vm4127_vm7, %v534_v61, %v804_v5  ;;  %v374_v25 = vpack.c.bf16 %v342_v6, %v342_v6  ;;  %v1101_v26 = vshll.u32 %v4387_v3, 16  ;;  %v4442_v61 = vld [vmem:[%s5356_s1 + $0x8] sm:$0xff] }
  0x86   : > { %1815 = vrot.lane.b32.xlu0 %v1654_v35, %s3870_s29  ;;  %v542_v16 = vor.u32 %v540_v52, %v539_v60  ;;  %v544_v21 = vrot.slane %v539_v60, 4  ;;  %v1810_v14 = vsel %vm1061_vm9, %v1805_v57, %v1809_v58  ;;  %v1851_v20 = vsel %vm1286_vm2, %v1849_v45, %v1850_v56  ;;  %806 = vst [vmem:[#allocation2 + $0x48] sm:$0xf] %v805_v23  ;;  %v4410_v35 = vld [vmem:[%s5356_s1 + $0x10] sm:$0xff]  ;;  %v899_v58 = vld [vmem:[#allocation2 + $0x38] sm:$0x1] }
  0x87   : > { %v2497_v15 = vshll.u32 %v2440_v62, 16  ;;  %v375_v30 = vpack.c.bf16 %v343_v10, %v343_v10  ;;  %v2495_v1 = vor.u32 %v2494_v55, %v2490_v63  ;;  %v631_v24 = vshrl.u32 %v374_v25, 16  ;;  %2189 = vmatpush.bf16.msra.mxu1 %v4410_v35 }
  0x88   : > { %v543_v8 = vsel %vm4114_vm6, %v535_v11, %v542_v16  ;;  %v809_v29 = vsel %vm4138_vm8, %v544_v21, %v808_v12  ;;  %v634_v31 = vshll.u32 %v374_v25, 16  ;;  %v1106_v32 = vshll.u32 %v4391_v18, 16  ;;  %v265_v11 = vld [vmem:[%s3966_s27 + $0x60] sm:$0xff] }
  0x89   : > { %v2499_v7 = vrot.slane %v2497_v15, 1  ;;  %807 = vst.msk [vmem:[#allocation2 + $0x4c] sm:$0xf] %vm384_vm0, %v543_v8  ;;  %v639_v33 = vshrl.u32 %v375_v30, 16  ;;  %v642_v34 = vshll.u32 %v375_v30, 16  ;;  %v2687_v4 = vrot.slane %v2440_v62, 1 }
  0x8a   : > { %810 = vst [vmem:[#allocation2 + $0x50] sm:$0x1] %v809_v29  ;;  %v1590_v38 = vunpack.c.l.b16 %v3407_v28  ;;  %v633_v40 = vrot.slane %v631_v24, 7  ;;  %v1103_v41 = vrot.slane %v1101_v26, 1  ;;  %v1888_v42 = vrot.slane %v4359_v2, 1  ;;  %v266_v28 = vld [vmem:[%s3966_s27 + $0x68] sm:$0xff] }
  0x8b   : > { %v1889_v46 = vrot.slane %v4371_v39, 1  ;;  %v641_v47 = vrot.slane %v639_v33, 7  ;;  %v2500_v49 = vsel %vm1061_vm9, %v2495_v1, %v2499_v7  ;;  %v1658_v0 = vshll.u32 %v4413_v37, 16  ;;  %2190 = vmatpush.bf16.msra.mxu1 %v4442_v61  ;;  %v3410_v1 = vld [vmem:[#allocation2 + $0x44] sm:$0x1] }
  0x8c   : > { %1339 = vrot.lane.b32.xlu1 %v1295_v36, %s3869_s28  ;;  %v2686_v36 = vrot.slane %v4376_v43, 1  ;;  %v636_v50 = vor.u32 %v634_v31, %v633_v40  ;;  %v637_v43 = vrot.slane %v633_v40, 4  ;;  %v1108_v54 = vrot.slane %v1106_v32, 1 }
  0x8d   : > { %1895 = vrot.lane.b32.xlu2 %v1851_v20, %s3869_s28  ;;  %v644_v44 = vor.u32 %v642_v34, %v641_v47  ;;  %v646_v52 = vrot.slane %v641_v47, 4  ;;  %v4422_v45 = vpack.c.b16 %v1590_v38, %v1590_v38  ;;  %v1656_v59 = vshrl.u32 %v4413_v37, 16  ;;  %v3757_v47 = vld [vmem:[%s5356_s1 + $0x28] sm:$0xff] }
  0x8e   : > { %1841 = vrot.lane.b32.xlu0 %v1810_v14, %s3870_s29  ;;  %v2688_v53 = vsel %vm1286_vm2, %v2686_v36, %v2687_v4  ;;  %v847_v2 = vsel %vm4127_vm7, %v636_v50, %v846_v48  ;;  %v1104_v60 = vor.u32 %v1103_v41, %v1099_v19  ;;  %v1890_v63 = vsel %vm1286_vm2, %v1888_v42, %v1889_v46  ;;  %v4450_v19 = vld [vmem:[#allocation2 + $0x30] sm:$0xff]  ;;  %v4456_v14 = vld [vmem:[%s5356_s1] sm:$0xff]  ;;  %v1255_v36 = vpop.permute.xlu2 %1254 }
  0x8f   : > { %v645_v56 = vsel %vm4114_vm6, %v637_v43, %v644_v44  ;;  %848 = vst [vmem:[#allocation2 + $0x90] sm:$0xf] %v847_v2  ;;  %v851_v57 = vsel %vm4138_vm8, %v646_v52, %v850_v51  ;;  %v1660_v5 = vrot.slane %v1658_v0, 1  ;;  %v1663_v6 = vshll.u32 %v4422_v45, 16  ;;  %2191 = vmatpush.bf16.msra.mxu1 %v4456_v14  ;;  %v3815_v50 = vld [vmem:[#allocation2] sm:$0xff]  ;;  %3777 = vmatpush.bf16.msra.mxu3 %v3757_v47 }
  0x90   : > { %v4427_v39 = vld [vmem:[#allocation2 + $0x48] sm:$0xff]  ;;  %849 = vst.msk [vmem:[#allocation2 + $0x94] sm:$0xf] %vm384_vm0, %v645_v56  ;;  %v1296_v16 = vrot.slane %v4387_v3, 1  ;;  %v1297_v12 = vrot.slane %v4391_v18, 1  ;;  %v1033_v21 = vunpack.c.l.b16 %v899_v58  ;;  %v1109_v8 = vsel %vm1061_vm9, %v1104_v60, %v1108_v54  ;;  %v1336_v4 = vpop.permute.xlu0 %1335  ;;  %v4486_v52 = vld [vmem:[#allocation2 + $0x3c] sm:$0xff]  ;;  %2050 = vmatpush.bf16.msra.mxu0 %v3757_v47 }
  0x91   : > { %v3584_v62 = vld [vmem:[#allocation2 + $0x50] sm:$0x1]  ;;  %v2504_v55 = vshll.u32 %v4427_v39, 16  ;;  %852 = vst [vmem:[#allocation2 + $0x98] sm:$0x1] %v851_v57  ;;  %v1661_v23 = vor.u32 %v1660_v5, %v1656_v59  ;;  %v1665_v3 = vrot.slane %v1663_v6, 1  ;;  %v299_v18 = vmul.f32 %v3974_v9, %v265_v11 }
  0x92   : > { %v2425_v10 = vunpack.c.l.b16 %v3584_v62  ;;  %v2502_v25 = vshrl.u32 %v4427_v39, 16  ;;  %v1298_v29 = vsel %vm1286_vm2, %v1296_v16, %v1297_v12  ;;  %v1852_v30 = vrot.slane %v4413_v37, 1  ;;  %v3756_v54 = vld [vmem:[%s5356_s1 + $0x20] sm:$0xff] }
  0x93   : > { %v2506_v26 = vrot.slane %v2504_v55, 1  ;;  %v1853_v7 = vrot.slane %v4422_v45, 1  ;;  %v4467_v24 = vpack.c.b16 %v1033_v21, %v1033_v21  ;;  %v1113_v31 = vshll.u32 %v4450_v19, 16  ;;  %v926_v21 = vld [vmem:[#allocation2 + $0xa4] sm:$0x1]  ;;  %3778 = vmatpush.bf16.msra.mxu3 %v3756_v54 }
  0x94   : > { %2651 = vrot.lane.b32.xlu1 %v2500_v49, %s3870_s29  ;;  %v4447_v15 = vpack.c.b16 %v2425_v10, %v2425_v10  ;;  %v1666_v34 = vsel %vm1061_vm9, %v1661_v23, %v1665_v3  ;;  %v300_v37 = vmul.f32 %v3974_v9, %v266_v28  ;;  %v332_v38 = vadd.f32 %v3987_v13, %v299_v18  ;;  %v4501_v23 = vld [vmem:[#allocation2 + $0x9c] sm:$0xff] }
  0x95   : > { %1921 = vrot.lane.b32.xlu2 %v1890_v63, %s3869_s28  ;;  %v2507_v40 = vor.u32 %v2506_v26, %v2502_v25  ;;  %v1591_v46 = vunpack.c.l.b16 %v3410_v1  ;;  %v1369_v43 = vsel %vm1367_vm10, %v3815_v50, %v1255_v36  ;;  %v1854_v51 = vsel %vm1286_vm2, %v1852_v30, %v1853_v7  ;;  %2051 = vmatpush.bf16.msra.mxu0 %v3756_v54  ;;  %v811_v30 = vld [vmem:[#allocation2 + $0x54] sm:$0xf]  ;;  %v3755_v1 = vld [vmem:[%s5356_s1 + $0x18] sm:$0xff]  ;;  %v4513_v7 = vld [vmem:[%s5356_s1 + $0x40] sm:$0xff] }
  0x96   : > { %2731 = vrot.lane.b32.xlu0 %v2688_v53, %s3869_s28  ;;  %v2509_v20 = vshll.u32 %v4447_v15, 16  ;;  %v1118_v44 = vshll.u32 %v4467_v24, 16  ;;  %v1402_v53 = vsel %vm1400_vm11, %v1369_v43, %v1336_v4  ;;  %v1111_v45 = vshrl.u32 %v4450_v19, 16  ;;  %v815_v36 = vld [vmem:[#allocation2 + $0x5c] sm:$0x1]  ;;  %2883 = vmatpush.bf16.msra.mxu2 %v4513_v7  ;;  %v269_v50 = vld [vmem:[%s3966_s27 + $0x80] sm:$0xff] }
  0x97   : > { %v4471_v32 = vld [vmem:[#allocation2 + $0x90] sm:$0xff]  ;;  %3554 = vmatmul.msk.bf16.vlgmr.msra.gmra.mxu1 %vm2012_vm12, %v1402_v53  ;;  %v333_v56 = vadd.f32 %v3987_v13, %v300_v37  ;;  %v364_v57 = vpack.c.bf16 %v332_v38, %v332_v38  ;;  %v1115_v59 = vrot.slane %v1113_v31, 1  ;;  %v4496_v60 = vpack.c.b16 %v1591_v46, %v1591_v46  ;;  %3779 = vmatpush.bf16.msra.mxu3 %v3755_v1 }
  0x98   : > { %v923_v33 = vld [vmem:[#allocation2 + $0x98] sm:$0x1]  ;;  %v2511_v41 = vrot.slane %v2509_v20, 1  ;;  %v1207_v48 = vshrl.u32 %v4471_v32, 16  ;;  %v1209_v49 = vshll.u32 %v4471_v32, 16  ;;  %v1323_v55 = vrot.slane %v4471_v32, 1 }
  0x99   : > { %v1041_v42 = vunpack.c.l.b16 %v923_v33  ;;  %v365_v5 = vpack.c.bf16 %v333_v56, %v333_v56  ;;  %v546_v6 = vshrl.u32 %v364_v57, 16  ;;  %v549_v10 = vshll.u32 %v364_v57, 16  ;;  %2052 = vmatpush.bf16.msra.mxu0 %v3755_v1  ;;  %v3413_v56 = vld [vmem:[#allocation2 + $0x50] sm:$0x1] }
  0x9a   : > { %v1211_v2 = vrot.slane %v1209_v49, 1  ;;  %v2512_v58 = vsel %vm1061_vm9, %v2507_v40, %v2511_v41  ;;  %v1120_v11 = vrot.slane %v1118_v44, 1  ;;  %v1670_v16 = vshll.u32 %v4486_v52, 16  ;;  %v267_v41 = vld [vmem:[%s3966_s27 + $0x70] sm:$0xff]  ;;  %v268_v49 = vld [vmem:[%s3966_s27 + $0x78] sm:$0xff] }
  0x9b   : > { %v1057_v0 = vpack.c.b16 %v1041_v42, %v1041_v42  ;;  %v548_v3 = vrot.slane %v546_v6, 7  ;;  %v554_v18 = vshrl.u32 %v365_v5, 16  ;;  %v557_v25 = vshll.u32 %v365_v5, 16  ;;  %3780 = vmatpush.bf16.msrb.mxu3 %v4410_v35  ;;  %v4557_v6 = vld [vmem:[%s5356_s1 + $0x30] sm:$0xff] }
  0x9c   : > { %1260 = vrot.lane.b32.xlu1 %v1109_v8, %s3870_s29  ;;  %v1212_v63 = vor.u32 %v1211_v2, %v1207_v48  ;;  %v1116_v26 = vor.u32 %v1115_v59, %v1111_v45  ;;  %v1668_v20 = vshrl.u32 %v4486_v52, 16  ;;  %v1675_v28 = vshll.u32 %v4496_v60, 16 }
  0x9d   : > { %1817 = vrot.lane.b32.xlu2 %v1666_v34, %s3870_s29  ;;  %v1214_v62 = vshll.u32 %v1057_v0, 16  ;;  %v1324_v8 = vrot.slane %v1057_v0, 1  ;;  %v1042_v31 = vunpack.c.l.b16 %v926_v21  ;;  %v551_v32 = vor.u32 %v549_v10, %v548_v3  ;;  %v270_v0 = vld [vmem:[%s3966_s27 + $0x88] sm:$0xff] }
  0x9e   : > { %1341 = vrot.lane.b32.xlu0 %v1298_v29, %s3869_s28  ;;  %v552_v33 = vrot.slane %v548_v3, 4  ;;  %v556_v34 = vrot.slane %v554_v18, 7  ;;  %v1672_v4 = vrot.slane %v1670_v16, 1  ;;  %v1855_v37 = vrot.slane %v4486_v52, 1  ;;  %v4566_v3 = vld [vmem:[#allocation2 + $0x48] sm:$0xff] }
  0x9f   : > { %v1216_v12 = vrot.slane %v1214_v62, 1  ;;  %v2689_v38 = vrot.slane %v4427_v39, 1  ;;  %v2690_v40 = vrot.slane %v4447_v15, 1  ;;  %v1325_v42 = vsel %vm1286_vm2, %v1323_v55, %v1324_v8  ;;  %3781 = vmatpush.bf16.msrb.mxu3 %v4442_v61 }
  0xa0   : > { %v559_v46 = vor.u32 %v557_v25, %v556_v34  ;;  %v561_v47 = vrot.slane %v556_v34, 4  ;;  %v812_v48 = vsel %vm4127_vm7, %v551_v32, %v811_v30  ;;  %v1121_v43 = vsel %vm1061_vm9, %v1116_v26, %v1120_v11 }
  0xa1   : > { %v1217_v29 = vsel %vm1061_vm9, %v1212_v63, %v1216_v12  ;;  %v1856_v39 = vrot.slane %v4496_v60, 1  ;;  %v1221_v15 = vshll.u32 %v4501_v23, 16  ;;  %813 = vst [vmem:[#allocation2 + $0x54] sm:$0xf] %v812_v48  ;;  %v4536_v44 = vpack.c.b16 %v1042_v31, %v1042_v31  ;;  %v818_v48 = vld [vmem:[#allocation2 + $0x60] sm:$0xf] }
  0xa2   : > { %v560_v52 = vsel %vm4114_vm6, %v552_v33, %v559_v46  ;;  %v816_v53 = vsel %vm4138_vm8, %v561_v47, %v815_v36  ;;  %v301_v54 = vmul.f32 %v3974_v9, %v267_v41  ;;  %v1673_v45 = vor.u32 %v1672_v4, %v1668_v20 }
  0xa3   : > { %v1677_v2 = vrot.slane %v1675_v28, 1  ;;  %814 = vst.msk [vmem:[#allocation2 + $0x58] sm:$0xf] %vm384_vm0, %v560_v52  ;;  %v302_v57 = vmul.f32 %v3974_v9, %v268_v49  ;;  %v303_v35 = vmul.f32 %v3974_v9, %v269_v50  ;;  %v2691_v59 = vsel %vm1286_vm2, %v2689_v38, %v2690_v40  ;;  %v902_v28 = vld [vmem:[#allocation2 + $0x44] sm:$0x1]  ;;  %3782 = vmatpush.bf16.msrb.mxu3 %v4456_v14  ;;  %v4589_v50 = vld [vmem:[#allocation2 + $0x3c] sm:$0xff] }
  0xa4   : > { %1897 = vrot.lane.b32.xlu1 %v1854_v51, %s3869_s28  ;;  %v4532_v51 = vld [vmem:[%s5356_s1 + $0x38] sm:$0xff]  ;;  %817 = vst [vmem:[#allocation2 + $0x5c] sm:$0x1] %v816_v53  ;;  %v334_v60 = vadd.f32 %v3987_v13, %v301_v54  ;;  %v304_v62 = vmul.f32 %v3974_v9, %v270_v0  ;;  %v1857_v63 = vsel %vm1286_vm2, %v1855_v37, %v1856_v39  ;;  %v1223_v5 = vrot.slane %v1221_v15, 1 }
  0xa5   : > { %1278 = vrot.lane.b32.xlu2 %v1217_v29, %s3870_s29  ;;  %2884 = vmatpush.bf16.msra.mxu2 %v4532_v51  ;;  %v335_v10 = vadd.f32 %v3987_v13, %v302_v57  ;;  %v336_v55 = vadd.f32 %v3987_v13, %v303_v35  ;;  %v1226_v11 = vshll.u32 %v4536_v44, 16  ;;  %v1592_v16 = vunpack.c.l.b16 %v3413_v56 }
  0xa6   : > { %2653 = vrot.lane.b32.xlu0 %v2512_v58, %s3870_s29  ;;  %v1219_v58 = vshrl.u32 %v4501_v23, 16  ;;  %v366_v12 = vpack.c.bf16 %v334_v60, %v334_v60  ;;  %v337_v21 = vadd.f32 %v3987_v13, %v304_v62  ;;  %v1678_v8 = vsel %vm1061_vm9, %v1673_v45, %v1677_v2  ;;  %v929_v2 = vld [vmem:[#allocation2 + $0xb0] sm:$0x1] }
  0xa7   : > { %v1299_v18 = vrot.slane %v4450_v19, 1  ;;  %v1300_v25 = vrot.slane %v4467_v24, 1  ;;  %v367_v26 = vpack.c.bf16 %v335_v10, %v335_v10  ;;  %v1326_v20 = vrot.slane %v4501_v23, 1 }
  0xa8   : > { %v1327_v61 = vrot.slane %v4536_v44, 1  ;;  %v563_v29 = vshrl.u32 %v366_v12, 16  ;;  %v4573_v30 = vpack.c.bf16 %v336_v55, %v336_v55  ;;  %v1224_v1 = vor.u32 %v1223_v5, %v1219_v58 }
  0xa9   : > { %2885 = vmatpush.bf16.msra.mxu2 %v4557_v6  ;;  %v566_v31 = vshll.u32 %v366_v12, 16  ;;  %v571_v32 = vshrl.u32 %v367_v26, 16  ;;  %v574_v33 = vshll.u32 %v367_v26, 16  ;;  %v1228_v19 = vrot.slane %v1226_v11, 1  ;;  %v4610_v12 = vld [vmem:[#allocation2 + $0xa8] sm:$0xff] }
  0xaa   : > { %v4576_v34 = vld [vmem:[#allocation2 + $0x54] sm:$0xff]  ;;  %v4578_v24 = vpack.c.b16 %v1592_v16, %v1592_v16  ;;  %v565_v23 = vrot.slane %v563_v29, 7  ;;  %v4580_v36 = vpack.c.bf16 %v337_v21, %v337_v21  ;;  %v1682_v37 = vshll.u32 %v4566_v3, 16  ;;  %v825_v29 = vld [vmem:[#allocation2 + $0x6c] sm:$0xf] }
  0xab   : > { %v3587_v4 = vld [vmem:[#allocation2 + $0x5c] sm:$0x1]  ;;  %v1301_v38 = vsel %vm1286_vm2, %v1299_v18, %v1300_v25  ;;  %v1034_v40 = vunpack.c.l.b16 %v902_v28  ;;  %v573_v41 = vrot.slane %v571_v32, 7  ;;  %v2514_v14 = vshrl.u32 %v4576_v34, 16 }
  0xac   : > { %1359 = vrot.lane.b32.xlu1 %v1325_v42, %s3869_s28  ;;  %v822_v42 = vld [vmem:[#allocation2 + $0x68] sm:$0x1]  ;;  %v2426_v46 = vunpack.c.l.b16 %v3587_v4  ;;  %v2516_v47 = vshll.u32 %v4576_v34, 16  ;;  %v580_v49 = vshrl.u32 %v4573_v30, 16  ;;  %v569_v39 = vrot.slane %v565_v23, 4 }
  0xad   : > { %2733 = vrot.lane.b32.xlu2 %v2691_v59, %s3869_s28  ;;  %v576_v15 = vor.u32 %v574_v33, %v573_v41  ;;  %v578_v0 = vrot.slane %v573_v41, 4  ;;  %v1229_v44 = vsel %vm1061_vm9, %v1224_v1, %v1228_v19  ;;  %v588_v45 = vshrl.u32 %v4580_v36, 16 }
  0xae   : > { %1262 = vrot.lane.b32.xlu0 %v1121_v43, %s3870_s29  ;;  %v568_v43 = vor.u32 %v566_v31, %v565_v23  ;;  %v2442_v52 = vpack.c.b16 %v2426_v46, %v2426_v46  ;;  %v2518_v54 = vrot.slane %v2516_v47, 1  ;;  %v1125_v58 = vshll.u32 %v4589_v50, 16  ;;  %v829_v23 = vld [vmem:[#allocation2 + $0x74] sm:$0x1] }
  0xaf   : > { %v577_v56 = vsel %vm4114_vm6, %v569_v39, %v576_v15  ;;  %v823_v35 = vsel %vm4138_vm8, %v578_v0, %v822_v42  ;;  %v1680_v59 = vshrl.u32 %v4566_v3, 16  ;;  %v1684_v5 = vrot.slane %v1682_v37, 1  ;;  %v3726_v0 = vld [vmem:[#allocation2 + $0x48] sm:$0xff] }
  0xb0   : > { %v819_v57 = vsel %vm4127_vm7, %v568_v43, %v818_v48  ;;  %v2519_v60 = vor.u32 %v2518_v54, %v2514_v14  ;;  %v2521_v62 = vshll.u32 %v2442_v52, 16  ;;  %v1687_v10 = vshll.u32 %v4578_v24, 16  ;;  %821 = vst.msk [vmem:[#allocation2 + $0x64] sm:$0xf] %vm384_vm0, %v577_v56  ;;  %v271_v43 = vld [vmem:[%s3966_s27 + $0x90] sm:$0xff] }
  0xb1   : > { %820 = vst [vmem:[#allocation2 + $0x60] sm:$0xf] %v819_v57  ;;  %v4606_v55 = vpack.c.b16 %v1034_v40, %v1034_v40  ;;  %v582_v11 = vrot.slane %v580_v49, 7  ;;  %v1328_v16 = vsel %vm1286_vm2, %v1326_v20, %v1327_v61  ;;  %v1043_v21 = vunpack.c.l.b16 %v929_v2 }
  0xb2   : > { %824 = vst [vmem:[#allocation2 + $0x68] sm:$0x1] %v823_v35  ;;  %v590_v18 = vrot.slane %v588_v45, 7  ;;  %v1123_v25 = vshrl.u32 %v4589_v50, 16  ;;  %v1127_v26 = vrot.slane %v1125_v58, 1  ;;  %v2693_v1 = vrot.slane %v2442_v52, 1 }
  0xb3   : > { %v1130_v28 = vshll.u32 %v4606_v55, 16  ;;  %v1685_v61 = vor.u32 %v1684_v5, %v1680_v59  ;;  %v1689_v32 = vrot.slane %v1687_v10, 1  ;;  %v586_v33 = vrot.slane %v582_v11, 4 }
  0xb4   : > { %1819 = vrot.lane.b32.xlu1 %v1678_v8, %s3870_s29  ;;  %v2523_v8 = vrot.slane %v2521_v62, 1  ;;  %v591_v19 = vshll.u32 %v4580_v36, 16  ;;  %v4621_v37 = vpack.c.b16 %v1043_v21, %v1043_v21  ;;  %v595_v40 = vrot.slane %v590_v18, 4 }
  0xb5   : > { %1343 = vrot.lane.b32.xlu2 %v1301_v38, %s3869_s28  ;;  %v1233_v38 = vshll.u32 %v4610_v12, 16  ;;  %v1302_v42 = vrot.slane %v4589_v50, 1  ;;  %v1128_v47 = vor.u32 %v1127_v26, %v1123_v25  ;;  %v1132_v48 = vrot.slane %v1130_v28, 1  ;;  %v3816_v28 = vld [vmem:[#allocation2 + $0x9c] sm:$0xff] }
  0xb6   : > { %1899 = vrot.lane.b32.xlu0 %v1857_v63, %s3869_s28  ;;  %v583_v63 = vshll.u32 %v4573_v30, 16  ;;  %v2692_v30 = vrot.slane %v4576_v34, 1  ;;  %v2524_v31 = vsel %vm1061_vm9, %v2519_v60, %v2523_v8  ;;  %v905_v34 = vld [vmem:[#allocation2 + $0x50] sm:$0x1]  ;;  %v593_v46 = vor.u32 %v591_v19, %v590_v18  ;;  %v272_v60 = vld [vmem:[%s3966_s27 + $0x98] sm:$0xff] }
  0xb7   : > { %v4592_v53 = vpop.permute.xlu2 %2727  ;;  %v830_v49 = vsel %vm4138_vm8, %v595_v40, %v829_v23  ;;  %v1690_v39 = vsel %vm1061_vm9, %v1685_v61, %v1689_v32  ;;  %v1231_v15 = vshrl.u32 %v4610_v12, 16  ;;  %v1303_v54 = vrot.slane %v4606_v55, 1 }
  0xb8   : > { %v585_v20 = vor.u32 %v583_v63, %v582_v11  ;;  %v2694_v36 = vsel %vm1286_vm2, %v2692_v30, %v2693_v1  ;;  %v4629_v14 = vld [vmem:[#allocation2 + $0x60] sm:$0xff]  ;;  %v594_v52 = vsel %vm4114_vm6, %v586_v33, %v593_v46  ;;  %831 = vst [vmem:[#allocation2 + $0x74] sm:$0x1] %v830_v49  ;;  %v1235_v45 = vrot.slane %v1233_v38, 1 }
  0xb9   : > { %v3590_v50 = vld [vmem:[#allocation2 + $0x68] sm:$0x1]  ;;  %v1238_v2 = vshll.u32 %v4621_v37, 16  ;;  %828 = vst.msk [vmem:[#allocation2 + $0x70] sm:$0xf] %vm384_vm0, %v594_v52  ;;  %v305_v57 = vmul.f32 %v3974_v9, %v271_v43  ;;  %v2528_v58 = vshll.u32 %v4629_v14, 16  ;;  %v1133_v59 = vsel %vm1061_vm9, %v1128_v47, %v1132_v48 }
  0xba   : > { %v826_v41 = vsel %vm4127_vm7, %v585_v20, %v825_v29  ;;  %v2427_v56 = vunpack.c.l.b16 %v3590_v50  ;;  %v1137_v5 = vshll.u32 %v3726_v0, 16  ;;  %v1304_v10 = vsel %vm1286_vm2, %v1302_v42, %v1303_v54  ;;  %v4666_v48 = vld [vmem:[#allocation2 + $0x54] sm:$0xff] }
  0xbb   : > { %827 = vst [vmem:[#allocation2 + $0x6c] sm:$0xf] %v826_v41  ;;  %v1236_v55 = vor.u32 %v1235_v45, %v1231_v15  ;;  %v1240_v11 = vrot.slane %v1238_v2, 1  ;;  %v1858_v8 = vrot.slane %v4566_v3, 1  ;;  %v1859_v18 = vrot.slane %v4578_v24, 1  ;;  %v3817_v54 = vld [vmem:[#allocation2 + $0x18] sm:$0xff] }
  0xbc   : > { %1280 = vrot.lane.b32.xlu1 %v1229_v44, %s3870_s29  ;;  %v1035_v44 = vunpack.c.l.b16 %v905_v34  ;;  %v4643_v35 = vpack.c.b16 %v2427_v56, %v2427_v56  ;;  %v306_v25 = vmul.f32 %v3974_v9, %v272_v60  ;;  %v338_v26 = vadd.f32 %v3987_v13, %v305_v57  ;;  %v3416_v24 = vld [vmem:[#allocation2 + $0x5c] sm:$0x1] }
  0xbd   : > { %2655 = vrot.lane.b32.xlu2 %v2524_v31, %s3870_s29  ;;  %v2526_v30 = vshrl.u32 %v4629_v14, 16  ;;  %v2530_v1 = vrot.slane %v2528_v58, 1  ;;  %v1135_v61 = vshrl.u32 %v3726_v0, 16  ;;  %v1139_v32 = vrot.slane %v1137_v5, 1  ;;  %v932_v60 = vld [vmem:[#allocation2 + $0xbc] sm:$0x1] }
  0xbe   : > { %1361 = vrot.lane.b32.xlu0 %v1328_v16, %s3869_s28  ;;  %v1051_v63 = vpack.c.b16 %v1035_v44, %v1035_v44  ;;  %v2533_v31 = vshll.u32 %v4643_v35, 16  ;;  %v1241_v3 = vsel %vm1061_vm9, %v1236_v55, %v1240_v11  ;;  %v1305_v19 = vrot.slane %v3726_v0, 1 }
  0xbf   : > { %v4619_v4 = vpop.permute.xlu2 %1337  ;;  %v370_v38 = vpack.c.bf16 %v338_v26, %v338_v26  ;;  %v2531_v34 = vor.u32 %v2530_v1, %v2526_v30  ;;  %v1860_v41 = vsel %vm1286_vm2, %v1858_v8, %v1859_v18  ;;  %v339_v42 = vadd.f32 %v3987_v13, %v306_v25  ;;  %v3593_v15 = vld [vmem:[#allocation2 + $0x74] sm:$0x1]  ;;  %v273_v18 = vld [vmem:[%s3966_s27 + $0xa0] sm:$0xff]  ;;  %v274_v25 = vld [vmem:[%s3966_s27 + $0xa8] sm:$0xff] }
  0xc0   : > { %v1142_v33 = vshll.u32 %v1051_v63, 16  ;;  %v1306_v23 = vrot.slane %v1051_v63, 1  ;;  %v2535_v40 = vrot.slane %v2533_v31, 1  ;;  %v1593_v49 = vunpack.c.l.b16 %v3416_v24  ;;  %v832_v1 = vld [vmem:[#allocation2 + $0x78] sm:$0xf] }
  0xc1   : > { %v2695_v43 = vrot.slane %v4629_v14, 1  ;;  %v1329_v0 = vrot.slane %v4610_v12, 1  ;;  %v1694_v44 = vshll.u32 %v4666_v48, 16  ;;  %v597_v52 = vshrl.u32 %v370_v38, 16  ;;  %v4702_v24 = vld [vmem:[#allocation2 + $0xb4] sm:$0xff] }
  0xc2   : > { %v1144_v47 = vrot.slane %v1142_v33, 1  ;;  %v4671_v50 = vsel %vm1286_vm2, %v1305_v19, %v1306_v23  ;;  %v2536_v14 = vsel %vm1061_vm9, %v2531_v34, %v2535_v40  ;;  %v1330_v2 = vrot.slane %v4621_v37, 1 }
  0xc3   : > { %v371_v56 = vpack.c.bf16 %v339_v42, %v339_v42  ;;  %v4682_v12 = vpack.c.b16 %v1593_v49, %v1593_v49  ;;  %v1861_v5 = vrot.slane %v4666_v48, 1  ;;  %v1696_v55 = vrot.slane %v1694_v44, 1 }
  0xc4   : > { %2735 = vrot.lane.b32.xlu1 %v2694_v36, %s3869_s28  ;;  %v1140_v36 = vor.u32 %v1139_v32, %v1135_v61  ;;  %v600_v8 = vshll.u32 %v370_v38, 16  ;;  %v1331_v26 = vsel %vm1286_vm2, %v1329_v0, %v1330_v2  ;;  %v307_v19 = vmul.f32 %v3974_v9, %v273_v18  ;;  %v4717_v0 = vld [vmem:[#allocation2 + $0x54] sm:$0xff]  ;;  %v3819_v2 = vld [vmem:[#allocation2 + $0xa8] sm:$0xff] }
  0xc5   : > { %1264 = vrot.lane.b32.xlu2 %v1133_v59, %s3870_s29  ;;  %v4684_v59 = vld [vmem:[#allocation2 + $0x6c] sm:$0xff]  ;;  %v1699_v11 = vshll.u32 %v4682_v12, 16  ;;  %v608_v30 = vshll.u32 %v371_v56, 16  ;;  %v308_v23 = vmul.f32 %v3974_v9, %v274_v25 }
  0xc6   : > { %v1916_v62 = vpop.permute.xlu1 %1915  ;;  %1821 = vrot.lane.b32.xlu0 %v1690_v39, %s3870_s29  ;;  %v2696_v39 = vrot.slane %v4643_v35, 1  ;;  %v1145_v35 = vsel %vm1061_vm9, %v1140_v36, %v1144_v47  ;;  %v2540_v61 = vshll.u32 %v4684_v59, 16  ;;  %v1245_v36 = vshll.u32 %v4702_v24, 16 }
  0xc7   : > { %v1812_v21 = vpop.permute.xlu2 %1811  ;;  %v2538_v9 = vshrl.u32 %v4684_v59, 16  ;;  %v341_v44 = vadd.f32 %v3987_v13, %v308_v23  ;;  %v1147_v23 = vshrl.u32 %v4717_v0, 16 }
  0xc8   : > { %v1836_v16 = vpop.permute.xlu0 %1835  ;;  %v2697_v37 = vsel %vm1286_vm2, %v2695_v43, %v2696_v39  ;;  %v340_v43 = vadd.f32 %v3987_v13, %v307_v19  ;;  %v2542_v39 = vrot.slane %v2540_v61, 1 }
  0xc9   : > { %v1948_v29 = vsel %vm1367_vm10, %v3816_v28, %v1836_v16  ;;  %v599_v16 = vrot.slane %v597_v52, 7  ;;  %v908_v28 = vld [vmem:[#allocation2 + $0x5c] sm:$0x1]  ;;  %v373_v13 = vpack.c.bf16 %v341_v44, %v341_v44 }
  0xca   : > { %v1980_v20 = vsel %vm1400_vm11, %v1948_v29, %v1916_v62  ;;  %v3818_v62 = vld [vmem:[#allocation2 + $0xc] sm:$0xff]  ;;  %v605_v29 = vshrl.u32 %v371_v56, 16  ;;  %v1036_v34 = vunpack.c.l.b16 %v908_v28  ;;  %v4741_v28 = vld [vmem:[#allocation2 + $0x60] sm:$0xff] }
  0xcb   : > { %3538 = vmatmul.msk.bf16.vlgmr.msra.gmra.mxu3 %vm2012_vm12, %v1980_v20  ;;  %v1924_v63 = vsel %vm1367_vm10, %v3818_v62, %v1812_v21  ;;  %v1044_v21 = vunpack.c.l.b16 %v932_v60  ;;  %v602_v32 = vor.u32 %v600_v8, %v599_v16  ;;  %v603_v33 = vrot.slane %v599_v16, 4  ;;  %v3419_v60 = vld [vmem:[#allocation2 + $0x68] sm:$0x1] }
  0xcc   : > { %1345 = vrot.lane.b32.xlu1 %v1304_v10, %s3869_s28  ;;  %3783 = vmatpush.bf16.msra.mxu3 %v4513_v7  ;;  %v1692_v10 = vshrl.u32 %v4666_v48, 16  ;;  %v1243_v62 = vshrl.u32 %v4702_v24, 16  ;;  %v3820_v16 = vld [vmem:[#allocation2 + $0x24] sm:$0xff] }
  0xcd   : > { %1901 = vrot.lane.b32.xlu2 %v1860_v41, %s3869_s28  ;;  %v1701_v41 = vrot.slane %v1699_v11, 1  ;;  %v833_v42 = vsel %vm4127_vm7, %v602_v32, %v832_v1  ;;  %v622_v11 = vshrl.u32 %v373_v13, 16  ;;  %v625_v1 = vshll.u32 %v373_v13, 16 }
  0xce   : > { %v2726_v46 = vpop.permute.xlu1 %2725  ;;  %1282 = vrot.lane.b32.xlu0 %v1241_v3, %s3870_s29  ;;  %v1697_v40 = vor.u32 %v1696_v55, %v1692_v10  ;;  %834 = vst [vmem:[#allocation2 + $0x78] sm:$0xf] %v833_v42 }
  0xcf   : > { %v1838_v58 = vpop.permute.xlu2 %1837 }
  0xd0   : > { %v2646_v7 = vpop.permute.xlu0 %2645  ;;  %3784 = vmatpush.bf16.msra.mxu3 %v4532_v51  ;;  %v2428_v51 = vunpack.c.l.b16 %v3593_v15  ;;  %v1950_v56 = vsel %vm1367_vm10, %v3819_v2, %v1838_v58  ;;  %v4734_v58 = vpack.c.b16 %v1036_v34, %v1036_v34 }
  0xd1   : > { %v2758_v45 = vsel %vm1367_vm10, %v3817_v54, %v2646_v7  ;;  %v4715_v7 = vpack.c.b16 %v1044_v21, %v1044_v21 }
  0xd2   : > { %v2790_v57 = vsel %vm1400_vm11, %v2758_v45, %v2726_v46  ;;  %v4698_v20 = vpack.c.b16 %v2428_v51, %v2428_v51  ;;  %v836_v46 = vld [vmem:[#allocation2 + $0x80] sm:$0x1]  ;;  %v1702_v51 = vsel %vm1061_vm9, %v1697_v40, %v1701_v41 }
  0xd3   : > { %3700 = vmatmul.msk.bf16.vlgmr.msra.gmra.mxu2 %vm2012_vm12, %v2790_v57  ;;  %v1862_v57 = vrot.slane %v4682_v12, 1  ;;  %v1149_v12 = vshll.u32 %v4717_v0, 16 }
  0xd4   : > { %2657 = vrot.lane.b32.xlu1 %v2536_v14, %s3870_s29  ;;  %3785 = vmatpush.bf16.msra.mxu3 %v4557_v6  ;;  %v607_v6 = vrot.slane %v605_v29, 7  ;;  %v2545_v52 = vshll.u32 %v4698_v20, 16  ;;  %v372_v14 = vpack.c.bf16 %v340_v43, %v340_v43  ;;  %v839_v43 = vld [vmem:[#allocation2 + $0x84] sm:$0xf] }
  0xd5   : > { %1363 = vrot.lane.b32.xlu2 %v1331_v26, %s3869_s28  ;;  %v1863_v32 = vsel %vm1286_vm2, %v1861_v5, %v1862_v57  ;;  %v1151_v5 = vrot.slane %v1149_v12, 1 }
  0xd6   : > { %v1892_v31 = vpop.permute.xlu1 %1891  ;;  %2737 = vrot.lane.b32.xlu0 %v2697_v37, %s3869_s28  ;;  %v610_v47 = vor.u32 %v608_v30, %v607_v6  ;;  %v612_v49 = vrot.slane %v607_v6, 4  ;;  %v1250_v37 = vshll.u32 %v4715_v7, 16  ;;  %v614_v10 = vshrl.u32 %v372_v14, 16 }
  0xd7   : > { %v1956_v3 = vsel %vm1400_vm11, %v1924_v63, %v1892_v31  ;;  %v4713_v15 = vpop.permute.xlu2 %2649  ;;  %v1247_v63 = vrot.slane %v1245_v36, 1  ;;  %v2547_v25 = vrot.slane %v2545_v52, 1  ;;  %v617_v29 = vshll.u32 %v372_v14, 16  ;;  %v3821_v31 = vld [vmem:[#allocation2 + $0xc] sm:$0xff]  ;;  %v3822_v52 = vld [vmem:[#allocation2 + $0x18] sm:$0xff] }
  0xd8   : > { %v2648_v38 = vpop.permute.xlu0 %2647  ;;  %3526 = vmatmul.msk.bf16.vlgmr.msra.gmra.mxu0 %vm2012_vm12, %v1956_v3  ;;  %v611_v54 = vsel %vm4114_vm6, %v603_v33, %v610_v47  ;;  %v837_v45 = vsel %vm4138_vm8, %v612_v49, %v836_v46  ;;  %v616_v26 = vrot.slane %v614_v10, 7  ;;  %v624_v30 = vrot.slane %v622_v11, 7 }
  0xd9   : > { %835 = vst.msk [vmem:[#allocation2 + $0x7c] sm:$0xf] %vm384_vm0, %v611_v54  ;;  %v2760_v8 = vsel %vm1367_vm10, %v3820_v16, %v2648_v38  ;;  %v1248_v33 = vor.u32 %v1247_v63, %v1243_v62  ;;  %v1252_v3 = vrot.slane %v1250_v37, 1  ;;  %v1154_v38 = vshll.u32 %v4734_v58, 16 }
  0xda   : > { %838 = vst [vmem:[#allocation2 + $0x80] sm:$0x1] %v837_v45  ;;  %v2792_v19 = vsel %vm1400_vm11, %v2760_v8, %v4592_v53  ;;  %v620_v40 = vrot.slane %v616_v26, 4  ;;  %v627_v41 = vor.u32 %v625_v1, %v624_v30  ;;  %v1706_v53 = vshll.u32 %v4741_v28, 16 }
  0xdb   : > { %v619_v42 = vor.u32 %v617_v29, %v616_v26  ;;  %v1332_v46 = vrot.slane %v4702_v24, 1  ;;  %v1333_v36 = vrot.slane %v4715_v7, 1  ;;  %v1253_v47 = vsel %vm1061_vm9, %v1248_v33, %v1252_v3  ;;  %v843_v7 = vld [vmem:[#allocation2 + $0x8c] sm:$0x1] }
  0xdc   : > { %1266 = vrot.lane.b32.xlu1 %v1145_v35, %s3870_s29  ;;  %v2543_v35 = vor.u32 %v2542_v39, %v2538_v9  ;;  %v1156_v39 = vrot.slane %v1154_v38, 1  ;;  %v628_v44 = vsel %vm4114_vm6, %v620_v40, %v627_v41  ;;  %v1152_v45 = vor.u32 %v1151_v5, %v1147_v23 }
  0xdd   : > { %1823 = vrot.lane.b32.xlu2 %v1702_v51, %s3870_s29  ;;  %v1704_v14 = vshrl.u32 %v4741_v28, 16  ;;  %v629_v2 = vrot.slane %v624_v30, 4  ;;  %842 = vst.msk [vmem:[#allocation2 + $0x88] sm:$0xf] %vm384_vm0, %v628_v44  ;;  %v1708_v57 = vrot.slane %v1706_v53, 1  ;;  %v840_v13 = vsel %vm4127_vm7, %v619_v42, %v839_v43 }
  0xde   : > { %v1918_v55 = vpop.permute.xlu1 %1917  ;;  %1347 = vrot.lane.b32.xlu0 %v4671_v50, %s3869_s28  ;;  %v1594_v50 = vunpack.c.l.b16 %v3419_v60  ;;  %v2548_v48 = vsel %vm1061_vm9, %v2543_v35, %v2547_v25  ;;  %v1334_v63 = vsel %vm1286_vm2, %v1332_v46, %v1333_v36  ;;  %v2698_v37 = vrot.slane %v4684_v59, 1  ;;  %841 = vst [vmem:[#allocation2 + $0x84] sm:$0xf] %v840_v13  ;;  %v3823_v25 = vld [vmem:[#allocation2 + $0xb4] sm:$0xff]  ;;  %v911_v42 = vld [vmem:[#allocation2 + $0x68] sm:$0x1] }
  0xdf   : > { %v1982_v18 = vsel %vm1400_vm11, %v1950_v56, %v1918_v55  ;;  %v4753_v34 = vpop.permute.xlu2 %1258  ;;  %v2699_v10 = vrot.slane %v4698_v20, 1  ;;  %v844_v35 = vsel %vm4138_vm8, %v629_v2, %v843_v7  ;;  %v1157_v12 = vsel %vm1061_vm9, %v1152_v45, %v1156_v39  ;;  %v3608_v20 = vld [vmem:[#allocation2 + $0xb0] sm:$0x1]  ;;  %v3422_v30 = vld [vmem:[#allocation2 + $0x74] sm:$0x1] }
  0xe0   : > { %3539 = vmatmul.msk.bf16.gmra.mxu3 %vm2012_vm12, %v1982_v18  ;;  %v1257_v21 = vpop.permute.xlu0 %1256  ;;  %v4773_v60 = vld [vmem:[#allocation2 + $0x78] sm:$0xff]  ;;  %845 = vst [vmem:[#allocation2 + $0x8c] sm:$0x1] %v844_v35  ;;  %v1709_v22 = vor.u32 %v1708_v57, %v1704_v14  ;;  %v1864_v26 = vrot.slane %v4741_v28, 1  ;;  %v2433_v29 = vunpack.c.l.b16 %v3608_v20  ;;  %v1595_v5 = vunpack.c.l.b16 %v3422_v30  ;;  %v4827_v14 = vld [vmem:[#allocation2 + $0x60] sm:$0xff] }
  0xe1   : > { %v1371_v61 = vsel %vm1367_vm10, %v3821_v31, %v1257_v21  ;;  %v3596_v49 = vld [vmem:[#allocation2 + $0x80] sm:$0x1]  ;;  %v2552_v59 = vshll.u32 %v4773_v60, 16  ;;  %v2700_v8 = vsel %vm1286_vm2, %v2698_v37, %v2699_v10  ;;  %v1037_v2 = vunpack.c.l.b16 %v911_v42  ;;  %v3825_v57 = vld [vmem:[#allocation2 + $0x24] sm:$0xff] }
  0xe2   : > { %v1404_v6 = vsel %vm1400_vm11, %v1371_v61, %v4619_v4  ;;  %v4759_v4 = vpack.c.b16 %v1594_v50, %v1594_v50  ;;  %v2429_v17 = vunpack.c.l.b16 %v3596_v49  ;;  %v4796_v50 = vld [vmem:[#allocation2 + $0xa8] sm:$0xff]  ;;  %v2550_v61 = vshrl.u32 %v4773_v60, 16  ;;  %v3824_v49 = vld [vmem:[#allocation2 + $0x30] sm:$0xff] }
  0xe3   : > { %3555 = vmatmul.msk.bf16.gmra.mxu1 %vm2012_vm12, %v1404_v6  ;;  %3701 = vmatmul.msk.bf16.gmra.mxu2 %vm2012_vm12, %v2792_v19  ;;  %v1308_v6 = vrot.slane %v4717_v0, 1  ;;  %v1309_v19 = vrot.slane %v4734_v58, 1  ;;  %v2600_v23 = vshll.u32 %v4796_v50, 16  ;;  %v4812_v41 = vpack.c.b16 %v2433_v29, %v2433_v29 }
  0xe4   : > { %1903 = vrot.lane.b32.xlu1 %v1863_v32, %s3869_s28  ;;  %v1711_v51 = vshll.u32 %v4759_v4, 16  ;;  %v4788_v16 = vpack.c.b16 %v2429_v17, %v2429_v17  ;;  %v1865_v21 = vrot.slane %v4759_v4, 1  ;;  %v2554_v32 = vrot.slane %v2552_v59, 1 }
  0xe5   : > { %1284 = vrot.lane.b32.xlu2 %v1253_v47, %s3870_s29  ;;  %v1310_v58 = vsel %vm1286_vm2, %v1308_v6, %v1309_v19  ;;  %v2598_v46 = vshrl.u32 %v4796_v50, 16  ;;  %v2602_v36 = vrot.slane %v2600_v23, 1  ;;  %v2605_v47 = vshll.u32 %v4812_v41, 16  ;;  %v4858_v6 = vld [vmem:[#allocation2 + $0xb4] sm:$0xff] }
  0xe6   : > { %v1814_v9 = vpop.permute.xlu1 %1813  ;;  %2659 = vrot.lane.b32.xlu0 %v2548_v48, %s3870_s29  ;;  %v1713_v11 = vrot.slane %v1711_v51, 1  ;;  %v2557_v33 = vshll.u32 %v4788_v16, 16  ;;  %v4809_v48 = vld [vmem:[#allocation2 + $0x6c] sm:$0xff]  ;;  %v1866_v40 = vsel %vm1286_vm2, %v1864_v26, %v1865_v21  ;;  %v2555_v4 = vor.u32 %v2554_v32, %v2550_v61  ;;  %v3826_v21 = vld [vmem:[#allocation2 + $0x18] sm:$0xff] }
  0xe7   : > { %v1926_v54 = vsel %vm1367_vm10, %v3822_v52, %v1814_v9  ;;  %v4782_v55 = vpop.permute.xlu2 %1895  ;;  %v2762_v43 = vsel %vm1367_vm10, %v3824_v49, %v4713_v15  ;;  %v4821_v39 = vpack.c.b16 %v1595_v5, %v1595_v5  ;;  %v1718_v44 = vshll.u32 %v4809_v48, 16 }
  0xe8   : > { %v1894_v56 = vpop.permute.xlu0 %1893  ;;  %v1714_v31 = vsel %vm1061_vm9, %v1709_v22, %v1713_v11  ;;  %v2559_v53 = vrot.slane %v2557_v33, 1  ;;  %v2702_v45 = vrot.slane %v4788_v16, 1  ;;  %v2603_v17 = vor.u32 %v2602_v36, %v2598_v46  ;;  %v4842_v16 = vld [vmem:[#allocation2 + $0x84] sm:$0xff] }
  0xe9   : > { %v1958_v62 = vsel %vm1400_vm11, %v1926_v54, %v1894_v56  ;;  %v2701_v54 = vrot.slane %v4773_v60, 1  ;;  %v3599_v56 = vld [vmem:[#allocation2 + $0x8c] sm:$0x1]  ;;  %v2607_v13 = vrot.slane %v2605_v47, 1  ;;  %v1716_v37 = vshrl.u32 %v4809_v48, 16 }
  0xea   : > { %3527 = vmatmul.msk.bf16.gmra.mxu0 %vm2012_vm12, %v1958_v62  ;;  %v2560_v15 = vsel %vm1061_vm9, %v2555_v4, %v2559_v53  ;;  %v1161_v62 = vshll.u32 %v4827_v14, 16  ;;  %v1720_v10 = vrot.slane %v1718_v44, 1  ;;  %v1723_v22 = vshll.u32 %v4821_v39, 16  ;;  %v914_v44 = vld [vmem:[#allocation2 + $0x74] sm:$0x1] }
  0xeb   : > { %v1053_v11 = vpack.c.b16 %v1037_v2, %v1037_v2  ;;  %v2430_v59 = vunpack.c.l.b16 %v3599_v56  ;;  %v2713_v20 = vrot.slane %v4796_v50, 1  ;;  %v1373_v29 = vsel %vm1367_vm10, %v3826_v21, %v4753_v34  ;;  %v3827_v34 = vld [vmem:[#allocation2 + $0xc0] sm:$0xff] }
  0xec   : > { %1365 = vrot.lane.b32.xlu1 %v1334_v63, %s3869_s28  ;;  %v1725_v61 = vrot.slane %v1723_v22, 1  ;;  %v2564_v33 = vshll.u32 %v4842_v16, 16  ;;  %v2612_v49 = vshll.u32 %v4858_v6, 16  ;;  %v2610_v56 = vshrl.u32 %v4858_v6, 16 }
  0xed   : > { %2739 = vrot.lane.b32.xlu2 %v2700_v8, %s3869_s28  ;;  %v2608_v8 = vsel %vm1061_vm9, %v2603_v17, %v2607_v13  ;;  %v1166_v26 = vshll.u32 %v1053_v11, 16  ;;  %v4853_v32 = vpack.c.b16 %v2430_v59, %v2430_v59  ;;  %v4878_v17 = vld [vmem:[#allocation2 + $0x6c] sm:$0xff]  ;;  %v1038_v13 = vunpack.c.l.b16 %v914_v44 }
  0xee   : > { %v1840_v18 = vpop.permute.xlu1 %1839  ;;  %1268 = vrot.lane.b32.xlu0 %v1157_v12, %s3870_s29  ;;  %v2703_v12 = vsel %vm1286_vm2, %v2701_v54, %v2702_v45  ;;  %v2566_v46 = vrot.slane %v2564_v33, 1  ;;  %v3828_v54 = vld [vmem:[#allocation2 + $0x3c] sm:$0xff]  ;;  %v3830_v44 = vld [vmem:[#allocation2 + $0x30] sm:$0xff] }
  0xef   : > { %v1952_v27 = vsel %vm1367_vm10, %v3823_v25, %v1840_v18  ;;  %v4807_v38 = vpop.permute.xlu2 %1921  ;;  %v3611_v18 = vld [vmem:[#allocation2 + $0xbc] sm:$0x1]  ;;  %v1159_v25 = vshrl.u32 %v4827_v14, 16  ;;  %v2569_v36 = vshll.u32 %v4853_v32, 16 }
  0xf0   : > { %v1920_v1 = vpop.permute.xlu0 %1919  ;;  %v2434_v19 = vunpack.c.l.b16 %v3611_v18 }
  0xf1   : > { %v1984_v3 = vsel %vm1400_vm11, %v1952_v27, %v1920_v1  ;;  %v1163_v27 = vrot.slane %v1161_v62, 1  ;;  %v1721_v1 = vor.u32 %v1720_v10, %v1716_v37  ;;  %v1867_v37 = vrot.slane %v4809_v48, 1 }
  0xf2   : > { %3540 = vmatmul.msk.bf16.gmra.mxu3 %vm2012_vm12, %v1984_v3  ;;  %v2450_v47 = vpack.c.b16 %v2434_v19, %v2434_v19  ;;  %v1868_v10 = vrot.slane %v4821_v39, 1  ;;  %v3829_v39 = vld [vmem:[#allocation2 + $0x24] sm:$0xff] }
  0xf3   : > { %v1726_v42 = vsel %vm1061_vm9, %v1721_v1, %v1725_v61  ;;  %v1171_v61 = vshrl.u32 %v4878_v17, 16  ;;  %v3614_v19 = vld [vmem:[#allocation2 + $0xc8] sm:$0x1] }
  0xf4   : > { %1825 = vrot.lane.b32.xlu1 %v1714_v31, %s3870_s29  ;;  %v1869_v18 = vsel %vm1286_vm2, %v1867_v37, %v1868_v10  ;;  %v2717_v21 = vrot.slane %v2450_v47, 1 }
  0xf5   : > { %1349 = vrot.lane.b32.xlu2 %v1310_v58, %s3869_s28  ;;  %v2562_v58 = vshrl.u32 %v4842_v16, 16 }
  0xf6   : > { %v2730_v9 = vpop.permute.xlu1 %2729  ;;  %1905 = vrot.lane.b32.xlu0 %v1866_v40, %s3869_s28  ;;  %v1164_v40 = vor.u32 %v1163_v27, %v1159_v25 }
  0xf7   : > { %v2794_v52 = vsel %vm1400_vm11, %v2762_v43, %v2730_v9  ;;  %v4837_v35 = vpop.permute.xlu2 %1817  ;;  %v1311_v43 = vrot.slane %v4827_v14, 1  ;;  %v1312_v9 = vrot.slane %v1053_v11, 1  ;;  %v2567_v2 = vor.u32 %v2566_v46, %v2562_v58 }
  0xf8   : > { %3702 = vmatmul.msk.bf16.gmra.mxu2 %vm2012_vm12, %v2794_v52  ;;  %v1816_v7 = vpop.permute.xlu0 %1815  ;;  %v2435_v46 = vunpack.c.l.b16 %v3614_v19 }
  0xf9   : > { %v1928_v51 = vsel %vm1367_vm10, %v3825_v57, %v1816_v7  ;;  %v2571_v7 = vrot.slane %v2569_v36, 1  ;;  %v2614_v57 = vrot.slane %v2612_v49, 1  ;;  %v3602_v49 = vld [vmem:[#allocation2 + $0x98] sm:$0x1] }
  0xfa   : > { %v1960_v63 = vsel %vm1400_vm11, %v1928_v51, %v4782_v55  ;;  %v2714_v55 = vrot.slane %v4812_v41, 1  ;;  %v1168_v41 = vrot.slane %v1166_v26, 1  ;;  %v2617_v51 = vshll.u32 %v2450_v47, 16 }
  0xfb   : > { %3528 = vmatmul.msk.bf16.gmra.mxu0 %vm2012_vm12, %v1960_v63  ;;  %v1313_v63 = vsel %vm1286_vm2, %v1311_v43, %v1312_v9  ;;  %v2572_v22 = vsel %vm1061_vm9, %v2567_v2, %v2571_v7  ;;  %v2615_v11 = vor.u32 %v2614_v57, %v2610_v56  ;;  %v2716_v26 = vrot.slane %v4858_v6, 1  ;;  %v4927_v57 = vld [vmem:[#allocation2 + $0x90] sm:$0xff] }
  0xfc   : > { %2661 = vrot.lane.b32.xlu1 %v2560_v15, %s3870_s29  ;;  %v2715_v5 = vsel %vm1286_vm2, %v2713_v20, %v2714_v55  ;;  %v2619_v59 = vrot.slane %v2617_v51, 1  ;;  %v4889_v20 = vpack.c.b16 %v1038_v13, %v1038_v13  ;;  %v1173_v55 = vshll.u32 %v4878_v17, 16 }
  0xfd   : > { %2669 = vrot.lane.b32.xlu2 %v2608_v8, %s3870_s29  ;;  %v3425_v8 = vld [vmem:[#allocation2 + $0x80] sm:$0x1]  ;;  %v4925_v56 = vpack.c.b16 %v2435_v46, %v2435_v46  ;;  %v2431_v51 = vunpack.c.l.b16 %v3602_v49 }
  0xfe   : > { %v1340_v30 = vpop.permute.xlu1 %1339  ;;  %2741 = vrot.lane.b32.xlu0 %v2703_v12, %s3869_s28  ;;  %v1175_v33 = vrot.slane %v1173_v55, 1 }
  0xff   : > { %v1406_v31 = vsel %vm1400_vm11, %v1373_v29, %v1340_v30  ;;  %v4864_v53 = vpop.permute.xlu2 %1278  ;;  %v4896_v29 = vld [vmem:[#allocation2 + $0x78] sm:$0xff]  ;;  %v1596_v30 = vunpack.c.l.b16 %v3425_v8 }
 0x100   : > { %3556 = vmatmul.msk.bf16.gmra.mxu1 %vm2012_vm12, %v1406_v31  ;;  %v1842_v3 = vpop.permute.xlu0 %1841  ;;  %v2620_v31 = vsel %vm1061_vm9, %v2615_v11, %v2619_v59  ;;  %v1176_v36 = vor.u32 %v1175_v33, %v1171_v61  ;;  %v1728_v43 = vshrl.u32 %v4896_v29, 16  ;;  %v2576_v11 = vshll.u32 %v4927_v57, 16 }
 0x101   : > { %v1954_v23 = vsel %vm1367_vm10, %v3827_v34, %v1842_v3  ;;  %v1178_v3 = vshll.u32 %v4889_v20, 16  ;;  %v4912_v58 = vpack.c.b16 %v1596_v30, %v1596_v30 }
 0x102   : > { %v1986_v4 = vsel %vm1400_vm11, %v1954_v23, %v4807_v38  ;;  %v1169_v38 = vsel %vm1061_vm9, %v1164_v40, %v1168_v41  ;;  %v2704_v23 = vrot.slane %v4842_v16, 1  ;;  %v1730_v40 = vshll.u32 %v4896_v29, 16 }
 0x103   : > { %3541 = vmatmul.msk.bf16.gmra.mxu3 %vm2012_vm12, %v1986_v4  ;;  %v4909_v4 = vld [vmem:[#allocation2 + $0xc0] sm:$0xff]  ;;  %v1180_v47 = vrot.slane %v1178_v3, 1  ;;  %v2578_v61 = vrot.slane %v2576_v11, 1  ;;  %v3832_v3 = vld [vmem:[#allocation2 + $0x90] sm:$0xff] }
 0x104   : > { %2749 = vrot.lane.b32.xlu1 %v2715_v5, %s3869_s28  ;;  %v2705_v5 = vrot.slane %v4853_v32, 1  ;;  %v1732_v9 = vrot.slane %v1730_v40, 1  ;;  %v2624_v2 = vshll.u32 %v4909_v4, 16  ;;  %v1393_v19 = vsel %vm1367_vm10, %v3832_v3, %v4864_v53  ;;  %v3833_v53 = vld [vmem:[#allocation2 + $0x30] sm:$0xff] }
 0x105   : > { %1270 = vrot.lane.b32.xlu2 %v1169_v38, %s3870_s29  ;;  %v1735_v38 = vshll.u32 %v4912_v58, 16 }
 0x106   : > { %v2652_v52 = vpop.permute.xlu1 %2651  ;;  %1827 = vrot.lane.b32.xlu0 %v1726_v42, %s3870_s29  ;;  %v2718_v42 = vsel %vm1286_vm2, %v2716_v26, %v2717_v21  ;;  %v2706_v32 = vsel %vm1286_vm2, %v2704_v23, %v2705_v5  ;;  %v1733_v10 = vor.u32 %v1732_v9, %v1728_v43  ;;  %v2626_v55 = vrot.slane %v2624_v2, 1 }
 0x107   : > { %v2764_v45 = vsel %vm1367_vm10, %v3828_v54, %v2652_v52  ;;  %v4885_v12 = vpop.permute.xlu2 %2733  ;;  %v1930_v52 = vsel %vm1367_vm10, %v3830_v44, %v4837_v35  ;;  %v1181_v35 = vsel %vm1061_vm9, %v1176_v36, %v1180_v47  ;;  %v1870_v21 = vrot.slane %v4896_v29, 1  ;;  %v4958_v36 = vld [vmem:[#allocation2 + $0x84] sm:$0xff] }
 0x108   : > { %v2732_v15 = vpop.permute.xlu0 %2731 }
 0x109   : > { %v2796_v62 = vsel %vm1400_vm11, %v2764_v45, %v2732_v15  ;;  %v1314_v45 = vrot.slane %v4878_v17, 1  ;;  %v1315_v15 = vrot.slane %v4889_v20, 1  ;;  %v2622_v20 = vshrl.u32 %v4909_v4, 16 }
 0x10a   : > { %3703 = vmatmul.msk.bf16.gmra.mxu2 %vm2012_vm12, %v2796_v62  ;;  %v917_v62 = vld [vmem:[#allocation2 + $0x80] sm:$0x1] }
 0x10b   : > { %v1039_v26 = vunpack.c.l.b16 %v917_v62  ;;  %v2627_v23 = vor.u32 %v2626_v55, %v2622_v20 }
 0x10c   : > { %1351 = vrot.lane.b32.xlu1 %v1313_v63, %s3869_s28  ;;  %v3831_v63 = vld [vmem:[#allocation2 + $0x48] sm:$0xff] }
 0x10d   : > { %1907 = vrot.lane.b32.xlu2 %v1869_v18, %s3869_s28  ;;  %v1316_v18 = vsel %vm1286_vm2, %v1314_v45, %v1315_v15  ;;  %v1742_v15 = vshll.u32 %v4958_v36, 16 }
 0x10e   : > { %v1261_v25 = vpop.permute.xlu1 %1260  ;;  %2663 = vrot.lane.b32.xlu0 %v2572_v22, %s3870_s29  ;;  %v1737_v22 = vrot.slane %v1735_v38, 1 }
 0x10f   : > { %v1375_v27 = vsel %vm1367_vm10, %v3829_v39, %v1261_v25  ;;  %v4907_v41 = vpop.permute.xlu2 %1343  ;;  %v2629_v25 = vshll.u32 %v4925_v56, 16  ;;  %v2447_v39 = vpack.c.b16 %v2431_v51, %v2431_v51  ;;  %v2707_v51 = vrot.slane %v4927_v57, 1 }
 0x110   : > { %v1342_v1 = vpop.permute.xlu0 %1341  ;;  %v1738_v30 = vsel %vm1061_vm9, %v1733_v10, %v1737_v22  ;;  %v1744_v20 = vrot.slane %v1742_v15, 1 }
 0x111   : > { %v1408_v34 = vsel %vm1400_vm11, %v1375_v27, %v1342_v1  ;;  %v4942_v27 = vld [vmem:[#allocation2 + $0x78] sm:$0xff]  ;;  %v3428_v1 = vld [vmem:[#allocation2 + $0x8c] sm:$0x1]  ;;  %v2581_v33 = vshll.u32 %v2447_v39, 16  ;;  %v2631_v40 = vrot.slane %v2629_v25, 1 }
 0x112   : > { %3557 = vmatmul.msk.bf16.gmra.mxu1 %vm2012_vm12, %v1408_v34  ;;  %v1597_v47 = vunpack.c.l.b16 %v3428_v1 }
 0x113   : > { %v2583_v9 = vrot.slane %v2581_v33, 1 }
 0x114   : > { %2671 = vrot.lane.b32.xlu1 %v2620_v31, %s3870_s29  ;;  %v2574_v31 = vshrl.u32 %v4927_v57, 16 }
 0x115   : > { %2743 = vrot.lane.b32.xlu2 %v2706_v32, %s3869_s28 }
 0x116   : > { %v1898_v54 = vpop.permute.xlu1 %1897  ;;  %2751 = vrot.lane.b32.xlu0 %v2718_v42, %s3869_s28  ;;  %v4953_v42 = vpack.c.b16 %v1039_v26, %v1039_v26  ;;  %v2579_v43 = vor.u32 %v2578_v61, %v2574_v31 }
 0x117   : > { %v1962_v7 = vsel %vm1400_vm11, %v1930_v52, %v1898_v54  ;;  %v4937_v8 = vpop.permute.xlu2 %2655  ;;  %v2632_v52 = vsel %vm1061_vm9, %v2627_v23, %v2631_v40  ;;  %v1183_v54 = vshrl.u32 %v4942_v27, 16  ;;  %v1873_v40 = vrot.slane %v4958_v36, 1 }
 0x118   : > { %3529 = vmatmul.msk.bf16.gmra.mxu0 %vm2012_vm12, %v1962_v7  ;;  %v2654_v13 = vpop.permute.xlu0 %2653  ;;  %v1190_v2 = vshll.u32 %v4953_v42, 16  ;;  %v1613_v7 = vpack.c.b16 %v1597_v47, %v1597_v47 }
 0x119   : > { %v2766_v37 = vsel %vm1367_vm10, %v3831_v63, %v2654_v13  ;;  %v2708_v13 = vrot.slane %v2447_v39, 1  ;;  %v3834_v63 = vld [vmem:[#allocation2 + $0x3c] sm:$0xff] }
 0x11a   : > { %v2798_v59 = vsel %vm1400_vm11, %v2766_v37, %v4885_v12  ;;  %v1871_v12 = vrot.slane %v4912_v58, 1  ;;  %v1185_v58 = vshll.u32 %v4942_v27, 16  ;;  %v1192_v22 = vrot.slane %v1190_v2, 1 }
 0x11b   : > { %3704 = vmatmul.msk.bf16.gmra.mxu2 %vm2012_vm12, %v2798_v59  ;;  %v1740_v59 = vshrl.u32 %v4958_v36, 16  ;;  %v1747_v55 = vshll.u32 %v1613_v7, 16  ;;  %v2709_v26 = vsel %vm1286_vm2, %v2707_v51, %v2708_v13  ;;  %v5007_v13 = vld [vmem:[#allocation2 + $0x90] sm:$0xff] }
 0x11c   : > { %1272 = vrot.lane.b32.xlu1 %v1181_v35, %s3870_s29  ;;  %v1872_v32 = vsel %vm1286_vm2, %v1870_v21, %v1871_v12  ;;  %v1187_v45 = vrot.slane %v1185_v58, 1  ;;  %v3605_v35 = vld [vmem:[#allocation2 + $0xa4] sm:$0x1]  ;;  %v2719_v21 = vrot.slane %v4909_v4, 1  ;;  %v2720_v12 = vrot.slane %v4925_v56, 1  ;;  %v3835_v56 = vld [vmem:[#allocation2 + $0x9c] sm:$0xff] }
 0x11d   : > { %1829 = vrot.lane.b32.xlu2 %v1738_v30, %s3870_s29  ;;  %v2432_v25 = vunpack.c.l.b16 %v3605_v35  ;;  %v1745_v31 = vor.u32 %v1744_v20, %v1740_v59  ;;  %v1749_v61 = vrot.slane %v1747_v55, 1  ;;  %v1874_v58 = vrot.slane %v1613_v7, 1 }
 0x11e   : > { %v1360_v34 = vpop.permute.xlu1 %1359  ;;  %1353 = vrot.lane.b32.xlu0 %v1316_v18, %s3869_s28  ;;  %v1188_v10 = vor.u32 %v1187_v45, %v1183_v54  ;;  %v4978_v18 = vld [vmem:[#allocation2 + $0x9c] sm:$0xff]  ;;  %v1317_v54 = vrot.slane %v4942_v27, 1  ;;  %v1318_v45 = vrot.slane %v4953_v42, 1 }
 0x11f   : > { %v1426_v5 = vsel %vm1400_vm11, %v1393_v19, %v1360_v34  ;;  %v4964_v44 = vpop.permute.xlu2 %1264  ;;  %v2448_v33 = vpack.c.b16 %v2432_v25, %v2432_v25  ;;  %v2588_v3 = vshll.u32 %v4978_v18, 16  ;;  %v3617_v19 = vld [vmem:[#allocation2 + $0xd4] sm:$0x1]  ;;  %v2721_v34 = vsel %vm1286_vm2, %v2719_v21, %v2720_v12  ;;  %v5020_v12 = vld [vmem:[#allocation2 + $0x84] sm:$0xff] }
 0x120   : > { %3566 = vmatmul.msk.bf16.vlgmr.msrb.gmra.mxu3 %vm2012_vm12, %v1426_v5  ;;  %v1263_v46 = vpop.permute.xlu0 %1262  ;;  %v1193_v1 = vsel %vm1061_vm9, %v1188_v10, %v1192_v22  ;;  %v2436_v47 = vunpack.c.l.b16 %v3617_v19  ;;  %v1875_v15 = vsel %vm1286_vm2, %v1873_v40, %v1874_v58  ;;  %v2710_v55 = vrot.slane %v4978_v18, 1 }
 0x121   : > { %v1377_v49 = vsel %vm1367_vm10, %v3833_v53, %v1263_v46  ;;  %v4994_v46 = vld [vmem:[#allocation2 + $0xcc] sm:$0xff]  ;;  %v2711_v25 = vrot.slane %v2448_v33, 1  ;;  %v1754_v21 = vshll.u32 %v5007_v13, 16  ;;  %v1752_v40 = vshrl.u32 %v5007_v13, 16 }
 0x122   : > { %v1410_v38 = vsel %vm1400_vm11, %v1377_v49, %v4907_v41  ;;  %v2584_v41 = vsel %vm1061_vm9, %v2579_v43, %v2583_v9  ;;  %v1750_v49 = vsel %vm1061_vm9, %v1745_v31, %v1749_v61  ;;  %v2590_v43 = vrot.slane %v2588_v3, 1  ;;  %v3837_v61 = vld [vmem:[#allocation2 + $0x48] sm:$0xff] }
 0x123   : > { %3558 = vmatmul.msk.bf16.gmra.mxu1 %vm2012_vm12, %v1410_v38  ;;  %v2593_v9 = vshll.u32 %v2448_v33, 16  ;;  %v3431_v38 = vld [vmem:[#allocation2 + $0x98] sm:$0x1]  ;;  %v2636_v2 = vshll.u32 %v4994_v46, 16  ;;  %v2452_v51 = vpack.c.b16 %v2436_v47, %v2436_v47  ;;  %v2634_v42 = vshrl.u32 %v4994_v46, 16 }
 0x124   : > { %1909 = vrot.lane.b32.xlu1 %v1872_v32, %s3869_s28  ;;  %v2586_v32 = vshrl.u32 %v4978_v18, 16  ;;  %v1756_v58 = vrot.slane %v1754_v21, 1 }
 0x125   : > { %2665 = vrot.lane.b32.xlu2 %v2584_v41, %s3870_s29  ;;  %v1598_v41 = vunpack.c.l.b16 %v3431_v38  ;;  %v2638_v10 = vrot.slane %v2636_v2, 1  ;;  %v2641_v22 = vshll.u32 %v2452_v51, 16 }
 0x126   : > { %v1820_v62 = vpop.permute.xlu1 %1819  ;;  %2673 = vrot.lane.b32.xlu0 %v2632_v52, %s3870_s29  ;;  %v2591_v35 = vor.u32 %v2590_v43, %v2586_v32  ;;  %v2723_v32 = vrot.slane %v2452_v51, 1 }
 0x127   : > { %v1932_v37 = vsel %vm1367_vm10, %v3834_v63, %v1820_v62  ;;  %v4985_v30 = vpop.permute.xlu2 %1901  ;;  %v2595_v62 = vrot.slane %v2593_v9, 1  ;;  %v920_v63 = vld [vmem:[#allocation2 + $0x8c] sm:$0x1]  ;;  %v2639_v33 = vor.u32 %v2638_v10, %v2634_v42  ;;  %v2643_v19 = vrot.slane %v2641_v22, 1 }
 0x128   : > { %v1900_v11 = vpop.permute.xlu0 %1899 }
 0x129   : > { %v1964_v39 = vsel %vm1400_vm11, %v1932_v37, %v1900_v11  ;;  %v1319_v37 = vsel %vm1286_vm2, %v1317_v54, %v1318_v45  ;;  %v3836_v11 = vld [vmem:[#allocation2 + $0x54] sm:$0xff]  ;;  %v2644_v43 = vsel %vm1061_vm9, %v2639_v33, %v2643_v19  ;;  %v3841_v19 = vld [vmem:[#allocation2 + $0x48] sm:$0xff] }
 0x12a   : > { %3530 = vmatmul.msk.bf16.gmra.mxu0 %vm2012_vm12, %v1964_v39  ;;  %v2768_v59 = vsel %vm1367_vm10, %v3836_v11, %v4937_v8  ;;  %v2596_v8 = vsel %vm1061_vm9, %v2591_v35, %v2595_v62  ;;  %v3839_v35 = vld [vmem:[#allocation2 + $0xa8] sm:$0xff]  ;;  %v1320_v11 = vrot.slane %v5020_v12, 1 }
 0x12c   : > { %2745 = vrot.lane.b32.xlu1 %v2709_v26, %s3869_s28  ;;  %v5017_v26 = vpack.c.b16 %v1598_v41, %v1598_v41 }
 0x12d   : > { %2753 = vrot.lane.b32.xlu2 %v2721_v34, %s3869_s28  ;;  %v1197_v34 = vshll.u32 %v5020_v12, 16 }
 0x12e   : > { %v1281_v23 = vpop.permute.xlu1 %1280  ;;  %1274 = vrot.lane.b32.xlu0 %v1193_v1, %s3870_s29  ;;  %v1040_v1 = vunpack.c.l.b16 %v920_v63  ;;  %v1759_v47 = vshll.u32 %v5017_v26, 16 }
 0x12f   : > { %v1395_v5 = vsel %vm1367_vm10, %v3835_v56, %v1281_v23  ;;  %v5004_v7 = vpop.permute.xlu2 %1363  ;;  %v2712_v56 = vsel %vm1286_vm2, %v2710_v55, %v2711_v25  ;;  %v1199_v9 = vrot.slane %v1197_v34, 1  ;;  %v3840_v25 = vld [vmem:[#allocation2 + $0x60] sm:$0xff] }
 0x130   : > { %v1362_v53 = vpop.permute.xlu0 %1361  ;;  %v1761_v41 = vrot.slane %v1759_v47, 1 }
 0x131   : > { %v1428_v52 = vsel %vm1400_vm11, %v1395_v5, %v1362_v53  ;;  %v1056_v53 = vpack.c.b16 %v1040_v1, %v1040_v1 }
 0x132   : > { %3567 = vmatmul.msk.bf16.gmra.mxu3 %vm2012_vm12, %v1428_v52  ;;  %v3838_v52 = vld [vmem:[#allocation2 + $0x3c] sm:$0xff] }
 0x133   : > { %v1202_v38 = vshll.u32 %v1056_v53, 16  ;;  %v1379_v54 = vsel %vm1367_vm10, %v3838_v52, %v4964_v44 }
 0x134   : > { %1831 = vrot.lane.b32.xlu1 %v1750_v49, %s3870_s29  ;;  %v2722_v49 = vrot.slane %v4994_v46, 1 }
 0x135   : > { %1355 = vrot.lane.b32.xlu2 %v1319_v37, %s3869_s28  ;;  %v1204_v42 = vrot.slane %v1202_v38, 1 }
 0x136   : > { %v2736_v20 = vpop.permute.xlu1 %2735  ;;  %1911 = vrot.lane.b32.xlu0 %v1875_v15, %s3869_s28  ;;  %v1757_v15 = vor.u32 %v1756_v58, %v1752_v40  ;;  %v2724_v63 = vsel %vm1286_vm2, %v2722_v49, %v2723_v32  ;;  %v2193_v40 = vpop.f32.mrf.mxu1  ;;  %v5071_v49 = vld [vmem:[%s5357_s2] ss:$0 sm:$0xff]  ;;  %v3842_v32 = vld [vmem:[#allocation2 + $0x54] sm:$0xff] }
 0x137   : > { %v2800_v39 = vsel %vm1400_vm11, %v2768_v59, %v2736_v20  ;;  %v5030_v5 = vpop.permute.xlu2 %1823  ;;  %v1321_v59 = vrot.slane %v1056_v53, 1 }
 0x138   : > { %3705 = vmatmul.msk.bf16.gmra.mxu2 %vm2012_vm12, %v2800_v39  ;;  %v1822_v31 = vpop.permute.xlu0 %1821  ;;  %v1762_v22 = vsel %vm1061_vm9, %v1757_v15, %v1761_v41  ;;  %v5082_v15 = vld [vmem:[%s5358_s3] ss:$0 sm:$0xff] }
 0x139   : > { %v1934_v3 = vsel %vm1367_vm10, %v3837_v61, %v1822_v31  ;;  %v1322_v1 = vsel %vm1286_vm2, %v1320_v11, %v1321_v59  ;;  %v1876_v31 = vrot.slane %v5007_v13, 1 }
 0x13a   : > { %v1966_v23 = vsel %vm1400_vm11, %v1934_v3, %v4985_v30  ;;  %v1195_v30 = vshrl.u32 %v5020_v12, 16 }
 0x13b   : > { %3531 = vmatmul.msk.bf16.gmra.mxu0 %vm2012_vm12, %v1966_v23 }
 0x13c   : > { %2667 = vrot.lane.b32.xlu1 %v2596_v8, %s3870_s29  ;;  %v1200_v37 = vor.u32 %v1199_v9, %v1195_v30  ;;  %v1877_v8 = vrot.slane %v5017_v26, 1 }
 0x13d   : > { %2675 = vrot.lane.b32.xlu2 %v2644_v43, %s3870_s29  ;;  %v1936_v43 = vsel %vm1367_vm10, %v3842_v32, %v5030_v5 }
 0x13e   : > { %v1346_v45 = vpop.permute.xlu1 %1345  ;;  %2747 = vrot.lane.b32.xlu0 %v2712_v56, %s3869_s28  ;;  %v1205_v20 = vsel %vm1061_vm9, %v1200_v37, %v1204_v42  ;;  %v1878_v3 = vsel %vm1286_vm2, %v1876_v31, %v1877_v8 }
 0x13f   : > { %v1412_v2 = vsel %vm1400_vm11, %v1379_v54, %v1346_v45  ;;  %v1285_v10 = vpop.permute.xlu2 %1284  ;;  %v3843_v54 = vld [vmem:[#allocation2 + $0x6c] sm:$0xff] }
 0x140   : > { %3559 = vmatmul.msk.bf16.gmra.mxu1 %vm2012_vm12, %v1412_v2  ;;  %v1283_v51 = vpop.permute.xlu0 %1282 }
 0x141   : > { %v1397_v62 = vsel %vm1367_vm10, %v3839_v35, %v1283_v51  ;;  %v2195_v51 = vpop.f32.mrf.mxu1 }
 0x142   : > { %v1430_v44 = vsel %vm1400_vm11, %v1397_v62, %v5004_v7 }
 0x143   : > { %3568 = vmatmul.msk.bf16.gmra.mxu3 %vm2012_vm12, %v1430_v44 }
 0x144   : > { %2755 = vrot.lane.b32.xlu1 %v2724_v63, %s3869_s28 }
 0x145   : > { %1276 = vrot.lane.b32.xlu2 %v1205_v20, %s3870_s29 }
 0x146   : > { %v2658_v55 = vpop.permute.xlu1 %2657  ;;  %1833 = vrot.lane.b32.xlu0 %v1762_v22, %s3870_s29  ;;  %v1399_v22 = vsel %vm1367_vm10, %v4702_v24, %v1285_v10 }
 0x147   : > { %v2770_v39 = vsel %vm1367_vm10, %v3840_v25, %v2658_v55  ;;  %v2740_v61 = vpop.permute.xlu2 %2739 }
 0x148   : > { %v2738_v21 = vpop.permute.xlu0 %2737 }
 0x149   : > { %v2802_v7 = vsel %vm1400_vm11, %v2770_v39, %v2738_v21 }
 0x14a   : > { %3706 = vmatmul.msk.bf16.gmra.mxu2 %vm2012_vm12, %v2802_v7 }
 0x14c   : > { %1357 = vrot.lane.b32.xlu1 %v1322_v1, %s3869_s28 }
 0x14d   : > { %1913 = vrot.lane.b32.xlu2 %v1878_v3, %s3869_s28 }
 0x14e   : > { %v1267_v33 = vpop.permute.xlu1 %1266 }
 0x14f   : > { %v1381_v34 = vsel %vm1367_vm10, %v3841_v19, %v1267_v33  ;;  %v1350_v26 = vpop.permute.xlu2 %1349 }
 0x150   : > { %v1348_v23 = vpop.permute.xlu0 %1347 }
 0x151   : > { %v1414_v56 = vsel %vm1400_vm11, %v1381_v34, %v1348_v23 }
 0x152   : > { %3560 = vmatmul.msk.bf16.gmra.mxu1 %vm2012_vm12, %v1414_v56 }
 0x155   : > { %v2054_v58 = vpop.f32.mrf.mxu0 }
 0x156   : > { %v2194_v47 = vadd.f32 %v2193_v40, %v2054_v58  ;;  %v2887_v53 = vpop.f32.mrf.mxu2  ;;  %v1904_v30 = vpop.permute.xlu1 %1903 }
 0x157   : > { %v1968_v38 = vsel %vm1400_vm11, %v1936_v43, %v1904_v30  ;;  %v5085_v41 = vpop.permute.xlu2 %2669 }
 0x158   : > { %v2967_v9 = vadd.f32 %v2887_v53, %v2194_v47  ;;  %v2660_v52 = vpop.permute.xlu0 %2659  ;;  %3532 = vmatmul.msk.bf16.gmra.mxu0 %vm2012_vm12, %v1968_v38 }
 0x159   : > { %v2772_v45 = vsel %vm1367_vm10, %v3843_v54, %v2660_v52 }
 0x15a   : > { %v3003_v2 = vadd.f32 %v5071_v49, %v2967_v9  ;;  %v2804_v5 = vsel %vm1400_vm11, %v2772_v45, %v2740_v61 }
 0x15b   : > { %3707 = vmatmul.msk.bf16.gmra.mxu2 %vm2012_vm12, %v2804_v5 }
 0x15c   : > { %v3068_v35 = vmin.f32 %v3003_v2, 0.0  ;;  %v3036_v63 = vmax.f32 %v3003_v2, 0.0 }
 0x15d   : > { %v2056_v62 = vpop.f32.mrf.mxu0 }
 0x15e   : > { %v3103_v37 = vmul.f32 %v5082_v15, %v3068_v35  ;;  %v2196_v42 = vadd.f32 %v2195_v51, %v2056_v62  ;;  %v2889_v44 = vpop.f32.mrf.mxu2  ;;  %v1366_v11 = vpop.permute.xlu1 %1365 }
 0x15f   : > { %v1432_v55 = vsel %vm1400_vm11, %v1399_v22, %v1366_v11  ;;  %v1271_v7 = vpop.permute.xlu2 %1270 }
 0x160   : > { %v3135_v59 = vadd.f32 %v3103_v37, %v3036_v63  ;;  %v2968_v20 = vadd.f32 %v2889_v44, %v2196_v42  ;;  %v1269_v25 = vpop.permute.xlu0 %1268  ;;  %3569 = vmatmul.msk.bf16.gmra.mxu3 %vm2012_vm12, %v1432_v55  ;;  %v2198_v31 = vpop.f32.mrf.mxu1 }
 0x161   : > { %v1383_v39 = vsel %vm1367_vm10, %v4717_v0, %v1269_v25  ;;  %v5107_v0 = vpop.f32.mrf.mxu3 }
 0x162   : > { %v3167_v21 = vpack.c.bf16 %v3135_v59, %v3135_v59  ;;  %v3004_v24 = vadd.f32 %v5071_v49, %v2968_v20  ;;  %v1416_v10 = vsel %vm1400_vm11, %v1383_v39, %v1350_v26 }
 0x163   : > { %3561 = vmatmul.msk.bf16.gmra.mxu1 %vm2012_vm12, %v1416_v10 }
 0x164   : > { %3200 = vst.msk [vmem:[%s5096_s9] sm:$0xf] %vm3199_vm13, %v3167_v21  ;;  %v3069_v1 = vmin.f32 %v3004_v24, 0.0  ;;  %v3037_v8 = vmax.f32 %v3004_v24, 0.0 }
 0x166   : > { %v3104_v61 = vmul.f32 %v5082_v15, %v3069_v1  ;;  %v2892_v3 = vpop.f32.mrf.mxu2  ;;  %v1826_v33 = vpop.permute.xlu1 %1825 }
 0x167   : > { %v2059_v19 = vpop.f32.mrf.mxu0  ;;  %v1938_v23 = vsel %vm1367_vm10, %v4741_v28, %v1826_v33  ;;  %v1908_v53 = vpop.permute.xlu2 %1907 }
 0x168   : > { %v3136_v34 = vadd.f32 %v3104_v61, %v3037_v8  ;;  %v2199_v56 = vadd.f32 %v2198_v31, %v2059_v19  ;;  %v1906_v40 = vpop.permute.xlu0 %1905  ;;  %v2200_v30 = vpop.f32.mrf.mxu1 }
 0x169   : > { %v1970_v26 = vsel %vm1400_vm11, %v1938_v23, %v1906_v40  ;;  %v5120_v35 = vpop.f32.mrf.mxu3 }
 0x16a   : > { %v3168_v58 = vpack.c.bf16 %v3136_v34, %v3136_v34  ;;  %v2969_v47 = vadd.f32 %v2892_v3, %v2199_v56  ;;  %3533 = vmatmul.msk.bf16.gmra.mxu0 %vm2012_vm12, %v1970_v26  ;;  %v1385_v3 = vsel %vm1367_vm10, %v4827_v14, %v1271_v7 }
 0x16c   : > { %3201 = vst.msk [vmem:[%s5096_s9 + $0x4] sm:$0xf] %vm3199_vm13, %v3168_v58  ;;  %v3005_v32 = vadd.f32 %v5071_v49, %v2969_v47 }
 0x16e   : > { %v3070_v43 = vmin.f32 %v3005_v32, 0.0  ;;  %v2662_v9 = vpop.permute.xlu1 %2661  ;;  %v3038_v52 = vmax.f32 %v3005_v32, 0.0  ;;  %v2894_v5 = vpop.f32.mrf.mxu2 }
 0x16f   : > { %v2061_v38 = vpop.f32.mrf.mxu0  ;;  %v2774_v54 = vsel %vm1367_vm10, %v4773_v60, %v2662_v9  ;;  %v2744_v37 = vpop.permute.xlu2 %2743  ;;  %v2782_v60 = vsel %vm1367_vm10, %v4796_v50, %v5085_v41 }
 0x170   : > { %v3105_v28 = vmul.f32 %v5082_v15, %v3070_v43  ;;  %v2201_v45 = vadd.f32 %v2200_v30, %v2061_v38  ;;  %v2742_v2 = vpop.permute.xlu0 %2741 }
 0x171   : > { %v2806_v51 = vsel %vm1400_vm11, %v2774_v54, %v2742_v2  ;;  %v5134_v21 = vpop.f32.mrf.mxu3 }
 0x172   : > { %v3137_v62 = vadd.f32 %v3105_v28, %v3038_v52  ;;  %v2970_v63 = vadd.f32 %v2894_v5, %v2201_v45  ;;  %3708 = vmatmul.msk.bf16.gmra.mxu2 %vm2012_vm12, %v2806_v51 }
 0x174   : > { %v3169_v42 = vpack.c.bf16 %v3137_v62, %v3137_v62  ;;  %v3006_v44 = vadd.f32 %v5071_v49, %v2970_v63 }
 0x176   : > { %3202 = vst.msk [vmem:[%s5096_s9 + $0x8] sm:$0xf] %vm3199_vm13, %v3169_v42  ;;  %v3071_v22 = vmin.f32 %v3006_v44, 0.0  ;;  %v2750_v11 = vpop.permute.xlu1 %2749  ;;  %v3039_v59 = vmax.f32 %v3006_v44, 0.0 }
 0x177   : > { %v2814_v55 = vsel %vm1400_vm11, %v2782_v60, %v2750_v11  ;;  %v1830_v50 = vpop.permute.xlu2 %1829 }
 0x178   : > { %v3106_v20 = vmul.f32 %v5082_v15, %v3071_v22  ;;  %v1828_v25 = vpop.permute.xlu0 %1827  ;;  %3712 = vmatmul.msk.bf16.vlgmr.msra.gmra.mxu3 %vm2012_vm12, %v2814_v55  ;;  %v2064_v10 = vpop.f32.mrf.mxu0 }
 0x179   : > { %v1940_v39 = vsel %vm1367_vm10, %v4809_v48, %v1828_v25  ;;  %v5149_v26 = vpop.f32.mrf.mxu3 }
 0x17a   : > { %v3138_v24 = vadd.f32 %v3106_v20, %v3039_v59  ;;  %v1972_v1 = vsel %vm1400_vm11, %v1940_v39, %v1908_v53 }
 0x17b   : > { %3534 = vmatmul.msk.bf16.gmra.mxu0 %vm2012_vm12, %v1972_v1  ;;  %v2897_v31 = vpop.f32.mrf.mxu2 }
 0x17c   : > { %v3170_v41 = vpack.c.bf16 %v3138_v24, %v3138_v24  ;;  %v1942_v24 = vsel %vm1367_vm10, %v4896_v29, %v1830_v50 }
 0x17d   : > { %v2203_v8 = vpop.f32.mrf.mxu1 }
 0x17e   : > { %3203 = vst.msk [vmem:[%s5096_s9 + $0xc] sm:$0xf] %vm3199_vm13, %v3170_v41  ;;  %v2204_v61 = vadd.f32 %v2203_v8, %v2064_v10  ;;  %v1352_v33 = vpop.permute.xlu1 %1351 }
 0x17f   : > { %v1418_v19 = vsel %vm1400_vm11, %v1385_v3, %v1352_v33  ;;  %v2666_v47 = vpop.permute.xlu2 %2665 }
 0x180   : > { %v2971_v48 = vadd.f32 %v2897_v31, %v2204_v61  ;;  %v2664_v34 = vpop.permute.xlu0 %2663  ;;  %3562 = vmatmul.msk.bf16.gmra.mxu1 %vm2012_vm12, %v1418_v19  ;;  %v2066_v14 = vpop.f32.mrf.mxu0 }
 0x181   : > { %v2776_v23 = vsel %vm1367_vm10, %v4842_v16, %v2664_v34  ;;  %v5157_v5 = vpop.f32.mrf.mxu3 }
 0x182   : > { %v3007_v56 = vadd.f32 %v5071_v49, %v2971_v48  ;;  %v2808_v40 = vsel %vm1400_vm11, %v2776_v23, %v2744_v37 }
 0x183   : > { %3709 = vmatmul.msk.bf16.gmra.mxu2 %vm2012_vm12, %v2808_v40  ;;  %v2899_v30 = vpop.f32.mrf.mxu2 }
 0x184   : > { %v3072_v58 = vmin.f32 %v3007_v56, 0.0  ;;  %v3040_v53 = vmax.f32 %v3007_v56, 0.0  ;;  %v2778_v56 = vsel %vm1367_vm10, %v4927_v57, %v2666_v47 }
 0x185   : > { %v2205_v7 = vpop.f32.mrf.mxu1 }
 0x186   : > { %v3107_v32 = vmul.f32 %v5082_v15, %v3072_v58  ;;  %v2206_v43 = vadd.f32 %v2205_v7, %v2066_v14  ;;  %v2672_v9 = vpop.permute.xlu1 %2671 }
 0x187   : > { %v2784_v52 = vsel %vm1367_vm10, %v4858_v6, %v2672_v9  ;;  %v2754_v42 = vpop.permute.xlu2 %2753 }
 0x188   : > { %v3139_v16 = vadd.f32 %v3107_v32, %v3040_v53  ;;  %v2972_v38 = vadd.f32 %v2899_v30, %v2206_v43  ;;  %v2752_v28 = vpop.permute.xlu0 %2751 }
 0x189   : > { %v2816_v54 = vsel %vm1400_vm11, %v2784_v52, %v2752_v28  ;;  %v5168_v25 = vpop.f32.mrf.mxu3 }
 0x18a   : > { %v3171_v45 = vpack.c.bf16 %v3139_v16, %v3139_v16  ;;  %v3008_v2 = vadd.f32 %v5071_v49, %v2972_v38  ;;  %3713 = vmatmul.msk.bf16.gmra.mxu3 %vm2012_vm12, %v2816_v54 }
 0x18c   : > { %3204 = vst.msk [vmem:[%s5096_s9 + $0x10] sm:$0xf] %vm3199_vm13, %v3171_v45  ;;  %v3073_v51 = vmin.f32 %v3008_v2, 0.0  ;;  %v3041_v62 = vmax.f32 %v3008_v2, 0.0 }
 0x18d   : > { %v2902_v20 = vpop.f32.mrf.mxu2 }
 0x18e   : > { %v3108_v63 = vmul.f32 %v5082_v15, %v3073_v51  ;;  %v1273_v37 = vpop.permute.xlu1 %1272 }
 0x18f   : > { %v1387_v44 = vsel %vm1367_vm10, %v4878_v17, %v1273_v37  ;;  %v2208_v22 = vpop.f32.mrf.mxu1  ;;  %v1356_v8 = vpop.permute.xlu2 %1355 }
 0x190   : > { %v3140_v6 = vadd.f32 %v3108_v63, %v3041_v62  ;;  %v1354_v60 = vpop.permute.xlu0 %1353 }
 0x191   : > { %v1420_v11 = vsel %vm1400_vm11, %v1387_v44, %v1354_v60  ;;  %v5182_v40 = vpop.f32.mrf.mxu3 }
 0x192   : > { %v3172_v59 = vpack.c.bf16 %v3140_v6, %v3140_v6  ;;  %3563 = vmatmul.msk.bf16.gmra.mxu1 %vm2012_vm12, %v1420_v11 }
 0x194   : > { %3205 = vst.msk [vmem:[%s5096_s9 + $0x14] sm:$0xf] %vm3199_vm13, %v3172_v59 }
 0x195   : > { %v2069_v55 = vpop.f32.mrf.mxu0  ;;  %v2904_v29 = vpop.f32.mrf.mxu2 }
 0x196   : > { %v2209_v39 = vadd.f32 %v2208_v22, %v2069_v55  ;;  %v1910_v10 = vpop.permute.xlu1 %1909 }
 0x197   : > { %v1974_v17 = vsel %vm1400_vm11, %v1942_v24, %v1910_v10  ;;  %v2210_v3 = vpop.f32.mrf.mxu1  ;;  %v2676_v57 = vpop.permute.xlu2 %2675 }
 0x198   : > { %v2973_v1 = vadd.f32 %v2902_v20, %v2209_v39  ;;  %v2674_v41 = vpop.permute.xlu0 %2673  ;;  %3535 = vmatmul.msk.bf16.gmra.mxu0 %vm2012_vm12, %v1974_v17 }
 0x199   : > { %v2786_v31 = vsel %vm1367_vm10, %v4909_v4, %v2674_v41  ;;  %v5197_v37 = vpop.f32.mrf.mxu3 }
 0x19a   : > { %v3009_v61 = vadd.f32 %v5071_v49, %v2973_v1  ;;  %v2818_v33 = vsel %vm1400_vm11, %v2786_v31, %v2754_v42 }
 0x19b   : > { %3714 = vmatmul.msk.bf16.gmra.mxu3 %vm2012_vm12, %v2818_v33 }
 0x19c   : > { %v3074_v48 = vmin.f32 %v3009_v61, 0.0  ;;  %v3042_v19 = vmax.f32 %v3009_v61, 0.0 }
 0x19d   : > { %v2071_v50 = vpop.f32.mrf.mxu0 }
 0x19e   : > { %v3109_v34 = vmul.f32 %v5082_v15, %v3074_v48  ;;  %v2211_v23 = vadd.f32 %v2210_v3, %v2071_v50  ;;  %v2746_v4 = vpop.permute.xlu1 %2745  ;;  %v2907_v28 = vpop.f32.mrf.mxu2 }
 0x19f   : > { %v2810_v7 = vsel %vm1400_vm11, %v2778_v56, %v2746_v4  ;;  %v1277_v22 = vpop.permute.xlu2 %1276 }
 0x1a0   : > { %v3141_v58 = vadd.f32 %v3109_v34, %v3042_v19  ;;  %v2974_v14 = vadd.f32 %v2904_v29, %v2211_v23  ;;  %v1275_v53 = vpop.permute.xlu0 %1274  ;;  %3710 = vmatmul.msk.bf16.gmra.mxu2 %vm2012_vm12, %v2810_v7  ;;  %v2213_v16 = vpop.f32.mrf.mxu1 }
 0x1a1   : > { %v1389_v32 = vsel %vm1367_vm10, %v4942_v27, %v1275_v53 }
 0x1a2   : > { %v3173_v43 = vpack.c.bf16 %v3141_v58, %v3141_v58  ;;  %v3010_v30 = vadd.f32 %v5071_v49, %v2974_v14  ;;  %v1422_v9 = vsel %vm1400_vm11, %v1389_v32, %v1356_v8 }
 0x1a3   : > { %3564 = vmatmul.msk.bf16.gmra.mxu1 %vm2012_vm12, %v1422_v9  ;;  %v5207_v41 = vpop.f32.mrf.mxu3 }
 0x1a4   : > { %3206 = vst.msk [vmem:[%s5096_s9 + $0x18] sm:$0xf] %vm3199_vm13, %v3173_v43  ;;  %v3075_v47 = vmin.f32 %v3010_v30, 0.0  ;;  %v3043_v38 = vmax.f32 %v3010_v30, 0.0  ;;  %v1391_v30 = vsel %vm1367_vm10, %v5020_v12, %v1277_v22 }
 0x1a6   : > { %v3110_v52 = vmul.f32 %v5082_v15, %v3075_v47  ;;  %v1832_v54 = vpop.permute.xlu1 %1831  ;;  %v2909_v1 = vpop.f32.mrf.mxu2 }
 0x1a7   : > { %v2074_v45 = vpop.f32.mrf.mxu0  ;;  %v1944_v2 = vsel %vm1367_vm10, %v4958_v36, %v1832_v54  ;;  %v1914_v29 = vpop.permute.xlu2 %1913 }
 0x1a8   : > { %v3142_v27 = vadd.f32 %v3110_v52, %v3043_v38  ;;  %v2214_v51 = vadd.f32 %v2213_v16, %v2074_v45  ;;  %v1912_v62 = vpop.permute.xlu0 %1911  ;;  %v2215_v11 = vpop.f32.mrf.mxu1 }
 0x1a9   : > { %v1976_v63 = vsel %vm1400_vm11, %v1944_v2, %v1912_v62 }
 0x1aa   : > { %v3174_v42 = vpack.c.bf16 %v3142_v27, %v3142_v27  ;;  %v2975_v6 = vadd.f32 %v2907_v28, %v2214_v51  ;;  %3536 = vmatmul.msk.bf16.gmra.mxu0 %vm2012_vm12, %v1976_v63 }
 0x1ac   : > { %3207 = vst.msk [vmem:[%s5096_s9 + $0x1c] sm:$0xf] %vm3199_vm13, %v3174_v42  ;;  %v3011_v44 = vadd.f32 %v5071_v49, %v2975_v6 }
 0x1ae   : > { %v3076_v60 = vmin.f32 %v3011_v44, 0.0  ;;  %v2668_v59 = vpop.permute.xlu1 %2667  ;;  %v3044_v20 = vmax.f32 %v3011_v44, 0.0 }
 0x1af   : > { %v2076_v36 = vpop.f32.mrf.mxu0  ;;  %v2780_v39 = vsel %vm1367_vm10, %v4978_v18, %v2668_v59  ;;  %v2788_v18 = vsel %vm1367_vm10, %v4994_v46, %v2676_v57  ;;  %v5222_v46 = vpop.f32.mrf.mxu3 }
 0x1b0   : > { %v3111_v55 = vmul.f32 %v5082_v15, %v3076_v60  ;;  %v2216_v24 = vadd.f32 %v2215_v11, %v2076_v36  ;;  %v2748_v10 = vpop.permute.xlu0 %2747 }
 0x1b1   : > { %v2812_v17 = vsel %vm1400_vm11, %v2780_v39, %v2748_v10 }
 0x1b2   : > { %v3143_v31 = vadd.f32 %v3111_v55, %v3044_v20  ;;  %v2976_v8 = vadd.f32 %v2909_v1, %v2216_v24  ;;  %3711 = vmatmul.msk.bf16.gmra.mxu2 %vm2012_vm12, %v2812_v17 }
 0x1b4   : > { %v3175_v61 = vpack.c.bf16 %v3143_v31, %v3143_v31  ;;  %v3012_v3 = vadd.f32 %v5071_v49, %v2976_v8 }
 0x1b6   : > { %3208 = vst.msk [vmem:[%s5096_s9 + $0x20] sm:$0xf] %vm3199_vm13, %v3175_v61  ;;  %v3077_v33 = vmin.f32 %v3012_v3, 0.0  ;;  %v2756_v48 = vpop.permute.xlu1 %2755  ;;  %v3045_v50 = vmax.f32 %v3012_v3, 0.0 }
 0x1b7   : > { %v2820_v34 = vsel %vm1400_vm11, %v2788_v18, %v2756_v48  ;;  %v5231_v16 = vpop.f32.mrf.mxu3 }
 0x1b8   : > { %v3112_v19 = vmul.f32 %v5082_v15, %v3077_v33  ;;  %v1834_v23 = vpop.permute.xlu0 %1833  ;;  %3715 = vmatmul.msk.bf16.gmra.mxu3 %vm2012_vm12, %v2820_v34  ;;  %v2079_v14 = vpop.f32.mrf.mxu0 }
 0x1b9   : > { %v1946_v56 = vsel %vm1367_vm10, %v5007_v13, %v1834_v23 }
 0x1ba   : > { %v3144_v4 = vadd.f32 %v3112_v19, %v3045_v50  ;;  %v1978_v58 = vsel %vm1400_vm11, %v1946_v56, %v1914_v29 }
 0x1bb   : > { %3537 = vmatmul.msk.bf16.gmra.mxu0 %vm2012_vm12, %v1978_v58  ;;  %v2912_v53 = vpop.f32.mrf.mxu2 }
 0x1bc   : > { %v3176_v7 = vpack.c.bf16 %v3144_v4, %v3144_v4 }
 0x1bd   : > { %v2218_v32 = vpop.f32.mrf.mxu1 }
 0x1be   : > { %3209 = vst.msk [vmem:[%s5096_s9 + $0x24] sm:$0xf] %vm3199_vm13, %v3176_v7  ;;  %v2219_v43 = vadd.f32 %v2218_v32, %v2079_v14  ;;  %v1358_v9 = vpop.permute.xlu1 %1357 }
 0x1bf   : > { %v1424_v13 = vsel %vm1400_vm11, %v1391_v30, %v1358_v9  ;;  %v5237_v6 = vpop.f32.mrf.mxu3 }
 0x1c0   : > { %v2977_v57 = vadd.f32 %v2912_v53, %v2219_v43  ;;  %3565 = vmatmul.msk.bf16.gmra.mxu1 %vm2012_vm12, %v1424_v13  ;;  %v2081_v52 = vpop.f32.mrf.mxu0 }
 0x1c2   : > { %v3013_v47 = vadd.f32 %v5071_v49, %v2977_v57 }
 0x1c3   : > { %v2914_v12 = vpop.f32.mrf.mxu2 }
 0x1c4   : > { %v3078_v38 = vmin.f32 %v3013_v47, 0.0  ;;  %v3046_v54 = vmax.f32 %v3013_v47, 0.0 }
 0x1c5   : > { %v2220_v28 = vpop.f32.mrf.mxu1 }
 0x1c6   : > { %v3113_v45 = vmul.f32 %v5082_v15, %v3078_v38  ;;  %v2221_v27 = vadd.f32 %v2220_v28, %v2081_v52 }
 0x1c7   : > { %v5242_v39 = vpop.f32.mrf.mxu3 }
 0x1c8   : > { %v3145_v2 = vadd.f32 %v3113_v45, %v3046_v54  ;;  %v2978_v51 = vadd.f32 %v2914_v12, %v2221_v27 }
 0x1ca   : > { %v3177_v62 = vpack.c.bf16 %v3145_v2, %v3145_v2  ;;  %v3014_v63 = vadd.f32 %v5071_v49, %v2978_v51 }
 0x1cc   : > { %3210 = vst.msk [vmem:[%s5096_s9 + $0x28] sm:$0xf] %vm3199_vm13, %v3177_v62  ;;  %v3079_v42 = vmin.f32 %v3014_v63, 0.0  ;;  %v3047_v44 = vmax.f32 %v3014_v63, 0.0 }
 0x1cd   : > { %v2917_v36 = vpop.f32.mrf.mxu2 }
 0x1ce   : > { %v3114_v22 = vmul.f32 %v5082_v15, %v3079_v42 }
 0x1cf   : > { %v2223_v11 = vpop.f32.mrf.mxu1  ;;  %v5246_v29 = vpop.f32.mrf.mxu3 }
 0x1d0   : > { %v3146_v60 = vadd.f32 %v3114_v22, %v3047_v44  ;;  %v2254_v22 = vadd.f32 %v5207_v41, %v5107_v0 }
 0x1d2   : > { %v3178_v59 = vpack.c.bf16 %v3146_v60, %v3146_v60 }
 0x1d4   : > { %3211 = vst.msk [vmem:[%s5096_s9 + $0x2c] sm:$0xf] %vm3199_vm13, %v3178_v59 }
 0x1d5   : > { %v2084_v20 = vpop.f32.mrf.mxu0  ;;  %v2919_v31 = vpop.f32.mrf.mxu2 }
 0x1d6   : > { %v2224_v55 = vadd.f32 %v2223_v11, %v2084_v20 }
 0x1d7   : > { %v2225_v1 = vpop.f32.mrf.mxu1 }
 0x1d8   : > { %v2979_v24 = vadd.f32 %v2917_v36, %v2224_v55 }
 0x1da   : > { %v3015_v10 = vadd.f32 %v5071_v49, %v2979_v24 }
 0x1dc   : > { %v3080_v17 = vmin.f32 %v3015_v10, 0.0  ;;  %v3048_v61 = vmax.f32 %v3015_v10, 0.0 }
 0x1dd   : > { %v2086_v8 = vpop.f32.mrf.mxu0 }
 0x1de   : > { %v3115_v3 = vmul.f32 %v5082_v15, %v3080_v17  ;;  %v2226_v33 = vadd.f32 %v2225_v1, %v2086_v8  ;;  %v2922_v58 = vpop.f32.mrf.mxu2 }
 0x1e0   : > { %v3147_v18 = vadd.f32 %v3115_v3, %v3048_v61  ;;  %v2980_v48 = vadd.f32 %v2919_v31, %v2226_v33  ;;  %v2228_v23 = vpop.f32.mrf.mxu1  ;;  %v2256_v31 = vadd.f32 %v5222_v46, %v5120_v35 }
 0x1e2   : > { %v3179_v50 = vpack.c.bf16 %v3147_v18, %v3147_v18  ;;  %v3016_v19 = vadd.f32 %v5071_v49, %v2980_v48 }
 0x1e3   : > { %v5252_v32 = vpop.f32.mrf.mxu3 }
 0x1e4   : > { %3212 = vst.msk [vmem:[%s5096_s9 + $0x30] sm:$0xf] %vm3199_vm13, %v3179_v50  ;;  %v3081_v34 = vmin.f32 %v3016_v19, 0.0  ;;  %v3049_v56 = vmax.f32 %v3016_v19, 0.0 }
 0x1e6   : > { %v3116_v4 = vmul.f32 %v5082_v15, %v3081_v34  ;;  %v2924_v54 = vpop.f32.mrf.mxu2 }
 0x1e7   : > { %v2089_v14 = vpop.f32.mrf.mxu0 }
 0x1e8   : > { %v2229_v7 = vadd.f32 %v2228_v23, %v2089_v14  ;;  %v3148_v53 = vadd.f32 %v3116_v4, %v3049_v56  ;;  %v2230_v13 = vpop.f32.mrf.mxu1 }
 0x1ea   : > { %v2981_v43 = vadd.f32 %v2922_v58, %v2229_v7  ;;  %v3180_v30 = vpack.c.bf16 %v3148_v53, %v3148_v53 }
 0x1eb   : > { %v5258_v2 = vpop.f32.mrf.mxu3 }
 0x1ec   : > { %v3017_v9 = vadd.f32 %v5071_v49, %v2981_v43  ;;  %3213 = vst.msk [vmem:[%s5096_s9 + $0x34] sm:$0xf] %vm3199_vm13, %v3180_v30 }
 0x1ee   : > { %v3082_v57 = vmin.f32 %v3017_v9, 0.0  ;;  %v3050_v38 = vmax.f32 %v3017_v9, 0.0  ;;  %v2259_v9 = vadd.f32 %v5231_v16, %v5134_v21  ;;  %v2261_v16 = vadd.f32 %v5237_v6, %v5149_v26 }
 0x1ef   : > { %v2091_v47 = vpop.f32.mrf.mxu0 }
 0x1f0   : > { %v3117_v52 = vmul.f32 %v5082_v15, %v3082_v57  ;;  %v2231_v28 = vadd.f32 %v2230_v13, %v2091_v47 }
 0x1f2   : > { %v3149_v45 = vadd.f32 %v3117_v52, %v3050_v38  ;;  %v2982_v27 = vadd.f32 %v2924_v54, %v2231_v28 }
 0x1f4   : > { %v3181_v12 = vpack.c.bf16 %v3149_v45, %v3149_v45  ;;  %v3018_v51 = vadd.f32 %v5071_v49, %v2982_v27 }
 0x1f5   : > { %v2927_v20 = vpop.f32.mrf.mxu2 }
 0x1f6   : > { %3214 = vst.msk [vmem:[%s5096_s9 + $0x38] sm:$0xf] %vm3199_vm13, %v3181_v12  ;;  %v3083_v62 = vmin.f32 %v3018_v51, 0.0  ;;  %v3051_v63 = vmax.f32 %v3018_v51, 0.0 }
 0x1f8   : > { %v3118_v42 = vmul.f32 %v5082_v15, %v3083_v62  ;;  %v2094_v11 = vpop.f32.mrf.mxu0 }
 0x1fa   : > { %v3150_v44 = vadd.f32 %v3118_v42, %v3051_v63 }
 0x1fb   : > { %v2947_v59 = vpop.f32.mrf.mxu3 }
 0x1fc   : > { %v3182_v60 = vpack.c.bf16 %v3150_v44, %v3150_v44  ;;  %v2991_v36 = vadd.f32 %v2947_v59, %v2254_v22 }
 0x1fd   : > { %v2233_v55 = vpop.f32.mrf.mxu1  ;;  %v2929_v46 = vpop.f32.mrf.mxu2 }
 0x1fe   : > { %3215 = vst.msk [vmem:[%s5096_s9 + $0x3c] sm:$0xf] %vm3199_vm13, %v3182_v60  ;;  %v3027_v24 = vadd.f32 %v5071_v49, %v2991_v36  ;;  %v2234_v10 = vadd.f32 %v2233_v55, %v2094_v11 }
 0x200   : > { %v3092_v1 = vmin.f32 %v3027_v24, 0.0  ;;  %v2983_v17 = vadd.f32 %v2927_v20, %v2234_v10  ;;  %v3060_v8 = vmax.f32 %v3027_v24, 0.0  ;;  %v2096_v50 = vpop.f32.mrf.mxu0 }
 0x202   : > { %v3127_v0 = vmul.f32 %v5082_v15, %v3092_v1  ;;  %v3019_v41 = vadd.f32 %v5071_v49, %v2983_v17  ;;  %v2264_v17 = vadd.f32 %v5242_v39, %v5157_v5 }
 0x203   : > { %v2949_v61 = vpop.f32.mrf.mxu3 }
 0x204   : > { %v3159_v3 = vadd.f32 %v3127_v0, %v3060_v8  ;;  %v3084_v33 = vmin.f32 %v3019_v41, 0.0  ;;  %v2992_v18 = vadd.f32 %v2949_v61, %v2256_v31  ;;  %v3052_v48 = vmax.f32 %v3019_v41, 0.0 }
 0x205   : > { %v2235_v19 = vpop.f32.mrf.mxu1 }
 0x206   : > { %v3191_v34 = vpack.c.bf16 %v3159_v3, %v3159_v3  ;;  %v3119_v23 = vmul.f32 %v5082_v15, %v3084_v33  ;;  %v3028_v56 = vadd.f32 %v5071_v49, %v2992_v18  ;;  %v2236_v35 = vadd.f32 %v2235_v19, %v2096_v50  ;;  %v2932_v42 = vpop.f32.mrf.mxu2 }
 0x208   : > { %3224 = vst.msk [vmem:[%s5096_s9 + $0x60] sm:$0xf] %vm3199_vm13, %v3191_v34  ;;  %v3151_v4 = vadd.f32 %v3119_v23, %v3052_v48  ;;  %v3093_v58 = vmin.f32 %v3028_v56, 0.0  ;;  %v2984_v14 = vadd.f32 %v2929_v46, %v2236_v35  ;;  %v3061_v53 = vmax.f32 %v3028_v56, 0.0 }
 0x209   : > { %v2266_v35 = vadd.f32 %v5246_v29, %v5168_v25 }
 0x20a   : > { %v3183_v7 = vpack.c.bf16 %v3151_v4, %v3151_v4  ;;  %v3128_v43 = vmul.f32 %v5082_v15, %v3093_v58  ;;  %v3020_v30 = vadd.f32 %v5071_v49, %v2984_v14 }
 0x20c   : > { %3216 = vst.msk [vmem:[%s5096_s9 + $0x40] sm:$0xf] %vm3199_vm13, %v3183_v7  ;;  %v3160_v57 = vadd.f32 %v3128_v43, %v3061_v53  ;;  %v3085_v13 = vmin.f32 %v3020_v30, 0.0  ;;  %v3053_v28 = vmax.f32 %v3020_v30, 0.0 }
 0x20d   : > { %v2952_v47 = vpop.f32.mrf.mxu3 }
 0x20e   : > { %v2993_v38 = vadd.f32 %v2952_v47, %v2259_v9  ;;  %v3192_v52 = vpack.c.bf16 %v3160_v57, %v3160_v57  ;;  %v3120_v54 = vmul.f32 %v5082_v15, %v3085_v13  ;;  %v2934_v61 = vpop.f32.mrf.mxu2 }
 0x20f   : > { %v2238_v12 = vpop.f32.mrf.mxu1 }
 0x210   : > { %v3029_v45 = vadd.f32 %v5071_v49, %v2993_v38  ;;  %3225 = vst.msk [vmem:[%s5096_s9 + $0x64] sm:$0xf] %vm3199_vm13, %v3192_v52  ;;  %v3152_v27 = vadd.f32 %v3120_v54, %v3053_v28 }
 0x212   : > { %v3094_v51 = vmin.f32 %v3029_v45, 0.0  ;;  %v3184_v21 = vpack.c.bf16 %v3152_v27, %v3152_v27  ;;  %v3062_v62 = vmax.f32 %v3029_v45, 0.0 }
 0x214   : > { %v3129_v63 = vmul.f32 %v5082_v15, %v3094_v51  ;;  %3217 = vst.msk [vmem:[%s5096_s9 + $0x44] sm:$0xf] %vm3199_vm13, %v3184_v21 }
 0x215   : > { %v2954_v44 = vpop.f32.mrf.mxu3  ;;  %v2099_v60 = vpop.f32.mrf.mxu0 }
 0x216   : > { %v3161_v22 = vadd.f32 %v3129_v63, %v3062_v62  ;;  %v2994_v11 = vadd.f32 %v2954_v44, %v2261_v16  ;;  %v2239_v59 = vadd.f32 %v2238_v12, %v2099_v60 }
 0x217   : > { %v2240_v6 = vpop.f32.mrf.mxu1 }
 0x218   : > { %v3193_v36 = vpack.c.bf16 %v3161_v22, %v3161_v22  ;;  %v3030_v20 = vadd.f32 %v5071_v49, %v2994_v11  ;;  %v2985_v55 = vadd.f32 %v2932_v42, %v2239_v59 }
 0x21a   : > { %3226 = vst.msk [vmem:[%s5096_s9 + $0x68] sm:$0xf] %vm3199_vm13, %v3193_v36  ;;  %v3095_v24 = vmin.f32 %v3030_v20, 0.0  ;;  %v3021_v26 = vadd.f32 %v5071_v49, %v2985_v55  ;;  %v3063_v10 = vmax.f32 %v3030_v20, 0.0 }
 0x21c   : > { %v3130_v1 = vmul.f32 %v5082_v15, %v3095_v24  ;;  %v3086_v31 = vmin.f32 %v3021_v26, 0.0  ;;  %v3054_v3 = vmax.f32 %v3021_v26, 0.0 }
 0x21d   : > { %v2101_v0 = vpop.f32.mrf.mxu0 }
 0x21e   : > { %v3162_v8 = vadd.f32 %v3130_v1, %v3063_v10  ;;  %v2957_v41 = vpop.f32.mrf.mxu3  ;;  %v3121_v33 = vmul.f32 %v5082_v15, %v3086_v31  ;;  %v2241_v18 = vadd.f32 %v2240_v6, %v2101_v0  ;;  %v2269_v10 = vadd.f32 %v5252_v32, %v5182_v40 }
 0x21f   : > { %v2995_v48 = vadd.f32 %v2957_v41, %v2264_v17 }
 0x220   : > { %v3194_v50 = vpack.c.bf16 %v3162_v8, %v3162_v8  ;;  %v3153_v19 = vadd.f32 %v3121_v33, %v3054_v3  ;;  %v2986_v34 = vadd.f32 %v2934_v61, %v2241_v18  ;;  %v2243_v14 = vpop.f32.mrf.mxu1 }
 0x221   : > { %v3031_v23 = vadd.f32 %v5071_v49, %v2995_v48  ;;  %v2271_v48 = vadd.f32 %v5258_v2, %v5197_v37 }
 0x222   : > { %3227 = vst.msk [vmem:[%s5096_s9 + $0x6c] sm:$0xf] %vm3199_vm13, %v3194_v50  ;;  %v3185_v56 = vpack.c.bf16 %v3153_v19, %v3153_v19  ;;  %v3022_v5 = vadd.f32 %v5071_v49, %v2986_v34 }
 0x223   : > { %v3096_v39 = vmin.f32 %v3031_v23, 0.0  ;;  %v3064_v4 = vmax.f32 %v3031_v23, 0.0  ;;  %v2937_v9 = vpop.f32.mrf.mxu2 }
 0x224   : > { %3218 = vst.msk [vmem:[%s5096_s9 + $0x48] sm:$0xf] %vm3199_vm13, %v3185_v56  ;;  %v3087_v46 = vmin.f32 %v3022_v5, 0.0  ;;  %v3055_v53 = vmax.f32 %v3022_v5, 0.0 }
 0x225   : > { %v3131_v58 = vmul.f32 %v5082_v15, %v3096_v39 }
 0x226   : > { %v2959_v7 = vpop.f32.mrf.mxu3  ;;  %v3122_v43 = vmul.f32 %v5082_v15, %v3087_v46 }
 0x227   : > { %v3163_v30 = vadd.f32 %v3131_v58, %v3064_v4  ;;  %v2996_v57 = vadd.f32 %v2959_v7, %v2266_v35  ;;  %v2104_v13 = vpop.f32.mrf.mxu0 }
 0x228   : > { %v2244_v47 = vadd.f32 %v2243_v14, %v2104_v13  ;;  %v3154_v38 = vadd.f32 %v3122_v43, %v3055_v53  ;;  %v2245_v16 = vpop.f32.mrf.mxu1 }
 0x229   : > { %v3195_v25 = vpack.c.bf16 %v3163_v30, %v3163_v30  ;;  %v3032_v29 = vadd.f32 %v5071_v49, %v2996_v57 }
 0x22a   : > { %v2987_v52 = vadd.f32 %v2937_v9, %v2244_v47  ;;  %v3186_v28 = vpack.c.bf16 %v3154_v38, %v3154_v38 }
 0x22b   : > { %3228 = vst.msk [vmem:[%s5096_s9 + $0x70] sm:$0xf] %vm3199_vm13, %v3195_v25  ;;  %v3097_v54 = vmin.f32 %v3032_v29, 0.0  ;;  %v3065_v27 = vmax.f32 %v3032_v29, 0.0  ;;  %v2939_v60 = vpop.f32.mrf.mxu2 }
 0x22c   : > { %v3023_v45 = vadd.f32 %v5071_v49, %v2987_v52  ;;  %3219 = vst.msk [vmem:[%s5096_s9 + $0x4c] sm:$0xf] %vm3199_vm13, %v3186_v28 }
 0x22d   : > { %v3132_v12 = vmul.f32 %v5082_v15, %v3097_v54 }
 0x22e   : > { %v3088_v51 = vmin.f32 %v3023_v45, 0.0  ;;  %v3056_v63 = vmax.f32 %v3023_v45, 0.0 }
 0x22f   : > { %v3164_v21 = vadd.f32 %v3132_v12, %v3065_v27  ;;  %v2106_v62 = vpop.f32.mrf.mxu0 }
 0x230   : > { %v3123_v42 = vmul.f32 %v5082_v15, %v3088_v51  ;;  %v2246_v44 = vadd.f32 %v2245_v16, %v2106_v62 }
 0x231   : > { %v3196_v22 = vpack.c.bf16 %v3164_v21, %v3164_v21 }
 0x232   : > { %v3155_v11 = vadd.f32 %v3123_v42, %v3056_v63  ;;  %v2988_v59 = vadd.f32 %v2939_v60, %v2246_v44 }
 0x233   : > { %3229 = vst.msk [vmem:[%s5096_s9 + $0x74] sm:$0xf] %vm3199_vm13, %v3196_v22 }
 0x234   : > { %v3187_v36 = vpack.c.bf16 %v3155_v11, %v3155_v11  ;;  %v3024_v20 = vadd.f32 %v5071_v49, %v2988_v59 }
 0x235   : > { %v2942_v0 = vpop.f32.mrf.mxu2 }
 0x236   : > { %3220 = vst.msk [vmem:[%s5096_s9 + $0x50] sm:$0xf] %vm3199_vm13, %v3187_v36  ;;  %v3089_v55 = vmin.f32 %v3024_v20, 0.0  ;;  %v3057_v24 = vmax.f32 %v3024_v20, 0.0 }
 0x238   : > { %v3124_v26 = vmul.f32 %v5082_v15, %v3089_v55  ;;  %v2109_v17 = vpop.f32.mrf.mxu0 }
 0x23a   : > { %v3156_v6 = vadd.f32 %v3124_v26, %v3057_v24 }
 0x23b   : > { %v2962_v31 = vpop.f32.mrf.mxu3 }
 0x23c   : > { %v3188_v1 = vpack.c.bf16 %v3156_v6, %v3156_v6  ;;  %v2997_v8 = vadd.f32 %v2962_v31, %v2269_v10 }
 0x23d   : > { %v2248_v41 = vpop.f32.mrf.mxu1  ;;  %v2944_v2 = vpop.f32.mrf.mxu2 }
 0x23e   : > { %3221 = vst.msk [vmem:[%s5096_s9 + $0x54] sm:$0xf] %vm3199_vm13, %v3188_v1  ;;  %v3033_v61 = vadd.f32 %v5071_v49, %v2997_v8  ;;  %v2249_v3 = vadd.f32 %v2248_v41, %v2109_v17 }
 0x240   : > { %v3098_v33 = vmin.f32 %v3033_v61, 0.0  ;;  %v2989_v18 = vadd.f32 %v2942_v0, %v2249_v3  ;;  %v3066_v50 = vmax.f32 %v3033_v61, 0.0  ;;  %v2111_v39 = vpop.f32.mrf.mxu0 }
 0x242   : > { %v3133_v40 = vmul.f32 %v5082_v15, %v3098_v33  ;;  %v3025_v32 = vadd.f32 %v5071_v49, %v2989_v18 }
 0x243   : > { %v2964_v19 = vpop.f32.mrf.mxu3 }
 0x244   : > { %v3165_v34 = vadd.f32 %v3133_v40, %v3066_v50  ;;  %v3090_v23 = vmin.f32 %v3025_v32, 0.0  ;;  %v2998_v56 = vadd.f32 %v2964_v19, %v2271_v48  ;;  %v3058_v5 = vmax.f32 %v3025_v32, 0.0 }
 0x245   : > { %v2250_v35 = vpop.f32.mrf.mxu1 }
 0x246   : > { %v3197_v46 = vpack.c.bf16 %v3165_v34, %v3165_v34  ;;  %v3125_v4 = vmul.f32 %v5082_v15, %v3090_v23  ;;  %v3034_v58 = vadd.f32 %v5071_v49, %v2998_v56  ;;  %v2251_v37 = vadd.f32 %v2250_v35, %v2111_v39 }
 0x248   : > { %3230 = vst.msk [vmem:[%s5096_s9 + $0x78] sm:$0xf] %vm3199_vm13, %v3197_v46  ;;  %v3157_v14 = vadd.f32 %v3125_v4, %v3058_v5  ;;  %v3099_v7 = vmin.f32 %v3034_v58, 0.0  ;;  %v2990_v53 = vadd.f32 %v2944_v2, %v2251_v37  ;;  %v3067_v30 = vmax.f32 %v3034_v58, 0.0 }
 0x24a   : > { %v3189_v43 = vpack.c.bf16 %v3157_v14, %v3157_v14  ;;  %v3134_v9 = vmul.f32 %v5082_v15, %v3099_v7  ;;  %v3026_v57 = vadd.f32 %v5071_v49, %v2990_v53 }
 0x24c   : > { %3222 = vst.msk [vmem:[%s5096_s9 + $0x58] sm:$0xf] %vm3199_vm13, %v3189_v43  ;;  %v3166_v13 = vadd.f32 %v3134_v9, %v3067_v30  ;;  %v3091_v47 = vmin.f32 %v3026_v57, 0.0  ;;  %v3059_v25 = vmax.f32 %v3026_v57, 0.0 }
 0x24e   : > { %v3198_v38 = vpack.c.bf16 %v3166_v13, %v3166_v13  ;;  %v3126_v29 = vmul.f32 %v5082_v15, %v3091_v47 }
 0x250   : > { %3231 = vst.msk [vmem:[%s5096_s9 + $0x7c] sm:$0xf] %vm3199_vm13, %v3198_v38  ;;  %v3158_v52 = vadd.f32 %v3126_v29, %v3059_v25 }
 0x252   : > { %v3190_v28 = vpack.c.bf16 %v3158_v52, %v3158_v52 }
 0x254   : > { %3223 = vst.msk [vmem:[%s5096_s9 + $0x5c] sm:$0xf] %vm3199_vm13, %v3190_v28 }
 0x255 PF: > { %s15_s20 = sadd.s32 1, %s3866_s20   ;;  %s5367_s18 = smov %s3862_s19 }
 0x256   : > { %p12_p5 = scmp.ge.s32.totalorder %s15_s20, 4   ;;  %s5368_s19 = smov %s5370_s21 }
 0x258   :  { %14 = sbr.rel (!%p12_p5) target bundleno = 2 (0x2), region = 80 }

// kernel: bottleneck_irse_v2_forward.5
= control target key start
LH: loop header
LB: loop body
LE: loop exit
PB: predicated region body
PF: predicated region fallthrough
CT: control target
= control target key end

     0   :  { %s3855_s15 = smov 0   ;;  %s3857_s16 = smov 0   ;;  %s5263_s0 = inlined_call_operand.vmem [shape: bf16[2,16,16,32], index: 0, kind: input, shape index: {}]   ;;  %s5264_s1 = inlined_call_operand.vmem [shape: bf16[3,96,32], index: 1, kind: input, shape index: {}]   ;;  %s5265_s2 = inlined_call_operand.vmem [shape: f32[1,32], index: 2, kind: input, shape index: {}]   ;;  %s5266_s3 = inlined_call_operand.vmem [shape: f32[2,256,32], index: 3, kind: output, shape index: {0}]   ;;  %s5267_s4 = inlined_call_operand.vmem [shape: f32[2,1,32], index: 4, kind: output, shape index: {1}]  }
   0x1   :  { %s3859_s17 = smov 0  }
   0x2 LB: > { %s27_s18 = sadd.s32 1, %s3820_s16  ;;  %p3220_p0 = scmp.ge.s32.totalorder %s3824_s17, 1  ;;  %s3824_s17 = sphi %s3859_s17, %s15_s17   ;;  %s3820_s16 = sphi %s3857_s16, %s5275_s16   ;;  %s3816_s15 = sphi %s3855_s15, %s5274_s15  }
   0x3   : > { %p29_p1 = scmp.ge.s32.totalorder %s27_s18, 2  ;;  %p179_p2 = scmp.lt.s32.totalorder %s3824_s17, 3 }
   0x5   : > { %s5277_s18 = smov (%p29_p1, %s27_s18), 0  ;;  %p180_p3 = pnand %p3220_p0, %p179_p2 }
   0x6   : > { %s3827_s19 = smov (!%p180_p3), 32   ;;  %p212_p4 = scmp.lt.s32.totalorder (!%p180_p3), %s3816_s15, 1 }
   0x7   : > { %183 = sbr.rel (%p180_p3) target bundleno = 622 (0x26e), region = 32  ;;  %s3828_s24 = smov (!%p180_p3), 64  }
   0xc   : > { %vm267_vm0 = vcmask 257024   ;;  %vm270_vm1 = vcmask 253952   ;;  %v3826_v0 = vmov 0   ;;  %vm944_vm2 = vsmask.f32 7424  ;;  %s5279_s15 = smov (!%p212_p4, %s3816_s15), 1 }
   0xd   : > { %268 = vst.msk [vmem:[#allocation2] sm:$0xf] %vm267_vm0, %v3826_v0  ;;  %s3659_s20 = sshll.u32 %s5279_s15, 7  ;;  %vm323_vm3 = vsmask.f32 256  ;;  %vm1169_vm9 = vcmask 1046528   ;;  %s5197_s28 = scalar_lea.vmem %s5267_s4, %s5279_s15 }
   0xe   : > { %269 = vst.msk [vmem:[#allocation2 + $0x4] sm:$0xf] %vm267_vm0, %v3826_v0  ;;  %s3962_s23 = scalar_lea.vmem %s5263_s0, %s3659_s20  ;;  %vm324_vm4 = vsmask.f32 4368  ;;  %vm648_vm5 = vsmask.f32 7938  ;;  %vm4002_vm6 = vmand %vm270_vm1, %vm323_vm3 }
   0xf   : > { %271 = vst.msk [vmem:[#allocation2 + $0x8] sm:$0x1] %vm270_vm1, %v3826_v0  ;;  %v237_v12 = vld [vmem:[%s3962_s23 + $0x8] sm:$0xf]  ;;  %v238_v13 = vld [vmem:[%s3962_s23 + $0xc] sm:$0xf]  ;;  %vm4010_vm7 = vmor %vm323_vm3, %vm324_vm4 }
  0x10   : > { %272 = vst.msk [vmem:[#allocation2 + $0xc] sm:$0xf] %vm267_vm0, %v3826_v0  ;;  %v236_v14 = vld [vmem:[%s3962_s23 + $0x4] sm:$0xf]  ;;  %v344_v15 = vshrl.u32 %v237_v12, 16  ;;  %v352_v17 = vshrl.u32 %v238_v13, 16  ;;  %vm4018_vm8 = vmand %vm267_vm0, %vm648_vm5 }
  0x11   : > { %273 = vst.msk [vmem:[#allocation2 + $0x10] sm:$0xf] %vm267_vm0, %v3826_v0  ;;  %v235_v16 = vld [vmem:[%s3962_s23] sm:$0xf]  ;;  %v335_v18 = vshrl.u32 %v236_v14, 16  ;;  %v347_v23 = vshll.u32 %v237_v12, 16 }
  0x12   : > { %274 = vst.msk [vmem:[#allocation2 + $0x14] sm:$0x1] %vm270_vm1, %v3826_v0  ;;  %v239_v19 = vld [vmem:[%s3962_s23 + $0x10] sm:$0xf]  ;;  %v240_v20 = vld [vmem:[%s3962_s23 + $0x14] sm:$0xf] }
  0x13   : > { %275 = vst.msk [vmem:[#allocation2 + $0x18] sm:$0xf] %vm267_vm0, %v3826_v0  ;;  %v327_v21 = vshrl.u32 %v235_v16, 16  ;;  %v346_v22 = vrot.slane %v344_v15, 7  ;;  %v355_v24 = vshll.u32 %v238_v13, 16  ;;  %v361_v25 = vshrl.u32 %v239_v19, 16 }
  0x14   : > { %276 = vst.msk [vmem:[#allocation2 + $0x1c] sm:$0xf] %vm267_vm0, %v3826_v0  ;;  %v369_v26 = vshrl.u32 %v240_v20, 16  ;;  %v354_v27 = vrot.slane %v352_v17, 7  ;;  %v337_v28 = vrot.slane %v335_v18, 7  ;;  %v330_v31 = vshll.u32 %v235_v16, 16 }
  0x15   : > { %v3891_v1 = vld [vmem:[#allocation2] sm:$0xff]  ;;  %277 = vst.msk [vmem:[#allocation2 + $0x20] sm:$0x1] %vm270_vm1, %v3826_v0  ;;  %v329_v30 = vrot.slane %v327_v21, 7  ;;  %v349_v33 = vor.u32 %v347_v23, %v346_v22  ;;  %v350_v34 = vrot.slane %v346_v22, 4  ;;  %v338_v37 = vshll.u32 %v236_v14, 16 }
  0x16   : > { %v770_v2 = vld [vmem:[#allocation2 + $0x8] sm:$0x1]  ;;  %278 = vst.msk [vmem:[#allocation2 + $0x24] sm:$0xf] %vm267_vm0, %v3826_v0  ;;  %v946_v4 = vshrl.u32 %v3891_v1, 16  ;;  %v948_v5 = vshll.u32 %v3891_v1, 16  ;;  %v357_v35 = vor.u32 %v355_v24, %v354_v27 }
  0x17   : > { %v912_v3 = vunpack.c.l.b16 %v770_v2  ;;  %279 = vst.msk [vmem:[#allocation2 + $0x28] sm:$0xf] %vm267_vm0, %v3826_v0  ;;  %v259_v29 = vld [vmem:[%s3962_s23 + $0x60] sm:$0xf]  ;;  %v260_v32 = vld [vmem:[%s3962_s23 + $0x64] sm:$0xf]  ;;  %v332_v49 = vor.u32 %v330_v31, %v329_v30  ;;  %v340_v54 = vor.u32 %v338_v37, %v337_v28 }
  0x18   : > { %280 = vst.msk [vmem:[#allocation2 + $0x2c] sm:$0x1] %vm270_vm1, %v3826_v0  ;;  %v950_v7 = vrot.slane %v948_v5, 1  ;;  %v363_v39 = vrot.slane %v361_v25, 7  ;;  %v371_v40 = vrot.slane %v369_v26, 7  ;;  %v372_v41 = vshll.u32 %v240_v20, 16 }
  0x19   : > { %v3903_v6 = vpack.c.b16 %v912_v3, %v912_v3  ;;  %281 = vst.msk [vmem:[#allocation2 + $0x30] sm:$0xf] %vm267_vm0, %v3826_v0  ;;  %v531_v42 = vshrl.u32 %v259_v29, 16  ;;  %v359_v44 = vrot.slane %v354_v27, 4  ;;  %v364_v45 = vshll.u32 %v239_v19, 16 }
  0x1a   : > { %282 = vst.msk [vmem:[#allocation2 + $0x34] sm:$0xf] %vm267_vm0, %v3826_v0  ;;  %v951_v8 = vor.u32 %v950_v7, %v946_v4  ;;  %v659_v36 = vld [vmem:[#allocation2 + $0x18] sm:$0xf]  ;;  %v539_v46 = vshrl.u32 %v260_v32, 16  ;;  %v333_v50 = vrot.slane %v329_v30, 4  ;;  %v358_v52 = vsel %vm4010_vm7, %v350_v34, %v357_v35 }
  0x1b   : > { %v953_v9 = vshll.u32 %v3903_v6, 16  ;;  %283 = vst.msk [vmem:[#allocation2 + $0x38] sm:$0x1] %vm270_vm1, %v3826_v0  ;;  %v342_v51 = vrot.slane %v337_v28, 4  ;;  %v660_v53 = vsel %vm4018_vm8, %v349_v33, %v659_v36  ;;  %v650_v55 = vld [vmem:[#allocation2 + $0xc] sm:$0xf]  ;;  %v374_v58 = vor.u32 %v372_v41, %v371_v40 }
  0x1c   : > { %284 = vst.msk [vmem:[#allocation2 + $0x3c] sm:$0xf] %vm267_vm0, %v3826_v0  ;;  %v663_v48 = vld [vmem:[#allocation2 + $0x20] sm:$0x1]  ;;  %v656_v56 = vld [vmem:[#allocation2 + $0x14] sm:$0x1]  ;;  %v366_v62 = vor.u32 %v364_v45, %v363_v39  ;;  %v651_v4 = vsel %vm4018_vm8, %v332_v49, %v650_v55 }
  0x1d   : > { %v955_v10 = vrot.slane %v953_v9, 1  ;;  %285 = vst.msk [vmem:[#allocation2 + $0x40] sm:$0xf] %vm267_vm0, %v3826_v0  ;;  %v367_v57 = vrot.slane %v363_v39, 4  ;;  %v533_v59 = vrot.slane %v531_v42, 7  ;;  %v534_v60 = vshll.u32 %v259_v29, 16 }
  0x1e   : > { %286 = vst.msk [vmem:[#allocation2 + $0x44] sm:$0x1] %vm270_vm1, %v3826_v0  ;;  %v664_v61 = vsel %vm4002_vm6, %v359_v44, %v663_v48  ;;  %v541_v63 = vrot.slane %v539_v46, 7  ;;  %v542_v2 = vshll.u32 %v260_v32, 16  ;;  %v262_v3 = vld [vmem:[%s3962_s23 + $0x6c] sm:$0xf] }
  0x1f   : > { %v956_v11 = vsel %vm944_vm2, %v951_v8, %v955_v10  ;;  %287 = vst.msk [vmem:[#allocation2 + $0x48] sm:$0xf] %vm267_vm0, %v3826_v0  ;;  %v666_v5 = vld [vmem:[#allocation2 + $0x24] sm:$0xf]  ;;  %v556_v7 = vshrl.u32 %v262_v3, 16  ;;  %v376_v8 = vrot.slane %v371_v40, 4  ;;  %v657_v10 = vsel %vm4002_vm6, %v342_v51, %v656_v56 }
  0x20   : > { %1137 = vrot.lane.b32.xlu1 %v956_v11, %s3827_s19  ;;  %288 = vst.msk [vmem:[#allocation2 + $0x4c] sm:$0xf] %vm267_vm0, %v3826_v0  ;;  %v670_v9 = vld [vmem:[#allocation2 + $0x2c] sm:$0x1]  ;;  %v375_v11 = vsel %vm4010_vm7, %v367_v57, %v374_v58  ;;  %v536_v12 = vor.u32 %v534_v60, %v533_v59  ;;  %v261_v14 = vld [vmem:[%s3962_s23 + $0x68] sm:$0xf]  ;;  %v667_v15 = vsel %vm4018_vm8, %v366_v62, %v666_v5 }
  0x21   : > { %289 = vst.msk [vmem:[#allocation2 + $0x50] sm:$0x1] %vm270_vm1, %v3826_v0  ;;  %v537_v16 = vrot.slane %v533_v59, 4  ;;  %v544_v17 = vor.u32 %v542_v2, %v541_v63  ;;  %v548_v19 = vshrl.u32 %v261_v14, 16  ;;  %v1170_v20 = vrot.slane %v3891_v1, 1 }
  0x22   : > { %290 = vst.msk [vmem:[#allocation2 + $0x54] sm:$0xf] %vm267_vm0, %v3826_v0  ;;  %v1171_v21 = vrot.slane %v3903_v6, 1  ;;  %v546_v22 = vrot.slane %v541_v63, 4  ;;  %v558_v23 = vrot.slane %v556_v7, 7  ;;  %v671_v24 = vsel %vm4002_vm6, %v376_v8, %v670_v9 }
  0x23   : > { %291 = vst.msk [vmem:[#allocation2 + $0x58] sm:$0xf] %vm267_vm0, %v3826_v0  ;;  %v550_v25 = vrot.slane %v548_v19, 7  ;;  %v551_v26 = vshll.u32 %v261_v14, 16  ;;  %v559_v27 = vshll.u32 %v262_v3, 16  ;;  %v545_v1 = vsel %vm4010_vm7, %v537_v16, %v544_v17 }
  0x24   : > { %292 = vst.msk [vmem:[#allocation2 + $0x5c] sm:$0x1] %vm270_vm1, %v3826_v0  ;;  %v1172_v28 = vsel %vm1169_vm9, %v1170_v20, %v1171_v21  ;;  %v563_v34 = vrot.slane %v558_v23, 4  ;;  %v241_v8 = vld [vmem:[%s3962_s23 + $0x18] sm:$0xf]  ;;  %vm1250_vm10 = vcmask 261120  }
  0x25   : > { %293 = vst.msk [vmem:[#allocation2 + $0x60] sm:$0xf] %vm267_vm0, %v3826_v0  ;;  %1218 = vrot.lane.b32.xlu2 %v1172_v28, %s3828_s24  ;;  %v553_v6 = vor.u32 %v551_v26, %v550_v25  ;;  %v554_v30 = vrot.slane %v550_v25, 4  ;;  %v561_v31 = vor.u32 %v559_v27, %v558_v23  ;;  %v378_v26 = vshrl.u32 %v241_v8, 16 }
  0x26   : > { %294 = vst.msk [vmem:[#allocation2 + $0x64] sm:$0xf] %vm267_vm0, %v3826_v0  ;;  %vm1283_vm11 = vcmask 523264   ;;  %vm1925_vm12 = vcmask 785408  }
  0x27   : > { %295 = vst.msk [vmem:[#allocation2 + $0x68] sm:$0x1] %vm270_vm1, %v3826_v0  ;;  %v562_v42 = vsel %vm4010_vm7, %v554_v30, %v561_v31  ;;  %v381_v31 = vshll.u32 %v241_v8, 16 }
  0x28   : > { %296 = vst.msk [vmem:[#allocation2 + $0x6c] sm:$0xf] %vm267_vm0, %v3826_v0 }
  0x29   : > { %297 = vst.msk [vmem:[#allocation2 + $0x70] sm:$0xf] %vm267_vm0, %v3826_v0 }
  0x2a   : > { %298 = vst.msk [vmem:[#allocation2 + $0x74] sm:$0x1] %vm270_vm1, %v3826_v0 }
  0x2b   : > { %299 = vst.msk [vmem:[#allocation2 + $0x78] sm:$0xf] %vm267_vm0, %v3826_v0 }
  0x2c   : > { %300 = vst.msk [vmem:[#allocation2 + $0x7c] sm:$0xf] %vm267_vm0, %v3826_v0 }
  0x2d   : > { %301 = vst.msk [vmem:[#allocation2 + $0x80] sm:$0x1] %vm270_vm1, %v3826_v0 }
  0x2e   : > { %302 = vst.msk [vmem:[#allocation2 + $0x84] sm:$0xf] %vm267_vm0, %v3826_v0 }
  0x2f   : > { %303 = vst.msk [vmem:[#allocation2 + $0x88] sm:$0xf] %vm267_vm0, %v3826_v0 }
  0x30   : > { %304 = vst.msk [vmem:[#allocation2 + $0x8c] sm:$0x1] %vm270_vm1, %v3826_v0 }
  0x31   : > { %305 = vst.msk [vmem:[#allocation2 + $0x90] sm:$0xf] %vm267_vm0, %v3826_v0 }
  0x32   : > { %306 = vst.msk [vmem:[#allocation2 + $0x94] sm:$0xf] %vm267_vm0, %v3826_v0 }
  0x33   : > { %307 = vst.msk [vmem:[#allocation2 + $0x98] sm:$0x1] %vm270_vm1, %v3826_v0 }
  0x34   : > { %308 = vst.msk [vmem:[#allocation2 + $0x9c] sm:$0xf] %vm267_vm0, %v3826_v0 }
  0x35   : > { %309 = vst.msk [vmem:[#allocation2 + $0xa0] sm:$0xf] %vm267_vm0, %v3826_v0 }
  0x36   : > { %310 = vst.msk [vmem:[#allocation2 + $0xa4] sm:$0x1] %vm270_vm1, %v3826_v0 }
  0x37   : > { %311 = vst.msk [vmem:[#allocation2 + $0xa8] sm:$0xf] %vm267_vm0, %v3826_v0 }
  0x38   : > { %312 = vst.msk [vmem:[#allocation2 + $0xac] sm:$0xf] %vm267_vm0, %v3826_v0 }
  0x39   : > { %313 = vst.msk [vmem:[#allocation2 + $0xb0] sm:$0x1] %vm270_vm1, %v3826_v0 }
  0x3a   : > { %314 = vst.msk [vmem:[#allocation2 + $0xb4] sm:$0xf] %vm267_vm0, %v3826_v0 }
  0x3b   : > { %315 = vst.msk [vmem:[#allocation2 + $0xb8] sm:$0xf] %vm267_vm0, %v3826_v0  ;;  %v736_v13 = vld [vmem:[#allocation2 + $0x9c] sm:$0xf] }
  0x3c   : > { %316 = vst.msk [vmem:[#allocation2 + $0xbc] sm:$0x1] %vm270_vm1, %v3826_v0  ;;  %v737_v29 = vsel %vm4018_vm8, %v536_v12, %v736_v13 }
  0x3d   : > { %317 = vst.msk [vmem:[#allocation2 + $0xc0] sm:$0xf] %vm267_vm0, %v3826_v0  ;;  %v740_v18 = vld [vmem:[#allocation2 + $0xa4] sm:$0x1] }
  0x3e   : > { %318 = vst.msk [vmem:[#allocation2 + $0xc4] sm:$0xf] %vm267_vm0, %v3826_v0  ;;  %v741_v33 = vsel %vm4002_vm6, %v546_v22, %v740_v18  ;;  %v743_v35 = vld [vmem:[#allocation2 + $0xa8] sm:$0xf] }
  0x3f   : > { %319 = vst.msk [vmem:[#allocation2 + $0xc8] sm:$0x1] %vm270_vm1, %v3826_v0  ;;  %v744_v40 = vsel %vm4018_vm8, %v553_v6, %v743_v35 }
  0x40   : > { %320 = vst.msk [vmem:[#allocation2 + $0xcc] sm:$0xf] %vm267_vm0, %v3826_v0  ;;  %v747_v37 = vld [vmem:[#allocation2 + $0xb0] sm:$0x1] }
  0x41   : > { %321 = vst.msk [vmem:[#allocation2 + $0xd0] sm:$0xf] %vm267_vm0, %v3826_v0  ;;  %v748_v48 = vsel %vm4002_vm6, %v563_v34, %v747_v37 }
  0x42   : > { %322 = vst.msk [vmem:[#allocation2 + $0xd4] sm:$0x1] %vm270_vm1, %v3826_v0  ;;  %v341_v0 = vsel %vm4010_vm7, %v333_v50, %v340_v54 }
  0x43   : > { %661 = vst [vmem:[#allocation2 + $0x18] sm:$0xf] %v660_v53 }
  0x44   : > { %662 = vst.msk [vmem:[#allocation2 + $0x1c] sm:$0xf] %vm267_vm0, %v358_v52 }
  0x45   : > { %665 = vst [vmem:[#allocation2 + $0x20] sm:$0x1] %v664_v61 }
  0x46   : > { %652 = vst [vmem:[#allocation2 + $0xc] sm:$0xf] %v651_v4  ;;  %v242_v4 = vld [vmem:[%s3962_s23 + $0x1c] sm:$0xf] }
  0x47   : > { %653 = vst.msk [vmem:[#allocation2 + $0x10] sm:$0xf] %vm267_vm0, %v341_v0  ;;  %v386_v21 = vshrl.u32 %v242_v4, 16 }
  0x48   : > { %658 = vst [vmem:[#allocation2 + $0x14] sm:$0x1] %v657_v10 }
  0x49   : > { %668 = vst [vmem:[#allocation2 + $0x24] sm:$0xf] %v667_v15 }
  0x4a   : > { %669 = vst.msk [vmem:[#allocation2 + $0x28] sm:$0xf] %vm267_vm0, %v375_v11 }
  0x4b   : > { %v4059_v32 = vld [vmem:[#allocation2 + $0x18] sm:$0xff]  ;;  %672 = vst [vmem:[#allocation2 + $0x2c] sm:$0x1] %v671_v24 }
  0x4c   : > { %v3495_v36 = vld [vmem:[#allocation2 + $0x20] sm:$0x1]  ;;  %738 = vst [vmem:[#allocation2 + $0x9c] sm:$0xf] %v737_v29  ;;  %v2608_v45 = vrot.slane %v4059_v32, 1  ;;  %v2387_v60 = vshll.u32 %v4059_v32, 16 }
  0x4d   : > { %v2352_v39 = vunpack.c.l.b16 %v3495_v36  ;;  %739 = vst.msk [vmem:[#allocation2 + $0xa0] sm:$0xf] %vm267_vm0, %v545_v1  ;;  %v3294_v0 = vld [vmem:[#allocation2 + $0x20] sm:$0x1]  ;;  %v2385_v12 = vshrl.u32 %v4059_v32, 16 }
  0x4e   : > { %v4066_v41 = vld [vmem:[#allocation2 + $0xc] sm:$0xff]  ;;  %742 = vst [vmem:[#allocation2 + $0xa4] sm:$0x1] %v741_v33  ;;  %v2389_v16 = vrot.slane %v2387_v60, 1  ;;  %v1477_v25 = vunpack.c.l.b16 %v3294_v0  ;;  %v264_v0 = vld [vmem:[%s3962_s23 + $0x74] sm:$0xf] }
  0x4f   : > { %v2368_v44 = vpack.c.b16 %v2352_v39, %v2352_v39  ;;  %v3291_v46 = vld [vmem:[#allocation2 + $0x14] sm:$0x1]  ;;  %v1509_v50 = vshrl.u32 %v4066_v41, 16  ;;  %v1511_v51 = vshll.u32 %v4066_v41, 16  ;;  %745 = vst [vmem:[#allocation2 + $0xa8] sm:$0xf] %v744_v40 }
  0x50   : > { %v1476_v49 = vunpack.c.l.b16 %v3291_v46  ;;  %v773_v54 = vld [vmem:[#allocation2 + $0x14] sm:$0x1]  ;;  %746 = vst.msk [vmem:[#allocation2 + $0xac] sm:$0xf] %vm267_vm0, %v562_v42  ;;  %v4079_v2 = vld [vmem:[#allocation2 + $0xc] sm:$0xff]  ;;  %v1732_v29 = vrot.slane %v4066_v41, 1  ;;  %v2390_v6 = vor.u32 %v2389_v16, %v2385_v12  ;;  %v1493_v39 = vpack.c.b16 %v1477_v25, %v1477_v25 }
  0x51   : > { %v2609_v52 = vrot.slane %v2368_v44, 1  ;;  %v3706_v53 = vld [vmem:[#allocation2 + $0x24] sm:$0xff]  ;;  %v1513_v56 = vrot.slane %v1511_v51, 1  ;;  %749 = vst [vmem:[#allocation2 + $0xb0] sm:$0x1] %v748_v48  ;;  %v913_v3 = vunpack.c.l.b16 %v773_v54  ;;  %v2392_v17 = vshll.u32 %v2368_v44, 16 }
  0x52   : > { %v1492_v55 = vpack.c.b16 %v1476_v49, %v1476_v49  ;;  %v3498_v57 = vld [vmem:[#allocation2 + $0x2c] sm:$0x1]  ;;  %v2399_v63 = vshll.u32 %v3706_v53, 16  ;;  %v2611_v7 = vrot.slane %v3706_v53, 1  ;;  %v2397_v10 = vshrl.u32 %v3706_v53, 16  ;;  %v3684_v42 = vld [vmem:[#allocation2 + $0x18] sm:$0xff] }
  0x53   : > { %v2610_v58 = vsel %vm1169_vm9, %v2608_v45, %v2609_v52  ;;  %v2353_v59 = vunpack.c.l.b16 %v3498_v57  ;;  %v1514_v61 = vor.u32 %v1513_v56, %v1509_v50  ;;  %v4085_v19 = vpack.c.b16 %v913_v3, %v913_v3  ;;  %v673_v46 = vld [vmem:[#allocation2 + $0x30] sm:$0xf]  ;;  %v677_v53 = vld [vmem:[#allocation2 + $0x38] sm:$0x1] }
  0x54   : > { %2656 = vrot.lane.b32.xlu0 %v2610_v58, %s3828_s24  ;;  %v1516_v62 = vshll.u32 %v1492_v55, 16  ;;  %v2401_v11 = vrot.slane %v2399_v63, 1  ;;  %v960_v20 = vshll.u32 %v4079_v2, 16  ;;  %v3695_v23 = vld [vmem:[#allocation2 + $0x9c] sm:$0xff]  ;;  %v1733_v1 = vrot.slane %v1492_v55, 1 }
  0x55   : > { %v2369_v5 = vpack.c.b16 %v2353_v59, %v2353_v59  ;;  %v3327_v13 = vld [vmem:[#allocation2 + $0xa4] sm:$0x1]  ;;  %v2394_v30 = vrot.slane %v2392_v17, 1  ;;  %v958_v32 = vshrl.u32 %v4079_v2, 16  ;;  %v965_v34 = vshll.u32 %v4085_v19, 16 }
  0x56   : > { %v1518_v9 = vrot.slane %v1516_v62, 1  ;;  %v1488_v24 = vunpack.c.l.b16 %v3327_v13  ;;  %v2402_v27 = vor.u32 %v2401_v11, %v2397_v10  ;;  %v962_v33 = vrot.slane %v960_v20, 1 }
  0x57   : > { %v2612_v14 = vrot.slane %v2369_v5, 1  ;;  %v2404_v15 = vshll.u32 %v2369_v5, 16  ;;  %v1734_v35 = vsel %vm1169_vm9, %v1732_v29, %v1733_v1  ;;  %v1655_v37 = vshll.u32 %v3695_v23, 16  ;;  %v4112_v12 = vld [vmem:[#allocation2 + $0xa8] sm:$0xff] }
  0x58   : > { %v1519_v18 = vsel %vm944_vm2, %v1514_v61, %v1518_v9  ;;  %v1504_v36 = vpack.c.b16 %v1488_v24, %v1488_v24  ;;  %1780 = vrot.lane.b32.xlu2 %v1734_v35, %s3828_s24  ;;  %v380_v40 = vrot.slane %v378_v26, 7  ;;  %v388_v44 = vrot.slane %v386_v21, 7  ;;  %v3330_v50 = vld [vmem:[#allocation2 + $0xb0] sm:$0x1]  ;;  %v4124_v1 = vld [vmem:[#allocation2 + $0x24] sm:$0xff] }
  0x59   : > { %1700 = vrot.lane.b32.xlu1 %v1519_v18, %s3827_s19  ;;  %v2613_v22 = vsel %vm1169_vm9, %v2611_v7, %v2612_v14  ;;  %v2406_v28 = vrot.slane %v2404_v15, 1  ;;  %v389_v45 = vshll.u32 %v242_v4, 16  ;;  %v1768_v48 = vrot.slane %v3695_v23, 1  ;;  %v263_v7 = vld [vmem:[%s3962_s23 + $0x70] sm:$0xf] }
  0x5a   : > { %v2395_v49 = vsel %vm944_vm2, %v2390_v6, %v2394_v30  ;;  %v383_v51 = vor.u32 %v381_v31, %v380_v40  ;;  %v384_v52 = vrot.slane %v380_v40, 4  ;;  %v1769_v54 = vrot.slane %v1504_v36, 1 }
  0x5b   : > { %v2407_v41 = vsel %vm944_vm2, %v2402_v27, %v2406_v28  ;;  %v963_v55 = vor.u32 %v962_v33, %v958_v32  ;;  %v967_v56 = vrot.slane %v965_v34, 1  ;;  %v391_v57 = vor.u32 %v389_v45, %v388_v44  ;;  %v243_v28 = vld [vmem:[%s3962_s23 + $0x20] sm:$0xf]  ;;  %v750_v32 = vld [vmem:[#allocation2 + $0xb4] sm:$0xf] }
  0x5c   : > { %2658 = vrot.lane.b32.xlu0 %v2613_v22, %s3828_s24  ;;  %v393_v58 = vrot.slane %v388_v44, 4  ;;  %v1653_v59 = vshrl.u32 %v3695_v23, 16  ;;  %v1657_v60 = vrot.slane %v1655_v37, 1  ;;  %v1660_v61 = vshll.u32 %v1504_v36, 16 }
  0x5d   : > { %v674_v62 = vsel %vm4018_vm8, %v383_v51, %v673_v46  ;;  %v1489_v63 = vunpack.c.l.b16 %v3330_v50  ;;  %v392_v3 = vsel %vm4010_vm7, %v384_v52, %v391_v57  ;;  %v1770_v5 = vsel %vm1169_vm9, %v1768_v48, %v1769_v54  ;;  %v776_v48 = vld [vmem:[#allocation2 + $0x20] sm:$0x1]  ;;  %v4142_v57 = vld [vmem:[#allocation2 + $0x18] sm:$0xff] }
  0x5e   : > { %675 = vst [vmem:[#allocation2 + $0x30] sm:$0xf] %v674_v62  ;;  %v678_v4 = vsel %vm4002_vm6, %v393_v58, %v677_v53  ;;  %v1735_v8 = vrot.slane %v3684_v42, 1  ;;  %v1736_v9 = vrot.slane %v1493_v39, 1  ;;  %v1173_v10 = vrot.slane %v4079_v2, 1 }
  0x5f   : > { %v1174_v11 = vrot.slane %v4085_v19, 1  ;;  %676 = vst.msk [vmem:[#allocation2 + $0x34] sm:$0xf] %vm267_vm0, %v392_v3  ;;  %v1521_v13 = vshrl.u32 %v3684_v42, 16  ;;  %v1523_v14 = vshll.u32 %v3684_v42, 16  ;;  %v1528_v15 = vshll.u32 %v1493_v39, 16 }
  0x60   : > { %679 = vst [vmem:[#allocation2 + $0x38] sm:$0x1] %v678_v4  ;;  %v968_v16 = vsel %vm944_vm2, %v963_v55, %v967_v56  ;;  %v1658_v17 = vor.u32 %v1657_v60, %v1653_v59  ;;  %v1662_v18 = vrot.slane %v1660_v61, 1  ;;  %1804 = vrot.lane.b32.xlu2 %v1770_v5, %s3828_s24  ;;  %v3297_v2 = vld [vmem:[#allocation2 + $0x2c] sm:$0x1]  ;;  %v565_v20 = vshrl.u32 %v263_v7, 16 }
  0x61   : > { %2578 = vrot.lane.b32.xlu1 %v2407_v41, %s3827_s19  ;;  %v4116_v19 = vpack.c.b16 %v1489_v63, %v1489_v63  ;;  %v1525_v21 = vrot.slane %v1523_v14, 1  ;;  %v1530_v22 = vrot.slane %v1528_v15, 1  ;;  %v568_v23 = vshll.u32 %v263_v7, 16  ;;  %v754_v41 = vld [vmem:[#allocation2 + $0xbc] sm:$0x1] }
  0x62   : > { %v1737_v24 = vsel %vm1169_vm9, %v1735_v8, %v1736_v9  ;;  %v4120_v25 = vsel %vm1169_vm9, %v1173_v10, %v1174_v11  ;;  %v567_v26 = vrot.slane %v565_v20, 7  ;;  %v573_v27 = vshrl.u32 %v264_v0, 16  ;;  %v244_v56 = vld [vmem:[%s3962_s23 + $0x24] sm:$0xf]  ;;  %v245_v5 = vld [vmem:[%s3962_s23 + $0x28] sm:$0xf] }
  0x63   : > { %v1771_v29 = vrot.slane %v4112_v12, 1  ;;  %v1478_v6 = vunpack.c.l.b16 %v3297_v2  ;;  %v1526_v30 = vor.u32 %v1525_v21, %v1521_v13  ;;  %v576_v31 = vshll.u32 %v264_v0, 16  ;;  %v680_v15 = vld [vmem:[#allocation2 + $0x3c] sm:$0xf]  ;;  %v246_v2 = vld [vmem:[%s3962_s23 + $0x2c] sm:$0xf] }
  0x64   : > { %2576 = vrot.lane.b32.xlu0 %v2395_v49, %s3827_s19  ;;  %v1663_v33 = vsel %vm944_vm2, %v1658_v17, %v1662_v18  ;;  %v570_v34 = vor.u32 %v568_v23, %v567_v26  ;;  %v571_v35 = vrot.slane %v567_v26, 4  ;;  %v575_v36 = vrot.slane %v573_v27, 7  ;;  %v684_v26 = vld [vmem:[#allocation2 + $0x44] sm:$0x1] }
  0x65   : > { %v1772_v37 = vrot.slane %v4116_v19, 1  ;;  %v1531_v40 = vsel %vm944_vm2, %v1526_v30, %v1530_v22  ;;  %v1667_v42 = vshll.u32 %v4112_v12, 16  ;;  %v395_v44 = vshrl.u32 %v243_v28, 16 }
  0x66   : > { %v4129_v39 = vld [vmem:[#allocation2 + $0x30] sm:$0xff]  ;;  %v1533_v46 = vshrl.u32 %v4124_v1, 16  ;;  %v578_v49 = vor.u32 %v576_v31, %v575_v36  ;;  %v580_v50 = vrot.slane %v575_v36, 4  ;;  %v751_v51 = vsel %vm4018_vm8, %v570_v34, %v750_v32 }
  0x67   : > { %v3501_v45 = vld [vmem:[#allocation2 + $0x38] sm:$0x1]  ;;  %v2411_v53 = vshll.u32 %v4129_v39, 16  ;;  %v4138_v54 = vpack.c.b16 %v1478_v6, %v1478_v6  ;;  %v1535_v55 = vshll.u32 %v4124_v1, 16  ;;  %752 = vst [vmem:[#allocation2 + $0xb4] sm:$0xf] %v751_v51  ;;  %v914_v63 = vunpack.c.l.b16 %v776_v48 }
  0x68   : > { %v2354_v52 = vunpack.c.l.b16 %v3501_v45  ;;  %1702 = vrot.lane.b32.xlu2 %v1531_v40, %s3827_s19  ;;  %v579_v58 = vsel %vm4010_vm7, %v571_v35, %v578_v49  ;;  %v755_v59 = vsel %vm4002_vm6, %v580_v50, %v754_v41  ;;  %v1665_v60 = vshrl.u32 %v4112_v12, 16 }
  0x69   : > { %1139 = vrot.lane.b32.xlu1 %v968_v16, %s3827_s19  ;;  %v1669_v61 = vrot.slane %v1667_v42, 1  ;;  %753 = vst.msk [vmem:[#allocation2 + $0xb8] sm:$0xf] %vm267_vm0, %v579_v58  ;;  %v1672_v3 = vshll.u32 %v4116_v19, 16  ;;  %v397_v4 = vrot.slane %v395_v44, 7  ;;  %v398_v0 = vshll.u32 %v243_v28, 16 }
  0x6a   : > { %v4150_v62 = vpack.c.b16 %v2354_v52, %v2354_v52  ;;  %756 = vst [vmem:[#allocation2 + $0xbc] sm:$0x1] %v755_v59  ;;  %v403_v8 = vshrl.u32 %v244_v56, 16  ;;  %v406_v9 = vshll.u32 %v244_v56, 16  ;;  %v2409_v10 = vshrl.u32 %v4129_v39, 16 }
  0x6b   : > { %v1670_v7 = vor.u32 %v1669_v61, %v1665_v60  ;;  %v2413_v11 = vrot.slane %v2411_v53, 1  ;;  %v1674_v14 = vrot.slane %v1672_v3, 1  ;;  %v400_v16 = vor.u32 %v398_v0, %v397_v4  ;;  %v687_v53 = vld [vmem:[#allocation2 + $0x48] sm:$0xf] }
  0x6c   : > { %1724 = vrot.lane.b32.xlu0 %v1663_v33, %s3827_s19  ;;  %v2416_v13 = vshll.u32 %v4150_v62, 16  ;;  %v401_v17 = vrot.slane %v397_v4, 4  ;;  %v405_v18 = vrot.slane %v403_v8, 7  ;;  %v412_v20 = vshrl.u32 %v245_v5, 16  ;;  %v265_v4 = vld [vmem:[%s3962_s23 + $0x78] sm:$0xf] }
  0x6d   : > { %v4159_v21 = vpack.c.b16 %v914_v63, %v914_v63  ;;  %v972_v22 = vshll.u32 %v4142_v57, 16  ;;  %v1675_v23 = vsel %vm944_vm2, %v1670_v7, %v1674_v14  ;;  %v415_v27 = vshll.u32 %v245_v5, 16  ;;  %v691_v63 = vld [vmem:[#allocation2 + $0x50] sm:$0x1]  ;;  %v266_v8 = vld [vmem:[%s3962_s23 + $0x7c] sm:$0xf] }
  0x6e   : > { %v408_v28 = vor.u32 %v406_v9, %v405_v18  ;;  %v410_v6 = vrot.slane %v405_v18, 4  ;;  %v681_v30 = vsel %vm4018_vm8, %v400_v16, %v680_v15  ;;  %v414_v31 = vrot.slane %v412_v20, 7 }
  0x6f   : > { %v1540_v32 = vshll.u32 %v4138_v54, 16  ;;  %v970_v33 = vshrl.u32 %v4142_v57, 16  ;;  %682 = vst [vmem:[#allocation2 + $0x3c] sm:$0xf] %v681_v30  ;;  %v420_v34 = vshrl.u32 %v246_v2, 16  ;;  %v2414_v35 = vor.u32 %v2413_v11, %v2409_v10 }
  0x70   : > { %v2418_v36 = vrot.slane %v2416_v13, 1  ;;  %v4169_v40 = vld [vmem:[#allocation2 + $0xb4] sm:$0xff]  ;;  %1726 = vrot.lane.b32.xlu2 %v1675_v23, %s3827_s19  ;;  %v409_v41 = vsel %vm4010_vm7, %v401_v17, %v408_v28  ;;  %v685_v42 = vsel %vm4002_vm6, %v410_v6, %v684_v26  ;;  %v2614_v45 = vrot.slane %v4129_v39, 1  ;;  %v779_v6 = vld [vmem:[#allocation2 + $0x2c] sm:$0x1] }
  0x71   : > { %1782 = vrot.lane.b32.xlu1 %v1737_v24, %s3828_s24  ;;  %v1537_v24 = vrot.slane %v1535_v55, 1  ;;  %v3333_v44 = vld [vmem:[#allocation2 + $0xbc] sm:$0x1]  ;;  %683 = vst.msk [vmem:[#allocation2 + $0x40] sm:$0xf] %vm267_vm0, %v409_v41  ;;  %v2615_v48 = vrot.slane %v4150_v62, 1  ;;  %v417_v49 = vor.u32 %v415_v27, %v414_v31 }
  0x72   : > { %v974_v50 = vrot.slane %v972_v22, 1  ;;  %v977_v51 = vshll.u32 %v4159_v21, 16  ;;  %v1490_v52 = vunpack.c.l.b16 %v3333_v44  ;;  %686 = vst [vmem:[#allocation2 + $0x44] sm:$0x1] %v685_v42  ;;  %v1679_v19 = vshll.u32 %v4169_v40, 16 }
  0x73   : > { %v418_v12 = vrot.slane %v414_v31, 4  ;;  %v422_v55 = vrot.slane %v420_v34, 7  ;;  %v1538_v39 = vor.u32 %v1537_v24, %v1533_v46  ;;  %v1542_v56 = vrot.slane %v1540_v32, 1  ;;  %v757_v30 = vld [vmem:[#allocation2 + $0xc0] sm:$0xf] }
  0x74   : > { %1220 = vrot.lane.b32.xlu0 %v4120_v25, %s3828_s24  ;;  %v1773_v25 = vsel %vm1169_vm9, %v1771_v29, %v1772_v37  ;;  %v423_v29 = vshll.u32 %v246_v2, 16  ;;  %v2419_v37 = vsel %vm944_vm2, %v2414_v35, %v2418_v36  ;;  %v4190_v58 = vpack.c.b16 %v1490_v52, %v1490_v52 }
  0x75   : > { %v2616_v59 = vsel %vm1169_vm9, %v2614_v45, %v2615_v48  ;;  %v427_v61 = vrot.slane %v422_v55, 4  ;;  %v688_v62 = vsel %vm4018_vm8, %v417_v49, %v687_v53  ;;  %v975_v3 = vor.u32 %v974_v50, %v970_v33  ;;  %v761_v49 = vld [vmem:[#allocation2 + $0xc8] sm:$0x1]  ;;  %v4221_v50 = vld [vmem:[#allocation2 + $0x30] sm:$0xff] }
  0x76   : > { %v425_v60 = vor.u32 %v423_v29, %v422_v55  ;;  %689 = vst [vmem:[#allocation2 + $0x48] sm:$0xf] %v688_v62  ;;  %v979_v5 = vrot.slane %v977_v51, 1  ;;  %v1677_v46 = vshrl.u32 %v4169_v40, 16  ;;  %v1681_v7 = vrot.slane %v1679_v19, 1 }
  0x77   : > { %v1684_v9 = vshll.u32 %v4190_v58, 16  ;;  %v1176_v10 = vrot.slane %v4142_v57, 1  ;;  %v1177_v11 = vrot.slane %v4159_v21, 1  ;;  %v692_v13 = vsel %vm4002_vm6, %v427_v61, %v691_v63  ;;  %v257_v19 = vld [vmem:[%s3962_s23 + $0x58] sm:$0xf] }
  0x78   : > { %v426_v0 = vsel %vm4010_vm7, %v418_v12, %v425_v60  ;;  %2660 = vrot.lane.b32.xlu2 %v2616_v59, %s3828_s24  ;;  %v1543_v14 = vsel %vm944_vm2, %v1538_v39, %v1542_v56  ;;  %693 = vst [vmem:[#allocation2 + $0x50] sm:$0x1] %v692_v13  ;;  %v582_v16 = vshrl.u32 %v265_v4, 16  ;;  %v585_v17 = vshll.u32 %v265_v4, 16  ;;  %v4210_v2 = vld [vmem:[#allocation2 + $0x3c] sm:$0xff]  ;;  %v4228_v12 = vld [vmem:[#allocation2 + $0x24] sm:$0xff] }
  0x79   : > { %1806 = vrot.lane.b32.xlu1 %v1773_v25, %s3828_s24  ;;  %690 = vst.msk [vmem:[#allocation2 + $0x4c] sm:$0xf] %vm267_vm0, %v426_v0  ;;  %v3504_v15 = vld [vmem:[#allocation2 + $0x44] sm:$0x1]  ;;  %v1738_v18 = vrot.slane %v4124_v1, 1  ;;  %v980_v57 = vsel %vm944_vm2, %v975_v3, %v979_v5  ;;  %v590_v21 = vshrl.u32 %v266_v8, 16  ;;  %v1682_v26 = vor.u32 %v1681_v7, %v1677_v46 }
  0x7a   : > { %v2355_v20 = vunpack.c.l.b16 %v3504_v15  ;;  %v584_v22 = vrot.slane %v582_v16, 7  ;;  %v593_v23 = vshll.u32 %v266_v8, 16  ;;  %v1686_v27 = vrot.slane %v1684_v9, 1  ;;  %v3300_v25 = vld [vmem:[#allocation2 + $0x38] sm:$0x1] }
  0x7b   : > { %v2423_v31 = vshll.u32 %v4210_v2, 16  ;;  %v1178_v24 = vsel %vm1169_vm9, %v1176_v10, %v1177_v11  ;;  %v592_v33 = vrot.slane %v590_v21, 7  ;;  %v1739_v34 = vrot.slane %v4138_v54, 1  ;;  %v258_v3 = vld [vmem:[%s3962_s23 + $0x5c] sm:$0xf] }
  0x7c   : > { %2580 = vrot.lane.b32.xlu0 %v2419_v37, %s3827_s19  ;;  %v2371_v28 = vpack.c.b16 %v2355_v20, %v2355_v20  ;;  %v587_v1 = vor.u32 %v585_v17, %v584_v22  ;;  %v588_v32 = vrot.slane %v584_v22, 4  ;;  %v2421_v35 = vshrl.u32 %v4210_v2, 16  ;;  %v729_v21 = vld [vmem:[#allocation2 + $0x90] sm:$0xf] }
  0x7d   : > { %v2425_v36 = vrot.slane %v2423_v31, 1  ;;  %v915_v42 = vunpack.c.l.b16 %v779_v6  ;;  %v595_v44 = vor.u32 %v593_v23, %v592_v33  ;;  %v597_v45 = vrot.slane %v592_v33, 4 }
  0x7e   : > { %v2428_v41 = vshll.u32 %v2371_v28, 16  ;;  %v758_v48 = vsel %vm4018_vm8, %v587_v1, %v757_v30  ;;  %v1687_v54 = vsel %vm944_vm2, %v1682_v26, %v1686_v27  ;;  %v1479_v55 = vunpack.c.l.b16 %v3300_v25  ;;  %v733_v1 = vld [vmem:[#allocation2 + $0x98] sm:$0x1] }
  0x7f   : > { %759 = vst [vmem:[#allocation2 + $0xc0] sm:$0xf] %v758_v48  ;;  %v596_v51 = vsel %vm4010_vm7, %v588_v32, %v595_v44  ;;  %v2426_v52 = vor.u32 %v2425_v36, %v2421_v35  ;;  %v762_v29 = vsel %vm4002_vm6, %v597_v45, %v761_v49  ;;  %v1740_v37 = vsel %vm1169_vm9, %v1738_v18, %v1739_v34  ;;  %v3507_v46 = vld [vmem:[#allocation2 + $0x50] sm:$0x1]  ;;  %v782_v34 = vld [vmem:[#allocation2 + $0x38] sm:$0x1] }
  0x80   : > { %1222 = vrot.lane.b32.xlu2 %v1178_v24, %s3828_s24  ;;  %v2430_v53 = vrot.slane %v2428_v41, 1  ;;  %760 = vst.msk [vmem:[#allocation2 + $0xc4] sm:$0xf] %vm267_vm0, %v596_v51  ;;  %v4234_v39 = vpack.c.b16 %v915_v42, %v915_v42  ;;  %v514_v56 = vshrl.u32 %v257_v19, 16  ;;  %v2617_v59 = vrot.slane %v4210_v2, 1  ;;  %v4255_v2 = vld [vmem:[#allocation2 + $0x48] sm:$0xff] }
  0x81   : > { %1704 = vrot.lane.b32.xlu1 %v1543_v14, %s3827_s19  ;;  %763 = vst [vmem:[#allocation2 + $0xc8] sm:$0x1] %v762_v29  ;;  %v2618_v60 = vrot.slane %v2371_v28, 1  ;;  %v1547_v61 = vshll.u32 %v4221_v50, 16  ;;  %v984_v62 = vshll.u32 %v4228_v12, 16  ;;  %v517_v4 = vshll.u32 %v257_v19, 16 }
  0x82   : > { %v2431_v63 = vsel %vm944_vm2, %v2426_v52, %v2430_v53  ;;  %v4242_v5 = vpack.c.b16 %v1479_v55, %v1479_v55  ;;  %v982_v7 = vshrl.u32 %v4228_v12, 16  ;;  %v989_v8 = vshll.u32 %v4234_v39, 16  ;;  %v4251_v14 = vld [vmem:[%s3962_s23 + $0x30] sm:$0xf]  ;;  %v4268_v35 = vld [vmem:[%s5264_s1 + $0x28] sm:$0xff]  ;;  %v3704_v36 = vld [vmem:[%s5264_s1 + $0x58] sm:$0xff] }
  0x83   : > { %v986_v0 = vrot.slane %v984_v62, 1  ;;  %v1774_v9 = vrot.slane %v4169_v40, 1  ;;  %v1775_v10 = vrot.slane %v4190_v58, 1  ;;  %v1545_v11 = vshrl.u32 %v4221_v50, 16  ;;  %v248_v49 = vld [vmem:[%s3962_s23 + $0x34] sm:$0xf]  ;;  %2117 = vmatpush.bf16.msra.mxu1 %v4268_v35  ;;  %1960 = vmatpush.bf16.msra.mxu0 %v3704_v36 }
  0x84   : > { %1141 = vrot.lane.b32.xlu0 %v980_v57, %s3827_s19  ;;  %v516_v13 = vrot.slane %v514_v56, 7  ;;  %v2619_v15 = vsel %vm1169_vm9, %v2617_v59, %v2618_v60  ;;  %v1549_v16 = vrot.slane %v1547_v61, 1  ;;  %v522_v17 = vshrl.u32 %v258_v3, 16  ;;  %v4289_v29 = vld [vmem:[#allocation2 + $0x30] sm:$0xff]  ;;  %3727 = vmatpush.bf16.msra.mxu3 %v3704_v36 }
  0x85   : > { %v525_v18 = vshll.u32 %v258_v3, 16  ;;  %v2356_v20 = vunpack.c.l.b16 %v3507_v46  ;;  %v987_v57 = vor.u32 %v986_v0, %v982_v7  ;;  %v991_v22 = vrot.slane %v989_v8, 1  ;;  %v694_v46 = vld [vmem:[#allocation2 + $0x54] sm:$0xf]  ;;  %v3303_v0 = vld [vmem:[#allocation2 + $0x44] sm:$0x1] }
  0x86   : > { %v519_v40 = vor.u32 %v517_v4, %v516_v13  ;;  %v1552_v58 = vshll.u32 %v4242_v5, 16  ;;  %v520_v26 = vrot.slane %v516_v13, 4  ;;  %v524_v27 = vrot.slane %v522_v17, 7  ;;  %v4318_v17 = vld [vmem:[%s5264_s1 + $0x18] sm:$0xff] }
  0x87   : > { %v429_v28 = vshrl.u32 %v4251_v14, 16  ;;  %v1776_v6 = vsel %vm1169_vm9, %v1774_v9, %v1775_v10  ;;  %v1179_v30 = vrot.slane %v4228_v12, 1  ;;  %v1180_v31 = vrot.slane %v4234_v39, 1  ;;  %v4262_v24 = vld [vmem:[#allocation2 + $0xc0] sm:$0xff] }
  0x88   : > { %2582 = vrot.lane.b32.xlu2 %v2431_v63, %s3827_s19  ;;  %v3336_v23 = vld [vmem:[#allocation2 + $0xc8] sm:$0x1]  ;;  %v1550_v32 = vor.u32 %v1549_v16, %v1545_v11  ;;  %v527_v41 = vor.u32 %v525_v18, %v524_v27  ;;  %v529_v42 = vrot.slane %v524_v27, 4  ;;  %v4273_v25 = vpack.c.b16 %v2356_v20, %v2356_v20  ;;  %v4294_v39 = vld [vmem:[%s5264_s1 + $0x20] sm:$0xff]  ;;  %v698_v16 = vld [vmem:[#allocation2 + $0x5c] sm:$0x1] }
  0x89   : > { %1728 = vrot.lane.b32.xlu1 %v1687_v54, %s3827_s19  ;;  %v1491_v33 = vunpack.c.l.b16 %v3336_v23  ;;  %v2435_v44 = vshll.u32 %v4255_v2, 16  ;;  %v992_v45 = vsel %vm944_vm2, %v987_v57, %v991_v22  ;;  %v730_v48 = vsel %vm4018_vm8, %v519_v40, %v729_v21  ;;  %2118 = vmatpush.bf16.msra.mxu1 %v4294_v39  ;;  %v3702_v23 = vld [vmem:[%s5264_s1 + $0x48] sm:$0xff] }
  0x8a   : > { %v1554_v54 = vrot.slane %v1552_v58, 1  ;;  %v528_v51 = vsel %vm4010_vm7, %v520_v26, %v527_v41  ;;  %731 = vst [vmem:[#allocation2 + $0x90] sm:$0xf] %v730_v48  ;;  %v734_v52 = vsel %vm4002_vm6, %v529_v42, %v733_v1  ;;  %v431_v53 = vrot.slane %v429_v28, 7  ;;  %v4346_v48 = vld [vmem:[%s3962_s23 + $0x3c] sm:$0xf] }
  0x8b   : > { %v1181_v19 = vsel %vm1169_vm9, %v1179_v30, %v1180_v31  ;;  %v2433_v12 = vshrl.u32 %v4255_v2, 16  ;;  %v1691_v55 = vshll.u32 %v4262_v24, 16  ;;  %732 = vst.msk [vmem:[#allocation2 + $0x94] sm:$0xf] %vm267_vm0, %v528_v51  ;;  %v4297_v56 = vpack.c.b16 %v1491_v33, %v1491_v33  ;;  %v4337_v30 = vld [vmem:[%s5264_s1 + $0x10] sm:$0xff] }
  0x8c   : > { %1784 = vrot.lane.b32.xlu0 %v1740_v37, %s3828_s24  ;;  %v916_v37 = vunpack.c.l.b16 %v782_v34  ;;  %735 = vst [vmem:[#allocation2 + $0x98] sm:$0x1] %v734_v52  ;;  %v432_v59 = vshll.u32 %v4251_v14, 16  ;;  %v437_v60 = vshrl.u32 %v248_v49, 16  ;;  %v440_v61 = vshll.u32 %v248_v49, 16  ;;  %v3687_v34 = vld [vmem:[#allocation2 + $0x3c] sm:$0xff] }
  0x8d   : > { %v2437_v62 = vrot.slane %v2435_v44, 1  ;;  %v2440_v63 = vshll.u32 %v4273_v25, 16  ;;  %v1741_v3 = vrot.slane %v4221_v50, 1  ;;  %v1742_v4 = vrot.slane %v4242_v5, 1  ;;  %v3703_v5 = vld [vmem:[%s5264_s1 + $0x50] sm:$0xff]  ;;  %2119 = vmatpush.bf16.msra.mxu1 %v4318_v17 }
  0x8e   : > { %v1555_v7 = vsel %vm944_vm2, %v1550_v32, %v1554_v54  ;;  %v434_v8 = vor.u32 %v432_v59, %v431_v53  ;;  %v435_v9 = vrot.slane %v431_v53, 4  ;;  %v439_v10 = vrot.slane %v437_v60, 7  ;;  %1961 = vmatpush.bf16.msra.mxu0 %v3703_v5  ;;  %3728 = vmatpush.bf16.msra.mxu3 %v3703_v5  ;;  %v4358_v53 = vld [vmem:[%s5264_s1 + $0x8] sm:$0xff]  ;;  %v3700_v60 = vld [vmem:[%s5264_s1 + $0x38] sm:$0xff] }
  0x8f   : > { %v1689_v11 = vshrl.u32 %v4262_v24, 16  ;;  %v1693_v13 = vrot.slane %v1691_v55, 1  ;;  %v4307_v14 = vpack.c.b16 %v916_v37, %v916_v37  ;;  %v1696_v50 = vshll.u32 %v4297_v56, 16  ;;  %v4366_v37 = vld [vmem:[#allocation2 + $0x50] sm:$0x1]  ;;  %v4370_v59 = vld [vmem:[#allocation2 + $0x48] sm:$0xff] }
  0x90   : > { %1143 = vrot.lane.b32.xlu2 %v992_v45, %s3827_s19  ;;  %v442_v18 = vor.u32 %v440_v61, %v439_v10  ;;  %v444_v20 = vrot.slane %v439_v10, 4  ;;  %v695_v57 = vsel %vm4018_vm8, %v434_v8, %v694_v46  ;;  %v2438_v22 = vor.u32 %v2437_v62, %v2433_v12 }
  0x91   : > { %2662 = vrot.lane.b32.xlu1 %v2619_v15, %s3828_s24  ;;  %v996_v15 = vshll.u32 %v4289_v29, 16  ;;  %v2442_v40 = vrot.slane %v2440_v63, 1  ;;  %v1480_v21 = vunpack.c.l.b16 %v3303_v0  ;;  %v1743_v58 = vsel %vm1169_vm9, %v1741_v3, %v1742_v4  ;;  %696 = vst [vmem:[#allocation2 + $0x54] sm:$0xf] %v695_v57  ;;  %2120 = vmatpush.bf16.msra.mxu1 %v4337_v30  ;;  %v4382_v4 = vld [vmem:[%s5264_s1] sm:$0xff] }
  0x92   : > { %v443_v26 = vsel %vm4010_vm7, %v435_v9, %v442_v18  ;;  %v699_v27 = vsel %vm4002_vm6, %v444_v20, %v698_v16  ;;  %v994_v28 = vshrl.u32 %v4289_v29, 16  ;;  %v1694_v31 = vor.u32 %v1693_v13, %v1689_v11  ;;  %1962 = vmatpush.bf16.msra.mxu0 %v3702_v23  ;;  %3729 = vmatpush.bf16.msra.mxu3 %v3702_v23  ;;  %v249_v0 = vld [vmem:[%s3962_s23 + $0x38] sm:$0xf]  ;;  %v3774_v20 = vld [vmem:[#allocation2] sm:$0xff] }
  0x93   : > { %697 = vst.msk [vmem:[#allocation2 + $0x58] sm:$0xf] %vm267_vm0, %v443_v26  ;;  %v1698_v1 = vrot.slane %v1696_v50, 1  ;;  %v1001_v32 = vshll.u32 %v4307_v14, 16  ;;  %v2443_v33 = vsel %vm944_vm2, %v2438_v22, %v2442_v40  ;;  %v1496_v36 = vpack.c.b16 %v1480_v21, %v1480_v21  ;;  %v806_v45 = vld [vmem:[#allocation2 + $0x98] sm:$0x1] }
  0x94   : > { %1808 = vrot.lane.b32.xlu0 %v1776_v6, %s3828_s24  ;;  %v998_v6 = vrot.slane %v996_v15, 1  ;;  %700 = vst [vmem:[#allocation2 + $0x5c] sm:$0x1] %v699_v27  ;;  %v1777_v41 = vrot.slane %v4262_v24, 1  ;;  %v1778_v42 = vrot.slane %v4297_v56, 1  ;;  %v2620_v51 = vrot.slane %v4255_v2, 1  ;;  %v1138_v15 = vpop.permute.xlu1 %1137  ;;  %v1219_v27 = vpop.permute.xlu2 %1218 }
  0x95   : > { %v1699_v49 = vsel %vm944_vm2, %v1694_v31, %v1698_v1  ;;  %v1003_v54 = vrot.slane %v1001_v32, 1  ;;  %v2621_v52 = vrot.slane %v4273_v25, 1  ;;  %v3701_v24 = vld [vmem:[%s5264_s1 + $0x40] sm:$0xff]  ;;  %v1744_v12 = vrot.slane %v3687_v34, 1  ;;  %v4368_v56 = vld [vmem:[#allocation2 + $0x90] sm:$0xff]  ;;  %2121 = vmatpush.bf16.msra.mxu1 %v4358_v53 }
  0x96   : > { %v999_v44 = vor.u32 %v998_v6, %v994_v28  ;;  %v1745_v55 = vrot.slane %v1496_v36, 1  ;;  %v1779_v2 = vsel %vm1169_vm9, %v1777_v41, %v1778_v42  ;;  %v1559_v25 = vshll.u32 %v3687_v34, 16  ;;  %1963 = vmatpush.bf16.msra.mxu0 %v3701_v24  ;;  %3730 = vmatpush.bf16.msra.mxu3 %v3701_v24  ;;  %v3699_v28 = vld [vmem:[%s5264_s1 + $0x30] sm:$0xff]  ;;  %v251_v24 = vld [vmem:[%s3962_s23 + $0x40] sm:$0xf] }
  0x97   : > { %v1557_v61 = vshrl.u32 %v3687_v34, 16  ;;  %v1564_v62 = vshll.u32 %v1496_v36, 16  ;;  %v454_v63 = vshrl.u32 %v4346_v48, 16  ;;  %v924_v3 = vunpack.c.l.b16 %v806_v45  ;;  %v4422_v36 = vld [vmem:[%s5264_s1 + $0x78] sm:$0xff]  ;;  %v701_v45 = vld [vmem:[#allocation2 + $0x60] sm:$0xf] }
  0x98   : > { %1786 = vrot.lane.b32.xlu2 %v1743_v58, %s3828_s24  ;;  %v1561_v46 = vrot.slane %v1559_v25, 1  ;;  %v1004_v8 = vsel %vm944_vm2, %v999_v44, %v1003_v54  ;;  %v2622_v9 = vsel %vm1169_vm9, %v2620_v51, %v2621_v52  ;;  %v4394_v10 = vsel %vm1169_vm9, %v1744_v12, %v1745_v55  ;;  %v4405_v58 = vld [vmem:[#allocation2 + $0x44] sm:$0x1]  ;;  %v705_v25 = vld [vmem:[#allocation2 + $0x68] sm:$0x1] }
  0x99   : > { %1224 = vrot.lane.b32.xlu1 %v1181_v19, %s3828_s24  ;;  %v4363_v19 = vld [vmem:[%s5264_s1 + $0x88] sm:$0xff]  ;;  %v1182_v11 = vrot.slane %v4289_v29, 1  ;;  %v1566_v50 = vrot.slane %v1564_v62, 1  ;;  %v1183_v5 = vrot.slane %v4307_v14, 1  ;;  %v1481_v18 = vunpack.c.l.b16 %v4366_v37  ;;  %2122 = vmatpush.bf16.msra.mxu1 %v4382_v4  ;;  %v252_v12 = vld [vmem:[%s3962_s23 + $0x44] sm:$0xf] }
  0x9a   : > { %2835 = vmatpush.bf16.msra.mxu2 %v4363_v19  ;;  %v1562_v16 = vor.u32 %v1561_v46, %v1557_v61  ;;  %v1252_v57 = vsel %vm1250_vm10, %v3774_v20, %v1138_v15  ;;  %1964 = vmatpush.bf16.msra.mxu0 %v3700_v60  ;;  %v446_v22 = vshrl.u32 %v249_v0, 16  ;;  %v4401_v40 = vpack.c.b16 %v924_v3, %v924_v3  ;;  %v4409_v23 = vld [vmem:[#allocation2 + $0x54] sm:$0xff]  ;;  %v4444_v46 = vld [vmem:[#allocation2 + $0x3c] sm:$0xff]  ;;  %v809_v15 = vld [vmem:[#allocation2 + $0xa4] sm:$0x1] }
  0x9b   : > { %v3510_v13 = vld [vmem:[#allocation2 + $0x5c] sm:$0x1]  ;;  %v1206_v21 = vrot.slane %v4368_v56, 1  ;;  %v1571_v29 = vshll.u32 %v4370_v59, 16  ;;  %v456_v14 = vrot.slane %v454_v63, 7  ;;  %v449_v6 = vshll.u32 %v249_v0, 16  ;;  %3731 = vmatpush.bf16.msra.mxu3 %v3700_v60 }
  0x9c   : > { %1706 = vrot.lane.b32.xlu0 %v1555_v7, %s3827_s19  ;;  %v4387_v7 = vld [vmem:[%s5264_s1 + $0x80] sm:$0xff]  ;;  %v2357_v26 = vunpack.c.l.b16 %v3510_v13  ;;  %v1567_v31 = vsel %vm944_vm2, %v1562_v16, %v1566_v50  ;;  %v1285_v1 = vsel %vm1283_vm11, %v1252_v57, %v1219_v27  ;;  %v1092_v32 = vshll.u32 %v4368_v56, 16  ;;  %v4442_v62 = vld [vmem:[%s5264_s1 + $0x70] sm:$0xff] }
  0x9d   : > { %v1184_v34 = vsel %vm1169_vm9, %v1182_v11, %v1183_v5  ;;  %3477 = vmatmul.msk.bf16.vlgmr.msra.gmra.mxu1 %vm1925_vm12, %v1285_v1  ;;  %v1090_v41 = vshrl.u32 %v4368_v56, 16  ;;  %v1097_v42 = vshll.u32 %v4401_v40, 16  ;;  %v457_v44 = vshll.u32 %v4346_v48, 16 }
  0x9e   : > { %2836 = vmatpush.bf16.msra.mxu2 %v4387_v7  ;;  %1965 = vmatpush.bf16.msra.mxu0 %v3699_v28  ;;  %v1569_v54 = vshrl.u32 %v4370_v59, 16  ;;  %v917_v51 = vunpack.c.l.b16 %v4405_v58  ;;  %v1094_v52 = vrot.slane %v1092_v32, 1  ;;  %v4434_v55 = vpack.c.b16 %v2357_v26, %v2357_v26  ;;  %v708_v26 = vld [vmem:[#allocation2 + $0x6c] sm:$0xf] }
  0x9f   : > { %v1099_v61 = vrot.slane %v1097_v42, 1  ;;  %v459_v63 = vor.u32 %v457_v44, %v456_v14  ;;  %v461_v3 = vrot.slane %v456_v14, 4  ;;  %3732 = vmatpush.bf16.msra.mxu3 %v3699_v28  ;;  %v471_v11 = vshrl.u32 %v252_v12, 16  ;;  %v4477_v44 = vld [vmem:[%s5264_s1 + $0x60] sm:$0xff] }
  0xa0   : > { %1810 = vrot.lane.b32.xlu2 %v1779_v2, %s3828_s24  ;;  %v2447_v2 = vshll.u32 %v4409_v23, 16  ;;  %v1095_v60 = vor.u32 %v1094_v52, %v1090_v41  ;;  %v2445_v13 = vshrl.u32 %v4409_v23, 16  ;;  %v474_v5 = vshll.u32 %v252_v12, 16 }
  0xa1   : > { %2584 = vrot.lane.b32.xlu1 %v2443_v33, %s3827_s19  ;;  %v448_v33 = vrot.slane %v446_v22, 7  ;;  %v706_v50 = vsel %vm4002_vm6, %v461_v3, %v705_v25  ;;  %v2452_v20 = vshll.u32 %v4434_v55, 16  ;;  %v473_v57 = vrot.slane %v471_v11, 7 }
  0xa2   : > { %2837 = vmatpush.bf16.msra.mxu2 %v4422_v36  ;;  %v1207_v22 = vrot.slane %v4401_v40, 1  ;;  %v1573_v58 = vrot.slane %v1571_v29, 1  ;;  %v1100_v14 = vsel %vm944_vm2, %v1095_v60, %v1099_v61  ;;  %707 = vst [vmem:[#allocation2 + $0x68] sm:$0x1] %v706_v50  ;;  %v933_v29 = vpack.c.b16 %v917_v51, %v917_v51  ;;  %v4486_v51 = vld [vmem:[#allocation2 + $0x9c] sm:$0xff] }
  0xa3   : > { %v451_v48 = vor.u32 %v449_v6, %v448_v33  ;;  %v452_v37 = vrot.slane %v448_v33, 4  ;;  %3733 = vmatpush.bf16.msrb.mxu3 %v4268_v35  ;;  %v476_v6 = vor.u32 %v474_v5, %v473_v57  ;;  %v1008_v1 = vshll.u32 %v4444_v46, 16  ;;  %v712_v33 = vld [vmem:[#allocation2 + $0x74] sm:$0x1]  ;;  %v3309_v50 = vld [vmem:[#allocation2 + $0x5c] sm:$0x1] }
  0xa4   : > { %1730 = vrot.lane.b32.xlu0 %v1699_v49, %s3827_s19  ;;  %v4428_v49 = vpack.c.b16 %v1481_v18, %v1481_v18  ;;  %v2449_v18 = vrot.slane %v2447_v2, 1  ;;  %v925_v32 = vunpack.c.l.b16 %v809_v15  ;;  %v2454_v42 = vrot.slane %v2452_v20, 1  ;;  %v788_v20 = vld [vmem:[#allocation2 + $0x50] sm:$0x1] }
  0xa5   : > { %v702_v0 = vsel %vm4018_vm8, %v451_v48, %v701_v45  ;;  %v460_v16 = vsel %vm4010_vm7, %v452_v37, %v459_v63  ;;  %v1208_v45 = vsel %vm1169_vm9, %v1206_v21, %v1207_v22  ;;  %v2623_v52 = vrot.slane %v4409_v23, 1 }
  0xa6   : > { %703 = vst [vmem:[#allocation2 + $0x60] sm:$0xf] %v702_v0  ;;  %2838 = vmatpush.bf16.msra.mxu2 %v4442_v62  ;;  %v1576_v40 = vshll.u32 %v4428_v49, 16  ;;  %v2450_v41 = vor.u32 %v2449_v18, %v2445_v13  ;;  %v1574_v56 = vor.u32 %v1573_v58, %v1569_v54  ;;  %v1006_v48 = vshrl.u32 %v4444_v46, 16  ;;  %v4522_v58 = vld [vmem:[#allocation2 + $0x54] sm:$0xff] }
  0xa7   : > { %704 = vst.msk [vmem:[#allocation2 + $0x64] sm:$0xf] %vm267_vm0, %v460_v16  ;;  %3734 = vmatpush.bf16.msrb.mxu3 %v4294_v39  ;;  %v1013_v37 = vshll.u32 %v933_v29, 16  ;;  %v4501_v25 = vpack.c.b16 %v925_v32, %v925_v32  ;;  %v1104_v60 = vshll.u32 %v4486_v51, 16  ;;  %v1102_v0 = vshrl.u32 %v4486_v51, 16 }
  0xa8   : > { %1708 = vrot.lane.b32.xlu2 %v1567_v31, %s3827_s19  ;;  %v478_v31 = vrot.slane %v473_v57, 4  ;;  %v1578_v21 = vrot.slane %v1576_v40, 1  ;;  %v2455_v23 = vsel %vm944_vm2, %v2450_v41, %v2454_v42  ;;  %v1185_v13 = vrot.slane %v4444_v46, 1  ;;  %v254_v32 = vld [vmem:[%s3962_s23 + $0x4c] sm:$0xf] }
  0xa9   : > { %1145 = vrot.lane.b32.xlu1 %v1004_v8, %s3827_s19  ;;  %v463_v8 = vshrl.u32 %v251_v24, 16  ;;  %v3513_v61 = vld [vmem:[#allocation2 + $0x68] sm:$0x1]  ;;  %v1015_v3 = vrot.slane %v1013_v37, 1  ;;  %v1186_v15 = vrot.slane %v933_v29, 1  ;;  %v1747_v22 = vrot.slane %v4370_v59, 1 }
  0xaa   : > { %v713_v2 = vsel %vm4002_vm6, %v478_v31, %v712_v33  ;;  %v1579_v54 = vsel %vm944_vm2, %v1574_v56, %v1578_v21  ;;  %v2358_v11 = vunpack.c.l.b16 %v3513_v61  ;;  %v1583_v29 = vshll.u32 %v4522_v58, 16  ;;  %v4536_v41 = vld [vmem:[#allocation2 + $0x48] sm:$0xff] }
  0xab   : > { %v465_v35 = vrot.slane %v463_v8, 7  ;;  %3735 = vmatpush.bf16.msrb.mxu3 %v4318_v17  ;;  %714 = vst [vmem:[#allocation2 + $0x74] sm:$0x1] %v713_v2  ;;  %v1109_v8 = vshll.u32 %v4501_v25, 16  ;;  %v1581_v56 = vshrl.u32 %v4522_v58, 16  ;;  %v491_v61 = vshll.u32 %v254_v32, 16 }
  0xac   : > { %2664 = vrot.lane.b32.xlu0 %v2622_v9, %s3828_s24  ;;  %v466_v9 = vshll.u32 %v251_v24, 16  ;;  %v2624_v24 = vrot.slane %v4434_v55, 1  ;;  %v1010_v55 = vrot.slane %v1008_v1, 1  ;;  %v2374_v46 = vpack.c.b16 %v2358_v11, %v2358_v11 }
  0xad   : > { %v469_v28 = vrot.slane %v465_v35, 4  ;;  %v1111_v18 = vrot.slane %v1109_v8, 1 }
  0xae   : > { %v468_v27 = vor.u32 %v466_v9, %v465_v35  ;;  %v2625_v17 = vsel %vm1169_vm9, %v2623_v52, %v2624_v24  ;;  %v1011_v63 = vor.u32 %v1010_v55, %v1006_v48  ;;  %v1106_v9 = vrot.slane %v1104_v60, 1  ;;  %v4513_v16 = vld [vmem:[#allocation2 + $0x60] sm:$0xff] }
  0xaf   : > { %v477_v39 = vsel %vm4010_vm7, %v469_v28, %v476_v6  ;;  %3736 = vmatpush.bf16.msrb.mxu3 %v4337_v30  ;;  %v2459_v35 = vshll.u32 %v4513_v16, 16  ;;  %v918_v6 = vunpack.c.l.b16 %v788_v20  ;;  %v2464_v31 = vshll.u32 %v2374_v46, 16 }
  0xb0   : > { %1161 = vrot.lane.b32.xlu2 %v1100_v14, %s3827_s19  ;;  %711 = vst.msk [vmem:[#allocation2 + $0x70] sm:$0xf] %vm267_vm0, %v477_v39  ;;  %v1016_v5 = vsel %vm944_vm2, %v1011_v63, %v1015_v3  ;;  %v1107_v57 = vor.u32 %v1106_v9, %v1102_v0  ;;  %v1187_v14 = vsel %vm1169_vm9, %v1185_v13, %v1186_v15  ;;  %v253_v39 = vld [vmem:[%s3962_s23 + $0x48] sm:$0xf]  ;;  %v1209_v52 = vrot.slane %v4486_v51, 1  ;;  %v3775_v0 = vld [vmem:[#allocation2 + $0xc] sm:$0xff] }
  0xb1   : > { %1788 = vrot.lane.b32.xlu1 %v4394_v10, %s3828_s24  ;;  %v4466_v10 = vld [vmem:[%s5264_s1 + $0x68] sm:$0xff]  ;;  %v2461_v28 = vrot.slane %v2459_v35, 1  ;;  %v2466_v1 = vrot.slane %v2464_v31, 1  ;;  %v1210_v24 = vrot.slane %v4501_v25, 1  ;;  %v934_v2 = vpack.c.b16 %v918_v6, %v918_v6 }
  0xb2   : > { %2839 = vmatpush.bf16.msra.mxu2 %v4466_v10  ;;  %v4490_v12 = vpop.permute.xlu2 %1780  ;;  %v1112_v40 = vsel %vm944_vm2, %v1107_v57, %v1111_v18  ;;  %v3516_v21 = vld [vmem:[#allocation2 + $0x74] sm:$0x1]  ;;  %v1020_v48 = vshll.u32 %v4536_v41, 16  ;;  %v2627_v37 = vrot.slane %v2374_v46, 1  ;;  %v1585_v60 = vrot.slane %v1583_v29, 1 }
  0xb3   : > { %3737 = vmatpush.bf16.msrb.mxu3 %v4358_v53  ;;  %v1748_v53 = vrot.slane %v4428_v49, 1  ;;  %v1188_v51 = vrot.slane %v4536_v41, 1  ;;  %v1018_v63 = vshrl.u32 %v4536_v41, 16  ;;  %v483_v3 = vshll.u32 %v253_v39, 16 }
  0xb4   : > { %1226 = vrot.lane.b32.xlu0 %v1184_v34, %s3828_s24  ;;  %v709_v34 = vsel %vm4018_vm8, %v468_v27, %v708_v26  ;;  %v1482_v26 = vunpack.c.l.b16 %v3309_v50  ;;  %v2457_v27 = vshrl.u32 %v4513_v16, 16  ;;  %v2359_v11 = vunpack.c.l.b16 %v3516_v21 }
  0xb5   : > { %710 = vst [vmem:[#allocation2 + $0x6c] sm:$0xf] %v709_v34  ;;  %v1749_v33 = vsel %vm1169_vm9, %v1747_v22, %v1748_v53  ;;  %v488_v34 = vshrl.u32 %v254_v32, 16  ;;  %v1022_v13 = vrot.slane %v1020_v48, 1  ;;  %v1025_v15 = vshll.u32 %v934_v2, 16 }
  0xb6   : > { %2840 = vmatpush.bf16.msra.mxu2 %v4477_v44  ;;  %v2462_v49 = vor.u32 %v2461_v28, %v2457_v27  ;;  %v1189_v50 = vrot.slane %v934_v2, 1  ;;  %v1586_v22 = vor.u32 %v1585_v60, %v1581_v56  ;;  %v715_v53 = vld [vmem:[#allocation2 + $0x78] sm:$0xf]  ;;  %v4567_v29 = vpack.c.b16 %v2359_v11, %v2359_v11 }
  0xb7   : > { %3738 = vmatpush.bf16.msrb.mxu3 %v4382_v4  ;;  %v4538_v4 = vpack.c.b16 %v1482_v26, %v1482_v26  ;;  %v490_v55 = vrot.slane %v488_v34, 7  ;;  %v1023_v46 = vor.u32 %v1022_v13, %v1018_v63  ;;  %v719_v26 = vld [vmem:[#allocation2 + $0x80] sm:$0x1] }
  0xb8   : > { %2666 = vrot.lane.b32.xlu2 %v2625_v17, %s3828_s24  ;;  %v2467_v17 = vsel %vm944_vm2, %v2462_v49, %v2466_v1  ;;  %v4570_v1 = vld [vmem:[#allocation2 + $0xa8] sm:$0xff]  ;;  %v1190_v48 = vsel %vm1169_vm9, %v1188_v51, %v1189_v50 }
  0xb9   : > { %1242 = vrot.lane.b32.xlu1 %v1208_v45, %s3828_s24  ;;  %v2626_v45 = vrot.slane %v4513_v16, 1  ;;  %v1588_v25 = vshll.u32 %v4538_v4, 16  ;;  %v493_v20 = vor.u32 %v491_v61, %v490_v55  ;;  %v495_v31 = vrot.slane %v490_v55, 4  ;;  %v4586_v55 = vld [vmem:[#allocation2 + $0x54] sm:$0xff] }
  0xba   : > { %v4515_v30 = vpop.permute.xlu2 %1804  ;;  %v1114_v50 = vshrl.u32 %v4570_v1, 16  ;;  %v1212_v38 = vrot.slane %v4570_v1, 1 }
  0xbb   : > { %v2628_v57 = vsel %vm1169_vm9, %v2626_v45, %v2627_v37  ;;  %v720_v34 = vsel %vm4002_vm6, %v495_v31, %v719_v26  ;;  %v255_v45 = vld [vmem:[%s3962_s23 + $0x50] sm:$0xf] }
  0xbc   : > { %2586 = vrot.lane.b32.xlu0 %v2455_v23, %s3827_s19  ;;  %v480_v23 = vshrl.u32 %v253_v39, 16  ;;  %v4555_v9 = vld [vmem:[#allocation2 + $0x6c] sm:$0xff]  ;;  %v497_v56 = vshrl.u32 %v255_v45, 16  ;;  %721 = vst [vmem:[#allocation2 + $0x80] sm:$0x1] %v720_v34  ;;  %v500_v11 = vshll.u32 %v255_v45, 16 }
  0xbd   : > { %v2471_v49 = vshll.u32 %v4555_v9, 16  ;;  %v2469_v37 = vshrl.u32 %v4555_v9, 16  ;;  %v1030_v34 = vshrl.u32 %v4586_v55, 16 }
  0xbe   : > { %v482_v18 = vrot.slane %v480_v23, 7  ;;  %v499_v63 = vrot.slane %v497_v56, 7  ;;  %v3777_v56 = vld [vmem:[#allocation2 + $0x9c] sm:$0xff] }
  0xc0   : > { %1228 = vrot.lane.b32.xlu2 %v1187_v14, %s3828_s24  ;;  %v1027_v14 = vrot.slane %v1025_v15, 1  ;;  %v485_v28 = vor.u32 %v483_v3, %v482_v18  ;;  %v486_v6 = vrot.slane %v482_v18, 4  ;;  %v3776_v15 = vld [vmem:[#allocation2 + $0x18] sm:$0xff] }
  0xc1   : > { %1710 = vrot.lane.b32.xlu1 %v1579_v54, %s3827_s19 }
  0xc2   : > { %v4540_v42 = vpop.permute.xlu2 %1702  ;;  %v494_v41 = vsel %vm4010_vm7, %v486_v6, %v493_v20  ;;  %v716_v39 = vsel %vm4018_vm8, %v485_v28, %v715_v53  ;;  %v1028_v2 = vsel %vm944_vm2, %v1023_v46, %v1027_v14  ;;  %v503_v20 = vrot.slane %v499_v63, 4 }
  0xc3   : > { %717 = vst [vmem:[#allocation2 + $0x78] sm:$0xf] %v716_v39 }
  0xc4   : > { %1147 = vrot.lane.b32.xlu0 %v1016_v5, %s3827_s19  ;;  %v812_v5 = vld [vmem:[#allocation2 + $0xb0] sm:$0x1]  ;;  %718 = vst.msk [vmem:[#allocation2 + $0x7c] sm:$0xf] %vm267_vm0, %v494_v41 }
  0xc5   : > { %v926_v32 = vunpack.c.l.b16 %v812_v5  ;;  %v1032_v5 = vshll.u32 %v4586_v55, 16 }
  0xc6   : > { %v4530_v59 = vpop.permute.xlu0 %2656 }
  0xc7   : > { %v4591_v60 = vpack.c.b16 %v926_v32, %v926_v32  ;;  %v3312_v32 = vld [vmem:[#allocation2 + $0x68] sm:$0x1]  ;;  %v1034_v45 = vrot.slane %v1032_v5, 1  ;;  %v2630_v5 = vrot.slane %v4567_v29, 1 }
  0xc8   : > { %2588 = vrot.lane.b32.xlu2 %v2467_v17, %s3827_s19  ;;  %v1116_v17 = vshll.u32 %v4570_v1, 16 }
  0xc9   : > { %1163 = vrot.lane.b32.xlu1 %v1112_v40, %s3827_s19  ;;  %v1211_v40 = vsel %vm1169_vm9, %v1209_v52, %v1210_v24  ;;  %v791_v24 = vld [vmem:[#allocation2 + $0x5c] sm:$0x1]  ;;  %v1121_v26 = vshll.u32 %v4591_v60, 16 }
  0xca   : > { %v4564_v27 = vpop.permute.xlu2 %1726  ;;  %v919_v51 = vunpack.c.l.b16 %v791_v24  ;;  %v1118_v46 = vrot.slane %v1116_v17, 1  ;;  %v1483_v24 = vunpack.c.l.b16 %v3312_v32  ;;  %v3781_v32 = vld [vmem:[#allocation2 + $0xa8] sm:$0xff] }
  0xcb   : > { %v1701_v54 = vpop.permute.xlu1 %1700  ;;  %v1123_v39 = vrot.slane %v1121_v26, 1 }
  0xcc   : > { %v1813_v8 = vsel %vm1250_vm10, %v3775_v0, %v1701_v54  ;;  %1790 = vrot.lane.b32.xlu0 %v1749_v33, %s3828_s24  ;;  %v256_v33 = vld [vmem:[%s3962_s23 + $0x54] sm:$0xf]  ;;  %v2473_v54 = vrot.slane %v2471_v49, 1  ;;  %v1750_v0 = vrot.slane %v4522_v58, 1  ;;  %v502_v58 = vor.u32 %v500_v11, %v499_v63 }
  0xcd   : > { %v1845_v16 = vsel %vm1283_vm11, %v1813_v8, %v4490_v12  ;;  %v1590_v12 = vrot.slane %v1588_v25, 1  ;;  %v505_v52 = vshrl.u32 %v256_v33, 16  ;;  %v2476_v25 = vshll.u32 %v4567_v29, 16 }
  0xce   : > { %3437 = vmatmul.msk.bf16.vlgmr.msra.gmra.mxu0 %vm1925_vm12, %v1845_v16  ;;  %v4561_v35 = vpop.permute.xlu0 %2658  ;;  %v1751_v8 = vrot.slane %v4538_v4, 1  ;;  %v508_v13 = vshll.u32 %v256_v33, 16  ;;  %v726_v4 = vld [vmem:[#allocation2 + $0x8c] sm:$0x1]  ;;  %v2474_v53 = vor.u32 %v2473_v54, %v2469_v37  ;;  %v1119_v41 = vor.u32 %v1118_v46, %v1114_v50 }
  0xcf   : > { %v1591_v23 = vsel %vm944_vm2, %v1586_v22, %v1590_v12  ;;  %v507_v61 = vrot.slane %v505_v52, 7  ;;  %v4608_v12 = vpack.c.b16 %v919_v51, %v919_v51  ;;  %v2478_v6 = vrot.slane %v2476_v25, 1 }
  0xd0   : > { %1149 = vrot.lane.b32.xlu2 %v1028_v2, %s3827_s19  ;;  %v1752_v31 = vsel %vm1169_vm9, %v1750_v0, %v1751_v8  ;;  %v1213_v2 = vrot.slane %v4591_v60, 1  ;;  %v1124_v60 = vsel %vm944_vm2, %v1119_v41, %v1123_v39  ;;  %v1035_v51 = vor.u32 %v1034_v45, %v1030_v34  ;;  %v815_v0 = vld [vmem:[#allocation2 + $0xbc] sm:$0x1] }
  0xd1   : > { %2668 = vrot.lane.b32.xlu1 %v2628_v57, %s3828_s24  ;;  %v722_v57 = vld [vmem:[#allocation2 + $0x84] sm:$0xf]  ;;  %v510_v14 = vor.u32 %v508_v13, %v507_v61  ;;  %v512_v28 = vrot.slane %v507_v61, 4  ;;  %v1037_v43 = vshll.u32 %v4608_v12, 16  ;;  %v2479_v52 = vsel %vm944_vm2, %v2474_v53, %v2478_v6  ;;  %v3778_v61 = vld [vmem:[#allocation2 + $0x18] sm:$0xff] }
  0xd2   : > { %v4601_v18 = vpop.permute.xlu2 %2660  ;;  %v1815_v54 = vsel %vm1250_vm10, %v3778_v61, %v4540_v42  ;;  %v1214_v8 = vsel %vm1169_vm9, %v1212_v38, %v1213_v2  ;;  %v2629_v11 = vrot.slane %v4555_v9, 1  ;;  %v927_v9 = vunpack.c.l.b16 %v815_v0  ;;  %v4653_v53 = vld [vmem:[#allocation2 + $0xb4] sm:$0xff] }
  0xd3   : > { %v4582_v21 = vpop.permute.xlu1 %2578  ;;  %v727_v33 = vsel %vm4002_vm6, %v512_v28, %v726_v4  ;;  %v1039_v63 = vrot.slane %v1037_v43, 1  ;;  %v1191_v41 = vrot.slane %v4586_v55, 1  ;;  %v1192_v45 = vrot.slane %v4608_v12, 1 }
  0xd4   : > { %1244 = vrot.lane.b32.xlu0 %v1211_v40, %s3828_s24  ;;  %v723_v40 = vsel %vm4018_vm8, %v502_v58, %v722_v57  ;;  %728 = vst [vmem:[#allocation2 + $0x8c] sm:$0x1] %v727_v33  ;;  %v3780_v57 = vld [vmem:[#allocation2 + $0x24] sm:$0xff]  ;;  %v3519_v58 = vld [vmem:[#allocation2 + $0x80] sm:$0x1]  ;;  %v2631_v28 = vsel %vm1169_vm9, %v2629_v11, %v2630_v5  ;;  %v1839_v33 = vsel %vm1250_vm10, %v3781_v32, %v4564_v27  ;;  %v1126_v43 = vshrl.u32 %v4653_v53, 16 }
  0xd5   : > { %724 = vst [vmem:[#allocation2 + $0x84] sm:$0xf] %v723_v40  ;;  %v1040_v46 = vsel %vm944_vm2, %v1035_v51, %v1039_v63  ;;  %v3315_v40 = vld [vmem:[#allocation2 + $0x74] sm:$0x1] }
  0xd6   : > { %v2577_v3 = vpop.permute.xlu0 %2576  ;;  %v1484_v38 = vunpack.c.l.b16 %v3315_v40 }
  0xd7   : > { %v2689_v16 = vsel %vm1250_vm10, %v3776_v15, %v2577_v3  ;;  %v1499_v3 = vpack.c.b16 %v1483_v24, %v1483_v24  ;;  %v3779_v15 = vld [vmem:[#allocation2 + $0xc] sm:$0xff] }
  0xd8   : > { %v2721_v22 = vsel %vm1283_vm11, %v2689_v16, %v4530_v59  ;;  %v511_v59 = vsel %vm4010_vm7, %v503_v20, %v510_v14  ;;  %1792 = vrot.lane.b32.xlu2 %v1752_v31, %s3828_s24  ;;  %v4664_v31 = vld [vmem:[#allocation2 + $0x78] sm:$0xff]  ;;  %v4675_v24 = vld [vmem:[#allocation2 + $0x6c] sm:$0xff]  ;;  %v4688_v63 = vpack.c.b16 %v1484_v38, %v1484_v38 }
  0xd9   : > { %1230 = vrot.lane.b32.xlu1 %v1190_v48, %s3828_s24  ;;  %3641 = vmatmul.msk.bf16.vlgmr.msra.gmra.mxu2 %vm1925_vm12, %v2721_v22  ;;  %725 = vst.msk [vmem:[#allocation2 + $0x88] sm:$0xf] %vm267_vm0, %v511_v59  ;;  %v1600_v20 = vshll.u32 %v1499_v3, 16  ;;  %v2360_v59 = vunpack.c.l.b16 %v3519_v58  ;;  %v2483_v2 = vshll.u32 %v4664_v31, 16  ;;  %v2481_v0 = vshrl.u32 %v4664_v31, 16 }
  0xda   : > { %v4628_v37 = vpop.permute.xlu2 %1222 }
  0xdb   : > { %v1140_v49 = vpop.permute.xlu1 %1139  ;;  %v1602_v4 = vrot.slane %v1600_v20, 1  ;;  %v4677_v27 = vpack.c.b16 %v2360_v59, %v2360_v59  ;;  %v1612_v20 = vshll.u32 %v4688_v63, 16 }
  0xdc   : > { %1712 = vrot.lane.b32.xlu0 %v1591_v23, %s3827_s19  ;;  %v4626_v23 = vld [vmem:[#allocation2 + $0x60] sm:$0xff]  ;;  %v1254_v16 = vsel %vm1250_vm10, %v3779_v15, %v1140_v49  ;;  %v1128_v49 = vshll.u32 %v4653_v53, 16  ;;  %v3522_v15 = vld [vmem:[#allocation2 + $0x8c] sm:$0x1] }
  0xdd   : > { %v1595_v25 = vshll.u32 %v4626_v23, 16  ;;  %v1593_v13 = vshrl.u32 %v4626_v23, 16  ;;  %v1753_v6 = vrot.slane %v4626_v23, 1 }
  0xde   : > { %v1725_v47 = vpop.permute.xlu0 %1724 }
  0xdf   : > { %v1837_v48 = vsel %vm1250_vm10, %v3777_v56, %v1725_v47  ;;  %v1597_v42 = vrot.slane %v1595_v25, 1  ;;  %v1130_v47 = vrot.slane %v1128_v49, 1  ;;  %v1215_v25 = vrot.slane %v4653_v53, 1 }
  0xe0   : > { %v1869_v17 = vsel %vm1283_vm11, %v1837_v48, %v4515_v30  ;;  %1246 = vrot.lane.b32.xlu2 %v1214_v8, %s3828_s24  ;;  %v794_v48 = vld [vmem:[#allocation2 + $0x68] sm:$0x1]  ;;  %v2485_v8 = vrot.slane %v2483_v2, 1  ;;  %v1614_v49 = vrot.slane %v1612_v20, 1  ;;  %v3785_v20 = vld [vmem:[#allocation2 + $0xb4] sm:$0xff] }
  0xe1   : > { %2590 = vrot.lane.b32.xlu1 %v2479_v52, %s3827_s19  ;;  %3449 = vmatmul.msk.bf16.vlgmr.msra.gmra.mxu3 %vm1925_vm12, %v1869_v17  ;;  %v1598_v14 = vor.u32 %v1597_v42, %v1593_v13  ;;  %v1131_v17 = vor.u32 %v1130_v47, %v1126_v43  ;;  %v920_v11 = vunpack.c.l.b16 %v794_v48  ;;  %v3784_v47 = vld [vmem:[#allocation2 + $0x24] sm:$0xff] }
  0xe2   : > { %3739 = vmatpush.bf16.msra.mxu3 %v4363_v19  ;;  %v2691_v19 = vsel %vm1250_vm10, %v3780_v57, %v4582_v21  ;;  %v4655_v26 = vpop.permute.xlu2 %2582  ;;  %v2486_v57 = vor.u32 %v2485_v8, %v2481_v0 }
  0xe3   : > { %v1783_v30 = vpop.permute.xlu1 %1782  ;;  %v2723_v21 = vsel %vm1283_vm11, %v2691_v19, %v4561_v35  ;;  %v1754_v35 = vrot.slane %v1499_v3, 1  ;;  %v1603_v39 = vsel %vm944_vm2, %v1598_v14, %v1602_v4  ;;  %v1607_v3 = vshll.u32 %v4675_v24, 16  ;;  %v4706_v14 = vld [vmem:[#allocation2 + $0x84] sm:$0xff] }
  0xe4   : > { %v1847_v50 = vsel %vm1283_vm11, %v1815_v54, %v1783_v30  ;;  %1165 = vrot.lane.b32.xlu0 %v1124_v60, %s3827_s19  ;;  %v1193_v54 = vsel %vm1169_vm9, %v1191_v41, %v1192_v45  ;;  %v4695_v30 = vld [vmem:[#allocation2 + $0x60] sm:$0xff]  ;;  %v2361_v4 = vunpack.c.l.b16 %v3522_v15  ;;  %v2493_v2 = vshrl.u32 %v4706_v14, 16 }
  0xe5   : > { %3438 = vmatmul.msk.bf16.gmra.mxu0 %vm1925_vm12, %v1847_v50  ;;  %v1605_v50 = vshrl.u32 %v4675_v24, 16  ;;  %v1609_v5 = vrot.slane %v1607_v3, 1  ;;  %v1042_v32 = vshrl.u32 %v4695_v30, 16 }
  0xe6   : > { %v1221_v22 = vpop.permute.xlu0 %1220  ;;  %3740 = vmatpush.bf16.msra.mxu3 %v4387_v7  ;;  %v943_v7 = vpack.c.b16 %v927_v9, %v927_v9  ;;  %v936_v9 = vpack.c.b16 %v920_v11, %v920_v11 }
  0xe7   : > { %v1287_v29 = vsel %vm1283_vm11, %v1254_v16, %v1221_v22  ;;  %v1044_v22 = vshll.u32 %v4695_v30, 16  ;;  %v1610_v40 = vor.u32 %v1609_v5, %v1605_v50 }
  0xe8   : > { %3478 = vmatmul.msk.bf16.gmra.mxu1 %vm1925_vm12, %v1287_v29  ;;  %v1133_v52 = vshll.u32 %v943_v7, 16  ;;  %1714 = vrot.lane.b32.xlu2 %v1603_v39, %s3827_s19  ;;  %v1216_v51 = vrot.slane %v943_v7, 1  ;;  %v2632_v29 = vrot.slane %v4664_v31, 1  ;;  %v1049_v41 = vshll.u32 %v936_v9, 16 }
  0xe9   : > { %1151 = vrot.lane.b32.xlu1 %v1040_v46, %s3827_s19  ;;  %3642 = vmatmul.msk.bf16.gmra.mxu2 %vm1925_vm12, %v2723_v21  ;;  %v3782_v46 = vld [vmem:[#allocation2 + $0x30] sm:$0xff]  ;;  %v2633_v21 = vrot.slane %v4677_v27, 1  ;;  %v4723_v39 = vpack.c.b16 %v2361_v4, %v2361_v4 }
  0xea   : > { %3741 = vmatpush.bf16.msra.mxu3 %v4422_v36  ;;  %v1755_v36 = vsel %vm1169_vm9, %v1753_v6, %v1754_v35  ;;  %v1135_v61 = vrot.slane %v1133_v52, 1  ;;  %v4685_v60 = vpop.permute.xlu2 %1143  ;;  %v1217_v16 = vsel %vm1169_vm9, %v1215_v25, %v1216_v51  ;;  %v1046_v35 = vrot.slane %v1044_v22, 1  ;;  %v4735_v25 = vld [vmem:[#allocation2 + $0xa8] sm:$0xff] }
  0xeb   : > { %v1807_v34 = vpop.permute.xlu1 %1806  ;;  %v2634_v45 = vsel %vm1169_vm9, %v2632_v29, %v2633_v21  ;;  %v2500_v48 = vshll.u32 %v4723_v39, 16  ;;  %v2531_v8 = vshll.u32 %v4735_v25, 16  ;;  %v1756_v22 = vrot.slane %v4675_v24, 1 }
  0xec   : > { %2670 = vrot.lane.b32.xlu0 %v2631_v28, %s3828_s24  ;;  %v1871_v12 = vsel %vm1283_vm11, %v1839_v33, %v1807_v34  ;;  %v1136_v13 = vsel %vm944_vm2, %v1131_v17, %v1135_v61  ;;  %v3783_v28 = vld [vmem:[#allocation2 + $0x18] sm:$0xff]  ;;  %v3531_v34 = vld [vmem:[#allocation2 + $0xb0] sm:$0x1]  ;;  %v1047_v38 = vor.u32 %v1046_v35, %v1042_v32  ;;  %v1194_v17 = vrot.slane %v4695_v30, 1  ;;  %v3787_v32 = vld [vmem:[#allocation2 + $0x24] sm:$0xff] }
  0xed   : > { %v1195_v61 = vrot.slane %v936_v9, 1  ;;  %v2502_v11 = vrot.slane %v2500_v48, 1  ;;  %v2533_v50 = vrot.slane %v2531_v8, 1  ;;  %v2636_v48 = vrot.slane %v4723_v39, 1  ;;  %v3788_v8 = vld [vmem:[#allocation2 + $0x30] sm:$0xff] }
  0xee   : > { %v2581_v56 = vpop.permute.xlu0 %2580  ;;  %3742 = vmatpush.bf16.msra.mxu3 %v4442_v62  ;;  %v2488_v62 = vshll.u32 %v4677_v27, 16  ;;  %v1051_v27 = vrot.slane %v1049_v41, 1  ;;  %v3534_v41 = vld [vmem:[#allocation2 + $0xbc] sm:$0x1] }
  0xf0   : > { %v2490_v19 = vrot.slane %v2488_v62, 1  ;;  %1167 = vrot.lane.b32.xlu2 %v1136_v13, %s3827_s19  ;;  %v1052_v3 = vsel %vm944_vm2, %v1047_v38, %v1051_v27  ;;  %v797_v13 = vld [vmem:[#allocation2 + $0x74] sm:$0x1] }
  0xf1   : > { %1794 = vrot.lane.b32.xlu1 %v1755_v36, %s3828_s24  ;;  %3450 = vmatmul.msk.bf16.gmra.mxu3 %vm1925_vm12, %v1871_v12 }
  0xf2   : > { %3743 = vmatpush.bf16.msra.mxu3 %v4466_v10  ;;  %v2693_v10 = vsel %vm1250_vm10, %v3782_v46, %v2581_v56  ;;  %v4712_v7 = vpop.permute.xlu2 %1786  ;;  %v2364_v56 = vunpack.c.l.b16 %v3531_v34  ;;  %v1757_v46 = vrot.slane %v4688_v63, 1  ;;  %v2644_v34 = vrot.slane %v4735_v25, 1 }
  0xf3   : > { %v1705_v42 = vpop.permute.xlu1 %1704  ;;  %v2725_v33 = vsel %vm1283_vm11, %v2693_v10, %v4601_v18  ;;  %v1615_v18 = vsel %vm944_vm2, %v1610_v40, %v1614_v49  ;;  %v921_v10 = vunpack.c.l.b16 %v797_v13  ;;  %v4757_v40 = vld [vmem:[#allocation2 + $0x78] sm:$0xff] }
  0xf4   : > { %1232 = vrot.lane.b32.xlu0 %v1193_v54, %s3828_s24  ;;  %v1817_v52 = vsel %vm1250_vm10, %v3784_v47, %v1705_v42  ;;  %v2380_v0 = vpack.c.b16 %v2364_v56, %v2364_v56  ;;  %v1196_v42 = vsel %vm1169_vm9, %v1194_v17, %v1195_v61  ;;  %v4774_v56 = vld [vmem:[#allocation2 + $0xb4] sm:$0xff] }
  0xf5   : > { %v937_v35 = vpack.c.b16 %v921_v10, %v921_v10  ;;  %v800_v10 = vld [vmem:[#allocation2 + $0x80] sm:$0x1] }
  0xf6   : > { %v1142_v58 = vpop.permute.xlu0 %1141  ;;  %3744 = vmatpush.bf16.msra.mxu3 %v4477_v44  ;;  %v2491_v44 = vsel %vm944_vm2, %v2486_v57, %v2490_v19  ;;  %v2536_v5 = vshll.u32 %v2380_v0, 16  ;;  %v3786_v19 = vld [vmem:[#allocation2 + $0x3c] sm:$0xff] }
  0xf7   : > { %v1256_v6 = vsel %vm1250_vm10, %v3783_v28, %v1142_v58  ;;  %v2695_v9 = vsel %vm1250_vm10, %v3786_v19, %v4655_v26  ;;  %v3318_v58 = vld [vmem:[#allocation2 + $0x80] sm:$0x1]  ;;  %v4755_v26 = vld [vmem:[#allocation2 + $0x6c] sm:$0xff] }
  0xf8   : > { %v1289_v59 = vsel %vm1283_vm11, %v1256_v6, %v4628_v37  ;;  %v2495_v37 = vshll.u32 %v4706_v14, 16  ;;  %2672 = vrot.lane.b32.xlu2 %v2634_v45, %s3828_s24  ;;  %v2538_v28 = vrot.slane %v2536_v5, 1  ;;  %v1485_v63 = vunpack.c.l.b16 %v3318_v58 }
  0xf9   : > { %1248 = vrot.lane.b32.xlu1 %v1217_v16, %s3828_s24  ;;  %3479 = vmatmul.msk.bf16.gmra.mxu1 %vm1925_vm12, %v1289_v59  ;;  %v2529_v16 = vshrl.u32 %v4735_v25, 16  ;;  %v2645_v45 = vrot.slane %v2380_v0, 1  ;;  %v1197_v19 = vrot.slane %v4755_v26, 1 }
  0xfa   : > { %3643 = vmatmul.msk.bf16.gmra.mxu2 %vm1925_vm12, %v2725_v33  ;;  %v2497_v12 = vrot.slane %v2495_v37, 1  ;;  %v4737_v51 = vpop.permute.xlu2 %1810  ;;  %v1258_v33 = vsel %vm1250_vm10, %v3787_v32, %v4685_v60  ;;  %v1056_v37 = vshll.u32 %v4755_v26, 16  ;;  %v1061_v60 = vshll.u32 %v937_v35, 16 }
  0xfb   : > { %v1729_v43 = vpop.permute.xlu1 %1728  ;;  %v2534_v21 = vor.u32 %v2533_v50, %v2529_v16  ;;  %v2646_v61 = vsel %vm1169_vm9, %v2644_v34, %v2645_v45  ;;  %v2543_v50 = vshll.u32 %v4774_v56, 16 }
  0xfc   : > { %2592 = vrot.lane.b32.xlu0 %v2491_v44, %s3827_s19  ;;  %v2498_v62 = vor.u32 %v2497_v12, %v2493_v2  ;;  %v1841_v57 = vsel %vm1250_vm10, %v3785_v20, %v1729_v43  ;;  %v1758_v44 = vsel %vm1169_vm9, %v1756_v22, %v1757_v46  ;;  %v1058_v38 = vrot.slane %v1056_v37, 1  ;;  %v4793_v20 = vld [vmem:[#allocation2 + $0x90] sm:$0xff] }
  0xfd   : > { %v2539_v43 = vsel %vm944_vm2, %v2534_v21, %v2538_v28  ;;  %v1501_v2 = vpack.c.b16 %v1485_v63, %v1485_v63  ;;  %v2635_v12 = vrot.slane %v4706_v14, 1  ;;  %v1063_v0 = vrot.slane %v1061_v60, 1 }
  0xfe   : > { %v1785_v36 = vpop.permute.xlu0 %1784  ;;  %v2503_v29 = vsel %vm944_vm2, %v2498_v62, %v2502_v11  ;;  %v1617_v11 = vshrl.u32 %v4757_v40, 16 }
  0xff   : > { %v1849_v54 = vsel %vm1283_vm11, %v1817_v52, %v1785_v36  ;;  %v1619_v52 = vshll.u32 %v4757_v40, 16  ;;  %v2365_v36 = vunpack.c.l.b16 %v3534_v41  ;;  %v1624_v39 = vshll.u32 %v1501_v2, 16  ;;  %v3789_v41 = vld [vmem:[#allocation2 + $0xc0] sm:$0xff] }
 0x100   : > { %3439 = vmatmul.msk.bf16.gmra.mxu0 %vm1925_vm12, %v1849_v54  ;;  %1234 = vrot.lane.b32.xlu2 %v1196_v42, %s3828_s24  ;;  %v3525_v54 = vld [vmem:[#allocation2 + $0x98] sm:$0x1]  ;;  %v2637_v5 = vsel %vm1169_vm9, %v2635_v12, %v2636_v48  ;;  %v3790_v48 = vld [vmem:[#allocation2 + $0x48] sm:$0xff] }
 0x101   : > { %1716 = vrot.lane.b32.xlu1 %v1615_v18, %s3827_s19  ;;  %v1054_v18 = vshrl.u32 %v4755_v26, 16  ;;  %v1621_v13 = vrot.slane %v1619_v52, 1  ;;  %v4787_v16 = vpack.c.b16 %v2365_v36, %v2365_v36  ;;  %v1626_v58 = vrot.slane %v1624_v39, 1 }
 0x102   : > { %v4759_v49 = vpop.permute.xlu2 %1708 }
 0x103   : > { %v2663_v15 = vpop.permute.xlu1 %2662  ;;  %v1622_v46 = vor.u32 %v1621_v13, %v1617_v11  ;;  %v2548_v21 = vshll.u32 %v4787_v16, 16 }
 0x104   : > { %1153 = vrot.lane.b32.xlu0 %v1052_v3, %s3827_s19  ;;  %v2727_v59 = vsel %vm1283_vm11, %v2695_v9, %v2663_v15  ;;  %v1059_v3 = vor.u32 %v1058_v38, %v1054_v18  ;;  %v1198_v9 = vrot.slane %v937_v35, 1  ;;  %v1760_v35 = vrot.slane %v1501_v2, 1 }
 0x105   : > { %v2550_v52 = vrot.slane %v2548_v21, 1  ;;  %v2505_v18 = vshrl.u32 %v4793_v20, 16 }
 0x106   : > { %v1809_v4 = vpop.permute.xlu0 %1808  ;;  %v1064_v22 = vsel %vm944_vm2, %v1059_v3, %v1063_v0  ;;  %v1199_v32 = vsel %vm1169_vm9, %v1197_v19, %v1198_v9  ;;  %v3791_v19 = vld [vmem:[#allocation2 + $0x3c] sm:$0xff] }
 0x107   : > { %v1873_v6 = vsel %vm1283_vm11, %v1841_v57, %v1809_v4  ;;  %v2362_v57 = vunpack.c.l.b16 %v3525_v54  ;;  %v2541_v4 = vshrl.u32 %v4774_v56, 16  ;;  %v1821_v9 = vsel %vm1250_vm10, %v3791_v19, %v4759_v49 }
 0x108   : > { %3451 = vmatmul.msk.bf16.gmra.mxu3 %vm1925_vm12, %v1873_v6  ;;  %2600 = vrot.lane.b32.xlu2 %v2539_v43, %s3827_s19  ;;  %v2507_v6 = vshll.u32 %v4793_v20, 16  ;;  %v1627_v43 = vsel %vm944_vm2, %v1622_v46, %v1626_v58 }
 0x109   : > { %2594 = vrot.lane.b32.xlu1 %v2503_v29, %s3827_s19  ;;  %v2545_v29 = vrot.slane %v2543_v50, 1  ;;  %v2378_v28 = vpack.c.b16 %v2362_v57, %v2362_v57 }
 0x10a   : > { %3644 = vmatmul.msk.bf16.gmra.mxu2 %vm1925_vm12, %v2727_v59  ;;  %v4783_v42 = vpop.permute.xlu2 %1161  ;;  %v4801_v59 = vld [vmem:[#allocation2 + $0x78] sm:$0xff]  ;;  %v2509_v38 = vrot.slane %v2507_v6, 1 }
 0x10b   : > { %v1225_v47 = vpop.permute.xlu1 %1224  ;;  %v2512_v60 = vshll.u32 %v2378_v28, 16  ;;  %v1066_v0 = vshrl.u32 %v4801_v59, 16  ;;  %v2639_v39 = vrot.slane %v2378_v28, 1 }
 0x10c   : > { %v1291_v27 = vsel %vm1283_vm11, %v1258_v33, %v1225_v47  ;;  %1796 = vrot.lane.b32.xlu0 %v1758_v44, %s3828_s24  ;;  %v922_v33 = vunpack.c.l.b16 %v800_v10  ;;  %v1759_v44 = vrot.slane %v4757_v40, 1  ;;  %v2546_v47 = vor.u32 %v2545_v29, %v2541_v4  ;;  %v3528_v4 = vld [vmem:[#allocation2 + $0xa4] sm:$0x1] }
 0x10d   : > { %3480 = vmatmul.msk.bf16.gmra.mxu1 %vm1925_vm12, %v1291_v27  ;;  %v1068_v27 = vshll.u32 %v4801_v59, 16  ;;  %v2510_v54 = vor.u32 %v2509_v38, %v2505_v18  ;;  %v2514_v3 = vrot.slane %v2512_v60, 1  ;;  %v4848_v38 = vld [vmem:[#allocation2 + $0x9c] sm:$0xff] }
 0x10e   : > { %v1707_v17 = vpop.permute.xlu0 %1706  ;;  %v4816_v2 = vpack.c.b16 %v922_v33, %v922_v33  ;;  %v1761_v36 = vsel %vm1169_vm9, %v1759_v44, %v1760_v35  ;;  %v2647_v44 = vrot.slane %v4774_v56, 1  ;;  %v2648_v35 = vrot.slane %v4787_v16, 1 }
 0x10f   : > { %v1819_v62 = vsel %vm1250_vm10, %v3788_v8, %v1707_v17  ;;  %v1070_v8 = vrot.slane %v1068_v27, 1  ;;  %v4853_v27 = vld [vmem:[#allocation2 + $0xc0] sm:$0xff] }
 0x110   : > { %v1851_v15 = vsel %vm1283_vm11, %v1819_v62, %v4712_v7  ;;  %1155 = vrot.lane.b32.xlu2 %v1064_v22, %s3827_s19  ;;  %v1073_v11 = vshll.u32 %v4816_v2, 16  ;;  %v2515_v22 = vsel %vm944_vm2, %v2510_v54, %v2514_v3  ;;  %v3324_v3 = vld [vmem:[#allocation2 + $0x98] sm:$0x1]  ;;  %v1201_v19 = vrot.slane %v4816_v2, 1 }
 0x111   : > { %2680 = vrot.lane.b32.xlu1 %v2646_v61, %s3828_s24  ;;  %3440 = vmatmul.msk.bf16.gmra.mxu0 %vm1925_vm12, %v1851_v15  ;;  %v2551_v61 = vsel %vm944_vm2, %v2546_v47, %v2550_v52  ;;  %v2638_v15 = vrot.slane %v4793_v20, 1  ;;  %v1071_v46 = vor.u32 %v1070_v8, %v1066_v0 }
 0x112   : > { %v4807_v34 = vpop.permute.xlu2 %2666  ;;  %v1075_v10 = vrot.slane %v1073_v11, 1 }
 0x113   : > { %v2585_v7 = vpop.permute.xlu1 %2584  ;;  %v2640_v29 = vsel %vm1169_vm9, %v2638_v15, %v2639_v39  ;;  %v2555_v39 = vshll.u32 %v4853_v27, 16 }
 0x114   : > { %2674 = vrot.lane.b32.xlu0 %v2637_v5, %s3828_s24  ;;  %v2697_v17 = vsel %vm1250_vm10, %v3790_v48, %v2585_v7  ;;  %v4827_v5 = vld [vmem:[#allocation2 + $0x84] sm:$0xff] }
 0x115   : > { %v1631_v7 = vshll.u32 %v4827_v5, 16  ;;  %v1629_v28 = vshrl.u32 %v4827_v5, 16 }
 0x116   : > { %v1731_v63 = vpop.permute.xlu0 %1730 }
 0x117   : > { %v1843_v37 = vsel %vm1250_vm10, %v3789_v41, %v1731_v63  ;;  %v1633_v6 = vrot.slane %v1631_v7, 1  ;;  %v3792_v63 = vld [vmem:[#allocation2 + $0x30] sm:$0xff]  ;;  %v2363_v41 = vunpack.c.l.b16 %v3528_v4  ;;  %v1487_v7 = vunpack.c.l.b16 %v3324_v3 }
 0x118   : > { %v1875_v45 = vsel %vm1283_vm11, %v1843_v37, %v4737_v51  ;;  %v3321_v51 = vld [vmem:[#allocation2 + $0x8c] sm:$0x1]  ;;  %1798 = vrot.lane.b32.xlu2 %v1761_v36, %s3828_s24  ;;  %v3537_v37 = vld [vmem:[#allocation2 + $0xc8] sm:$0x1]  ;;  %v3793_v36 = vld [vmem:[#allocation2 + $0x90] sm:$0xff] }
 0x119   : > { %1236 = vrot.lane.b32.xlu1 %v1199_v32, %s3828_s24  ;;  %3452 = vmatmul.msk.bf16.gmra.mxu3 %vm1925_vm12, %v1875_v45  ;;  %v1486_v13 = vunpack.c.l.b16 %v3321_v51  ;;  %v1634_v47 = vor.u32 %v1633_v6, %v1629_v28  ;;  %v2366_v16 = vunpack.c.l.b16 %v3537_v37  ;;  %v2649_v51 = vsel %vm1169_vm9, %v2647_v44, %v2648_v35  ;;  %v4885_v44 = vld [vmem:[#allocation2 + $0x84] sm:$0xff] }
 0x11a   : > { %v4829_v57 = vpop.permute.xlu2 %1228  ;;  %v2379_v48 = vpack.c.b16 %v2363_v41, %v2363_v41  ;;  %v2553_v28 = vshrl.u32 %v4853_v27, 16  ;;  %v4887_v35 = vpack.c.b16 %v1487_v7, %v1487_v7  ;;  %v2641_v37 = vrot.slane %v4848_v38, 1 }
 0x11b   : > { %v1146_v12 = vpop.permute.xlu1 %1145  ;;  %v1502_v58 = vpack.c.b16 %v1486_v13, %v1486_v13 }
 0x11c   : > { %1718 = vrot.lane.b32.xlu0 %v1627_v43, %s3827_s19  ;;  %v1260_v32 = vsel %vm1250_vm10, %v3792_v63, %v1146_v12  ;;  %v1076_v43 = vsel %vm944_vm2, %v1071_v46, %v1075_v10  ;;  %v1276_v12 = vsel %vm1250_vm10, %v3793_v36, %v4783_v42  ;;  %v2524_v13 = vshll.u32 %v2379_v48, 16 }
 0x11d   : > { %v1636_v49 = vshll.u32 %v1502_v58, 16  ;;  %v1763_v54 = vrot.slane %v1502_v58, 1  ;;  %v4865_v42 = vpack.c.b16 %v2366_v16, %v2366_v16  ;;  %v2557_v63 = vrot.slane %v2555_v39, 1 }
 0x11e   : > { %v2665_v62 = vpop.permute.xlu0 %2664  ;;  %v2526_v4 = vrot.slane %v2524_v13, 1  ;;  %v1080_v36 = vshll.u32 %v4885_v44, 16 }
 0x11f   : > { %v2729_v50 = vsel %vm1283_vm11, %v2697_v17, %v2665_v62  ;;  %v1638_v52 = vrot.slane %v1636_v49, 1  ;;  %v2519_v17 = vshll.u32 %v4848_v38, 16  ;;  %v2517_v62 = vshrl.u32 %v4848_v38, 16 }
 0x120   : > { %3645 = vmatmul.msk.bf16.gmra.mxu2 %vm1925_vm12, %v2729_v50  ;;  %2676 = vrot.lane.b32.xlu2 %v2640_v29, %s3828_s24  ;;  %v1200_v50 = vrot.slane %v4801_v59, 1  ;;  %v3794_v29 = vld [vmem:[#allocation2 + $0x54] sm:$0xff] }
 0x121   : > { %2602 = vrot.lane.b32.xlu1 %v2551_v61, %s3827_s19  ;;  %v1762_v61 = vrot.slane %v4827_v5, 1  ;;  %v1639_v0 = vsel %vm944_vm2, %v1634_v47, %v1638_v52  ;;  %v2521_v11 = vrot.slane %v2519_v17, 1  ;;  %v3540_v47 = vld [vmem:[#allocation2 + $0xd4] sm:$0x1]  ;;  %v2558_v52 = vor.u32 %v2557_v63, %v2553_v28 }
 0x122   : > { %v4850_v60 = vpop.permute.xlu2 %2588  ;;  %v1202_v49 = vsel %vm1169_vm9, %v1200_v50, %v1201_v19  ;;  %v1648_v17 = vshll.u32 %v4887_v35, 16  ;;  %v2367_v3 = vunpack.c.l.b16 %v3540_v47  ;;  %v1078_v50 = vshrl.u32 %v4885_v44, 16 }
 0x123   : > { %v1789_v21 = vpop.permute.xlu1 %1788  ;;  %v1764_v10 = vsel %vm1169_vm9, %v1762_v61, %v1763_v54  ;;  %v2522_v58 = vor.u32 %v2521_v11, %v2517_v62  ;;  %v4898_v54 = vld [vmem:[#allocation2 + $0xcc] sm:$0xff]  ;;  %v3795_v62 = vld [vmem:[#allocation2 + $0x3c] sm:$0xff]  ;;  %v1082_v19 = vrot.slane %v1080_v36, 1 }
 0x124   : > { %v1853_v33 = vsel %vm1283_vm11, %v1821_v9, %v1789_v21  ;;  %2596 = vrot.lane.b32.xlu0 %v2515_v22, %s3827_s19  ;;  %v803_v9 = vld [vmem:[#allocation2 + $0x8c] sm:$0x1]  ;;  %v4871_v22 = vld [vmem:[#allocation2 + $0x90] sm:$0xff]  ;;  %v2565_v63 = vshrl.u32 %v4898_v54, 16 }
 0x125   : > { %3441 = vmatmul.msk.bf16.gmra.mxu0 %vm1925_vm12, %v1853_v33  ;;  %v923_v33 = vunpack.c.l.b16 %v803_v9  ;;  %v1643_v41 = vshll.u32 %v4871_v22, 16 }
 0x126   : > { %v1227_v45 = vpop.permute.xlu0 %1226 }
 0x127   : > { %v1293_v18 = vsel %vm1283_vm11, %v1260_v32, %v1227_v45  ;;  %v2560_v32 = vshll.u32 %v4865_v42, 16  ;;  %v2642_v45 = vrot.slane %v2379_v48, 1  ;;  %v939_v16 = vpack.c.b16 %v923_v33, %v923_v33 }
 0x128   : > { %3481 = vmatmul.msk.bf16.gmra.mxu1 %vm1925_vm12, %v1293_v18  ;;  %1720 = vrot.lane.b32.xlu2 %v1639_v0, %s3827_s19  ;;  %v2650_v0 = vrot.slane %v4853_v27, 1 }
 0x129   : > { %1157 = vrot.lane.b32.xlu1 %v1076_v43, %s3827_s19  ;;  %v2562_v18 = vrot.slane %v2560_v32, 1  ;;  %v2643_v48 = vsel %vm1169_vm9, %v2641_v37, %v2642_v45  ;;  %v1085_v9 = vshll.u32 %v939_v16, 16  ;;  %v1204_v37 = vrot.slane %v939_v16, 1 }
 0x12a   : > { %v4877_v6 = vpop.permute.xlu2 %1149 }
 0x12b   : > { %v1243_v8 = vpop.permute.xlu1 %1242  ;;  %v2563_v39 = vsel %vm944_vm2, %v2558_v52, %v2562_v18  ;;  %v1087_v28 = vrot.slane %v1085_v9, 1 }
 0x12c   : > { %v1309_v15 = vsel %vm1283_vm11, %v1276_v12, %v1243_v8  ;;  %2682 = vrot.lane.b32.xlu0 %v2649_v51, %s3828_s24  ;;  %v1641_v12 = vshrl.u32 %v4871_v22, 16  ;;  %v1645_v51 = vrot.slane %v1643_v41, 1  ;;  %v2651_v8 = vrot.slane %v4865_v42, 1 }
 0x12d   : > { %3489 = vmatmul.msk.bf16.vlgmr.msrb.gmra.mxu3 %vm1925_vm12, %v1309_v15  ;;  %v1650_v42 = vrot.slane %v1648_v17, 1  ;;  %v1203_v41 = vrot.slane %v4885_v44, 1  ;;  %v3798_v17 = vld [vmem:[#allocation2 + $0x9c] sm:$0xff] }
 0x12e   : > { %v2587_v46 = vpop.permute.xlu0 %2586  ;;  %v1646_v7 = vor.u32 %v1645_v51, %v1641_v12 }
 0x12f   : > { %v2699_v21 = vsel %vm1250_vm10, %v3794_v29, %v2587_v46  ;;  %v2383_v46 = vpack.c.b16 %v2367_v3, %v2367_v3  ;;  %v3796_v29 = vld [vmem:[#allocation2 + $0x48] sm:$0xff]  ;;  %v1205_v12 = vsel %vm1169_vm9, %v1203_v41, %v1204_v37 }
 0x130   : > { %v2731_v2 = vsel %vm1283_vm11, %v2699_v21, %v4807_v34  ;;  %v2527_v34 = vsel %vm944_vm2, %v2522_v58, %v2526_v4  ;;  %v2652_v58 = vsel %vm1169_vm9, %v2650_v0, %v2651_v8  ;;  %v1083_v21 = vor.u32 %v1082_v19, %v1078_v50 }
 0x131   : > { %1800 = vrot.lane.b32.xlu1 %v1764_v10, %s3828_s24  ;;  %3646 = vmatmul.msk.bf16.gmra.mxu2 %vm1925_vm12, %v2731_v2  ;;  %v2567_v10 = vshll.u32 %v4898_v54, 16  ;;  %v1651_v2 = vsel %vm944_vm2, %v1646_v7, %v1650_v42  ;;  %v2653_v8 = vrot.slane %v4898_v54, 1 }
 0x132   : > { %2598 = vrot.lane.b32.xlu2 %v2527_v34, %s3827_s19  ;;  %v4903_v13 = vpop.permute.xlu2 %1792  ;;  %v1088_v52 = vsel %vm944_vm2, %v1083_v21, %v1087_v28 }
 0x133   : > { %v1711_v43 = vpop.permute.xlu1 %1710  ;;  %v2569_v33 = vrot.slane %v2567_v10, 1 }
 0x134   : > { %1238 = vrot.lane.b32.xlu0 %v1202_v49, %s3828_s24  ;;  %v2572_v49 = vshll.u32 %v2383_v46, 16 }
 0x135   : > { %v2570_v18 = vor.u32 %v2569_v33, %v2565_v63 }
 0x136   : > { %v1148_v61 = vpop.permute.xlu0 %1147  ;;  %v2574_v36 = vrot.slane %v2572_v49, 1  ;;  %v3801_v49 = vld [vmem:[#allocation2 + $0x6c] sm:$0xff] }
 0x137   : > { %v1262_v11 = vsel %vm1250_vm10, %v3795_v62, %v1148_v61  ;;  %v2654_v62 = vrot.slane %v2383_v46, 1  ;;  %v3800_v46 = vld [vmem:[#allocation2 + $0x54] sm:$0xff] }
 0x138   : > { %v1295_v15 = vsel %vm1283_vm11, %v1262_v11, %v4829_v57  ;;  %v1823_v57 = vsel %vm1250_vm10, %v3796_v29, %v1711_v43  ;;  %v3797_v43 = vld [vmem:[#allocation2 + $0x60] sm:$0xff]  ;;  %v2575_v0 = vsel %vm944_vm2, %v2570_v18, %v2574_v36 }
 0x139   : > { %2678 = vrot.lane.b32.xlu1 %v2643_v48, %s3828_s24  ;;  %3482 = vmatmul.msk.bf16.gmra.mxu1 %vm1925_vm12, %v1295_v15  ;;  %v2701_v47 = vsel %vm1250_vm10, %v3797_v43, %v4850_v60  ;;  %v1765_v60 = vrot.slane %v4871_v22, 1  ;;  %v1766_v48 = vrot.slane %v4887_v35, 1  ;;  %v2655_v35 = vsel %vm1169_vm9, %v2653_v8, %v2654_v62 }
 0x13a   : > { %2684 = vrot.lane.b32.xlu2 %v2652_v58, %s3828_s24  ;;  %v1247_v34 = vpop.permute.xlu2 %1246 }
 0x13b   : > { %v1164_v4 = vpop.permute.xlu1 %1163  ;;  %v1767_v19 = vsel %vm1169_vm9, %v1765_v60, %v1766_v48 }
 0x13c   : > { %2604 = vrot.lane.b32.xlu0 %v2563_v39, %s3827_s19  ;;  %v1278_v16 = vsel %vm1250_vm10, %v3798_v17, %v1164_v4  ;;  %v3799_v39 = vld [vmem:[#allocation2 + $0x48] sm:$0xff]  ;;  %v2124_v4 = vpop.f32.mrf.mxu1 }
 0x13d   : > { %v1264_v50 = vsel %vm1250_vm10, %v3799_v39, %v4877_v6 }
 0x13e   : > { %v1791_v32 = vpop.permute.xlu0 %1790 }
 0x13f   : > { %v1855_v45 = vsel %vm1283_vm11, %v1823_v57, %v1791_v32 }
 0x140   : > { %3442 = vmatmul.msk.bf16.gmra.mxu0 %vm1925_vm12, %v1855_v45 }
 0x141   : > { %1722 = vrot.lane.b32.xlu1 %v1651_v2, %s3827_s19 }
 0x142   : > { %1240 = vrot.lane.b32.xlu2 %v1205_v12, %s3828_s24  ;;  %v1715_v15 = vpop.permute.xlu2 %1714 }
 0x143   : > { %v2669_v51 = vpop.permute.xlu1 %2668  ;;  %v1827_v18 = vsel %vm1250_vm10, %v4626_v23, %v1715_v15 }
 0x144   : > { %v2733_v61 = vsel %vm1283_vm11, %v2701_v47, %v2669_v51  ;;  %1159 = vrot.lane.b32.xlu0 %v1088_v52, %s3827_s19  ;;  %v2126_v45 = vpop.f32.mrf.mxu1 }
 0x145   : > { %3647 = vmatmul.msk.bf16.gmra.mxu2 %vm1925_vm12, %v2733_v61 }
 0x146   : > { %v1245_v3 = vpop.permute.xlu0 %1244 }
 0x147   : > { %v1311_v11 = vsel %vm1283_vm11, %v1278_v16, %v1245_v3 }
 0x148   : > { %3490 = vmatmul.msk.bf16.gmra.mxu3 %vm1925_vm12, %v1311_v11 }
 0x149   : > { %2606 = vrot.lane.b32.xlu1 %v2575_v0, %s3827_s19  ;;  %s3660_s19 = sshll.u32 %s5279_s15, 8 }
 0x14a   : > { %2686 = vrot.lane.b32.xlu2 %v2655_v35, %s3828_s24  ;;  %v1168_v10 = vpop.permute.xlu2 %1167  ;;  %s4964_s25 = scalar_lea.vmem %s5266_s3, %s3660_s19 }
 0x14b   : > { %v1231_v9 = vpop.permute.xlu1 %1230  ;;  %v1967_v57 = vpop.f32.mrf.mxu0  ;;  %v1282_v11 = vsel %vm1250_vm10, %v4653_v53, %v1168_v10 }
 0x14c   : > { %v1297_v7 = vsel %vm1283_vm11, %v1264_v50, %v1231_v9  ;;  %1802 = vrot.lane.b32.xlu0 %v1767_v19, %s3828_s24  ;;  %v2125_v32 = vadd.f32 %v2124_v4, %v1967_v57 }
 0x14d   : > { %3483 = vmatmul.msk.bf16.gmra.mxu1 %vm1925_vm12, %v1297_v7 }
 0x14e   : > { %v1713_v42 = vpop.permute.xlu0 %1712 }
 0x14f   : > { %v1825_v6 = vsel %vm1250_vm10, %v3800_v46, %v1713_v42 }
 0x150   : > { %v1857_v58 = vsel %vm1283_vm11, %v1825_v6, %v4903_v13  ;;  %v4958_v13 = vld [vmem:[%s5265_s2] ss:$0 sm:$0xff] }
 0x151   : > { %3443 = vmatmul.msk.bf16.gmra.mxu0 %vm1925_vm12, %v1857_v58 }
 0x152   : > { %v2673_v2 = vpop.permute.xlu2 %2672 }
 0x153   : > { %v2591_v29 = vpop.permute.xlu1 %2590  ;;  %v1969_v52 = vpop.f32.mrf.mxu0 }
 0x154   : > { %v2703_v41 = vsel %vm1250_vm10, %v3801_v49, %v2591_v29  ;;  %v2127_v12 = vadd.f32 %v2126_v45, %v1969_v52 }
 0x156   : > { %v1166_v21 = vpop.permute.xlu0 %1165 }
 0x157   : > { %v1280_v28 = vsel %vm1250_vm10, %v4570_v1, %v1166_v21 }
 0x158   : > { %v1313_v63 = vsel %vm1283_vm11, %v1280_v28, %v1247_v34 }
 0x159   : > { %3491 = vmatmul.msk.bf16.gmra.mxu3 %vm1925_vm12, %v1313_v63 }
 0x15a   : > { %v1235_v36 = vpop.permute.xlu2 %1234 }
 0x15b   : > { %v1152_v33 = vpop.permute.xlu1 %1151 }
 0x15c   : > { %v2842_v37 = vpop.f32.mrf.mxu2  ;;  %v1266_v17 = vsel %vm1250_vm10, %v4586_v55, %v1152_v33 }
 0x15d   : > { %v2922_v43 = vadd.f32 %v2842_v37, %v2125_v32 }
 0x15e   : > { %v2671_v1 = vpop.permute.xlu0 %2670 }
 0x15f   : > { %v2958_v34 = vadd.f32 %v4958_v13, %v2922_v43  ;;  %v2735_v47 = vsel %vm1283_vm11, %v2703_v41, %v2671_v1 }
 0x160   : > { %3648 = vmatmul.msk.bf16.gmra.mxu2 %vm1925_vm12, %v2735_v47 }
 0x161   : > { %2990 = vst.msk [vmem:[%s4964_s25] sm:$0xff] %vm1250_vm10, %v2958_v34  ;;  %v3028_v62 = vsel %vm1250_vm10, %v2958_v34, 0.0 }
 0x162   : > { %v1972_v23 = vpop.f32.mrf.mxu0  ;;  %v2601_v19 = vpop.permute.xlu2 %2600 }
 0x163   : > { %v1795_v51 = vpop.permute.xlu1 %1794 }
 0x164   : > { %v1859_v16 = vsel %vm1283_vm11, %v1827_v18, %v1795_v51  ;;  %v2844_v61 = vpop.f32.mrf.mxu2  ;;  %v4988_v46 = vpop.f32.mrf.mxu3 }
 0x165   : > { %3444 = vmatmul.msk.bf16.gmra.mxu0 %vm1925_vm12, %v1859_v16  ;;  %v2923_v60 = vadd.f32 %v2844_v61, %v2127_v12  ;;  %v2129_v48 = vpop.f32.mrf.mxu1  ;;  %v2713_v61 = vsel %vm1250_vm10, %v4735_v25, %v2601_v19 }
 0x166   : > { %v1233_v3 = vpop.permute.xlu0 %1232  ;;  %v2130_v39 = vadd.f32 %v2129_v48, %v1972_v23 }
 0x167   : > { %v2959_v0 = vadd.f32 %v4958_v13, %v2923_v60  ;;  %v1299_v8 = vsel %vm1283_vm11, %v1266_v17, %v1233_v3 }
 0x168   : > { %3484 = vmatmul.msk.bf16.gmra.mxu1 %vm1925_vm12, %v1299_v8 }
 0x169   : > { %2991 = vst.msk [vmem:[%s4964_s25 + $0x8] sm:$0xff] %vm1250_vm10, %v2959_v0  ;;  %v3029_v55 = vsel %vm1250_vm10, %v2959_v0, 0.0 }
 0x16a   : > { %v3030_v15 = vadd.f32 %v3029_v55, %v3028_v62  ;;  %v1974_v29 = vpop.f32.mrf.mxu0  ;;  %v1156_v33 = vpop.permute.xlu2 %1155 }
 0x16b   : > { %v1249_v50 = vpop.permute.xlu1 %1248 }
 0x16c   : > { %v1315_v35 = vsel %vm1283_vm11, %v1282_v11, %v1249_v50  ;;  %v2847_v9 = vpop.f32.mrf.mxu2  ;;  %v5001_v37 = vpop.f32.mrf.mxu3 }
 0x16d   : > { %3492 = vmatmul.msk.bf16.gmra.mxu3 %vm1925_vm12, %v1315_v35  ;;  %v2924_v7 = vadd.f32 %v2847_v9, %v2130_v39  ;;  %v2131_v42 = vpop.f32.mrf.mxu1 }
 0x16e   : > { %v2593_v6 = vpop.permute.xlu0 %2592  ;;  %v2132_v21 = vadd.f32 %v2131_v42, %v1974_v29 }
 0x16f   : > { %v2960_v58 = vadd.f32 %v4958_v13, %v2924_v7  ;;  %v2705_v4 = vsel %vm1250_vm10, %v4664_v31, %v2593_v6 }
 0x170   : > { %v2737_v53 = vsel %vm1283_vm11, %v2705_v4, %v2673_v2 }
 0x171   : > { %2992 = vst.msk [vmem:[%s4964_s25 + $0x10] sm:$0xff] %vm1250_vm10, %v2960_v58  ;;  %v3031_v10 = vsel %vm1250_vm10, %v2960_v58, 0.0  ;;  %3649 = vmatmul.msk.bf16.gmra.mxu2 %vm1925_vm12, %v2737_v53 }
 0x172   : > { %v3032_v57 = vadd.f32 %v3031_v10, %v3030_v15  ;;  %v1799_v17 = vpop.permute.xlu2 %1798 }
 0x173   : > { %v1717_v28 = vpop.permute.xlu1 %1716 }
 0x174   : > { %v2849_v63 = vpop.f32.mrf.mxu2  ;;  %v1829_v47 = vsel %vm1250_vm10, %v4675_v24, %v1717_v28  ;;  %v5014_v60 = vpop.f32.mrf.mxu3 }
 0x175   : > { %v2925_v32 = vadd.f32 %v2849_v63, %v2132_v21 }
 0x176   : > { %v1154_v49 = vpop.permute.xlu0 %1153  ;;  %v2134_v2 = vpop.f32.mrf.mxu1 }
 0x177   : > { %v2961_v41 = vadd.f32 %v4958_v13, %v2925_v32  ;;  %v1268_v31 = vsel %vm1250_vm10, %v4695_v30, %v1154_v49 }
 0x178   : > { %v1301_v45 = vsel %vm1283_vm11, %v1268_v31, %v1235_v36 }
 0x179   : > { %2993 = vst.msk [vmem:[%s4964_s25 + $0x18] sm:$0xff] %vm1250_vm10, %v2961_v41  ;;  %v3033_v43 = vsel %vm1250_vm10, %v2961_v41, 0.0  ;;  %3485 = vmatmul.msk.bf16.gmra.mxu1 %vm1925_vm12, %v1301_v45 }
 0x17a   : > { %v3034_v1 = vadd.f32 %v3033_v43, %v3032_v57  ;;  %v2677_v50 = vpop.permute.xlu2 %2676 }
 0x17b   : > { %v2595_v34 = vpop.permute.xlu1 %2594 }
 0x17c   : > { %v2707_v24 = vsel %vm1250_vm10, %v4706_v14, %v2595_v34  ;;  %v1270_v14 = vsel %vm1250_vm10, %v4755_v26, %v1156_v33  ;;  %v5029_v7 = vpop.f32.mrf.mxu3 }
 0x17d   : > { %v2852_v52 = vpop.f32.mrf.mxu2  ;;  %v1977_v18 = vpop.f32.mrf.mxu0 }
 0x17e   : > { %v2135_v30 = vadd.f32 %v2134_v2, %v1977_v18  ;;  %v1797_v12 = vpop.permute.xlu0 %1796  ;;  %v2136_v16 = vpop.f32.mrf.mxu1 }
 0x17f   : > { %v1861_v51 = vsel %vm1283_vm11, %v1829_v47, %v1797_v12 }
 0x180   : > { %v2926_v36 = vadd.f32 %v2852_v52, %v2135_v30  ;;  %3445 = vmatmul.msk.bf16.gmra.mxu0 %vm1925_vm12, %v1861_v51 }
 0x182   : > { %v2962_v48 = vadd.f32 %v4958_v13, %v2926_v36  ;;  %v1721_v32 = vpop.permute.xlu2 %1720 }
 0x183   : > { %v2681_v3 = vpop.permute.xlu1 %2680 }
 0x184   : > { %2994 = vst.msk [vmem:[%s4964_s25 + $0x20] sm:$0xff] %vm1250_vm10, %v2962_v48  ;;  %v3035_v0 = vsel %vm1250_vm10, %v2962_v48, 0.0  ;;  %v2745_v8 = vsel %vm1283_vm11, %v2713_v61, %v2681_v3  ;;  %v1833_v61 = vsel %vm1250_vm10, %v4827_v5, %v1721_v32 }
 0x185   : > { %v3036_v23 = vadd.f32 %v3035_v0, %v3034_v1  ;;  %3653 = vmatmul.msk.bf16.vlgmr.msra.gmra.mxu3 %vm1925_vm12, %v2745_v8  ;;  %v2854_v62 = vpop.f32.mrf.mxu2  ;;  %v1979_v25 = vpop.f32.mrf.mxu0 }
 0x186   : > { %v2137_v55 = vadd.f32 %v2136_v16, %v1979_v25  ;;  %v2675_v11 = vpop.permute.xlu0 %2674 }
 0x187   : > { %v2739_v15 = vsel %vm1283_vm11, %v2707_v24, %v2675_v11 }
 0x188   : > { %v2927_v39 = vadd.f32 %v2854_v62, %v2137_v55  ;;  %3650 = vmatmul.msk.bf16.gmra.mxu2 %vm1925_vm12, %v2739_v15 }
 0x18a   : > { %v2963_v19 = vadd.f32 %v4958_v13, %v2927_v39  ;;  %v2139_v35 = vpop.f32.mrf.mxu1 }
 0x18b   : > { %v1237_v9 = vpop.permute.xlu1 %1236  ;;  %v5041_v33 = vpop.f32.mrf.mxu3 }
 0x18c   : > { %2995 = vst.msk [vmem:[%s4964_s25 + $0x28] sm:$0xff] %vm1250_vm10, %v2963_v19  ;;  %v3037_v42 = vsel %vm1250_vm10, %v2963_v19, 0.0  ;;  %v1303_v6 = vsel %vm1283_vm11, %v1270_v14, %v1237_v9  ;;  %v2599_v51 = vpop.permute.xlu2 %2598 }
 0x18d   : > { %v3038_v58 = vadd.f32 %v3037_v42, %v3036_v23  ;;  %3486 = vmatmul.msk.bf16.gmra.mxu1 %vm1925_vm12, %v1303_v6  ;;  %v2857_v4 = vpop.f32.mrf.mxu2  ;;  %v2711_v15 = vsel %vm1250_vm10, %v4848_v38, %v2599_v51 }
 0x18e   : > { %v1719_v53 = vpop.permute.xlu0 %1718  ;;  %v1982_v26 = vpop.f32.mrf.mxu0 }
 0x18f   : > { %v1831_v10 = vsel %vm1250_vm10, %v4757_v40, %v1719_v53  ;;  %v2140_v29 = vadd.f32 %v2139_v35, %v1982_v26 }
 0x190   : > { %v1863_v57 = vsel %vm1283_vm11, %v1831_v10, %v1799_v17 }
 0x191   : > { %v2928_v21 = vadd.f32 %v2857_v4, %v2140_v29  ;;  %3446 = vmatmul.msk.bf16.gmra.mxu0 %vm1925_vm12, %v1863_v57 }
 0x192   : > { %v2141_v41 = vpop.f32.mrf.mxu1 }
 0x193   : > { %v2964_v28 = vadd.f32 %v4958_v13, %v2928_v21  ;;  %v2603_v63 = vpop.permute.xlu1 %2602  ;;  %v5056_v17 = vpop.f32.mrf.mxu3 }
 0x194   : > { %v2715_v30 = vsel %vm1250_vm10, %v4774_v56, %v2603_v63  ;;  %v2685_v55 = vpop.permute.xlu2 %2684 }
 0x195   : > { %2996 = vst.msk [vmem:[%s4964_s25 + $0x30] sm:$0xff] %vm1250_vm10, %v2964_v28  ;;  %v3039_v49 = vsel %vm1250_vm10, %v2964_v28, 0.0  ;;  %v2859_v1 = vpop.f32.mrf.mxu2 }
 0x196   : > { %v3040_v31 = vadd.f32 %v3039_v49, %v3038_v58  ;;  %v2597_v40 = vpop.permute.xlu0 %2596  ;;  %v1984_v2 = vpop.f32.mrf.mxu0 }
 0x197   : > { %v2709_v45 = vsel %vm1250_vm10, %v4793_v20, %v2597_v40  ;;  %v2142_v43 = vadd.f32 %v2141_v41, %v1984_v2 }
 0x198   : > { %v2741_v34 = vsel %vm1283_vm11, %v2709_v45, %v2677_v50 }
 0x199   : > { %v2929_v47 = vadd.f32 %v2859_v1, %v2142_v43  ;;  %3651 = vmatmul.msk.bf16.gmra.mxu2 %vm1925_vm12, %v2741_v34 }
 0x19b   : > { %v2965_v52 = vadd.f32 %v4958_v13, %v2929_v47  ;;  %v1158_v18 = vpop.permute.xlu1 %1157 }
 0x19c   : > { %v1272_v56 = vsel %vm1250_vm10, %v4801_v59, %v1158_v18  ;;  %v5067_v11 = vpop.f32.mrf.mxu3  ;;  %v1241_v26 = vpop.permute.xlu2 %1240 }
 0x19d   : > { %2997 = vst.msk [vmem:[%s4964_s25 + $0x38] sm:$0xff] %vm1250_vm10, %v2965_v52  ;;  %v3041_v12 = vsel %vm1250_vm10, %v2965_v52, 0.0 }
 0x19e   : > { %v3042_v20 = vadd.f32 %v3041_v12, %v3040_v31  ;;  %v2683_v36 = vpop.permute.xlu0 %2682 }
 0x19f   : > { %v2747_v16 = vsel %vm1283_vm11, %v2715_v30, %v2683_v36 }
 0x1a0   : > { %3654 = vmatmul.msk.bf16.gmra.mxu3 %vm1925_vm12, %v2747_v16 }
 0x1a2   : > { %v1987_v48 = vpop.f32.mrf.mxu0 }
 0x1a3   : > { %v1801_v3 = vpop.permute.xlu1 %1800  ;;  %v2862_v0 = vpop.f32.mrf.mxu2 }
 0x1a4   : > { %v1865_v24 = vsel %vm1283_vm11, %v1833_v61, %v1801_v3  ;;  %v5082_v10 = vpop.f32.mrf.mxu3  ;;  %v2687_v40 = vpop.permute.xlu2 %2686 }
 0x1a5   : > { %3447 = vmatmul.msk.bf16.gmra.mxu0 %vm1925_vm12, %v1865_v24  ;;  %v2144_v8 = vpop.f32.mrf.mxu1 }
 0x1a6   : > { %v2145_v23 = vadd.f32 %v2144_v8, %v1987_v48  ;;  %v1239_v62 = vpop.permute.xlu0 %1238 }
 0x1a7   : > { %v1305_v25 = vsel %vm1283_vm11, %v1272_v56, %v1239_v62 }
 0x1a8   : > { %v2930_v5 = vadd.f32 %v2862_v0, %v2145_v23  ;;  %3487 = vmatmul.msk.bf16.gmra.mxu1 %vm1925_vm12, %v1305_v25 }
 0x1aa   : > { %v2966_v59 = vadd.f32 %v4958_v13, %v2930_v5  ;;  %v1989_v35 = vpop.f32.mrf.mxu0 }
 0x1ab   : > { %v2679_v39 = vpop.permute.xlu1 %2678  ;;  %v2864_v58 = vpop.f32.mrf.mxu2 }
 0x1ac   : > { %2998 = vst.msk [vmem:[%s4964_s25 + $0x40] sm:$0xff] %vm1250_vm10, %v2966_v59  ;;  %v3043_v14 = vsel %vm1250_vm10, %v2966_v59, 0.0  ;;  %v2743_v50 = vsel %vm1283_vm11, %v2711_v15, %v2679_v39 }
 0x1ad   : > { %v3044_v19 = vadd.f32 %v3043_v14, %v3042_v20  ;;  %3652 = vmatmul.msk.bf16.gmra.mxu2 %vm1925_vm12, %v2743_v50  ;;  %v2146_v9 = vpop.f32.mrf.mxu1 }
 0x1ae   : > { %v2147_v42 = vadd.f32 %v2146_v9, %v1989_v35  ;;  %v2605_v6 = vpop.permute.xlu0 %2604 }
 0x1af   : > { %v2717_v38 = vsel %vm1250_vm10, %v4853_v27, %v2605_v6 }
 0x1b0   : > { %v2931_v4 = vadd.f32 %v2864_v58, %v2147_v42  ;;  %v2749_v53 = vsel %vm1283_vm11, %v2717_v38, %v2685_v55  ;;  %v5092_v2 = vpop.f32.mrf.mxu3 }
 0x1b1   : > { %3655 = vmatmul.msk.bf16.gmra.mxu3 %vm1925_vm12, %v2749_v53 }
 0x1b2   : > { %v2967_v29 = vadd.f32 %v4958_v13, %v2931_v4 }
 0x1b3   : > { %v1723_v57 = vpop.permute.xlu1 %1722 }
 0x1b4   : > { %2999 = vst.msk [vmem:[%s4964_s25 + $0x48] sm:$0xff] %vm1250_vm10, %v2967_v29  ;;  %v3045_v21 = vsel %vm1250_vm10, %v2967_v29, 0.0  ;;  %v2867_v41 = vpop.f32.mrf.mxu2  ;;  %v1835_v45 = vsel %vm1250_vm10, %v4871_v22, %v1723_v57 }
 0x1b5   : > { %v3046_v28 = vadd.f32 %v3045_v21, %v3044_v19 }
 0x1b6   : > { %v1160_v63 = vpop.permute.xlu0 %1159  ;;  %v2149_v32 = vpop.f32.mrf.mxu1 }
 0x1b7   : > { %v1274_v27 = vsel %vm1250_vm10, %v4885_v44, %v1160_v63 }
 0x1b8   : > { %v1307_v49 = vsel %vm1283_vm11, %v1274_v27, %v1241_v26  ;;  %v5106_v36 = vpop.f32.mrf.mxu3 }
 0x1b9   : > { %3488 = vmatmul.msk.bf16.gmra.mxu1 %vm1925_vm12, %v1307_v49 }
 0x1bb   : > { %v2607_v31 = vpop.permute.xlu1 %2606 }
 0x1bc   : > { %v2719_v43 = vsel %vm1250_vm10, %v4898_v54, %v2607_v31  ;;  %v2869_v22 = vpop.f32.mrf.mxu2 }
 0x1bd   : > { %v1992_v1 = vpop.f32.mrf.mxu0  ;;  %v2751_v47 = vsel %vm1283_vm11, %v2719_v43, %v2687_v40 }
 0x1be   : > { %v2150_v34 = vadd.f32 %v2149_v32, %v1992_v1  ;;  %v1803_v44 = vpop.permute.xlu0 %1802  ;;  %v2151_v12 = vpop.f32.mrf.mxu1 }
 0x1bf   : > { %v1867_v52 = vsel %vm1283_vm11, %v1835_v45, %v1803_v44 }
 0x1c0   : > { %v2932_v18 = vadd.f32 %v2867_v41, %v2150_v34  ;;  %3448 = vmatmul.msk.bf16.gmra.mxu0 %vm1925_vm12, %v1867_v52 }
 0x1c1   : > { %3656 = vmatmul.msk.bf16.gmra.mxu3 %vm1925_vm12, %v2751_v47 }
 0x1c2   : > { %v2968_v30 = vadd.f32 %v4958_v13, %v2932_v18 }
 0x1c4   : > { %3000 = vst.msk [vmem:[%s4964_s25 + $0x50] sm:$0xff] %vm1250_vm10, %v2968_v30  ;;  %v3047_v54 = vsel %vm1250_vm10, %v2968_v30, 0.0 }
 0x1c5   : > { %v3048_v51 = vadd.f32 %v3047_v54, %v3046_v28  ;;  %v1994_v20 = vpop.f32.mrf.mxu0 }
 0x1c6   : > { %v2152_v16 = vadd.f32 %v2151_v12, %v1994_v20 }
 0x1c8   : > { %v2933_v61 = vadd.f32 %v2869_v22, %v2152_v16  ;;  %v2872_v0 = vpop.f32.mrf.mxu2  ;;  %v2185_v16 = vadd.f32 %v5092_v2, %v4988_v46  ;;  %v2187_v46 = vadd.f32 %v5106_v36, %v5001_v37 }
 0x1ca   : > { %v2969_v48 = vadd.f32 %v4958_v13, %v2933_v61  ;;  %v2154_v56 = vpop.f32.mrf.mxu1 }
 0x1cb   : > { %v5112_v8 = vpop.f32.mrf.mxu3 }
 0x1cc   : > { %3001 = vst.msk [vmem:[%s4964_s25 + $0x58] sm:$0xff] %vm1250_vm10, %v2969_v48  ;;  %v3049_v3 = vsel %vm1250_vm10, %v2969_v48, 0.0 }
 0x1cd   : > { %v3050_v24 = vadd.f32 %v3049_v3, %v3048_v51 }
 0x1ce   : > { %v1997_v23 = vpop.f32.mrf.mxu0 }
 0x1cf   : > { %v2155_v62 = vadd.f32 %v2154_v56, %v1997_v23 }
 0x1d0   : > { %v2874_v50 = vpop.f32.mrf.mxu2 }
 0x1d1   : > { %v2934_v25 = vadd.f32 %v2872_v0, %v2155_v62 }
 0x1d2   : > { %v2156_v59 = vpop.f32.mrf.mxu1 }
 0x1d3   : > { %v2970_v55 = vadd.f32 %v4958_v13, %v2934_v25  ;;  %v5118_v19 = vpop.f32.mrf.mxu3 }
 0x1d5   : > { %3002 = vst.msk [vmem:[%s4964_s25 + $0x60] sm:$0xff] %vm1250_vm10, %v2970_v55  ;;  %v3051_v5 = vsel %vm1250_vm10, %v2970_v55, 0.0 }
 0x1d6   : > { %v3052_v15 = vadd.f32 %v3051_v5, %v3050_v24  ;;  %v1999_v39 = vpop.f32.mrf.mxu0 }
 0x1d7   : > { %v2157_v14 = vadd.f32 %v2156_v59, %v1999_v39 }
 0x1d9   : > { %v2935_v35 = vadd.f32 %v2874_v50, %v2157_v14 }
 0x1db   : > { %v2971_v9 = vadd.f32 %v4958_v13, %v2935_v35 }
 0x1dc   : > { %v5124_v58 = vpop.f32.mrf.mxu3 }
 0x1dd   : > { %3003 = vst.msk [vmem:[%s4964_s25 + $0x68] sm:$0xff] %vm1250_vm10, %v2971_v9  ;;  %v3053_v42 = vsel %vm1250_vm10, %v2971_v9, 0.0  ;;  %v2190_v9 = vadd.f32 %v5112_v8, %v5014_v60 }
 0x1de   : > { %v3054_v6 = vadd.f32 %v3053_v42, %v3052_v15 }
 0x1e2   : > { %v2002_v38 = vpop.f32.mrf.mxu0 }
 0x1e3   : > { %v2877_v4 = vpop.f32.mrf.mxu2 }
 0x1e4   : > { %v5127_v21 = vpop.f32.mrf.mxu3 }
 0x1e5   : > { %v2159_v53 = vpop.f32.mrf.mxu1 }
 0x1e6   : > { %v2160_v26 = vadd.f32 %v2159_v53, %v2002_v38 }
 0x1e8   : > { %v2936_v29 = vadd.f32 %v2877_v4, %v2160_v26 }
 0x1ea   : > { %v2972_v57 = vadd.f32 %v4958_v13, %v2936_v29  ;;  %v2004_v27 = vpop.f32.mrf.mxu0 }
 0x1eb   : > { %v2879_v41 = vpop.f32.mrf.mxu2 }
 0x1ec   : > { %3004 = vst.msk [vmem:[%s4964_s25 + $0x70] sm:$0xff] %vm1250_vm10, %v2972_v57  ;;  %v3055_v28 = vsel %vm1250_vm10, %v2972_v57, 0.0 }
 0x1ed   : > { %v3056_v63 = vadd.f32 %v3055_v28, %v3054_v6  ;;  %v2161_v32 = vpop.f32.mrf.mxu1  ;;  %v2192_v28 = vadd.f32 %v5118_v19, %v5029_v7  ;;  %v2195_v19 = vadd.f32 %v5124_v58, %v5041_v33 }
 0x1ee   : > { %v2162_v49 = vadd.f32 %v2161_v32, %v2004_v27 }
 0x1f0   : > { %v2937_v31 = vadd.f32 %v2879_v41, %v2162_v49  ;;  %v5138_v1 = vpop.f32.mrf.mxu3 }
 0x1f2   : > { %v2973_v40 = vadd.f32 %v4958_v13, %v2937_v31 }
 0x1f4   : > { %3005 = vst.msk [vmem:[%s4964_s25 + $0x78] sm:$0xff] %vm1250_vm10, %v2973_v40  ;;  %v3057_v45 = vsel %vm1250_vm10, %v2973_v40, 0.0  ;;  %v2882_v44 = vpop.f32.mrf.mxu2 }
 0x1f5   : > { %v5136_v43 = vadd.f32 %v3057_v45, %v3056_v63 }
 0x1f6   : > { %v2164_v34 = vpop.f32.mrf.mxu1 }
 0x1f8   : > { %v5140_v18 = vpop.f32.mrf.mxu3 }
 0x1fc   : > { %v2884_v51 = vpop.f32.mrf.mxu2 }
 0x1fd   : > { %v2007_v47 = vpop.f32.mrf.mxu0 }
 0x1fe   : > { %v2165_v52 = vadd.f32 %v2164_v34, %v2007_v47  ;;  %v2166_v22 = vpop.f32.mrf.mxu1 }
 0x200   : > { %v2938_v30 = vadd.f32 %v2882_v44, %v2165_v52  ;;  %v3829_v44 = vmov 0.0   ;;  %v2197_v52 = vadd.f32 %v5127_v21, %v5056_v17 }
 0x201   : > { %3026 = vst.msk [vmem:[%s5197_s28] sm:$0x1] %vm270_vm1, %v3829_v44 }
 0x202   : > { %v5143_v12 = vadd.f32 %v4958_v13, %v2938_v30 }
 0x204   : > { %3006 = vst.msk [vmem:[%s4964_s25 + $0x80] sm:$0xff] %vm1250_vm10, %v5143_v12 }
 0x205   : > { %v2009_v54 = vpop.f32.mrf.mxu0 }
 0x206   : > { %v2167_v20 = vadd.f32 %v2166_v22, %v2009_v54  ;;  %v3059_v22 = vsel %vm1250_vm10, %v5143_v12, 0.0 }
 0x208   : > { %v2939_v61 = vadd.f32 %v2884_v51, %v2167_v20  ;;  %v2902_v48 = vpop.f32.mrf.mxu3 }
 0x209   : > { %v2946_v3 = vadd.f32 %v2902_v48, %v2185_v16 }
 0x20a   : > { %v2975_v56 = vadd.f32 %v4958_v13, %v2939_v61  ;;  %v2169_v0 = vpop.f32.mrf.mxu1  ;;  %v3060_v61 = vadd.f32 %v3059_v22, %v5136_v43 }
 0x20b   : > { %v5152_v24 = vadd.f32 %v4958_v13, %v2946_v3  ;;  %v2887_v23 = vpop.f32.mrf.mxu2 }
 0x20c   : > { %3007 = vst.msk [vmem:[%s4964_s25 + $0x88] sm:$0xff] %vm1250_vm10, %v2975_v56  ;;  %v3061_v20 = vsel %vm1250_vm10, %v2975_v56, 0.0 }
 0x20d   : > { %3014 = vst.msk [vmem:[%s4964_s25 + $0xc0] sm:$0xff] %vm1250_vm10, %v5152_v24  ;;  %v3062_v17 = vadd.f32 %v3061_v20, %v3060_v61 }
 0x20e   : > { %v2012_v62 = vpop.f32.mrf.mxu0 }
 0x20f   : > { %v2170_v2 = vadd.f32 %v2169_v0, %v2012_v62 }
 0x210   : > { %v2904_v25 = vpop.f32.mrf.mxu3 }
 0x211   : > { %v2947_v55 = vadd.f32 %v2904_v25, %v2187_v46  ;;  %v2940_v5 = vadd.f32 %v2887_v23, %v2170_v2  ;;  %v2200_v23 = vadd.f32 %v5138_v1, %v5067_v11 }
 0x212   : > { %v2171_v39 = vpop.f32.mrf.mxu1 }
 0x213   : > { %v5162_v15 = vadd.f32 %v4958_v13, %v2947_v55  ;;  %v2976_v59 = vadd.f32 %v4958_v13, %v2940_v5  ;;  %v2889_v35 = vpop.f32.mrf.mxu2 }
 0x215   : > { %3015 = vst.msk [vmem:[%s4964_s25 + $0xc8] sm:$0xff] %vm1250_vm10, %v5162_v15  ;;  %v3063_v3 = vsel %vm1250_vm10, %v2976_v59, 0.0 }
 0x216   : > { %3008 = vst.msk [vmem:[%s4964_s25 + $0x90] sm:$0xff] %vm1250_vm10, %v2976_v59  ;;  %v2014_v14 = vpop.f32.mrf.mxu0  ;;  %v3064_v62 = vadd.f32 %v3063_v3, %v3062_v17 }
 0x217   : > { %v2172_v50 = vadd.f32 %v2171_v39, %v2014_v14 }
 0x219   : > { %v2941_v37 = vadd.f32 %v2889_v35, %v2172_v50 }
 0x21b   : > { %v2977_v36 = vadd.f32 %v4958_v13, %v2941_v37 }
 0x21c   : > { %v2892_v4 = vpop.f32.mrf.mxu2 }
 0x21d   : > { %3009 = vst.msk [vmem:[%s4964_s25 + $0x98] sm:$0xff] %vm1250_vm10, %v2977_v36  ;;  %v3065_v21 = vsel %vm1250_vm10, %v2977_v36, 0.0  ;;  %v2202_v36 = vadd.f32 %v5140_v18, %v5082_v10 }
 0x21e   : > { %v3066_v46 = vadd.f32 %v3065_v21, %v3064_v62 }
 0x222   : > { %v2017_v42 = vpop.f32.mrf.mxu0 }
 0x223   : > { %v2907_v6 = vpop.f32.mrf.mxu3 }
 0x224   : > { %v2948_v38 = vadd.f32 %v2907_v6, %v2190_v9  ;;  %v2894_v31 = vpop.f32.mrf.mxu2 }
 0x225   : > { %v2174_v53 = vpop.f32.mrf.mxu1 }
 0x226   : > { %v5176_v26 = vadd.f32 %v4958_v13, %v2948_v38  ;;  %v2175_v29 = vadd.f32 %v2174_v53, %v2017_v42  ;;  %v3075_v53 = vsel %vm1250_vm10, %v5152_v24, 0.0 }
 0x228   : > { %3016 = vst.msk [vmem:[%s4964_s25 + $0xd0] sm:$0xff] %vm1250_vm10, %v5176_v26  ;;  %v2942_v57 = vadd.f32 %v2892_v4, %v2175_v29  ;;  %v3079_v10 = vsel %vm1250_vm10, %v5176_v26, 0.0 }
 0x22a   : > { %v2978_v60 = vadd.f32 %v4958_v13, %v2942_v57  ;;  %v2019_v27 = vpop.f32.mrf.mxu0 }
 0x22b   : > { %v2909_v8 = vpop.f32.mrf.mxu3 }
 0x22c   : > { %3010 = vst.msk [vmem:[%s4964_s25 + $0xa0] sm:$0xff] %vm1250_vm10, %v2978_v60  ;;  %v2949_v63 = vadd.f32 %v2909_v8, %v2192_v28  ;;  %v3067_v56 = vsel %vm1250_vm10, %v2978_v60, 0.0  ;;  %v3077_v28 = vsel %vm1250_vm10, %v5162_v15, 0.0 }
 0x22d   : > { %v2176_v32 = vpop.f32.mrf.mxu1  ;;  %v3068_v39 = vadd.f32 %v3067_v56, %v3066_v46 }
 0x22e   : > { %v5187_v49 = vadd.f32 %v4958_v13, %v2949_v63  ;;  %v2177_v41 = vadd.f32 %v2176_v32, %v2019_v27 }
 0x230   : > { %3017 = vst.msk [vmem:[%s4964_s25 + $0xd8] sm:$0xff] %vm1250_vm10, %v5187_v49  ;;  %v2943_v40 = vadd.f32 %v2894_v31, %v2177_v41  ;;  %v2897_v58 = vpop.f32.mrf.mxu2  ;;  %v3081_v8 = vsel %vm1250_vm10, %v5187_v49, 0.0  ;;  %v3027_v49 = vld [vmem:[%s5197_s28] sm:$0x1] }
 0x232   : > { %v2979_v7 = vadd.f32 %v4958_v13, %v2943_v40 }
 0x234   : > { %3011 = vst.msk [vmem:[%s4964_s25 + $0xa8] sm:$0xff] %vm1250_vm10, %v2979_v7  ;;  %v2912_v45 = vpop.f32.mrf.mxu3  ;;  %v3069_v5 = vsel %vm1250_vm10, %v2979_v7, 0.0 }
 0x235   : > { %v2950_v34 = vadd.f32 %v2912_v45, %v2195_v19  ;;  %v3070_v35 = vadd.f32 %v3069_v5, %v3068_v39 }
 0x236   : > { %v2179_v30 = vpop.f32.mrf.mxu1 }
 0x237   : > { %v2986_v47 = vadd.f32 %v4958_v13, %v2950_v34 }
 0x238   : > { %v2899_v14 = vpop.f32.mrf.mxu2 }
 0x239   : > { %3018 = vst.msk [vmem:[%s4964_s25 + $0xe0] sm:$0xff] %vm1250_vm10, %v2986_v47  ;;  %v3083_v24 = vsel %vm1250_vm10, %v2986_v47, 0.0 }
 0x23c   : > { %v2914_v33 = vpop.f32.mrf.mxu3 }
 0x23d   : > { %v2951_v54 = vadd.f32 %v2914_v33, %v2197_v52  ;;  %v2022_v51 = vpop.f32.mrf.mxu0 }
 0x23e   : > { %v2180_v16 = vadd.f32 %v2179_v30, %v2022_v51  ;;  %v2181_v2 = vpop.f32.mrf.mxu1 }
 0x23f   : > { %v2987_v48 = vadd.f32 %v4958_v13, %v2951_v54 }
 0x240   : > { %v2944_v0 = vadd.f32 %v2897_v58, %v2180_v16 }
 0x241   : > { %3019 = vst.msk [vmem:[%s4964_s25 + $0xe8] sm:$0xff] %vm1250_vm10, %v2987_v48 }
 0x242   : > { %v2980_v12 = vadd.f32 %v4958_v13, %v2944_v0 }
 0x244   : > { %3012 = vst.msk [vmem:[%s4964_s25 + $0xb0] sm:$0xff] %vm1250_vm10, %v2980_v12  ;;  %v2917_v43 = vpop.f32.mrf.mxu3  ;;  %v3071_v11 = vsel %vm1250_vm10, %v2980_v12, 0.0 }
 0x245   : > { %v2952_v25 = vadd.f32 %v2917_v43, %v2200_v23  ;;  %v2024_v55 = vpop.f32.mrf.mxu0  ;;  %v3072_v9 = vadd.f32 %v3071_v11, %v3070_v35 }
 0x246   : > { %v2182_v59 = vadd.f32 %v2181_v2, %v2024_v55 }
 0x247   : > { %v2988_v50 = vadd.f32 %v4958_v13, %v2952_v25 }
 0x248   : > { %v2945_v1 = vadd.f32 %v2899_v14, %v2182_v59 }
 0x249   : > { %3020 = vst.msk [vmem:[%s4964_s25 + $0xf0] sm:$0xff] %vm1250_vm10, %v2988_v50  ;;  %v3087_v15 = vsel %vm1250_vm10, %v2988_v50, 0.0 }
 0x24a   : > { %v2981_v37 = vadd.f32 %v4958_v13, %v2945_v1 }
 0x24c   : > { %3013 = vst.msk [vmem:[%s4964_s25 + $0xb8] sm:$0xff] %vm1250_vm10, %v2981_v37  ;;  %v3073_v42 = vsel %vm1250_vm10, %v2981_v37, 0.0  ;;  %v2919_v6 = vpop.f32.mrf.mxu3 }
 0x24d   : > { %v3074_v38 = vadd.f32 %v3073_v42, %v3072_v9  ;;  %v2953_v4 = vadd.f32 %v2919_v6, %v2202_v36 }
 0x24f   : > { %v3076_v29 = vadd.f32 %v3075_v53, %v3074_v38  ;;  %v2989_v57 = vadd.f32 %v4958_v13, %v2953_v4  ;;  %v3085_v13 = vsel %vm1250_vm10, %v2987_v48, 0.0 }
 0x251   : > { %v3078_v60 = vadd.f32 %v3077_v28, %v3076_v29  ;;  %3021 = vst.msk [vmem:[%s4964_s25 + $0xf8] sm:$0xff] %vm1250_vm10, %v2989_v57  ;;  %v3089_v31 = vsel %vm1250_vm10, %v2989_v57, 0.0 }
 0x253   : > { %v3080_v18 = vadd.f32 %v3079_v10, %v3078_v60 }
 0x255   : > { %v3082_v63 = vadd.f32 %v3081_v8, %v3080_v18 }
 0x257   : > { %v3084_v27 = vadd.f32 %v3083_v24, %v3082_v63 }
 0x259   : > { %v3086_v32 = vadd.f32 %v3085_v13, %v3084_v27 }
 0x25b   : > { %v3088_v41 = vadd.f32 %v3087_v15, %v3086_v32 }
 0x25d   : > { %v3090_v40 = vadd.f32 %v3089_v31, %v3088_v41 }
 0x25f   : > { %v3091_v26 = vrot.slane %v3090_v40, 4 }
 0x261   : > { %v3092_v7 = vadd.f32 %v3091_v26, %v3090_v40 }
 0x263   : > { %v3093_v19 = vrot.slane %v3092_v7, 2 }
 0x265   : > { %v3094_v45 = vadd.f32 %v3093_v19, %v3092_v7 }
 0x267   : > { %v3095_v34 = vrot.slane %v3094_v45, 1 }
 0x269   : > { %v3096_v44 = vadd.f32 %v3095_v34, %v3094_v45 }
 0x26b   : > { %v3097_v52 = vadd.f32 %v3096_v44, %v3027_v49 }
 0x26d   : > { %3099 = vst.msk [vmem:[%s5197_s28] sm:$0x1] %vm270_vm1, %v3097_v52 }
 0x26e PF: > { %s15_s17 = sadd.s32 1, %s3824_s17   ;;  %s5274_s15 = smov %s3820_s16 }
 0x26f   : > { %p12_p5 = scmp.ge.s32.totalorder %s15_s17, 4   ;;  %s5275_s16 = smov %s5277_s18 }
 0x271   :  { %14 = sbr.rel (!%p12_p5) target bundleno = 2 (0x2), region = 88 }

</bundles_post_ra>
